<compile_context>
chip_gen: v5e
topology: v5e:2x2
jax: 0.10.0
libtpu: 0.0.40
codegen_flags: <defaults>
</compile_context>

<pallas_src>
import functools

import jax
import jax.numpy as jnp
from jax.experimental import pallas as pl
from jax.experimental.pallas import tpu as pltpu


# ----------------------------- kernels ------------------------------------- #

def _linear_kernel_f32out(x_ref, w_ref, b_ref, o_ref):
    # x_ref: (tm, tk) f32  -- activation tile, cast to bf16 in-kernel
    # w_ref: (tk, tn) bf16 -- pre-transposed weight tile [K, N]
    # b_ref: (1, tn)  f32  -- bias tile
    # o_ref: (tm, tn) f32  -- output tile, doubles as the K-axis accumulator
    k = pl.program_id(2)

    @pl.when(k == 0)
    def _():
        o_ref[...] = jnp.broadcast_to(b_ref[...], o_ref.shape)

    o_ref[...] += jnp.dot(
        x_ref[...].astype(jnp.bfloat16),
        w_ref[...],
        preferred_element_type=jnp.float32,
    )


def _linear_kernel_narrowout(x_ref, w_ref, b_ref, o_ref, acc_ref):
    # Same as above, but with an f32 scratch accumulator because the output
    # dtype is narrower than f32.
    k = pl.program_id(2)

    @pl.when(k == 0)
    def _():
        acc_ref[...] = jnp.broadcast_to(b_ref[...], acc_ref.shape)

    acc_ref[...] += jnp.dot(
        x_ref[...].astype(jnp.bfloat16),
        w_ref[...],
        preferred_element_type=jnp.float32,
    )

    @pl.when(k == pl.num_programs(2) - 1)
    def _():
        o_ref[...] = acc_ref[...].astype(o_ref.dtype)


# --------------------------- tiling helpers --------------------------------- #

def _pick_tile(dim, candidates):
    """Largest candidate that evenly divides `dim`, else the full extent."""
    for c in candidates:
        if c <= dim and dim % c == 0:
            return c
    # TODO(synk): add a padding / cdiv-grid path for non-divisible extents.
    return dim


def _choose_tiles(M, K, N, x_bytes, out_bytes, vmem_budget):
    # Maximize tn and tm first (x is re-read N/tn times, w re-read M/tm times),
    # then tk to amortize per-step overhead.  tm multiples of 16 for bf16 packing.
    tm = _pick_tile(M, (256, 128, 64, 32, 16))
    tn = _pick_tile(N, (1024, 512, 256, 128))
    tk = _pick_tile(K, (2048, 1024, 512, 256, 128))

    def vmem_bytes(tm_, tn_, tk_):
        # double-buffered inputs + double-buffered output tile (+ bias, tiny)
        return (2 * (tm_ * tk_ * x_bytes + tk_ * tn_ * 2)
                + 2 * tm_ * tn_ * out_bytes
                + 2 * tn_ * 4)

    # Shrink tk, then tn, if over budget (rare at these candidate caps).
    tk_opts = [c for c in (2048, 1024, 512, 256, 128) if c <= tk and K % c == 0] or [tk]
    tn_opts = [c for c in (1024, 512, 256, 128) if c <= tn and N % c == 0] or [tn]
    for tn_try in tn_opts:
        for tk_try in tk_opts:
            if vmem_bytes(tm, tn_try, tk_try) <= vmem_budget:
                tn, tk = tn_try, tk_try
                break
        else:
            continue
        break

    # Keep >=2 steps on a parallel axis so v7x's two TensorCores both get work.
    if M // tm == 1 and N // tn == 1:
        for c in (tm // 2, 128, 64, 32, 16):
            if c >= 16 and c % 16 == 0 and M % c == 0:
                tm = c
                break

    return tm, tn, tk


# --------------------------- pallas_call wrapper ---------------------------- #

@jax.jit
def pallas_linear(x, weight_t_bf16, bias2d_f32):
    """y = x @ W.T + b with W pre-transposed/cast: weight_t_bf16 = W.T as [K, N] bf16.

    x:             [M, K] (f32; cast to bf16 per-tile inside the kernel)
    weight_t_bf16: [K, N] bf16  (prepared once at init — no per-call passes)
    bias2d_f32:    [1, N] f32
    """
    M, K = x.shape
    K2, N = weight_t_bf16.shape
    assert K == K2, (K, K2)
    out_dtype = x.dtype

    vmem_limit = 48 * 1024 * 1024  # safe on v7x (64 MiB phys), ample on v5e/v6e
    tm, tn, tk = _choose_tiles(
        M, K, N,
        x_bytes=x.dtype.itemsize,
        out_bytes=jnp.dtype(out_dtype).itemsize,
        vmem_budget=vmem_limit - (8 << 20),  # leave pipeline headroom
    )
    grid = (M // tm, N // tn, K // tk)

    in_specs = [
        pl.BlockSpec((tm, tk), lambda i, j, k: (i, k)),   # x (f32, cast in-kernel)
        pl.BlockSpec((tk, tn), lambda i, j, k: (k, j)),   # W.T [K, N] bf16
        pl.BlockSpec((1, tn), lambda i, j, k: (0, j)),    # bias
    ]
    out_spec = pl.BlockSpec((tm, tn), lambda i, j, k: (i, j))
    cparams = pltpu.CompilerParams(
        dimension_semantics=("parallel", "parallel", "arbitrary"),
        vmem_limit_bytes=vmem_limit,
    )

    if out_dtype == jnp.float32:
        # Accumulate directly into the resident f32 output tile (no scratch).
        return pl.pallas_call(
            _linear_kernel_f32out,
            out_shape=jax.ShapeDtypeStruct((M, N), out_dtype),
            grid=grid,
            in_specs=in_specs,
            out_specs=out_spec,
            compiler_params=cparams,
        )(x, weight_t_bf16, bias2d_f32)

    # Narrower output dtype: keep an f32 VMEM accumulator.
    return pl.pallas_call(
        _linear_kernel_narrowout,
        out_shape=jax.ShapeDtypeStruct((M, N), out_dtype),
        grid=grid,
        in_specs=in_specs,
        out_specs=out_spec,
        scratch_shapes=[pltpu.VMEM((tm, tn), jnp.float32)],
        compiler_params=cparams,
    )(x, weight_t_bf16, bias2d_f32)


# ------------------------------ modules ------------------------------------- #

class Net:
    """Concrete inner `net` (nn.Linear equivalent) whose forward is the Pallas kernel."""

    def __init__(self, in_features, out_features, key):
        k_w, k_b = jax.random.split(key)
        bound = 1.0 / (in_features ** 0.5)
        # PyTorch nn.Linear parameter layout: weight [out, in], bias [out].
        self.weight = jax.random.uniform(
            k_w, (out_features, in_features), jnp.float32, -bound, bound)
        self.bias = jax.random.uniform(
            k_b, (out_features,), jnp.float32, -bound, bound)
        # One-time parameter prep (amortized; avoids per-call HBM passes):
        #   transpose to [K, N] + cast to bf16, bias to (1, N) f32.
        self._weight_t_bf16 = jnp.asarray(self.weight.T, dtype=jnp.bfloat16)
        self._bias2d_f32 = self.bias.reshape(1, out_features).astype(jnp.float32)

    def __call__(self, x):
        return pallas_linear(x, self._weight_t_bf16, self._bias2d_f32)


class WrapperOneInput:
    """Pallas/JAX equivalent of the PyTorch WrapperOneInput module."""

    def __init__(self, net):
        self.net = net

    def forward(self, x):
        # x is a dict of keyword args, exactly like `self.net(**x)` in PyTorch.
        return self.net(**x)


# -------------------------------- main -------------------------------------- #

if __name__ == "__main__":
    key = jax.random.PRNGKey(0)
    k_in, k_net = jax.random.split(key)

    # Shapes chosen so the tiled grid is exercised (grid = 2 x 1 x 1 of
    # 256 x 512 output tiles with K=1024 covered in one step) while staying
    # small in absolute terms (~5 MB of arrays).
    batch, in_features, out_features = 512, 1024, 512
    x = jax.random.normal(k_in, (batch, in_features), jnp.float32)

    net = Net(in_features, out_features, k_net)
    wrapper = WrapperOneInput(net)

    out = wrapper.forward({"x": x})
    out = jax.block_until_ready(out)

    # Reference with matching precision (bf16 operands, f32 accumulation).
    ref = (jnp.dot(x.astype(jnp.bfloat16),
                   net.weight.astype(jnp.bfloat16).T,
                   preferred_element_type=jnp.float32)
           + net.bias).astype(x.dtype)

    assert out.shape == (batch, out_features), out.shape
    assert jnp.allclose(out, ref, atol=1e-2, rtol=1e-2), (
        float(jnp.max(jnp.abs(out - ref))))

    print("KERNEL_OK")
</pallas_src>

<mosaic_0001>
module attributes {stable_mosaic.version = 11 : i64} {
  func.func @_linear_kernel_f32out(%arg0: i32, %arg1: i32, %arg2: i32, %arg3: memref<256x1024xf32, #tpu.memory_space<vmem>>, %arg4: memref<1024x512xbf16, #tpu.memory_space<vmem>>, %arg5: memref<1x512xf32, #tpu.memory_space<vmem>>, %arg6: memref<256x512xf32, #tpu.memory_space<vmem>>) attributes {dimension_semantics = [#tpu.dimension_semantics<parallel>, #tpu.dimension_semantics<parallel>, #tpu.dimension_semantics<arbitrary>], iteration_bounds = array<i64: 2, 1, 1>, scalar_prefetch = 0 : i64, scratch_operands = 0 : i64, tpu.core_type = #tpu.core_type<tc>, window_params = [{transform_indices = @transform_0, window_bounds = array<i64: 256, 1024>}, {transform_indices = @transform_1, window_bounds = array<i64: 1024, 512>}, {transform_indices = @transform_2, window_bounds = array<i64: 1, 512>}, {transform_indices = @transform_3, window_bounds = array<i64: 256, 512>}]} {
    %c0_i32 = arith.constant 0 : i32
    %0 = arith.cmpi eq, %arg2, %c0_i32 : i32
    %1 = arith.extui %0 : i1 to i32
    %c0_i32_0 = arith.constant 0 : i32
    %2 = arith.cmpi ne, %1, %c0_i32_0 : i32
    scf.if %2 {
      %c0_8 = arith.constant 0 : index
      %c0_9 = arith.constant 0 : index
      %10 = vector.load %arg5[%c0_8, %c0_9] : memref<1x512xf32, #tpu.memory_space<vmem>>, vector<1x512xf32>
      %11 = vector.shape_cast %10 : vector<1x512xf32> to vector<1x512xf32>
      %12 = vector.broadcast %11 : vector<1x512xf32> to vector<256x512xf32>
      %c0_10 = arith.constant 0 : index
      %c0_11 = arith.constant 0 : index
      %13 = vector.load %arg6[%c0_10, %c0_11] : memref<256x512xf32, #tpu.memory_space<vmem>>, vector<256x512xf32>
      tpu.vector_store %arg6[%c0_10, %c0_11], %12 {strides = array<i32>} : memref<256x512xf32, #tpu.memory_space<vmem>>, vector<256x512xf32>,
    } else {
    }
    %c0 = arith.constant 0 : index
    %c0_1 = arith.constant 0 : index
    %3 = vector.load %arg6[%c0, %c0_1] : memref<256x512xf32, #tpu.memory_space<vmem>>, vector<256x512xf32>
    %c0_2 = arith.constant 0 : index
    %c0_3 = arith.constant 0 : index
    %4 = vector.load %arg3[%c0_2, %c0_3] : memref<256x1024xf32, #tpu.memory_space<vmem>>, vector<256x1024xf32>
    %5 = arith.truncf %4 : vector<256x1024xf32> to vector<256x1024xbf16>
    %c0_4 = arith.constant 0 : index
    %c0_5 = arith.constant 0 : index
    %6 = vector.load %arg4[%c0_4, %c0_5] : memref<1024x512xbf16, #tpu.memory_space<vmem>>, vector<1024x512xbf16>
    %cst = arith.constant dense<0.000000e+00> : vector<256x512xf32>
    %7 = tpu.matmul %5, %6, %cst {dimension_numbers = #tpu.dot_dimension_numbers<[1], [0], [0], [1], [0, 0, 1, 1], [], []>} : vector<256x1024xbf16>, vector<1024x512xbf16>, vector<256x512xf32> -> vector<256x512xf32>
    %8 = arith.addf %3, %7 : vector<256x512xf32>
    %c0_6 = arith.constant 0 : index
    %c0_7 = arith.constant 0 : index
    %9 = vector.load %arg6[%c0_6, %c0_7] : memref<256x512xf32, #tpu.memory_space<vmem>>, vector<256x512xf32>
    tpu.vector_store %arg6[%c0_6, %c0_7], %8 {strides = array<i32>} : memref<256x512xf32, #tpu.memory_space<vmem>>, vector<256x512xf32>,
    return
  }
  func.func @transform_0(%arg0: i32, %arg1: i32, %arg2: i32) -> (i32, i32) {
    %c0_i32 = arith.constant 0 : i32
    return %arg0, %arg2 : i32, i32
  }
  func.func @transform_1(%arg0: i32, %arg1: i32, %arg2: i32) -> (i32, i32) {
    %c0_i32 = arith.constant 0 : i32
    return %arg2, %arg1 : i32, i32
  }
  func.func @transform_2(%arg0: i32, %arg1: i32, %arg2: i32) -> (i32, i32) {
    %c0_i32 = arith.constant 0 : i32
    %c0_i32_0 = arith.constant 0 : i32
    return %c0_i32, %arg1 : i32, i32
  }
  func.func @transform_3(%arg0: i32, %arg1: i32, %arg2: i32) -> (i32, i32) {
    %c0_i32 = arith.constant 0 : i32
    return %arg0, %arg1 : i32, i32
  }
}

</mosaic_0001>

<bundles_post_ra>
// kernel: pallas_linear.1
= control target key start
LH: loop header
LB: loop body
LE: loop exit
PB: predicated region body
PF: predicated region fallthrough
CT: control target
= control target key end

     0   :  { %s9153_s0 = inlined_call_operand.hbm [shape: f32[512,1024], index: 0, kind: input, shape index: {}]   ;;  %s9154_s1 = inlined_call_operand.hbm [shape: bf16[1024,512], index: 1, kind: input, shape index: {}]   ;;  %s9155_s2 = inlined_call_operand.hbm [shape: f32[1,512], index: 2, kind: input, shape index: {}]   ;;  %s9156_s3 = inlined_call_operand.hbm [shape: f32[512,512], index: 3, kind: output, shape index: {}]  }
   0x1   :  { %9376 = sst [smem:[#allocation137_spill]] %s9154_s1 }
   0x2   :  { %8 = vsyncpa [#allocation3], 0 }
   0x3   :  { %10 = vsyncpa [#allocation3 + $0x1], 0 }
   0x4   :  { %11 = vsyncpa [#allocation6], 0 }
   0x5   :  { %12 = vsyncpa [#allocation4], 0 }
   0x6   :  { %14 = vsyncpa [#allocation4 + $0x1], 0  ;;  %s7310_s12 = smov 0   ;;  %s7312_s13 = smov 0  }
   0x7   :  { %s7314_s14 = smov 0   ;;  %s7316_s15 = smov 0  }
   0x8   :  { %s7318_s16 = smov 0   ;;  %s7320_s17 = smov 0  }
   0x9 LB: > { %s5704_s18 = sadd.s32 4294967295, %s7280_s17   ;;  %s5705_s19 = sadd.s32 4294967294, %s7280_s17   ;;  %s7280_s17 = sphi %s7320_s17, %s20_s17   ;;  %s7276_s16 = sphi %s7318_s16, %s9886_s16   ;;  %s7272_s15 = sphi %s7316_s15, %s9885_s15   ;;  %s7268_s14 = sphi %s7314_s14, %s9884_s14   ;;  %s7264_s13 = sphi %s7312_s13, %s9883_s13   ;;  %s7260_s12 = sphi %s7310_s12, %s9882_s12  }
   0xa   : > { %p61_p0 = scmp.ne.s32.totalorder %s7264_s13, %s7260_s12  ;;  %p7344_p1 = scmp.eq.s32.totalorder %s5704_s18, 0 }
   0xb   : > { %p7348_p2 = scmp.eq.s32.totalorder %s5704_s18, 1  ;;  %p147_p3 = scmp.eq.s32.totalorder %s5705_s19, 1 }
   0xc   : > { %p7354_p4 = por %p7344_p1, %p61_p0  ;;  %p5706_p5 = scmp.ge.s32.totalorder %s7280_s17, 1 }
   0xd   : > { %p7359_p6 = por %p147_p3, %p61_p0  ;;  %p154_p7 = scmp.lt.s32.totalorder %s7280_s17, 3 }
   0xe   : > { %s9381_s1 = sld [smem:[#allocation137_spill]]  ;;  %s7282_s28 = smov [#allocation5]  }
   0xf   : > { %p7367_p8 = pnand %p5706_p5, %p154_p7  ;;  %s173_s29 = sshll.u32 %s7282_s28, 4  ;;  %s174_s29 = int_to_ptr.vmem [resolvable:$true] %s173_s29 }
  0x10   : > { %p5709_p11 = scmp.ge.s32.totalorder %s7280_s17, 2  ;;  %s188_s5 = sshll.u32 %s9155_s2, 4  ;;  %s189_s5 = int_to_ptr.hbm [resolvable:$true] %s188_s5 }
  0x11   : > { %p7021_p9 = pneg %p7367_p8  ;;  %s7283_s6 = smov 256  }
  0x12   : > { %s7284_s7 = smov 16   ;;  %s7285_s8 = smov [#allocation7]  }
  0x13   : > { %p7022_p10 = pnand %p7021_p9, %p7344_p1  ;;  %s190_s9 = sshll.u32 %s7285_s8, 4  ;;  %s191_s9 = int_to_ptr.vmem [resolvable:$true] %s190_s9 }
  0x14   : > { %s171_s26 = sshll.u32 %s9381_s1, 4  ;;  %s39_s10 = sadd.s32 1, %s7276_s16  ;;  %s172_s26 = int_to_ptr.hbm [resolvable:$true] %s171_s26 }
  0x15   : > { %7024 = dma.hbm_to_vmem [thread:$0]  (!%p7022_p10), %s172_s26, 32768, %s174_s29, [#allocation6], %s7283_s6, %s7283_s6, %s7284_s7  }
  0x16   : > { %7027 = dma.hbm_to_vmem [thread:$0]  (!%p7022_p10), %s189_s5, 64, %s191_s9, [#allocation6]  }
  0x17   : > { %s48_s11 = sadd.s32 1, %s7268_s14  ;;  %p41_p12 = scmp.ge.s32.totalorder %s39_s10, 2 }
  0x18   : > { %p55_p13 = scmp.ne.s32.totalorder %s7268_s14, %s7264_s13  ;;  %p56_p0 = scmp.eq.s32.totalorder %s7280_s17, 0 }
  0x19   : > { %p7038_p3 = scmp.lt.s32.totalorder %s7280_s17, 2  ;;  %s9888_s10 = smov (%p41_p12, %s39_s10), 0 }
  0x1a   : > { %p7387_p5 = por %p56_p0, %p55_p13  ;;  %p7393_p7 = por %p7348_p2, %p55_p13 }
  0x1b   : > { %s43_s24 = ssub.s32 %s7276_s16, %s9888_s10  ;;  %s201_s25 = sand.u32 1, %s7268_s14  }
  0x1c   : > { %p46_p9 = scmp.eq.s32.totalorder %s43_s24, 0  ;;  %s5710_s26 = sshll.u32 %s201_s25, 11 }
  0x1d   : > { %s6750_s28 = sshll.u32 %s7276_s16, 11  ;;  %s205_s7 = scalar_lea.vmem [#allocation2], %s5710_s26 }
  0x1e   : > { %s7402_s29 = scalar_select %p46_p9, %s7268_s14, %s48_s11  }
  0x1f   : > { %s213_s5 = scalar_lea.hbm %s9153_s0, %s6750_s28  ;;  %s216_s8 = sshll.u32 %s205_s7, 4  ;;  %s217_s8 = int_to_ptr.vmem [resolvable:$true] %s216_s8 }
  0x20   : > { %s214_s6 = sshll.u32 %s213_s5, 4  ;;  %p7029_p2 = pnand %p7038_p3, %p7387_p5  ;;  %s215_s6 = int_to_ptr.hbm [resolvable:$true] %s214_s6 }
  0x21   : > { %s202_s21 = scalar_lea.sflag [#allocation3], %s201_s25  ;;  %s7286_s9 = smov 1024  }
  0x22   : > { %s7287_s1 = smov 64   ;;  %228 = sbr.rel (%p7367_p8) target bundleno = 2265 (0x8d9), region = 32 }
  0x23   : > { %7031 = dma.hbm_to_vmem [thread:$0]  (!%p7029_p2), %s215_s6, 32768, %s217_s8, %s202_s21, %s7286_s9, %s7286_s9, %s7287_s1  }
  0x27   : > { %s7414_s11 = sand.u32 1, %s7264_s13  }
  0x28   : > { %s5715_s24 = sshll.u32 %s7414_s11, 11  ;;  %s231_s26 = scalar_lea.sflag [#allocation3], %s7414_s11 }
  0x29   : > { %s7418_s28 = scalar_lea.vmem [#allocation2], %s5715_s24 }
  0x2a   : > { %7247 = dma.done.wait (%p7354_p4), %s231_s26, 32768  }
  0x2b   : > { %7249 = vsyncadd (%p7354_p4), %s231_s26, 4294934528 }
  0x2c   : > { %7251 = dma.done.wait (%p7344_p1), [#allocation6], 32832  }
  0x2d   : > { %7253 = vsyncadd (%p7344_p1), [#allocation6], 4294934464  ;;  %v5833_v0 = vld [vmem:[#allocation5 + $0xe0] sm:$0xf]  ;;  %v6781_v1 = vld [vmem:[#allocation5 + $0xec] sm:$0xf0] }
  0x2e   : > { %v5961_v2 = vld [vmem:[#allocation5 + $0x1e0] sm:$0xf]  ;;  %v5834_v3 = vor.u32 %v6781_v1, %v5833_v0  ;;  %v6813_v4 = vld [vmem:[#allocation5 + $0x1ec] sm:$0xf0]  ;;  %s5718_s1 = sshll.u32 %s7414_s11, 10  ;;  %s7008_s22 = sshll.u32 %s7272_s15, 10 }
  0x2f   : > { %v6089_v5 = vld [vmem:[#allocation5 + $0x2e0] sm:$0xf]  ;;  %v6845_v6 = vld [vmem:[#allocation5 + $0x2ec] sm:$0xf0]  ;;  %v5962_v7 = vor.u32 %v6813_v4, %v5961_v2  ;;  %s7950_s20 = scalar_lea.vmem [#allocation8], %s5718_s1  ;;  %s5584_s25 = scalar_lea.hbm %s9156_s3, %s7008_s22 }
  0x30   : > { %v6090_v8 = vor.u32 %v6845_v6, %v6089_v5  ;;  %v6217_v9 = vld [vmem:[#allocation5 + $0x3e0] sm:$0xf]  ;;  %v6877_v10 = vld [vmem:[#allocation5 + $0x3ec] sm:$0xf0]  ;;  %2465 = vmatpush.bf16.msra.mxu0 %v5834_v3  ;;  %s5585_s30 = sshll.u32 %s7950_s20, 4  ;;  %s5587_s4 = sshll.u32 %s5584_s25, 4  ;;  %s5586_s30 = int_to_ptr.vmem [resolvable:$true] %s5585_s30  ;;  %s5588_s4 = int_to_ptr.hbm [resolvable:$true] %s5587_s4 }
  0x31   : > { %v5817_v11 = vld [vmem:[#allocation5 + $0xc0] sm:$0xf]  ;;  %v6218_v12 = vor.u32 %v6877_v10, %v6217_v9  ;;  %v6777_v13 = vld [vmem:[#allocation5 + $0xcc] sm:$0xf0]  ;;  %2554 = vmatpush.bf16.msra.mxu1 %v5962_v7  ;;  %s5570_s15 = scalar_lea.sflag [#allocation4], %s7414_s11  ;;  %s7208_s5 = sshra.s32 %s5588_s4, 4  ;;  %s7209_s5 = int_to_ptr.hbm [resolvable:$true] %s7208_s5 }
  0x32   : > { %v5945_v14 = vld [vmem:[#allocation5 + $0x1c0] sm:$0xf]  ;;  %v6809_v15 = vld [vmem:[#allocation5 + $0x1cc] sm:$0xf0]  ;;  %2643 = vmatpush.bf16.msra.mxu2 %v6090_v8  ;;  %v5818_v16 = vor.u32 %v6777_v13, %v5817_v11  ;;  %s7210_s6 = scalar_lea.hbm %s7209_s5, 1024  ;;  %s7214_s21 = scalar_lea.hbm %s9156_s3, 2048 }
  0x33   : > { %v5946_v17 = vor.u32 %v6809_v15, %v5945_v14  ;;  %v6073_v18 = vld [vmem:[#allocation5 + $0x2c0] sm:$0xf]  ;;  %v6841_v19 = vld [vmem:[#allocation5 + $0x2cc] sm:$0xf0]  ;;  %2732 = vmatpush.bf16.msra.mxu3 %v6218_v12  ;;  %p7211_p1 = scmp.ne.s32.totalorder %s7209_s5, %s7210_s6  ;;  %p7215_p10 = scmp.lt.s32.totalorder %s7209_s5, %s9156_s3 }
  0x34   : > { %v6201_v20 = vld [vmem:[#allocation5 + $0x3c0] sm:$0xf]  ;;  %v6074_v21 = vor.u32 %v6841_v19, %v6073_v18  ;;  %v6873_v22 = vld [vmem:[#allocation5 + $0x3cc] sm:$0xf0]  ;;  %2466 = vmatpush.bf16.msra.mxu0 %v5818_v16  ;;  %p7216_p12 = scmp.lt.s32.totalorder %s7214_s21, %s7210_s6 }
  0x35   : > { %v5801_v23 = vld [vmem:[#allocation5 + $0xa0] sm:$0xf]  ;;  %v6773_v24 = vld [vmem:[#allocation5 + $0xac] sm:$0xf0]  ;;  %v6202_v25 = vor.u32 %v6873_v22, %v6201_v20  ;;  %2555 = vmatpush.bf16.msra.mxu1 %v5946_v17  ;;  %p7212_p4 = pnand %p7211_p1, %p7393_p7 }
  0x36   : > { %v5929_v26 = vld [vmem:[#allocation5 + $0x1a0] sm:$0xf]  ;;  %v6805_v27 = vld [vmem:[#allocation5 + $0x1ac] sm:$0xf0]  ;;  %v5802_v29 = vor.u32 %v6773_v24, %v5801_v23  ;;  %2644 = vmatpush.bf16.msra.mxu2 %v6074_v21  ;;  %p7217_p13 = por %p7216_p12, %p7215_p10 }
  0x37   : > { %v6057_v28 = vld [vmem:[#allocation5 + $0x2a0] sm:$0xf]  ;;  %v6837_v30 = vld [vmem:[#allocation5 + $0x2ac] sm:$0xf0]  ;;  %v5930_v33 = vor.u32 %v6805_v27, %v5929_v26  ;;  %2733 = vmatpush.bf16.msra.mxu3 %v6202_v25  ;;  %p7213_p8 = pneg %p7212_p4 }
  0x38   : > { %v6185_v31 = vld [vmem:[#allocation5 + $0x3a0] sm:$0xf]  ;;  %v6869_v32 = vld [vmem:[#allocation5 + $0x3ac] sm:$0xf0]  ;;  %v6058_v34 = vor.u32 %v6837_v30, %v6057_v28  ;;  %2467 = vmatpush.bf16.msra.mxu0 %v5802_v29  ;;  %v546_v30 = vld [vmem:[%s7418_s28 + $0x8] sm:$0xff] }
  0x39   : > { %v5785_v35 = vld [vmem:[#allocation5 + $0x80] sm:$0xf]  ;;  %v6769_v36 = vld [vmem:[#allocation5 + $0x8c] sm:$0xf0]  ;;  %v6186_v38 = vor.u32 %v6869_v32, %v6185_v31  ;;  %2556 = vmatpush.bf16.msra.mxu1 %v5930_v33  ;;  %p7218_p0 = pnand %p7217_p13, %p7213_p8 }
  0x3a   : > { %v5913_v37 = vld [vmem:[#allocation5 + $0x180] sm:$0xf]  ;;  %v6801_v39 = vld [vmem:[#allocation5 + $0x18c] sm:$0xf0]  ;;  %v5786_v44 = vor.u32 %v6769_v36, %v5785_v35  ;;  %2645 = vmatpush.bf16.msra.mxu2 %v6058_v34  ;;  %v554_v34 = vld [vmem:[%s7418_s28 + $0x48] sm:$0xff] }
  0x3b   : > { %v6041_v40 = vld [vmem:[#allocation5 + $0x280] sm:$0xf]  ;;  %v6833_v41 = vld [vmem:[#allocation5 + $0x28c] sm:$0xf0]  ;;  %v5914_v45 = vor.u32 %v6801_v39, %v5913_v37  ;;  %2734 = vmatpush.bf16.msra.mxu3 %v6186_v38 }
  0x3c   : > { %v6169_v42 = vld [vmem:[#allocation5 + $0x380] sm:$0xf]  ;;  %v6865_v43 = vld [vmem:[#allocation5 + $0x38c] sm:$0xf0]  ;;  %v6042_v46 = vor.u32 %v6833_v41, %v6041_v40  ;;  %2468 = vmatpush.bf16.msra.mxu0 %v5786_v44  ;;  %v548_v41 = vld [vmem:[%s7418_s28 + $0x18] sm:$0xff] }
  0x3d   : > { %v5769_v47 = vld [vmem:[#allocation5 + $0x60] sm:$0xf]  ;;  %v6765_v48 = vld [vmem:[#allocation5 + $0x6c] sm:$0xf0]  ;;  %v6170_v50 = vor.u32 %v6865_v43, %v6169_v42  ;;  %2557 = vmatpush.bf16.msra.mxu1 %v5914_v45  ;;  %v556_v43 = vld [vmem:[%s7418_s28 + $0x58] sm:$0xff] }
  0x3e   : > { %v5897_v49 = vld [vmem:[#allocation5 + $0x160] sm:$0xf]  ;;  %v6797_v51 = vld [vmem:[#allocation5 + $0x16c] sm:$0xf0]  ;;  %v5770_v56 = vor.u32 %v6765_v48, %v5769_v47  ;;  %2646 = vmatpush.bf16.msra.mxu2 %v6042_v46 }
  0x3f   : > { %v6025_v52 = vld [vmem:[#allocation5 + $0x260] sm:$0xf]  ;;  %v6829_v53 = vld [vmem:[#allocation5 + $0x26c] sm:$0xf0]  ;;  %v5898_v57 = vor.u32 %v6797_v51, %v5897_v49  ;;  %2735 = vmatpush.bf16.msra.mxu3 %v6170_v50  ;;  %v7438_v51 = vpack.c.bf16 %v554_v34, %v546_v30 }
  0x40   : > { %v6153_v54 = vld [vmem:[#allocation5 + $0x360] sm:$0xf]  ;;  %v6861_v55 = vld [vmem:[#allocation5 + $0x36c] sm:$0xf0]  ;;  %v6026_v58 = vor.u32 %v6829_v53, %v6025_v52  ;;  %2469 = vmatpush.bf16.msra.mxu0 %v5770_v56  ;;  %v7442_v53 = vpack.c.bf16 %v556_v43, %v548_v41  ;;  %v602_v43 = vld [vmem:[%s7418_s28 + $0x1c8] sm:$0xff] }
  0x41   : > { %v5753_v59 = vld [vmem:[#allocation5 + $0x40] sm:$0xf]  ;;  %v6761_v60 = vld [vmem:[#allocation5 + $0x4c] sm:$0xf0]  ;;  %v6154_v62 = vor.u32 %v6861_v55, %v6153_v54  ;;  %2558 = vmatpush.bf16.msra.mxu1 %v5898_v57  ;;  %9386 = vst [vmem:[#allocation13_spill] sm:$0xff] %v7438_v51 }
  0x42   : > { %v5881_v61 = vld [vmem:[#allocation5 + $0x140] sm:$0xf]  ;;  %v6793_v63 = vld [vmem:[#allocation5 + $0x14c] sm:$0xf0]  ;;  %v5754_v4 = vor.u32 %v6761_v60, %v5753_v59  ;;  %2647 = vmatpush.bf16.msra.mxu2 %v6026_v58  ;;  %9388 = vst [vmem:[#allocation15_spill] sm:$0xff] %v7442_v53 }
  0x43   : > { %v6009_v0 = vld [vmem:[#allocation5 + $0x240] sm:$0xf]  ;;  %v6825_v1 = vld [vmem:[#allocation5 + $0x24c] sm:$0xf0]  ;;  %v5882_v5 = vor.u32 %v6793_v63, %v5881_v61  ;;  %2736 = vmatpush.bf16.msra.mxu3 %v6154_v62 }
  0x44   : > { %v6137_v2 = vld [vmem:[#allocation5 + $0x340] sm:$0xf]  ;;  %v6857_v3 = vld [vmem:[#allocation5 + $0x34c] sm:$0xf0]  ;;  %v6010_v6 = vor.u32 %v6825_v1, %v6009_v0  ;;  %2470 = vmatpush.bf16.msra.mxu0 %v5754_v4 }
  0x45   : > { %v5737_v7 = vld [vmem:[#allocation5 + $0x20] sm:$0xf]  ;;  %v6757_v8 = vld [vmem:[#allocation5 + $0x2c] sm:$0xf0]  ;;  %v6138_v10 = vor.u32 %v6857_v3, %v6137_v2  ;;  %2559 = vmatpush.bf16.msra.mxu1 %v5882_v5 }
  0x46   : > { %v5865_v9 = vld [vmem:[#allocation5 + $0x120] sm:$0xf]  ;;  %v6789_v11 = vld [vmem:[#allocation5 + $0x12c] sm:$0xf0]  ;;  %v5738_v17 = vor.u32 %v6757_v8, %v5737_v7  ;;  %2648 = vmatpush.bf16.msra.mxu2 %v6010_v6  ;;  %v562_v6 = vld [vmem:[%s7418_s28 + $0x88] sm:$0xff] }
  0x47   : > { %v5993_v12 = vld [vmem:[#allocation5 + $0x220] sm:$0xf]  ;;  %v6821_v13 = vld [vmem:[#allocation5 + $0x22c] sm:$0xf0]  ;;  %v5866_v21 = vor.u32 %v6789_v11, %v5865_v9  ;;  %2737 = vmatpush.bf16.msra.mxu3 %v6138_v10  ;;  %v570_v7 = vld [vmem:[%s7418_s28 + $0xc8] sm:$0xff] }
  0x48   : > { %v6121_v14 = vld [vmem:[#allocation5 + $0x320] sm:$0xf]  ;;  %v6853_v15 = vld [vmem:[#allocation5 + $0x32c] sm:$0xf0]  ;;  %v5994_v22 = vor.u32 %v6821_v13, %v5993_v12  ;;  %2471 = vmatpush.bf16.msra.mxu0 %v5738_v17  ;;  %v564_v10 = vld [vmem:[%s7418_s28 + $0x98] sm:$0xff]  ;;  %v7458_v13 = vpack.c.bf16 %v570_v7, %v562_v6 }
  0x49   : > { %v5721_v16 = vld [vmem:[#allocation5] sm:$0xf]  ;;  %v6753_v18 = vld [vmem:[#allocation5 + $0xc] sm:$0xf0]  ;;  %v6122_v26 = vor.u32 %v6853_v15, %v6121_v14  ;;  %2560 = vmatpush.bf16.msra.mxu1 %v5866_v21  ;;  %v572_v11 = vld [vmem:[%s7418_s28 + $0xd8] sm:$0xff] }
  0x4a   : > { %v5849_v19 = vld [vmem:[#allocation5 + $0x100] sm:$0xf]  ;;  %v6785_v20 = vld [vmem:[#allocation5 + $0x10c] sm:$0xf0]  ;;  %v5722_v33 = vor.u32 %v6753_v18, %v5721_v16  ;;  %2649 = vmatpush.bf16.msra.mxu2 %v5994_v22  ;;  %9390 = vst [vmem:[#allocation17_spill] sm:$0xff] %v7458_v13  ;;  %v7462_v15 = vpack.c.bf16 %v572_v11, %v564_v10  ;;  %v578_v18 = vld [vmem:[%s7418_s28 + $0x108] sm:$0xff] }
  0x4b   : > { %v5977_v23 = vld [vmem:[#allocation5 + $0x200] sm:$0xf]  ;;  %v6817_v24 = vld [vmem:[#allocation5 + $0x20c] sm:$0xf0]  ;;  %v5850_v37 = vor.u32 %v6785_v20, %v5849_v19  ;;  %2738 = vmatpush.bf16.msra.mxu3 %v6122_v26  ;;  %v586_v19 = vld [vmem:[%s7418_s28 + $0x148] sm:$0xff] }
  0x4c   : > { %v6105_v25 = vld [vmem:[#allocation5 + $0x300] sm:$0xf]  ;;  %v6849_v27 = vld [vmem:[#allocation5 + $0x30c] sm:$0xf0]  ;;  %v5978_v38 = vor.u32 %v6817_v24, %v5977_v23  ;;  %2472 = vmatpush.bf16.msra.mxu0 %v5722_v33  ;;  %9392 = vst [vmem:[#allocation19_spill] sm:$0xff] %v7462_v15  ;;  %v580_v22 = vld [vmem:[%s7418_s28 + $0x118] sm:$0xff] }
  0x4d   : > { %v545_v28 = vld [vmem:[%s7418_s28] sm:$0xff]  ;;  %v6973_v32 = vld [vmem:[#allocation5 + $0x6ec] sm:$0xf0]  ;;  %v6106_v42 = vor.u32 %v6849_v27, %v6105_v25  ;;  %2561 = vmatpush.bf16.msra.mxu1 %v5850_v37  ;;  %v588_v23 = vld [vmem:[%s7418_s28 + $0x158] sm:$0xff]  ;;  %v7478_v25 = vpack.c.bf16 %v586_v19, %v578_v18 }
  0x4e   : > { %v553_v29 = vld [vmem:[%s7418_s28 + $0x40] sm:$0xff]  ;;  %v7005_v36 = vld [vmem:[#allocation5 + $0x7ec] sm:$0xf0]  ;;  %2650 = vmatpush.bf16.msra.mxu2 %v5978_v38  ;;  %v7482_v27 = vpack.c.bf16 %v588_v23, %v580_v22  ;;  %v626_v22 = vld [vmem:[%s7418_s28 + $0x288] sm:$0xff] }
  0x4f   : > { %v6601_v31 = vld [vmem:[#allocation5 + $0x6e0] sm:$0xf]  ;;  %v547_v39 = vld [vmem:[%s7418_s28 + $0x10] sm:$0xff]  ;;  %v7436_v47 = vpack.c.bf16 %v553_v29, %v545_v28  ;;  %2739 = vmatpush.bf16.msra.mxu3 %v6106_v42  ;;  %9394 = vst [vmem:[#allocation21_spill] sm:$0xff] %v7478_v25  ;;  %v594_v42 = vld [vmem:[%s7418_s28 + $0x188] sm:$0xff] }
  0x50   : > { %v6729_v35 = vld [vmem:[#allocation5 + $0x7e0] sm:$0xf]  ;;  %v555_v40 = vld [vmem:[%s7418_s28 + $0x50] sm:$0xff]  ;;  %v6602_v44 = vor.u32 %v6973_v32, %v6601_v31  ;;  %2562 = vmatmul.bf16.vlgmr.msra.gmra.mxu1 %v7438_v51  ;;  %9396 = vst [vmem:[#allocation23_spill] sm:$0xff] %v7482_v27  ;;  %v634_v23 = vld [vmem:[%s7418_s28 + $0x2c8] sm:$0xff] }
  0x51   : > { %v6345_v45 = vld [vmem:[#allocation5 + $0x4e0] sm:$0xf]  ;;  %v6909_v46 = vld [vmem:[#allocation5 + $0x4ec] sm:$0xf0]  ;;  %9385 = vst [vmem:[#allocation12_spill] sm:$0xff] %v7436_v47  ;;  %v6730_v48 = vor.u32 %v7005_v36, %v6729_v35  ;;  %v7440_v52 = vpack.c.bf16 %v555_v40, %v547_v39  ;;  %2473 = vmatmul.bf16.vlgmr.msra.gmra.mxu0 %v7436_v47 }
  0x52   : > { %v6473_v49 = vld [vmem:[#allocation5 + $0x5e0] sm:$0xf]  ;;  %v6941_v50 = vld [vmem:[#allocation5 + $0x5ec] sm:$0xf0]  ;;  %v6346_v54 = vor.u32 %v6909_v46, %v6345_v45  ;;  %2999 = vmatpush.bf16.msrb.mxu2 %v6602_v44  ;;  %2740 = vmatmul.bf16.vlgmr.msra.gmra.mxu3 %v7442_v53  ;;  %v596_v46 = vld [vmem:[%s7418_s28 + $0x198] sm:$0xff] }
  0x53   : > { %9387 = vst [vmem:[#allocation14_spill] sm:$0xff] %v7440_v52  ;;  %v6474_v55 = vor.u32 %v6941_v50, %v6473_v49  ;;  %3088 = vmatpush.bf16.msrb.mxu3 %v6730_v48  ;;  %2651 = vmatmul.bf16.vlgmr.msra.gmra.mxu2 %v7440_v52  ;;  %v6585_v56 = vld [vmem:[#allocation5 + $0x6c0] sm:$0xf]  ;;  %v6969_v57 = vld [vmem:[#allocation5 + $0x6cc] sm:$0xf0]  ;;  %v604_v48 = vld [vmem:[%s7418_s28 + $0x1d8] sm:$0xff]  ;;  %v7498_v50 = vpack.c.bf16 %v602_v43, %v594_v42 }
  0x54   : > { %2821 = vmatpush.bf16.msrb.mxu0 %v6346_v54  ;;  %v6329_v58 = vld [vmem:[#allocation5 + $0x4c0] sm:$0xf]  ;;  %v6586_v59 = vor.u32 %v6969_v57, %v6585_v56  ;;  %v6905_v60 = vld [vmem:[#allocation5 + $0x4cc] sm:$0xf0]  ;;  %v644_v42 = vld [vmem:[%s7418_s28 + $0x318] sm:$0xff] }
  0x55   : > { %2910 = vmatpush.bf16.msrb.mxu1 %v6474_v55  ;;  %v6713_v61 = vld [vmem:[#allocation5 + $0x7c0] sm:$0xf]  ;;  %v7001_v62 = vld [vmem:[#allocation5 + $0x7cc] sm:$0xf0]  ;;  %v6330_v63 = vor.u32 %v6905_v60, %v6329_v58  ;;  %9398 = vst [vmem:[#allocation25_spill] sm:$0xff] %v7498_v50  ;;  %v7502_v55 = vpack.c.bf16 %v604_v48, %v596_v46  ;;  %v610_v58 = vld [vmem:[%s7418_s28 + $0x208] sm:$0xff] }
  0x56   : > { %v6714_v0 = vor.u32 %v7001_v62, %v6713_v61  ;;  %v6457_v1 = vld [vmem:[#allocation5 + $0x5c0] sm:$0xf]  ;;  %v6937_v2 = vld [vmem:[#allocation5 + $0x5cc] sm:$0xf0]  ;;  %3000 = vmatpush.bf16.msrb.mxu2 %v6586_v59  ;;  %v618_v59 = vld [vmem:[%s7418_s28 + $0x248] sm:$0xff] }
  0x57   : > { %v6458_v3 = vor.u32 %v6937_v2, %v6457_v1  ;;  %v561_v4 = vld [vmem:[%s7418_s28 + $0x80] sm:$0xff]  ;;  %v563_v8 = vld [vmem:[%s7418_s28 + $0x90] sm:$0xff]  ;;  %9400 = vst [vmem:[#allocation27_spill] sm:$0xff] %v7502_v55  ;;  %v612_v62 = vld [vmem:[%s7418_s28 + $0x218] sm:$0xff]  ;;  %v7518_v1 = vpack.c.bf16 %v618_v59, %v610_v58 }
  0x58   : > { %2822 = vmatpush.bf16.msrb.mxu0 %v6330_v63  ;;  %3089 = vmatpush.bf16.msrb.mxu3 %v6714_v0  ;;  %v569_v5 = vld [vmem:[%s7418_s28 + $0xc0] sm:$0xff]  ;;  %v571_v9 = vld [vmem:[%s7418_s28 + $0xd0] sm:$0xff]  ;;  %v620_v63 = vld [vmem:[%s7418_s28 + $0x258] sm:$0xff] }
  0x59   : > { %2911 = vmatpush.bf16.msrb.mxu1 %v6458_v3  ;;  %v7456_v12 = vpack.c.bf16 %v569_v5, %v561_v4  ;;  %v7460_v14 = vpack.c.bf16 %v571_v9, %v563_v8  ;;  %v577_v16 = vld [vmem:[%s7418_s28 + $0x100] sm:$0xff]  ;;  %v579_v20 = vld [vmem:[%s7418_s28 + $0x110] sm:$0xff]  ;;  %9402 = vst [vmem:[#allocation29_spill] sm:$0xff] %v7518_v1  ;;  %v7522_v3 = vpack.c.bf16 %v620_v63, %v612_v62  ;;  %v652_v43 = vld [vmem:[%s7418_s28 + $0x358] sm:$0xff] }
  0x5a   : > { %v585_v17 = vld [vmem:[%s7418_s28 + $0x140] sm:$0xff]  ;;  %v587_v21 = vld [vmem:[%s7418_s28 + $0x150] sm:$0xff]  ;;  %v7562_v48 = vpack.c.bf16 %v652_v43, %v644_v42 }
  0x5b   : > { %9389 = vst [vmem:[#allocation16_spill] sm:$0xff] %v7456_v12  ;;  %v7476_v24 = vpack.c.bf16 %v585_v17, %v577_v16  ;;  %v7480_v26 = vpack.c.bf16 %v587_v21, %v579_v20  ;;  %v6569_v28 = vld [vmem:[#allocation5 + $0x6a0] sm:$0xf]  ;;  %v6965_v29 = vld [vmem:[#allocation5 + $0x6ac] sm:$0xf0] }
  0x5c   : > { %9391 = vst [vmem:[#allocation18_spill] sm:$0xff] %v7460_v14  ;;  %v6313_v30 = vld [vmem:[#allocation5 + $0x4a0] sm:$0xf]  ;;  %v6570_v31 = vor.u32 %v6965_v29, %v6569_v28  ;;  %v6901_v32 = vld [vmem:[#allocation5 + $0x4ac] sm:$0xf0] }
  0x5d   : > { %9393 = vst [vmem:[#allocation20_spill] sm:$0xff] %v7476_v24  ;;  %v6697_v33 = vld [vmem:[#allocation5 + $0x7a0] sm:$0xf]  ;;  %v6997_v34 = vld [vmem:[#allocation5 + $0x7ac] sm:$0xf0]  ;;  %v6314_v35 = vor.u32 %v6901_v32, %v6313_v30  ;;  %v628_v30 = vld [vmem:[%s7418_s28 + $0x298] sm:$0xff] }
  0x5e   : > { %9395 = vst [vmem:[#allocation22_spill] sm:$0xff] %v7480_v26  ;;  %v6698_v36 = vor.u32 %v6997_v34, %v6697_v33  ;;  %v6441_v37 = vld [vmem:[#allocation5 + $0x5a0] sm:$0xf]  ;;  %v6933_v38 = vld [vmem:[#allocation5 + $0x5ac] sm:$0xf0]  ;;  %3001 = vmatpush.bf16.msrb.mxu2 %v6570_v31  ;;  %v636_v31 = vld [vmem:[%s7418_s28 + $0x2d8] sm:$0xff]  ;;  %v7538_v33 = vpack.c.bf16 %v634_v23, %v626_v22 }
  0x5f   : > { %v6442_v39 = vor.u32 %v6933_v38, %v6441_v37  ;;  %2823 = vmatpush.bf16.msrb.mxu0 %v6314_v35  ;;  %v593_v40 = vld [vmem:[%s7418_s28 + $0x180] sm:$0xff]  ;;  %v595_v44 = vld [vmem:[%s7418_s28 + $0x190] sm:$0xff]  ;;  %9404 = vst [vmem:[#allocation31_spill] sm:$0xff] %v7522_v3  ;;  %v7542_v35 = vpack.c.bf16 %v636_v31, %v628_v30  ;;  %v642_v38 = vld [vmem:[%s7418_s28 + $0x308] sm:$0xff] }
  0x60   : > { %2567 = vmatmul.bf16.gmra.mxu1 %v7458_v13  ;;  %3090 = vmatpush.bf16.msrb.mxu3 %v6698_v36  ;;  %v601_v41 = vld [vmem:[%s7418_s28 + $0x1c0] sm:$0xff]  ;;  %v603_v45 = vld [vmem:[%s7418_s28 + $0x1d0] sm:$0xff]  ;;  %9406 = vst [vmem:[#allocation33_spill] sm:$0xff] %v7538_v33  ;;  %v674_v30 = vld [vmem:[%s7418_s28 + $0x408] sm:$0xff] }
  0x61   : > { %2478 = vmatmul.bf16.gmra.mxu0 %v7456_v12  ;;  %2912 = vmatpush.bf16.msrb.mxu1 %v6442_v39  ;;  %v7496_v49 = vpack.c.bf16 %v601_v41, %v593_v40  ;;  %v7500_v54 = vpack.c.bf16 %v603_v45, %v595_v44  ;;  %v609_v56 = vld [vmem:[%s7418_s28 + $0x200] sm:$0xff]  ;;  %v611_v60 = vld [vmem:[%s7418_s28 + $0x210] sm:$0xff]  ;;  %9408 = vst [vmem:[#allocation35_spill] sm:$0xff] %v7542_v35  ;;  %v650_v39 = vld [vmem:[%s7418_s28 + $0x348] sm:$0xff] }
  0x62   : > { %2745 = vmatmul.bf16.gmra.mxu3 %v7462_v15  ;;  %v617_v57 = vld [vmem:[%s7418_s28 + $0x240] sm:$0xff]  ;;  %v619_v61 = vld [vmem:[%s7418_s28 + $0x250] sm:$0xff]  ;;  %v7558_v45 = vpack.c.bf16 %v650_v39, %v642_v38  ;;  %9412 = vst [vmem:[#allocation39_spill] sm:$0xff] %v7562_v48  ;;  %v682_v31 = vld [vmem:[%s7418_s28 + $0x448] sm:$0xff] }
  0x63   : > { %2656 = vmatmul.bf16.gmra.mxu2 %v7460_v14  ;;  %9397 = vst [vmem:[#allocation24_spill] sm:$0xff] %v7496_v49  ;;  %v7516_v0 = vpack.c.bf16 %v617_v57, %v609_v56  ;;  %v7520_v2 = vpack.c.bf16 %v619_v61, %v611_v60  ;;  %v6553_v4 = vld [vmem:[#allocation5 + $0x680] sm:$0xf]  ;;  %v6961_v5 = vld [vmem:[#allocation5 + $0x68c] sm:$0xf0]  ;;  %v676_v38 = vld [vmem:[%s7418_s28 + $0x418] sm:$0xff]  ;;  %v7598_v42 = vpack.c.bf16 %v682_v31, %v674_v30 }
  0x64   : > { %9399 = vst [vmem:[#allocation26_spill] sm:$0xff] %v7500_v54  ;;  %v6297_v6 = vld [vmem:[#allocation5 + $0x480] sm:$0xf]  ;;  %v6554_v7 = vor.u32 %v6961_v5, %v6553_v4  ;;  %v6897_v8 = vld [vmem:[#allocation5 + $0x48c] sm:$0xf0]  ;;  %v684_v39 = vld [vmem:[%s7418_s28 + $0x458] sm:$0xff] }
  0x65   : > { %9401 = vst [vmem:[#allocation28_spill] sm:$0xff] %v7516_v0  ;;  %v6681_v9 = vld [vmem:[#allocation5 + $0x780] sm:$0xf]  ;;  %v6993_v10 = vld [vmem:[#allocation5 + $0x78c] sm:$0xf0]  ;;  %v6298_v11 = vor.u32 %v6897_v8, %v6297_v6 }
  0x66   : > { %9403 = vst [vmem:[#allocation30_spill] sm:$0xff] %v7520_v2  ;;  %v6682_v16 = vor.u32 %v6993_v10, %v6681_v9  ;;  %v6425_v17 = vld [vmem:[#allocation5 + $0x580] sm:$0xf]  ;;  %v6929_v18 = vld [vmem:[#allocation5 + $0x58c] sm:$0xf0]  ;;  %3002 = vmatpush.bf16.msrb.mxu2 %v6554_v7  ;;  %v658_v10 = vld [vmem:[%s7418_s28 + $0x388] sm:$0xff] }
  0x67   : > { %v6426_v19 = vor.u32 %v6929_v18, %v6425_v17  ;;  %2824 = vmatpush.bf16.msrb.mxu0 %v6298_v11  ;;  %v625_v20 = vld [vmem:[%s7418_s28 + $0x280] sm:$0xff]  ;;  %v627_v28 = vld [vmem:[%s7418_s28 + $0x290] sm:$0xff]  ;;  %9410 = vst [vmem:[#allocation37_spill] sm:$0xff] %v7558_v45  ;;  %v666_v11 = vld [vmem:[%s7418_s28 + $0x3c8] sm:$0xff] }
  0x68   : > { %3091 = vmatpush.bf16.msrb.mxu3 %v6682_v16  ;;  %v633_v21 = vld [vmem:[%s7418_s28 + $0x2c0] sm:$0xff]  ;;  %v635_v29 = vld [vmem:[%s7418_s28 + $0x2d0] sm:$0xff]  ;;  %v660_v18 = vld [vmem:[%s7418_s28 + $0x398] sm:$0xff]  ;;  %9418 = vst [vmem:[#allocation45_spill] sm:$0xff] %v7598_v42 }
  0x69   : > { %2913 = vmatpush.bf16.msrb.mxu1 %v6426_v19  ;;  %v7536_v32 = vpack.c.bf16 %v633_v21, %v625_v20  ;;  %v7540_v34 = vpack.c.bf16 %v635_v29, %v627_v28  ;;  %v641_v36 = vld [vmem:[%s7418_s28 + $0x300] sm:$0xff]  ;;  %v643_v40 = vld [vmem:[%s7418_s28 + $0x310] sm:$0xff]  ;;  %v668_v19 = vld [vmem:[%s7418_s28 + $0x3d8] sm:$0xff]  ;;  %v7578_v21 = vpack.c.bf16 %v666_v11, %v658_v10 }
  0x6a   : > { %v649_v37 = vld [vmem:[%s7418_s28 + $0x340] sm:$0xff]  ;;  %v651_v41 = vld [vmem:[%s7418_s28 + $0x350] sm:$0xff]  ;;  %v7582_v23 = vpack.c.bf16 %v668_v19, %v660_v18 }
  0x6b   : > { %9405 = vst [vmem:[#allocation32_spill] sm:$0xff] %v7536_v32  ;;  %v7556_v44 = vpack.c.bf16 %v649_v37, %v641_v36  ;;  %v7560_v46 = vpack.c.bf16 %v651_v41, %v643_v40  ;;  %v6537_v56 = vld [vmem:[#allocation5 + $0x660] sm:$0xf]  ;;  %v6957_v57 = vld [vmem:[#allocation5 + $0x66c] sm:$0xf0] }
  0x6c   : > { %9407 = vst [vmem:[#allocation34_spill] sm:$0xff] %v7540_v34  ;;  %v6281_v58 = vld [vmem:[#allocation5 + $0x460] sm:$0xf]  ;;  %v6538_v59 = vor.u32 %v6957_v57, %v6537_v56  ;;  %v6893_v60 = vld [vmem:[#allocation5 + $0x46c] sm:$0xf0]  ;;  %v7602_v57 = vpack.c.bf16 %v684_v39, %v676_v38 }
  0x6d   : > { %9409 = vst [vmem:[#allocation36_spill] sm:$0xff] %v7556_v44  ;;  %v6665_v61 = vld [vmem:[#allocation5 + $0x760] sm:$0xf]  ;;  %v6989_v62 = vld [vmem:[#allocation5 + $0x76c] sm:$0xf0]  ;;  %v6282_v63 = vor.u32 %v6893_v60, %v6281_v58 }
  0x6e   : > { %9411 = vst [vmem:[#allocation38_spill] sm:$0xff] %v7560_v46  ;;  %v6666_v4 = vor.u32 %v6989_v62, %v6665_v61  ;;  %3003 = vmatpush.bf16.msrb.mxu2 %v6538_v59  ;;  %v6409_v5 = vld [vmem:[#allocation5 + $0x560] sm:$0xf]  ;;  %v6925_v6 = vld [vmem:[#allocation5 + $0x56c] sm:$0xf0] }
  0x6f   : > { %2825 = vmatpush.bf16.msrb.mxu0 %v6282_v63  ;;  %v6410_v7 = vor.u32 %v6925_v6, %v6409_v5  ;;  %v657_v8 = vld [vmem:[%s7418_s28 + $0x380] sm:$0xff]  ;;  %v659_v16 = vld [vmem:[%s7418_s28 + $0x390] sm:$0xff]  ;;  %9414 = vst [vmem:[#allocation41_spill] sm:$0xff] %v7578_v21 }
  0x70   : > { %2572 = vmatmul.bf16.gmra.mxu1 %v7478_v25  ;;  %3092 = vmatpush.bf16.msrb.mxu3 %v6666_v4  ;;  %v665_v9 = vld [vmem:[%s7418_s28 + $0x3c0] sm:$0xff]  ;;  %v667_v17 = vld [vmem:[%s7418_s28 + $0x3d0] sm:$0xff]  ;;  %9416 = vst [vmem:[#allocation43_spill] sm:$0xff] %v7582_v23 }
  0x71   : > { %2483 = vmatmul.bf16.gmra.mxu0 %v7476_v24  ;;  %2914 = vmatpush.bf16.msrb.mxu1 %v6410_v7  ;;  %v7576_v20 = vpack.c.bf16 %v665_v9, %v657_v8  ;;  %v7580_v22 = vpack.c.bf16 %v667_v17, %v659_v16  ;;  %v673_v28 = vld [vmem:[%s7418_s28 + $0x400] sm:$0xff]  ;;  %v675_v36 = vld [vmem:[%s7418_s28 + $0x410] sm:$0xff]  ;;  %9420 = vst [vmem:[#allocation47_spill] sm:$0xff] %v7602_v57 }
  0x72   : > { %2750 = vmatmul.bf16.gmra.mxu3 %v7482_v27  ;;  %v681_v29 = vld [vmem:[%s7418_s28 + $0x440] sm:$0xff]  ;;  %v683_v37 = vld [vmem:[%s7418_s28 + $0x450] sm:$0xff] }
  0x73   : > { %2661 = vmatmul.bf16.gmra.mxu2 %v7480_v26  ;;  %9413 = vst [vmem:[#allocation40_spill] sm:$0xff] %v7576_v20  ;;  %v7596_v40 = vpack.c.bf16 %v681_v29, %v673_v28  ;;  %v7600_v43 = vpack.c.bf16 %v683_v37, %v675_v36  ;;  %v6521_v59 = vld [vmem:[#allocation5 + $0x640] sm:$0xf]  ;;  %v6953_v60 = vld [vmem:[#allocation5 + $0x64c] sm:$0xf0]  ;;  %v690_v36 = vld [vmem:[%s7418_s28 + $0x488] sm:$0xff] }
  0x74   : > { %9415 = vst [vmem:[#allocation42_spill] sm:$0xff] %v7580_v22  ;;  %v6265_v61 = vld [vmem:[#allocation5 + $0x440] sm:$0xf]  ;;  %v6522_v62 = vor.u32 %v6953_v60, %v6521_v59  ;;  %v6889_v63 = vld [vmem:[#allocation5 + $0x44c] sm:$0xf0]  ;;  %v698_v37 = vld [vmem:[%s7418_s28 + $0x4c8] sm:$0xff] }
  0x75   : > { %9417 = vst [vmem:[#allocation44_spill] sm:$0xff] %v7596_v40  ;;  %v6649_v4 = vld [vmem:[#allocation5 + $0x740] sm:$0xf]  ;;  %v6985_v5 = vld [vmem:[#allocation5 + $0x74c] sm:$0xf0]  ;;  %v6266_v7 = vor.u32 %v6889_v63, %v6265_v61  ;;  %v7620_v63 = vpack.c.bf16 %v698_v37, %v690_v36  ;;  %v714_v36 = vld [vmem:[%s7418_s28 + $0x548] sm:$0xff] }
  0x76   : > { %9419 = vst [vmem:[#allocation46_spill] sm:$0xff] %v7600_v43  ;;  %v6650_v8 = vor.u32 %v6985_v5, %v6649_v4  ;;  %3004 = vmatpush.bf16.msrb.mxu2 %v6522_v62  ;;  %v6393_v19 = vld [vmem:[#allocation5 + $0x540] sm:$0xf]  ;;  %v6921_v28 = vld [vmem:[#allocation5 + $0x54c] sm:$0xf0] }
  0x77   : > { %2826 = vmatpush.bf16.msrb.mxu0 %v6266_v7  ;;  %v6394_v29 = vor.u32 %v6921_v28, %v6393_v19  ;;  %v689_v30 = vld [vmem:[%s7418_s28 + $0x480] sm:$0xff]  ;;  %v691_v38 = vld [vmem:[%s7418_s28 + $0x490] sm:$0xff]  ;;  %9422 = vst [vmem:[#allocation49_spill] sm:$0xff] %v7620_v63 }
  0x78   : > { %3093 = vmatpush.bf16.msrb.mxu3 %v6650_v8  ;;  %v697_v31 = vld [vmem:[%s7418_s28 + $0x4c0] sm:$0xff]  ;;  %v699_v39 = vld [vmem:[%s7418_s28 + $0x4d0] sm:$0xff] }
  0x79   : > { %2915 = vmatpush.bf16.msrb.mxu1 %v6394_v29  ;;  %v7618_v59 = vpack.c.bf16 %v697_v31, %v689_v30  ;;  %v7622_v4 = vpack.c.bf16 %v699_v39, %v691_v38  ;;  %v705_v29 = vld [vmem:[%s7418_s28 + $0x500] sm:$0xff]  ;;  %v706_v31 = vld [vmem:[%s7418_s28 + $0x508] sm:$0xff]  ;;  %v707_v37 = vld [vmem:[%s7418_s28 + $0x510] sm:$0xff] }
  0x7a   : > { %v713_v30 = vld [vmem:[%s7418_s28 + $0x540] sm:$0xff]  ;;  %v715_v38 = vld [vmem:[%s7418_s28 + $0x550] sm:$0xff]  ;;  %v708_v39 = vld [vmem:[%s7418_s28 + $0x518] sm:$0xff] }
  0x7b   : > { %9421 = vst [vmem:[#allocation48_spill] sm:$0xff] %v7618_v59 }
  0x7c   : > { %9423 = vst [vmem:[#allocation50_spill] sm:$0xff] %v7622_v4 }
  0x80   : > { %2577 = vmatmul.bf16.gmra.mxu1 %v7498_v50 }
  0x81   : > { %2488 = vmatmul.bf16.gmra.mxu0 %v7496_v49 }
  0x82   : > { %2755 = vmatmul.bf16.gmra.mxu3 %v7502_v55 }
  0x83   : > { %2666 = vmatmul.bf16.gmra.mxu2 %v7500_v54 }
  0x90   : > { %2582 = vmatmul.bf16.gmra.mxu1 %v7518_v1 }
  0x91   : > { %2493 = vmatmul.bf16.gmra.mxu0 %v7516_v0 }
  0x92   : > { %2760 = vmatmul.bf16.gmra.mxu3 %v7522_v3 }
  0x93   : > { %2671 = vmatmul.bf16.gmra.mxu2 %v7520_v2 }
  0xa0   : > { %2587 = vmatmul.bf16.gmra.mxu1 %v7538_v33 }
  0xa1   : > { %2498 = vmatmul.bf16.gmra.mxu0 %v7536_v32 }
  0xa2   : > { %2765 = vmatmul.bf16.gmra.mxu3 %v7542_v35 }
  0xa3   : > { %2676 = vmatmul.bf16.gmra.mxu2 %v7540_v34 }
  0xb0   : > { %2592 = vmatmul.bf16.gmra.mxu1 %v7558_v45 }
  0xb1   : > { %2503 = vmatmul.bf16.gmra.mxu0 %v7556_v44 }
  0xb2   : > { %2770 = vmatmul.bf16.gmra.mxu3 %v7562_v48 }
  0xb3   : > { %2681 = vmatmul.bf16.gmra.mxu2 %v7560_v46 }
  0xc0   : > { %2597 = vmatmul.bf16.gmra.mxu1 %v7578_v21 }
  0xc1   : > { %2508 = vmatmul.bf16.gmra.mxu0 %v7576_v20 }
  0xc2   : > { %2775 = vmatmul.bf16.gmra.mxu3 %v7582_v23 }
  0xc3   : > { %2686 = vmatmul.bf16.gmra.mxu2 %v7580_v22 }
  0xcd   : > { %v2563_v56 = vpop.f32.mrf.mxu1 }
  0xce   : > { %v2474_v41 = vpop.f32.mrf.mxu0 }
  0xcf   : > { %v2564_v58 = vadd.f32 %v2563_v56, %v2474_v41  ;;  %v692_v41 = vld [vmem:[%s7418_s28 + $0x498] sm:$0xff] }
  0xd0   : > { %2602 = vmatmul.bf16.gmra.mxu1 %v7598_v42  ;;  %v700_v56 = vld [vmem:[%s7418_s28 + $0x4d8] sm:$0xff] }
  0xd1   : > { %2513 = vmatmul.bf16.gmra.mxu0 %v7596_v40 }
  0xd2   : > { %2780 = vmatmul.bf16.gmra.mxu3 %v7602_v57 }
  0xd3   : > { %2691 = vmatmul.bf16.gmra.mxu2 %v7600_v43 }
  0xd5   : > { %v2741_v10 = vpop.f32.mrf.mxu3  ;;  %v2565_v16 = vpop.f32.mrf.mxu1 }
  0xd6   : > { %v2652_v6 = vpop.f32.mrf.mxu2  ;;  %v2476_v11 = vpop.f32.mrf.mxu0 }
  0xd7   : > { %v2653_v9 = vadd.f32 %v2652_v6, %v2564_v58  ;;  %v2566_v18 = vadd.f32 %v2565_v16, %v2476_v11  ;;  %v7624_v6 = vpack.c.bf16 %v700_v56, %v692_v41  ;;  %v716_v41 = vld [vmem:[%s7418_s28 + $0x558] sm:$0xff] }
  0xd9   : > { %v7608_v17 = vadd.f32 %v2741_v10, %v2653_v9  ;;  %9424 = vst [vmem:[#allocation51_spill] sm:$0xff] %v7624_v6 }
  0xdd   : > { %v2743_v61 = vpop.f32.mrf.mxu3  ;;  %v2568_v5 = vpop.f32.mrf.mxu1 }
  0xde   : > { %v2654_v58 = vpop.f32.mrf.mxu2  ;;  %v2479_v62 = vpop.f32.mrf.mxu0 }
  0xdf   : > { %v2655_v60 = vadd.f32 %v2654_v58, %v2566_v18  ;;  %v2569_v8 = vadd.f32 %v2568_v5, %v2479_v62  ;;  %v7642_v58 = vpack.c.bf16 %v713_v30, %v705_v29  ;;  %v7644_v5 = vpack.c.bf16 %v714_v36, %v706_v31  ;;  %v6249_v29 = vld [vmem:[#allocation5 + $0x420] sm:$0xf]  ;;  %v6885_v31 = vld [vmem:[#allocation5 + $0x42c] sm:$0xf0] }
  0xe0   : > { %2607 = vmatmul.bf16.gmra.mxu1 %v7620_v63  ;;  %v6633_v36 = vld [vmem:[#allocation5 + $0x720] sm:$0xf] }
  0xe1   : > { %v7626_v7 = vadd.f32 %v2743_v61, %v2655_v60  ;;  %2518 = vmatmul.bf16.gmra.mxu0 %v7618_v59  ;;  %9425 = vst [vmem:[#allocation52_spill] sm:$0xff] %v7642_v58 }
  0xe2   : > { %2785 = vmatmul.bf16.gmra.mxu3 %v7624_v6  ;;  %9426 = vst [vmem:[#allocation53_spill] sm:$0xff] %v7644_v5 }
  0xe3   : > { %2696 = vmatmul.bf16.gmra.mxu2 %v7622_v4 }
  0xe5   : > { %v2746_v11 = vpop.f32.mrf.mxu3  ;;  %v2570_v18 = vpop.f32.mrf.mxu1 }
  0xe6   : > { %v2657_v9 = vpop.f32.mrf.mxu2  ;;  %v2481_v16 = vpop.f32.mrf.mxu0 }
  0xe7   : > { %v2658_v10 = vadd.f32 %v2657_v9, %v2569_v8  ;;  %v2571_v28 = vadd.f32 %v2570_v18, %v2481_v16  ;;  %v7646_v8 = vpack.c.bf16 %v715_v38, %v707_v37  ;;  %v6505_v18 = vld [vmem:[#allocation5 + $0x620] sm:$0xf]  ;;  %v6981_v37 = vld [vmem:[#allocation5 + $0x72c] sm:$0xf0] }
  0xe9   : > { %v7632_v19 = vadd.f32 %v2746_v11, %v2658_v10  ;;  %9427 = vst [vmem:[#allocation54_spill] sm:$0xff] %v7646_v8  ;;  %v7648_v10 = vpack.c.bf16 %v716_v41, %v708_v39  ;;  %v6250_v39 = vor.u32 %v6885_v31, %v6249_v29  ;;  %v6634_v41 = vor.u32 %v6981_v37, %v6633_v36  ;;  %v721_v31 = vld [vmem:[%s7418_s28 + $0x580] sm:$0xff]  ;;  %v722_v37 = vld [vmem:[%s7418_s28 + $0x588] sm:$0xff] }
  0xea   : > { %v729_v36 = vld [vmem:[%s7418_s28 + $0x5c0] sm:$0xff] }
  0xeb   : > { %9428 = vst [vmem:[#allocation55_spill] sm:$0xff] %v7648_v10  ;;  %2827 = vmatpush.bf16.msrb.mxu0 %v6250_v39  ;;  %3094 = vmatpush.bf16.msrb.mxu3 %v6634_v41  ;;  %v7666_v6 = vpack.c.bf16 %v729_v36, %v721_v31 }
  0xed   : > { %v2748_v61 = vpop.f32.mrf.mxu3  ;;  %v2573_v9 = vpop.f32.mrf.mxu1  ;;  %9429 = vst [vmem:[#allocation56_spill] sm:$0xff] %v7666_v6 }
  0xee   : > { %v2659_v56 = vpop.f32.mrf.mxu2  ;;  %v2484_v62 = vpop.f32.mrf.mxu0 }
  0xef   : > { %v2660_v60 = vadd.f32 %v2659_v56, %v2571_v28  ;;  %v2574_v16 = vadd.f32 %v2573_v9, %v2484_v62  ;;  %v6949_v28 = vld [vmem:[#allocation5 + $0x62c] sm:$0xf0] }
  0xf0   : > { %2612 = vmatmul.bf16.gmra.mxu1 %v7644_v5  ;;  %v6506_v30 = vor.u32 %v6949_v28, %v6505_v18  ;;  %v6377_v28 = vld [vmem:[#allocation5 + $0x520] sm:$0xf]  ;;  %v724_v5 = vld [vmem:[%s7418_s28 + $0x598] sm:$0xff] }
  0xf1   : > { %v7650_v11 = vadd.f32 %v2748_v61, %v2660_v60  ;;  %2523 = vmatmul.bf16.gmra.mxu0 %v7642_v58 }
  0xf2   : > { %2790 = vmatmul.bf16.gmra.mxu3 %v7648_v10  ;;  %3005 = vmatpush.bf16.msrb.mxu2 %v6506_v30  ;;  %v6917_v10 = vld [vmem:[#allocation5 + $0x52c] sm:$0xf0]  ;;  %v732_v30 = vld [vmem:[%s7418_s28 + $0x5d8] sm:$0xff] }
  0xf3   : > { %2701 = vmatmul.bf16.gmra.mxu2 %v7646_v8  ;;  %v6378_v29 = vor.u32 %v6917_v10, %v6377_v28  ;;  %v731_v8 = vld [vmem:[%s7418_s28 + $0x5d0] sm:$0xff] }
  0xf5   : > { %v2751_v60 = vpop.f32.mrf.mxu3  ;;  %v2575_v62 = vpop.f32.mrf.mxu1  ;;  %2916 = vmatpush.bf16.msrb.mxu1 %v6378_v29 }
  0xf6   : > { %v2662_v38 = vpop.f32.mrf.mxu2  ;;  %v2486_v61 = vpop.f32.mrf.mxu0 }
  0xf7   : > { %v2663_v56 = vadd.f32 %v2662_v38, %v2574_v16  ;;  %v2576_v18 = vadd.f32 %v2575_v62, %v2486_v61  ;;  %v730_v16 = vld [vmem:[%s7418_s28 + $0x5c8] sm:$0xff]  ;;  %v723_v38 = vld [vmem:[%s7418_s28 + $0x590] sm:$0xff]  ;;  %v7672_v62 = vpack.c.bf16 %v732_v30, %v724_v5 }
  0xf8   : > { %v7670_v61 = vpack.c.bf16 %v731_v8, %v723_v38  ;;  %v745_v38 = vld [vmem:[%s7418_s28 + $0x640] sm:$0xff]  ;;  %v738_v30 = vld [vmem:[%s7418_s28 + $0x608] sm:$0xff] }
  0xf9   : > { %v7656_v9 = vadd.f32 %v2751_v60, %v2663_v56  ;;  %v7668_v60 = vpack.c.bf16 %v730_v16, %v722_v37  ;;  %9432 = vst [vmem:[#allocation59_spill] sm:$0xff] %v7672_v62  ;;  %v737_v16 = vld [vmem:[%s7418_s28 + $0x600] sm:$0xff] }
  0xfa   : > { %9431 = vst [vmem:[#allocation58_spill] sm:$0xff] %v7670_v61 }
  0xfb   : > { %9430 = vst [vmem:[#allocation57_spill] sm:$0xff] %v7668_v60 }
  0xfd   : > { %v2753_v41 = vpop.f32.mrf.mxu3  ;;  %v2578_v10 = vpop.f32.mrf.mxu1 }
  0xfe   : > { %v2664_v58 = vpop.f32.mrf.mxu2  ;;  %v2489_v56 = vpop.f32.mrf.mxu0 }
  0xff   : > { %v2665_v39 = vadd.f32 %v2664_v58, %v2576_v18  ;;  %v2579_v29 = vadd.f32 %v2578_v10, %v2489_v56  ;;  %v747_v56 = vld [vmem:[%s7418_s28 + $0x650] sm:$0xff]  ;;  %v740_v10 = vld [vmem:[%s7418_s28 + $0x618] sm:$0xff] }
 0x100   : > { %2617 = vmatmul.bf16.gmra.mxu1 %v7668_v60  ;;  %v748_v60 = vld [vmem:[%s7418_s28 + $0x658] sm:$0xff] }
 0x101   : > { %v7674_v28 = vadd.f32 %v2753_v41, %v2665_v39  ;;  %2528 = vmatmul.bf16.gmra.mxu0 %v7666_v6  ;;  %v746_v39 = vld [vmem:[%s7418_s28 + $0x648] sm:$0xff]  ;;  %v739_v41 = vld [vmem:[%s7418_s28 + $0x610] sm:$0xff]  ;;  %v7690_v6 = vpack.c.bf16 %v745_v38, %v737_v16  ;;  %v6233_v16 = vld [vmem:[#allocation5 + $0x400] sm:$0xf] }
 0x102   : > { %2795 = vmatmul.bf16.gmra.mxu3 %v7672_v62  ;;  %v7694_v63 = vpack.c.bf16 %v747_v56, %v739_v41  ;;  %v6977_v41 = vld [vmem:[#allocation5 + $0x70c] sm:$0xf0] }
 0x103   : > { %2706 = vmatmul.bf16.gmra.mxu2 %v7670_v61  ;;  %9433 = vst [vmem:[#allocation60_spill] sm:$0xff] %v7690_v6 }
 0x104   : > { %9435 = vst [vmem:[#allocation62_spill] sm:$0xff] %v7694_v63 }
 0x105   : > { %v2756_v8 = vpop.f32.mrf.mxu3  ;;  %v2580_v31 = vpop.f32.mrf.mxu1 }
 0x106   : > { %v2667_v58 = vpop.f32.mrf.mxu2  ;;  %v2491_v18 = vpop.f32.mrf.mxu0 }
 0x107   : > { %v2668_v5 = vadd.f32 %v2667_v58, %v2579_v29  ;;  %v2581_v37 = vadd.f32 %v2580_v31, %v2491_v18  ;;  %v7692_v58 = vpack.c.bf16 %v746_v39, %v738_v30  ;;  %v6881_v30 = vld [vmem:[#allocation5 + $0x40c] sm:$0xf0]  ;;  %v6617_v39 = vld [vmem:[#allocation5 + $0x700] sm:$0xf] }
 0x109   : > { %v7680_v36 = vadd.f32 %v2756_v8, %v2668_v5  ;;  %9434 = vst [vmem:[#allocation61_spill] sm:$0xff] %v7692_v58  ;;  %v7696_v8 = vpack.c.bf16 %v748_v60, %v740_v10 }
 0x10b   : > { %9436 = vst [vmem:[#allocation63_spill] sm:$0xff] %v7696_v8 }
 0x10d   : > { %v2758_v4 = vpop.f32.mrf.mxu3  ;;  %v2583_v5 = vpop.f32.mrf.mxu1 }
 0x10e   : > { %v2669_v61 = vpop.f32.mrf.mxu2  ;;  %v2494_v29 = vpop.f32.mrf.mxu0 }
 0x10f   : > { %v2670_v62 = vadd.f32 %v2669_v61, %v2581_v37  ;;  %v2584_v31 = vadd.f32 %v2583_v5, %v2494_v29  ;;  %v6489_v61 = vld [vmem:[#allocation5 + $0x600] sm:$0xf]  ;;  %v6945_v37 = vld [vmem:[#allocation5 + $0x60c] sm:$0xf0] }
 0x110   : > { %2622 = vmatmul.bf16.gmra.mxu1 %v7692_v58  ;;  %v6490_v38 = vor.u32 %v6945_v37, %v6489_v61  ;;  %v763_v58 = vld [vmem:[%s7418_s28 + $0x6d0] sm:$0xff] }
 0x111   : > { %v7698_v18 = vadd.f32 %v2758_v4, %v2670_v62  ;;  %2533 = vmatmul.bf16.gmra.mxu0 %v7690_v6  ;;  %v6234_v4 = vor.u32 %v6881_v30, %v6233_v16  ;;  %v6618_v62 = vor.u32 %v6977_v41, %v6617_v39  ;;  %v753_v30 = vld [vmem:[%s7418_s28 + $0x680] sm:$0xff]  ;;  %v754_v41 = vld [vmem:[%s7418_s28 + $0x688] sm:$0xff]  ;;  %v756_v6 = vld [vmem:[%s7418_s28 + $0x698] sm:$0xff] }
 0x112   : > { %2800 = vmatmul.bf16.gmra.mxu3 %v7696_v8  ;;  %3006 = vmatpush.bf16.msrb.mxu2 %v6490_v38  ;;  %v6361_v8 = vld [vmem:[#allocation5 + $0x500] sm:$0xf]  ;;  %v764_v38 = vld [vmem:[%s7418_s28 + $0x6d8] sm:$0xff] }
 0x113   : > { %2711 = vmatmul.bf16.gmra.mxu2 %v7694_v63  ;;  %2828 = vmatpush.bf16.msrb.mxu0 %v6234_v4  ;;  %v6913_v63 = vld [vmem:[#allocation5 + $0x50c] sm:$0xf0]  ;;  %v761_v39 = vld [vmem:[%s7418_s28 + $0x6c0] sm:$0xff] }
 0x114   : > { %3095 = vmatpush.bf16.msrb.mxu3 %v6618_v62  ;;  %v6362_v16 = vor.u32 %v6913_v63, %v6361_v8  ;;  %v7714_v57 = vpack.c.bf16 %v761_v39, %v753_v30  ;;  %v7720_v8 = vpack.c.bf16 %v764_v38, %v756_v6  ;;  %v770_v38 = vld [vmem:[%s7418_s28 + $0x708] sm:$0xff] }
 0x115   : > { %v2761_v10 = vpop.f32.mrf.mxu3  ;;  %v2585_v5 = vpop.f32.mrf.mxu1 }
 0x116   : > { %v2672_v60 = vpop.f32.mrf.mxu2  ;;  %v2496_v29 = vpop.f32.mrf.mxu0  ;;  %2917 = vmatpush.bf16.msrb.mxu1 %v6362_v16  ;;  %9437 = vst [vmem:[#allocation64_spill] sm:$0xff] %v7714_v57 }
 0x117   : > { %v2673_v56 = vadd.f32 %v2672_v60, %v2584_v31  ;;  %v2586_v37 = vadd.f32 %v2585_v5, %v2496_v29  ;;  %v762_v31 = vld [vmem:[%s7418_s28 + $0x6c8] sm:$0xff]  ;;  %v755_v60 = vld [vmem:[%s7418_s28 + $0x690] sm:$0xff]  ;;  %9440 = vst [vmem:[#allocation67_spill] sm:$0xff] %v7720_v8 }
 0x118   : > { %v7718_v29 = vpack.c.bf16 %v763_v58, %v755_v60  ;;  %v777_v60 = vld [vmem:[%s7418_s28 + $0x740] sm:$0xff] }
 0x119   : > { %v7704_v61 = vadd.f32 %v2761_v10, %v2673_v56  ;;  %v7716_v10 = vpack.c.bf16 %v762_v31, %v754_v41  ;;  %v769_v31 = vld [vmem:[%s7418_s28 + $0x700] sm:$0xff] }
 0x11a   : > { %9439 = vst [vmem:[#allocation66_spill] sm:$0xff] %v7718_v29 }
 0x11b   : > { %9438 = vst [vmem:[#allocation65_spill] sm:$0xff] %v7716_v10 }
 0x11d   : > { %v2763_v62 = vpop.f32.mrf.mxu3  ;;  %v2588_v63 = vpop.f32.mrf.mxu1 }
 0x11e   : > { %v2674_v59 = vpop.f32.mrf.mxu2  ;;  %v2499_v56 = vpop.f32.mrf.mxu0 }
 0x11f   : > { %v2675_v4 = vadd.f32 %v2674_v59, %v2586_v37  ;;  %v2589_v16 = vadd.f32 %v2588_v63, %v2499_v56  ;;  %v779_v56 = vld [vmem:[%s7418_s28 + $0x750] sm:$0xff]  ;;  %v772_v63 = vld [vmem:[%s7418_s28 + $0x718] sm:$0xff] }
 0x120   : > { %2627 = vmatmul.bf16.gmra.mxu1 %v7716_v10  ;;  %v780_v10 = vld [vmem:[%s7418_s28 + $0x758] sm:$0xff] }
 0x121   : > { %v7722_v5 = vadd.f32 %v2763_v62, %v2675_v4  ;;  %2538 = vmatmul.bf16.gmra.mxu0 %v7714_v57  ;;  %v778_v4 = vld [vmem:[%s7418_s28 + $0x748] sm:$0xff]  ;;  %v771_v62 = vld [vmem:[%s7418_s28 + $0x710] sm:$0xff]  ;;  %v7738_v57 = vpack.c.bf16 %v777_v60, %v769_v31  ;;  %v6779_v31 = vld [vmem:[#allocation5 + $0xe4] sm:$0xf] }
 0x122   : > { %2805 = vmatmul.bf16.gmra.mxu3 %v7720_v8  ;;  %v7742_v42 = vpack.c.bf16 %v779_v56, %v771_v62  ;;  %v6219_v62 = vld [vmem:[#allocation5 + $0x3f0] sm:$0xf0] }
 0x123   : > { %2716 = vmatmul.bf16.gmra.mxu2 %v7718_v29  ;;  %9441 = vst [vmem:[#allocation68_spill] sm:$0xff] %v7738_v57 }
 0x124   : > { %9443 = vst [vmem:[#allocation70_spill] sm:$0xff] %v7742_v42 }
 0x125   : > { %v2766_v58 = vpop.f32.mrf.mxu3  ;;  %v2590_v30 = vpop.f32.mrf.mxu1 }
 0x126   : > { %v2677_v59 = vpop.f32.mrf.mxu2  ;;  %v2501_v37 = vpop.f32.mrf.mxu0 }
 0x127   : > { %v2678_v6 = vadd.f32 %v2677_v59, %v2589_v16  ;;  %v2591_v41 = vadd.f32 %v2590_v30, %v2501_v37  ;;  %v7740_v59 = vpack.c.bf16 %v778_v4, %v770_v38  ;;  %v5835_v38 = vld [vmem:[#allocation5 + $0xf0] sm:$0xf0]  ;;  %v6875_v4 = vld [vmem:[#allocation5 + $0x3e4] sm:$0xf] }
 0x129   : > { %v7728_v39 = vadd.f32 %v2766_v58, %v2678_v6  ;;  %9442 = vst [vmem:[#allocation69_spill] sm:$0xff] %v7740_v59  ;;  %v7744_v58 = vpack.c.bf16 %v780_v10, %v772_v63 }
 0x12b   : > { %9444 = vst [vmem:[#allocation71_spill] sm:$0xff] %v7744_v58 }
 0x12d   : > { %v2768_v43 = vpop.f32.mrf.mxu3  ;;  %v2593_v6 = vpop.f32.mrf.mxu1 }
 0x12e   : > { %v2679_v29 = vpop.f32.mrf.mxu2  ;;  %v2504_v16 = vpop.f32.mrf.mxu0 }
 0x12f   : > { %v2680_v8 = vadd.f32 %v2679_v29, %v2591_v41  ;;  %v2594_v30 = vadd.f32 %v2593_v6, %v2504_v16  ;;  %v6843_v29 = vld [vmem:[#allocation5 + $0x2e4] sm:$0xf]  ;;  %v6091_v41 = vld [vmem:[#allocation5 + $0x2f0] sm:$0xf0] }
 0x130   : > { %2632 = vmatmul.bf16.gmra.mxu1 %v7740_v59  ;;  %v6094_v60 = vor.u32 %v6843_v29, %v6091_v41  ;;  %v795_v59 = vld [vmem:[%s7418_s28 + $0x7d0] sm:$0xff] }
 0x131   : > { %v7746_v37 = vadd.f32 %v2768_v43, %v2680_v8  ;;  %2543 = vmatmul.bf16.gmra.mxu0 %v7738_v57  ;;  %v5838_v43 = vor.u32 %v6779_v31, %v5835_v38  ;;  %v6222_v8 = vor.u32 %v6875_v4, %v6219_v62  ;;  %v785_v38 = vld [vmem:[%s7418_s28 + $0x780] sm:$0xff]  ;;  %v786_v62 = vld [vmem:[%s7418_s28 + $0x788] sm:$0xff]  ;;  %v788_v57 = vld [vmem:[%s7418_s28 + $0x798] sm:$0xff] }
 0x132   : > { %2810 = vmatmul.bf16.gmra.mxu3 %v7744_v58  ;;  %3355 = vmatpush.bf16.msra.mxu2 %v6094_v60  ;;  %v6811_v58 = vld [vmem:[#allocation5 + $0x1e4] sm:$0xf]  ;;  %v796_v60 = vld [vmem:[%s7418_s28 + $0x7d8] sm:$0xff] }
 0x133   : > { %2721 = vmatmul.bf16.gmra.mxu2 %v7742_v42  ;;  %3177 = vmatpush.bf16.msra.mxu0 %v5838_v43  ;;  %v5963_v42 = vld [vmem:[#allocation5 + $0x1f0] sm:$0xf0]  ;;  %v793_v4 = vld [vmem:[%s7418_s28 + $0x7c0] sm:$0xff] }
 0x134   : > { %3444 = vmatpush.bf16.msra.mxu3 %v6222_v8  ;;  %v5966_v31 = vor.u32 %v6811_v58, %v5963_v42  ;;  %v7762_v23 = vpack.c.bf16 %v793_v4, %v785_v38  ;;  %v7768_v58 = vpack.c.bf16 %v796_v60, %v788_v57  ;;  %v550_v60 = vld [vmem:[%s7418_s28 + $0x28] sm:$0xff] }
 0x135   : > { %v2771_v63 = vpop.f32.mrf.mxu3  ;;  %v2595_v6 = vpop.f32.mrf.mxu1 }
 0x136   : > { %v2682_v10 = vpop.f32.mrf.mxu2  ;;  %v2506_v16 = vpop.f32.mrf.mxu0  ;;  %3266 = vmatpush.bf16.msra.mxu1 %v5966_v31  ;;  %9445 = vst [vmem:[#allocation72_spill] sm:$0xff] %v7762_v23 }
 0x137   : > { %v2683_v56 = vadd.f32 %v2682_v10, %v2594_v30  ;;  %v2596_v41 = vadd.f32 %v2595_v6, %v2506_v16  ;;  %v794_v30 = vld [vmem:[%s7418_s28 + $0x7c8] sm:$0xff]  ;;  %v787_v10 = vld [vmem:[%s7418_s28 + $0x790] sm:$0xff]  ;;  %9448 = vst [vmem:[#allocation75_spill] sm:$0xff] %v7768_v58 }
 0x138   : > { %v7766_v16 = vpack.c.bf16 %v795_v59, %v787_v10  ;;  %v557_v10 = vld [vmem:[%s7418_s28 + $0x60] sm:$0xff] }
 0x139   : > { %v7752_v29 = vadd.f32 %v2771_v63, %v2683_v56  ;;  %v7764_v63 = vpack.c.bf16 %v794_v30, %v786_v62  ;;  %v549_v30 = vld [vmem:[%s7418_s28 + $0x20] sm:$0xff] }
 0x13a   : > { %9447 = vst [vmem:[#allocation74_spill] sm:$0xff] %v7766_v16 }
 0x13b   : > { %9446 = vst [vmem:[#allocation73_spill] sm:$0xff] %v7764_v63 }
 0x13d   : > { %v2773_v8 = vpop.f32.mrf.mxu3  ;;  %v2598_v42 = vpop.f32.mrf.mxu1 }
 0x13e   : > { %v2684_v40 = vpop.f32.mrf.mxu2  ;;  %v2509_v56 = vpop.f32.mrf.mxu0 }
 0x13f   : > { %v2685_v43 = vadd.f32 %v2684_v40, %v2596_v41  ;;  %v2599_v31 = vadd.f32 %v2598_v42, %v2509_v56  ;;  %v559_v56 = vld [vmem:[%s7418_s28 + $0x70] sm:$0xff]  ;;  %v552_v42 = vld [vmem:[%s7418_s28 + $0x38] sm:$0xff] }
 0x140   : > { %2637 = vmatmul.bf16.gmra.mxu1 %v7764_v63  ;;  %v560_v63 = vld [vmem:[%s7418_s28 + $0x78] sm:$0xff] }
 0x141   : > { %v7770_v6 = vadd.f32 %v2773_v8, %v2685_v43  ;;  %2548 = vmatmul.bf16.gmra.mxu0 %v7762_v23  ;;  %v558_v43 = vld [vmem:[%s7418_s28 + $0x68] sm:$0xff]  ;;  %v551_v8 = vld [vmem:[%s7418_s28 + $0x30] sm:$0xff]  ;;  %v7786_v23 = vpack.c.bf16 %v557_v10, %v549_v30  ;;  %v6775_v30 = vld [vmem:[#allocation5 + $0xc4] sm:$0xf] }
 0x142   : > { %2815 = vmatmul.bf16.gmra.mxu3 %v7768_v58  ;;  %v7790_v21 = vpack.c.bf16 %v559_v56, %v551_v8  ;;  %v6203_v8 = vld [vmem:[#allocation5 + $0x3d0] sm:$0xf0] }
 0x143   : > { %2726 = vmatmul.bf16.gmra.mxu2 %v7766_v16  ;;  %9449 = vst [vmem:[#allocation76_spill] sm:$0xff] %v7786_v23 }
 0x144   : > { %9451 = vst [vmem:[#allocation78_spill] sm:$0xff] %v7790_v21 }
 0x145   : > { %v2776_v59 = vpop.f32.mrf.mxu3  ;;  %v2600_v38 = vpop.f32.mrf.mxu1 }
 0x146   : > { %v2687_v40 = vpop.f32.mrf.mxu2  ;;  %v2511_v41 = vpop.f32.mrf.mxu0 }
 0x147   : > { %v2688_v57 = vadd.f32 %v2687_v40, %v2599_v31  ;;  %v2601_v62 = vadd.f32 %v2600_v38, %v2511_v41  ;;  %v7788_v40 = vpack.c.bf16 %v558_v43, %v550_v60  ;;  %v5819_v60 = vld [vmem:[#allocation5 + $0xd0] sm:$0xf0]  ;;  %v6871_v43 = vld [vmem:[#allocation5 + $0x3c4] sm:$0xf] }
 0x149   : > { %v7776_v4 = vadd.f32 %v2776_v59, %v2688_v57  ;;  %9450 = vst [vmem:[#allocation77_spill] sm:$0xff] %v7788_v40  ;;  %v7792_v59 = vpack.c.bf16 %v560_v63, %v552_v42 }
 0x14b   : > { %9452 = vst [vmem:[#allocation79_spill] sm:$0xff] %v7792_v59 }
 0x14d   : > { %v2778_v22 = vpop.f32.mrf.mxu3  ;;  %v2603_v57 = vpop.f32.mrf.mxu1 }
 0x14e   : > { %v2689_v16 = vpop.f32.mrf.mxu2  ;;  %v2514_v31 = vpop.f32.mrf.mxu0 }
 0x14f   : > { %v2690_v58 = vadd.f32 %v2689_v16, %v2601_v62  ;;  %v2604_v38 = vadd.f32 %v2603_v57, %v2514_v31  ;;  %v6839_v16 = vld [vmem:[#allocation5 + $0x2c4] sm:$0xf]  ;;  %v6075_v62 = vld [vmem:[#allocation5 + $0x2d0] sm:$0xf0] }
 0x150   : > { %2918 = vmatmul.bf16.vlgmr.msrb.gmra.mxu1 %v7788_v40  ;;  %v6078_v10 = vor.u32 %v6839_v16, %v6075_v62  ;;  %v575_v40 = vld [vmem:[%s7418_s28 + $0xf0] sm:$0xff] }
 0x151   : > { %v7794_v41 = vadd.f32 %v2778_v22, %v2690_v58  ;;  %2829 = vmatmul.bf16.vlgmr.msrb.gmra.mxu0 %v7786_v23  ;;  %v5822_v22 = vor.u32 %v6775_v30, %v5819_v60  ;;  %v6206_v58 = vor.u32 %v6871_v43, %v6203_v8  ;;  %v565_v60 = vld [vmem:[%s7418_s28 + $0xa0] sm:$0xff]  ;;  %v566_v8 = vld [vmem:[%s7418_s28 + $0xa8] sm:$0xff]  ;;  %v568_v23 = vld [vmem:[%s7418_s28 + $0xb8] sm:$0xff] }
 0x152   : > { %3096 = vmatmul.bf16.vlgmr.msrb.gmra.mxu3 %v7792_v59  ;;  %3356 = vmatpush.bf16.msra.mxu2 %v6078_v10  ;;  %v6807_v59 = vld [vmem:[#allocation5 + $0x1c4] sm:$0xf]  ;;  %v576_v10 = vld [vmem:[%s7418_s28 + $0xf8] sm:$0xff] }
 0x153   : > { %3007 = vmatmul.bf16.vlgmr.msrb.gmra.mxu2 %v7790_v21  ;;  %3178 = vmatpush.bf16.msra.mxu0 %v5822_v22  ;;  %v5947_v21 = vld [vmem:[#allocation5 + $0x1d0] sm:$0xf0]  ;;  %v573_v43 = vld [vmem:[%s7418_s28 + $0xe0] sm:$0xff] }
 0x154   : > { %3445 = vmatpush.bf16.msra.mxu3 %v6206_v58  ;;  %v5950_v30 = vor.u32 %v6807_v59, %v5947_v21  ;;  %v7810_v48 = vpack.c.bf16 %v573_v43, %v565_v60  ;;  %v7816_v59 = vpack.c.bf16 %v576_v10, %v568_v23  ;;  %v582_v10 = vld [vmem:[%s7418_s28 + $0x128] sm:$0xff] }
 0x155   : > { %v2781_v42 = vpop.f32.mrf.mxu3  ;;  %v2605_v57 = vpop.f32.mrf.mxu1 }
 0x156   : > { %v2692_v63 = vpop.f32.mrf.mxu2  ;;  %v2516_v31 = vpop.f32.mrf.mxu0  ;;  %3267 = vmatpush.bf16.msra.mxu1 %v5950_v30  ;;  %9453 = vst [vmem:[#allocation80_spill] sm:$0xff] %v7810_v48 }
 0x157   : > { %v2693_v56 = vadd.f32 %v2692_v63, %v2604_v38  ;;  %v2606_v62 = vadd.f32 %v2605_v57, %v2516_v31  ;;  %v574_v38 = vld [vmem:[%s7418_s28 + $0xe8] sm:$0xff]  ;;  %v567_v63 = vld [vmem:[%s7418_s28 + $0xb0] sm:$0xff]  ;;  %9456 = vst [vmem:[#allocation83_spill] sm:$0xff] %v7816_v59 }
 0x158   : > { %v7814_v31 = vpack.c.bf16 %v575_v40, %v567_v63  ;;  %v589_v63 = vld [vmem:[%s7418_s28 + $0x160] sm:$0xff] }
 0x159   : > { %v7800_v16 = vadd.f32 %v2781_v42, %v2693_v56  ;;  %v7812_v42 = vpack.c.bf16 %v574_v38, %v566_v8  ;;  %v581_v38 = vld [vmem:[%s7418_s28 + $0x120] sm:$0xff] }
 0x15a   : > { %9455 = vst [vmem:[#allocation82_spill] sm:$0xff] %v7814_v31 }
 0x15b   : > { %9454 = vst [vmem:[#allocation81_spill] sm:$0xff] %v7812_v42 }
 0x15d   : > { %v2783_v58 = vpop.f32.mrf.mxu3  ;;  %v2608_v21 = vpop.f32.mrf.mxu1 }
 0x15e   : > { %v2694_v20 = vpop.f32.mrf.mxu2  ;;  %v2519_v56 = vpop.f32.mrf.mxu0 }
 0x15f   : > { %v2695_v22 = vadd.f32 %v2694_v20, %v2606_v62  ;;  %v2609_v30 = vadd.f32 %v2608_v21, %v2519_v56  ;;  %v591_v56 = vld [vmem:[%s7418_s28 + $0x170] sm:$0xff]  ;;  %v584_v21 = vld [vmem:[%s7418_s28 + $0x138] sm:$0xff] }
 0x160   : > { %2923 = vmatmul.bf16.gmra.mxu1 %v7812_v42  ;;  %v592_v42 = vld [vmem:[%s7418_s28 + $0x178] sm:$0xff] }
 0x161   : > { %v7818_v57 = vadd.f32 %v2783_v58, %v2695_v22  ;;  %2834 = vmatmul.bf16.gmra.mxu0 %v7810_v48  ;;  %v590_v22 = vld [vmem:[%s7418_s28 + $0x168] sm:$0xff]  ;;  %v583_v58 = vld [vmem:[%s7418_s28 + $0x130] sm:$0xff]  ;;  %v7834_v48 = vpack.c.bf16 %v589_v63, %v581_v38  ;;  %v6771_v38 = vld [vmem:[#allocation5 + $0xa4] sm:$0xf] }
 0x162   : > { %3101 = vmatmul.bf16.gmra.mxu3 %v7816_v59  ;;  %v7838_v45 = vpack.c.bf16 %v591_v56, %v583_v58  ;;  %v6187_v58 = vld [vmem:[#allocation5 + $0x3b0] sm:$0xf0] }
 0x163   : > { %3012 = vmatmul.bf16.gmra.mxu2 %v7814_v31  ;;  %9457 = vst [vmem:[#allocation84_spill] sm:$0xff] %v7834_v48 }
 0x164   : > { %9459 = vst [vmem:[#allocation86_spill] sm:$0xff] %v7838_v45 }
 0x165   : > { %v2786_v40 = vpop.f32.mrf.mxu3  ;;  %v2610_v60 = vpop.f32.mrf.mxu1 }
 0x166   : > { %v2697_v20 = vpop.f32.mrf.mxu2  ;;  %v2521_v62 = vpop.f32.mrf.mxu0 }
 0x167   : > { %v2698_v23 = vadd.f32 %v2697_v20, %v2609_v30  ;;  %v2611_v8 = vadd.f32 %v2610_v60, %v2521_v62  ;;  %v7836_v20 = vpack.c.bf16 %v590_v22, %v582_v10  ;;  %v5803_v10 = vld [vmem:[#allocation5 + $0xb0] sm:$0xf0]  ;;  %v6867_v22 = vld [vmem:[#allocation5 + $0x3a4] sm:$0xf] }
 0x169   : > { %v7824_v43 = vadd.f32 %v2786_v40, %v2698_v23  ;;  %9458 = vst [vmem:[#allocation85_spill] sm:$0xff] %v7836_v20  ;;  %v7840_v40 = vpack.c.bf16 %v592_v42, %v584_v21 }
 0x16b   : > { %9460 = vst [vmem:[#allocation87_spill] sm:$0xff] %v7840_v40 }
 0x16d   : > { %v2788_v46 = vpop.f32.mrf.mxu3  ;;  %v2613_v23 = vpop.f32.mrf.mxu1 }
 0x16e   : > { %v2699_v31 = vpop.f32.mrf.mxu2  ;;  %v2524_v30 = vpop.f32.mrf.mxu0 }
 0x16f   : > { %v2700_v59 = vadd.f32 %v2699_v31, %v2611_v8  ;;  %v2614_v60 = vadd.f32 %v2613_v23, %v2524_v30  ;;  %v6835_v31 = vld [vmem:[#allocation5 + $0x2a4] sm:$0xf]  ;;  %v6059_v8 = vld [vmem:[#allocation5 + $0x2b0] sm:$0xf0] }
 0x170   : > { %2928 = vmatmul.bf16.gmra.mxu1 %v7836_v20  ;;  %v6062_v63 = vor.u32 %v6835_v31, %v6059_v8  ;;  %v607_v20 = vld [vmem:[%s7418_s28 + $0x1f0] sm:$0xff] }
 0x171   : > { %v7842_v62 = vadd.f32 %v2788_v46, %v2700_v59  ;;  %2839 = vmatmul.bf16.gmra.mxu0 %v7834_v48  ;;  %v5806_v46 = vor.u32 %v6771_v38, %v5803_v10  ;;  %v6190_v59 = vor.u32 %v6867_v22, %v6187_v58  ;;  %v597_v10 = vld [vmem:[%s7418_s28 + $0x1a0] sm:$0xff]  ;;  %v598_v58 = vld [vmem:[%s7418_s28 + $0x1a8] sm:$0xff]  ;;  %v600_v48 = vld [vmem:[%s7418_s28 + $0x1b8] sm:$0xff] }
 0x172   : > { %3106 = vmatmul.bf16.gmra.mxu3 %v7840_v40  ;;  %3357 = vmatpush.bf16.msra.mxu2 %v6062_v63  ;;  %v6803_v40 = vld [vmem:[#allocation5 + $0x1a4] sm:$0xf]  ;;  %v608_v63 = vld [vmem:[%s7418_s28 + $0x1f8] sm:$0xff] }
 0x173   : > { %3017 = vmatmul.bf16.gmra.mxu2 %v7838_v45  ;;  %3179 = vmatpush.bf16.msra.mxu0 %v5806_v46  ;;  %v5931_v45 = vld [vmem:[#allocation5 + $0x1b0] sm:$0xf0]  ;;  %v605_v22 = vld [vmem:[%s7418_s28 + $0x1e0] sm:$0xff] }
 0x174   : > { %3446 = vmatpush.bf16.msra.mxu3 %v6190_v59  ;;  %v5934_v38 = vor.u32 %v6803_v40, %v5931_v45  ;;  %v7858_v35 = vpack.c.bf16 %v605_v22, %v597_v10  ;;  %v7864_v40 = vpack.c.bf16 %v608_v63, %v600_v48  ;;  %v614_v63 = vld [vmem:[%s7418_s28 + $0x228] sm:$0xff] }
 0x175   : > { %v2791_v21 = vpop.f32.mrf.mxu3  ;;  %v2615_v23 = vpop.f32.mrf.mxu1 }
 0x176   : > { %v2702_v42 = vpop.f32.mrf.mxu2  ;;  %v2526_v30 = vpop.f32.mrf.mxu0  ;;  %3268 = vmatpush.bf16.msra.mxu1 %v5934_v38  ;;  %9461 = vst [vmem:[#allocation88_spill] sm:$0xff] %v7858_v35 }
 0x177   : > { %v2703_v56 = vadd.f32 %v2702_v42, %v2614_v60  ;;  %v2616_v8 = vadd.f32 %v2615_v23, %v2526_v30  ;;  %v606_v60 = vld [vmem:[%s7418_s28 + $0x1e8] sm:$0xff]  ;;  %v599_v42 = vld [vmem:[%s7418_s28 + $0x1b0] sm:$0xff]  ;;  %9464 = vst [vmem:[#allocation91_spill] sm:$0xff] %v7864_v40 }
 0x178   : > { %v7862_v30 = vpack.c.bf16 %v607_v20, %v599_v42  ;;  %v621_v42 = vld [vmem:[%s7418_s28 + $0x260] sm:$0xff] }
 0x179   : > { %v7848_v31 = vadd.f32 %v2791_v21, %v2703_v56  ;;  %v7860_v21 = vpack.c.bf16 %v606_v60, %v598_v58  ;;  %v613_v60 = vld [vmem:[%s7418_s28 + $0x220] sm:$0xff] }
 0x17a   : > { %9463 = vst [vmem:[#allocation90_spill] sm:$0xff] %v7862_v30 }
 0x17b   : > { %9462 = vst [vmem:[#allocation89_spill] sm:$0xff] %v7860_v21 }
 0x17d   : > { %v2793_v59 = vpop.f32.mrf.mxu3  ;;  %v2618_v45 = vpop.f32.mrf.mxu1 }
 0x17e   : > { %v2704_v44 = vpop.f32.mrf.mxu2  ;;  %v2529_v56 = vpop.f32.mrf.mxu0 }
 0x17f   : > { %v2705_v46 = vadd.f32 %v2704_v44, %v2616_v8  ;;  %v2619_v38 = vadd.f32 %v2618_v45, %v2529_v56  ;;  %v623_v56 = vld [vmem:[%s7418_s28 + $0x270] sm:$0xff]  ;;  %v616_v45 = vld [vmem:[%s7418_s28 + $0x238] sm:$0xff] }
 0x180   : > { %2933 = vmatmul.bf16.gmra.mxu1 %v7860_v21  ;;  %v624_v21 = vld [vmem:[%s7418_s28 + $0x278] sm:$0xff] }
 0x181   : > { %v7866_v23 = vadd.f32 %v2793_v59, %v2705_v46  ;;  %2844 = vmatmul.bf16.gmra.mxu0 %v7858_v35  ;;  %v622_v46 = vld [vmem:[%s7418_s28 + $0x268] sm:$0xff]  ;;  %v615_v59 = vld [vmem:[%s7418_s28 + $0x230] sm:$0xff]  ;;  %v7882_v35 = vpack.c.bf16 %v621_v42, %v613_v60  ;;  %v6767_v60 = vld [vmem:[#allocation5 + $0x84] sm:$0xf] }
 0x182   : > { %3111 = vmatmul.bf16.gmra.mxu3 %v7864_v40  ;;  %v7886_v33 = vpack.c.bf16 %v623_v56, %v615_v59  ;;  %v6171_v59 = vld [vmem:[#allocation5 + $0x390] sm:$0xf0] }
 0x183   : > { %3022 = vmatmul.bf16.gmra.mxu2 %v7862_v30  ;;  %9465 = vst [vmem:[#allocation92_spill] sm:$0xff] %v7882_v35 }
 0x184   : > { %9467 = vst [vmem:[#allocation94_spill] sm:$0xff] %v7886_v33 }
 0x185   : > { %v2796_v20 = vpop.f32.mrf.mxu3  ;;  %v2620_v10 = vpop.f32.mrf.mxu1 }
 0x186   : > { %v2707_v44 = vpop.f32.mrf.mxu2  ;;  %v2531_v8 = vpop.f32.mrf.mxu0 }
 0x187   : > { %v2708_v48 = vadd.f32 %v2707_v44, %v2619_v38  ;;  %v2621_v58 = vadd.f32 %v2620_v10, %v2531_v8  ;;  %v7884_v44 = vpack.c.bf16 %v622_v46, %v614_v63  ;;  %v5787_v63 = vld [vmem:[#allocation5 + $0x90] sm:$0xf0]  ;;  %v6863_v46 = vld [vmem:[#allocation5 + $0x384] sm:$0xf] }
 0x189   : > { %v7872_v22 = vadd.f32 %v2796_v20, %v2708_v48  ;;  %9466 = vst [vmem:[#allocation93_spill] sm:$0xff] %v7884_v44  ;;  %v7888_v20 = vpack.c.bf16 %v624_v21, %v616_v45 }
 0x18b   : > { %9468 = vst [vmem:[#allocation95_spill] sm:$0xff] %v7888_v20 }
 0x18d   : > { %v2798_v34 = vpop.f32.mrf.mxu3  ;;  %v2623_v48 = vpop.f32.mrf.mxu1 }
 0x18e   : > { %v2709_v30 = vpop.f32.mrf.mxu2  ;;  %v2534_v38 = vpop.f32.mrf.mxu0 }
 0x18f   : > { %v2710_v40 = vadd.f32 %v2709_v30, %v2621_v58  ;;  %v2624_v10 = vadd.f32 %v2623_v48, %v2534_v38  ;;  %v6831_v30 = vld [vmem:[#allocation5 + $0x284] sm:$0xf]  ;;  %v6043_v58 = vld [vmem:[#allocation5 + $0x290] sm:$0xf0] }
 0x190   : > { %2938 = vmatmul.bf16.gmra.mxu1 %v7884_v44  ;;  %v6046_v42 = vor.u32 %v6831_v30, %v6043_v58  ;;  %v639_v44 = vld [vmem:[%s7418_s28 + $0x2f0] sm:$0xff] }
 0x191   : > { %v7890_v8 = vadd.f32 %v2798_v34, %v2710_v40  ;;  %2849 = vmatmul.bf16.gmra.mxu0 %v7882_v35  ;;  %v5790_v34 = vor.u32 %v6767_v60, %v5787_v63  ;;  %v6174_v40 = vor.u32 %v6863_v46, %v6171_v59  ;;  %v629_v63 = vld [vmem:[%s7418_s28 + $0x2a0] sm:$0xff]  ;;  %v630_v59 = vld [vmem:[%s7418_s28 + $0x2a8] sm:$0xff]  ;;  %v632_v35 = vld [vmem:[%s7418_s28 + $0x2b8] sm:$0xff] }
 0x192   : > { %3116 = vmatmul.bf16.gmra.mxu3 %v7888_v20  ;;  %3358 = vmatpush.bf16.msra.mxu2 %v6046_v42  ;;  %v6799_v20 = vld [vmem:[#allocation5 + $0x184] sm:$0xf]  ;;  %v640_v42 = vld [vmem:[%s7418_s28 + $0x2f8] sm:$0xff] }
 0x193   : > { %3027 = vmatmul.bf16.gmra.mxu2 %v7886_v33  ;;  %3180 = vmatpush.bf16.msra.mxu0 %v5790_v34  ;;  %v5915_v33 = vld [vmem:[#allocation5 + $0x190] sm:$0xf0]  ;;  %v637_v46 = vld [vmem:[%s7418_s28 + $0x2e0] sm:$0xff] }
 0x194   : > { %3447 = vmatpush.bf16.msra.mxu3 %v6174_v40  ;;  %v5918_v60 = vor.u32 %v6799_v20, %v5915_v33  ;;  %v7906_v3 = vpack.c.bf16 %v637_v46, %v629_v63  ;;  %v7912_v20 = vpack.c.bf16 %v640_v42, %v632_v35  ;;  %v646_v42 = vld [vmem:[%s7418_s28 + $0x328] sm:$0xff] }
 0x195   : > { %v2801_v45 = vpop.f32.mrf.mxu3  ;;  %v2625_v48 = vpop.f32.mrf.mxu1 }
 0x196   : > { %v2712_v21 = vpop.f32.mrf.mxu2  ;;  %v2536_v38 = vpop.f32.mrf.mxu0  ;;  %3269 = vmatpush.bf16.msra.mxu1 %v5918_v60  ;;  %9469 = vst [vmem:[#allocation96_spill] sm:$0xff] %v7906_v3 }
 0x197   : > { %v2713_v56 = vadd.f32 %v2712_v21, %v2624_v10  ;;  %v2626_v58 = vadd.f32 %v2625_v48, %v2536_v38  ;;  %v638_v10 = vld [vmem:[%s7418_s28 + $0x2e8] sm:$0xff]  ;;  %v631_v21 = vld [vmem:[%s7418_s28 + $0x2b0] sm:$0xff]  ;;  %9472 = vst [vmem:[#allocation99_spill] sm:$0xff] %v7912_v20 }
 0x198   : > { %v7910_v38 = vpack.c.bf16 %v639_v44, %v631_v21  ;;  %v653_v21 = vld [vmem:[%s7418_s28 + $0x360] sm:$0xff] }
 0x199   : > { %v7896_v30 = vadd.f32 %v2801_v45, %v2713_v56  ;;  %v7908_v45 = vpack.c.bf16 %v638_v10, %v630_v59  ;;  %v645_v10 = vld [vmem:[%s7418_s28 + $0x320] sm:$0xff] }
 0x19a   : > { %9471 = vst [vmem:[#allocation98_spill] sm:$0xff] %v7910_v38 }
 0x19b   : > { %9470 = vst [vmem:[#allocation97_spill] sm:$0xff] %v7908_v45 }
 0x19d   : > { %v2803_v40 = vpop.f32.mrf.mxu3  ;;  %v2628_v33 = vpop.f32.mrf.mxu1 }
 0x19e   : > { %v2714_v32 = vpop.f32.mrf.mxu2  ;;  %v2539_v56 = vpop.f32.mrf.mxu0 }
 0x19f   : > { %v2715_v34 = vadd.f32 %v2714_v32, %v2626_v58  ;;  %v2629_v60 = vadd.f32 %v2628_v33, %v2539_v56  ;;  %v655_v56 = vld [vmem:[%s7418_s28 + $0x370] sm:$0xff]  ;;  %v648_v33 = vld [vmem:[%s7418_s28 + $0x338] sm:$0xff] }
 0x1a0   : > { %2943 = vmatmul.bf16.gmra.mxu1 %v7908_v45  ;;  %v656_v45 = vld [vmem:[%s7418_s28 + $0x378] sm:$0xff] }
 0x1a1   : > { %v7914_v48 = vadd.f32 %v2803_v40, %v2715_v34  ;;  %2854 = vmatmul.bf16.gmra.mxu0 %v7906_v3  ;;  %v654_v34 = vld [vmem:[%s7418_s28 + $0x368] sm:$0xff]  ;;  %v647_v40 = vld [vmem:[%s7418_s28 + $0x330] sm:$0xff]  ;;  %v7930_v3 = vpack.c.bf16 %v653_v21, %v645_v10  ;;  %v6763_v10 = vld [vmem:[#allocation5 + $0x64] sm:$0xf] }
 0x1a2   : > { %3121 = vmatmul.bf16.gmra.mxu3 %v7912_v20  ;;  %v7934_v2 = vpack.c.bf16 %v655_v56, %v647_v40 }
 0x1a3   : > { %9473 = vst [vmem:[#allocation100_spill] sm:$0xff] %v7914_v48  ;;  %3032 = vmatmul.bf16.gmra.mxu2 %v7910_v38 }
 0x1a4   : > { %9475 = vst [vmem:[#allocation102_spill] sm:$0xff] %v7930_v3 }
 0x1a5   : > { %v2806_v44 = vpop.f32.mrf.mxu3  ;;  %v2630_v63 = vpop.f32.mrf.mxu1  ;;  %9477 = vst [vmem:[#allocation104_spill] sm:$0xff] %v7934_v2 }
 0x1a6   : > { %v2717_v32 = vpop.f32.mrf.mxu2  ;;  %v2541_v58 = vpop.f32.mrf.mxu0 }
 0x1a7   : > { %v2718_v35 = vadd.f32 %v2717_v32, %v2629_v60  ;;  %v2631_v59 = vadd.f32 %v2630_v63, %v2541_v58  ;;  %v7932_v32 = vpack.c.bf16 %v654_v34, %v646_v42  ;;  %v5771_v42 = vld [vmem:[#allocation5 + $0x70] sm:$0xf0]  ;;  %v6859_v34 = vld [vmem:[#allocation5 + $0x364] sm:$0xf] }
 0x1a9   : > { %v7920_v46 = vadd.f32 %v2806_v44, %v2718_v35  ;;  %9476 = vst [vmem:[#allocation103_spill] sm:$0xff] %v7932_v32  ;;  %v7936_v44 = vpack.c.bf16 %v656_v45, %v648_v33  ;;  %v6155_v45 = vld [vmem:[#allocation5 + $0x370] sm:$0xf0] }
 0x1aa   : > { %v6158_v40 = vor.u32 %v6859_v34, %v6155_v45  ;;  %v661_v34 = vld [vmem:[%s7418_s28 + $0x3a0] sm:$0xff]  ;;  %v670_v45 = vld [vmem:[%s7418_s28 + $0x3e8] sm:$0xff] }
 0x1ab   : > { %9474 = vst [vmem:[#allocation101_spill] sm:$0xff] %v7920_v46 }
 0x1ac   : > { %9478 = vst [vmem:[#allocation105_spill] sm:$0xff] %v7936_v44  ;;  %3448 = vmatpush.bf16.msra.mxu3 %v6158_v40  ;;  %v664_v40 = vld [vmem:[%s7418_s28 + $0x3b8] sm:$0xff] }
 0x1ad   : > { %v2808_v48 = vpop.f32.mrf.mxu3  ;;  %v2633_v35 = vpop.f32.mrf.mxu1 }
 0x1ae   : > { %v2719_v38 = vpop.f32.mrf.mxu2  ;;  %v2544_v60 = vpop.f32.mrf.mxu0 }
 0x1af   : > { %v2720_v20 = vadd.f32 %v2719_v38, %v2631_v59  ;;  %v2634_v63 = vadd.f32 %v2633_v35, %v2544_v60  ;;  %v6827_v38 = vld [vmem:[#allocation5 + $0x264] sm:$0xf]  ;;  %v6027_v59 = vld [vmem:[#allocation5 + $0x270] sm:$0xf0]  ;;  %v279_v35 = vld [vmem:[#allocation7] sm:$0xf] }
 0x1b0   : > { %2948 = vmatmul.bf16.gmra.mxu1 %v7932_v32  ;;  %v6030_v21 = vor.u32 %v6827_v38, %v6027_v59  ;;  %v7945_v59 = vperm.slane %v279_v35, 0 }
 0x1b1   : > { %v7938_v58 = vadd.f32 %v2808_v48, %v2720_v20  ;;  %2859 = vmatmul.bf16.gmra.mxu0 %v7930_v3  ;;  %v5774_v48 = vor.u32 %v6763_v10, %v5771_v42 }
 0x1b2   : > { %3126 = vmatmul.bf16.gmra.mxu3 %v7936_v44  ;;  %3359 = vmatpush.bf16.msra.mxu2 %v6030_v21  ;;  %393 = vst [vmem:[%s7950_s20 + $0x340] sm:$0xff] %v7945_v59  ;;  %v662_v21 = vld [vmem:[%s7418_s28 + $0x3a8] sm:$0xff] }
 0x1b3   : > { %9479 = vst [vmem:[#allocation106_spill] sm:$0xff] %v7938_v58  ;;  %3037 = vmatmul.bf16.gmra.mxu2 %v7934_v2  ;;  %3181 = vmatpush.bf16.msra.mxu0 %v5774_v48  ;;  %v671_v48 = vld [vmem:[%s7418_s28 + $0x3f0] sm:$0xff] }
 0x1b4   : > { %397 = vst [vmem:[%s7950_s20 + $0x360] sm:$0xff] %v7945_v59 }
 0x1b5   : > { %v2811_v33 = vpop.f32.mrf.mxu3  ;;  %v2635_v38 = vpop.f32.mrf.mxu1  ;;  %401 = vst [vmem:[%s7950_s20 + $0x380] sm:$0xff] %v7945_v59 }
 0x1b6   : > { %v2722_v20 = vpop.f32.mrf.mxu2  ;;  %v2546_v60 = vpop.f32.mrf.mxu0  ;;  %405 = vst [vmem:[%s7950_s20 + $0x3a0] sm:$0xff] %v7945_v59 }
 0x1b7   : > { %v2723_v56 = vadd.f32 %v2722_v20, %v2634_v63  ;;  %v2636_v42 = vadd.f32 %v2635_v38, %v2546_v60  ;;  %v669_v63 = vld [vmem:[%s7418_s28 + $0x3e0] sm:$0xff]  ;;  %v663_v20 = vld [vmem:[%s7418_s28 + $0x3b0] sm:$0xff]  ;;  %409 = vst [vmem:[%s7950_s20 + $0x3c0] sm:$0xff] %v7945_v59 }
 0x1b8   : > { %v5899_v60 = vld [vmem:[#allocation5 + $0x170] sm:$0xf0]  ;;  %v7967_v38 = vpack.c.bf16 %v669_v63, %v661_v34  ;;  %v7973_v58 = vpack.c.bf16 %v671_v48, %v663_v20  ;;  %413 = vst [vmem:[%s7950_s20 + $0x3e0] sm:$0xff] %v7945_v59  ;;  %v685_v20 = vld [vmem:[%s7418_s28 + $0x460] sm:$0xff]  ;;  %v678_v48 = vld [vmem:[%s7418_s28 + $0x428] sm:$0xff] }
 0x1b9   : > { %v7947_v10 = vadd.f32 %v2811_v33, %v2723_v56  ;;  %v672_v56 = vld [vmem:[%s7418_s28 + $0x3f8] sm:$0xff]  ;;  %v6795_v33 = vld [vmem:[#allocation5 + $0x164] sm:$0xf] }
 0x1ba   : > { %9481 = vst [vmem:[#allocation108_spill] sm:$0xff] %v7967_v38  ;;  %v5902_v44 = vor.u32 %v6795_v33, %v5899_v60  ;;  %v7977_v1 = vpack.c.bf16 %v672_v56, %v664_v40  ;;  %v686_v40 = vld [vmem:[%s7418_s28 + $0x468] sm:$0xff]  ;;  %v679_v56 = vld [vmem:[%s7418_s28 + $0x430] sm:$0xff]  ;;  %v680_v60 = vld [vmem:[%s7418_s28 + $0x438] sm:$0xff] }
 0x1bb   : > { %9480 = vst [vmem:[#allocation107_spill] sm:$0xff] %v7947_v10  ;;  %v7971_v10 = vpack.c.bf16 %v670_v45, %v662_v21  ;;  %v687_v33 = vld [vmem:[%s7418_s28 + $0x470] sm:$0xff] }
 0x1bc   : > { %9483 = vst [vmem:[#allocation110_spill] sm:$0xff] %v7973_v58  ;;  %3270 = vmatpush.bf16.msra.mxu1 %v5902_v44 }
 0x1bd   : > { %v2813_v32 = vpop.f32.mrf.mxu3  ;;  %9482 = vst [vmem:[#allocation109_spill] sm:$0xff] %v7971_v10  ;;  %v2638_v46 = vpop.f32.mrf.mxu1 }
 0x1be   : > { %v2724_v35 = vpop.f32.mrf.mxu2  ;;  %v2549_v3 = vpop.f32.mrf.mxu0  ;;  %9484 = vst [vmem:[#allocation111_spill] sm:$0xff] %v7977_v1 }
 0x1bf   : > { %v2725_v2 = vadd.f32 %v2724_v35, %v2636_v42  ;;  %v2639_v63 = vadd.f32 %v2638_v46, %v2549_v3  ;;  %v677_v46 = vld [vmem:[%s7418_s28 + $0x420] sm:$0xff]  ;;  %v688_v35 = vld [vmem:[%s7418_s28 + $0x478] sm:$0xff] }
 0x1c0   : > { %2953 = vmatmul.bf16.gmra.mxu1 %v7971_v10  ;;  %v7995_v10 = vpack.c.bf16 %v685_v20, %v677_v46  ;;  %v6011_v46 = vld [vmem:[#allocation5 + $0x250] sm:$0xf0]  ;;  %v6759_v20 = vld [vmem:[#allocation5 + $0x44] sm:$0xf] }
 0x1c1   : > { %v7979_v34 = vadd.f32 %v2813_v32, %v2725_v2  ;;  %2864 = vmatmul.bf16.gmra.mxu0 %v7967_v38 }
 0x1c2   : > { %3131 = vmatmul.bf16.gmra.mxu3 %v7977_v1  ;;  %9487 = vst [vmem:[#allocation114_spill] sm:$0xff] %v7995_v10 }
 0x1c3   : > { %9485 = vst [vmem:[#allocation112_spill] sm:$0xff] %v7979_v34  ;;  %3042 = vmatmul.bf16.gmra.mxu2 %v7973_v58  ;;  %v7999_v34 = vpack.c.bf16 %v687_v33, %v679_v56  ;;  %v5755_v56 = vld [vmem:[#allocation5 + $0x50] sm:$0xf0] }
 0x1c5   : > { %v2816_v44 = vpop.f32.mrf.mxu3  ;;  %v2640_v2 = vpop.f32.mrf.mxu1  ;;  %9489 = vst [vmem:[#allocation116_spill] sm:$0xff] %v7999_v34 }
 0x1c6   : > { %v2727_v42 = vpop.f32.mrf.mxu2  ;;  %v2551_v45 = vpop.f32.mrf.mxu0 }
 0x1c7   : > { %v2728_v21 = vadd.f32 %v2727_v42, %v2639_v63  ;;  %v2641_v3 = vadd.f32 %v2640_v2, %v2551_v45  ;;  %v7997_v42 = vpack.c.bf16 %v686_v40, %v678_v48 }
 0x1c9   : > { %v7985_v32 = vadd.f32 %v2816_v44, %v2728_v21  ;;  %9488 = vst [vmem:[#allocation115_spill] sm:$0xff] %v7997_v42  ;;  %v8001_v44 = vpack.c.bf16 %v688_v35, %v680_v60  ;;  %v5758_v35 = vor.u32 %v6759_v20, %v5755_v56  ;;  %v704_v56 = vld [vmem:[%s7418_s28 + $0x4f8] sm:$0xff] }
 0x1cb   : > { %9486 = vst [vmem:[#allocation113_spill] sm:$0xff] %v7985_v32  ;;  %3182 = vmatpush.bf16.msra.mxu0 %v5758_v35 }
 0x1cc   : > { %9490 = vst [vmem:[#allocation117_spill] sm:$0xff] %v8001_v44 }
 0x1cd   : > { %v2818_v38 = vpop.f32.mrf.mxu3  ;;  %v2919_v21 = vpop.f32.mrf.mxu1 }
 0x1ce   : > { %v2729_v58 = vpop.f32.mrf.mxu2  ;;  %v2830_v63 = vpop.f32.mrf.mxu0 }
 0x1cf   : > { %v2730_v1 = vadd.f32 %v2729_v58, %v2641_v3  ;;  %v2831_v2 = vadd.f32 %v2830_v63, %v7608_v17  ;;  %v6823_v3 = vld [vmem:[#allocation5 + $0x244] sm:$0xf]  ;;  %v6139_v17 = vld [vmem:[#allocation5 + $0x350] sm:$0xf0] }
 0x1d0   : > { %2958 = vmatmul.bf16.gmra.mxu1 %v7997_v42  ;;  %v6014_v40 = vor.u32 %v6823_v3, %v6011_v46  ;;  %v693_v46 = vld [vmem:[%s7418_s28 + $0x4a0] sm:$0xff]  ;;  %v695_v42 = vld [vmem:[%s7418_s28 + $0x4b0] sm:$0xff] }
 0x1d1   : > { %v8003_v45 = vadd.f32 %v2818_v38, %v2730_v1  ;;  %2869 = vmatmul.bf16.gmra.mxu0 %v7995_v10  ;;  %v2920_v58 = vadd.f32 %v2919_v21, %v2831_v2  ;;  %v6855_v1 = vld [vmem:[#allocation5 + $0x344] sm:$0xf]  ;;  %v703_v10 = vld [vmem:[%s7418_s28 + $0x4f0] sm:$0xff] }
 0x1d2   : > { %3136 = vmatmul.bf16.gmra.mxu3 %v8001_v44  ;;  %v6142_v63 = vor.u32 %v6855_v1, %v6139_v17  ;;  %3360 = vmatpush.bf16.msra.mxu2 %v6014_v40  ;;  %v6791_v1 = vld [vmem:[#allocation5 + $0x144] sm:$0xf]  ;;  %v5883_v17 = vld [vmem:[#allocation5 + $0x150] sm:$0xf0] }
 0x1d3   : > { %9491 = vst [vmem:[#allocation118_spill] sm:$0xff] %v8003_v45  ;;  %3047 = vmatmul.bf16.gmra.mxu2 %v7999_v34  ;;  %v702_v34 = vld [vmem:[%s7418_s28 + $0x4e8] sm:$0xff]  ;;  %v696_v45 = vld [vmem:[%s7418_s28 + $0x4b8] sm:$0xff] }
 0x1d4   : > { %3449 = vmatpush.bf16.msra.mxu3 %v6142_v63  ;;  %v8027_v0 = vpack.c.bf16 %v704_v56, %v696_v45  ;;  %v709_v56 = vld [vmem:[%s7418_s28 + $0x520] sm:$0xff] }
 0x1d5   : > { %v3097_v33 = vpop.f32.mrf.mxu3  ;;  %v2921_v21 = vpop.f32.mrf.mxu1 }
 0x1d6   : > { %v3008_v48 = vpop.f32.mrf.mxu2  ;;  %v2832_v60 = vpop.f32.mrf.mxu0 }
 0x1d7   : > { %v3009_v38 = vadd.f32 %v3008_v48, %v2920_v58  ;;  %v2833_v3 = vadd.f32 %v2832_v60, %v7626_v7  ;;  %v701_v58 = vld [vmem:[%s7418_s28 + $0x4e0] sm:$0xff]  ;;  %v694_v48 = vld [vmem:[%s7418_s28 + $0x4a8] sm:$0xff]  ;;  %v5886_v7 = vor.u32 %v6791_v1, %v5883_v17 }
 0x1d8   : > { %v8023_v63 = vpack.c.bf16 %v702_v34, %v694_v48  ;;  %v717_v1 = vld [vmem:[%s7418_s28 + $0x560] sm:$0xff]  ;;  %v710_v17 = vld [vmem:[%s7418_s28 + $0x528] sm:$0xff] }
 0x1d9   : > { %v3098_v2 = vadd.f32 %v3097_v33, %v3009_v38  ;;  %v2922_v20 = vadd.f32 %v2921_v21, %v2833_v3  ;;  %v8021_v38 = vpack.c.bf16 %v701_v58, %v693_v46  ;;  %3271 = vmatpush.bf16.msra.mxu1 %v5886_v7  ;;  %v711_v7 = vld [vmem:[%s7418_s28 + $0x530] sm:$0xff] }
 0x1db   : > { %v5313_v44 = vadd.f32 %v3098_v2, %v7945_v59  ;;  %v8025_v2 = vpack.c.bf16 %v703_v10, %v695_v42 }
 0x1dd   : > { %5441 = vst [vmem:[%s7950_s20] sm:$0xff] %v5313_v44  ;;  %v3099_v60 = vpop.f32.mrf.mxu3  ;;  %v2924_v32 = vpop.f32.mrf.mxu1 }
 0x1de   : > { %v3010_v40 = vpop.f32.mrf.mxu2  ;;  %v2835_v35 = vpop.f32.mrf.mxu0 }
 0x1df   : > { %v3011_v33 = vadd.f32 %v3010_v40, %v2922_v20  ;;  %v2836_v21 = vadd.f32 %v2835_v35, %v7632_v19  ;;  %v718_v40 = vld [vmem:[%s7418_s28 + $0x568] sm:$0xff]  ;;  %v720_v35 = vld [vmem:[%s7418_s28 + $0x578] sm:$0xff] }
 0x1e0   : > { %2963 = vmatmul.bf16.gmra.mxu1 %v8023_v63 }
 0x1e1   : > { %v3100_v44 = vadd.f32 %v3099_v60, %v3011_v33  ;;  %2874 = vmatmul.bf16.gmra.mxu0 %v8021_v38  ;;  %v2925_v10 = vadd.f32 %v2924_v32, %v2836_v21  ;;  %v719_v33 = vld [vmem:[%s7418_s28 + $0x570] sm:$0xff]  ;;  %v712_v60 = vld [vmem:[%s7418_s28 + $0x538] sm:$0xff]  ;;  %v8047_v21 = vpack.c.bf16 %v717_v1, %v709_v56  ;;  %v6819_v56 = vld [vmem:[#allocation5 + $0x224] sm:$0xf] }
 0x1e2   : > { %3141 = vmatmul.bf16.gmra.mxu3 %v8027_v0  ;;  %v5995_v1 = vld [vmem:[#allocation5 + $0x230] sm:$0xf0] }
 0x1e3   : > { %v5317_v3 = vadd.f32 %v3100_v44, %v7945_v59  ;;  %3052 = vmatmul.bf16.gmra.mxu2 %v8025_v2  ;;  %9492 = vst [vmem:[#allocation119_spill] sm:$0xff] %v8047_v21 }
 0x1e5   : > { %5445 = vst [vmem:[%s7950_s20 + $0x20] sm:$0xff] %v5317_v3  ;;  %v3102_v42 = vpop.f32.mrf.mxu3  ;;  %v2926_v46 = vpop.f32.mrf.mxu1 }
 0x1e6   : > { %v3013_v19 = vpop.f32.mrf.mxu2  ;;  %v2837_v45 = vpop.f32.mrf.mxu0 }
 0x1e7   : > { %v3014_v34 = vadd.f32 %v3013_v19, %v2925_v10  ;;  %v2838_v48 = vadd.f32 %v2837_v45, %v7650_v11  ;;  %v8049_v11 = vpack.c.bf16 %v718_v40, %v710_v17  ;;  %v8053_v45 = vpack.c.bf16 %v720_v35, %v712_v60 }
 0x1e8   : > { %v5998_v40 = vor.u32 %v6819_v56, %v5995_v1  ;;  %v726_v56 = vld [vmem:[%s7418_s28 + $0x5a8] sm:$0xff] }
 0x1e9   : > { %v3103_v58 = vadd.f32 %v3102_v42, %v3014_v34  ;;  %v2927_v32 = vadd.f32 %v2926_v46, %v2838_v48  ;;  %9493 = vst [vmem:[#allocation120_spill] sm:$0xff] %v8049_v11  ;;  %v8051_v34 = vpack.c.bf16 %v719_v33, %v711_v7  ;;  %v6755_v7 = vld [vmem:[#allocation5 + $0x24] sm:$0xf]  ;;  %v5739_v33 = vld [vmem:[#allocation5 + $0x30] sm:$0xf0]  ;;  %v734_v1 = vld [vmem:[%s7418_s28 + $0x5e8] sm:$0xff] }
 0x1ea   : > { %9495 = vst [vmem:[#allocation122_spill] sm:$0xff] %v8053_v45  ;;  %3361 = vmatpush.bf16.msra.mxu2 %v5998_v40  ;;  %v6787_v40 = vld [vmem:[#allocation5 + $0x124] sm:$0xf] }
 0x1eb   : > { %v5321_v20 = vadd.f32 %v3103_v58, %v7945_v59  ;;  %9494 = vst [vmem:[#allocation121_spill] sm:$0xff] %v8051_v34 }
 0x1ed   : > { %5449 = vst [vmem:[%s7950_s20 + $0x40] sm:$0xff] %v5321_v20  ;;  %v3104_v10 = vpop.f32.mrf.mxu3  ;;  %v2929_v42 = vpop.f32.mrf.mxu1 }
 0x1ee   : > { %v3015_v44 = vpop.f32.mrf.mxu2  ;;  %v2840_v19 = vpop.f32.mrf.mxu0 }
 0x1ef   : > { %v3016_v3 = vadd.f32 %v3015_v44, %v2927_v32  ;;  %v2841_v20 = vadd.f32 %v2840_v19, %v7656_v9  ;;  %v6851_v9 = vld [vmem:[#allocation5 + $0x324] sm:$0xf]  ;;  %v5742_v44 = vor.u32 %v6755_v7, %v5739_v33  ;;  %v735_v7 = vld [vmem:[%s7418_s28 + $0x5f0] sm:$0xff]  ;;  %v728_v33 = vld [vmem:[%s7418_s28 + $0x5b8] sm:$0xff] }
 0x1f0   : > { %2968 = vmatmul.bf16.gmra.mxu1 %v8049_v11  ;;  %v5867_v11 = vld [vmem:[#allocation5 + $0x130] sm:$0xf0] }
 0x1f1   : > { %v3105_v58 = vadd.f32 %v3104_v10, %v3016_v3  ;;  %2879 = vmatmul.bf16.gmra.mxu0 %v8047_v21  ;;  %v2930_v48 = vadd.f32 %v2929_v42, %v2841_v20  ;;  %v6123_v3 = vld [vmem:[#allocation5 + $0x330] sm:$0xf0]  ;;  %v725_v20 = vld [vmem:[%s7418_s28 + $0x5a0] sm:$0xff] }
 0x1f2   : > { %3146 = vmatmul.bf16.gmra.mxu3 %v8053_v45  ;;  %v6126_v19 = vor.u32 %v6851_v9, %v6123_v3  ;;  %3183 = vmatpush.bf16.msra.mxu0 %v5742_v44  ;;  %v8075_v3 = vpack.c.bf16 %v734_v1, %v726_v56 }
 0x1f3   : > { %v5325_v46 = vadd.f32 %v3105_v58, %v7945_v59  ;;  %3057 = vmatmul.bf16.gmra.mxu2 %v8051_v34  ;;  %v736_v34 = vld [vmem:[%s7418_s28 + $0x5f8] sm:$0xff] }
 0x1f4   : > { %3450 = vmatpush.bf16.msra.mxu3 %v6126_v19  ;;  %v8079_v21 = vpack.c.bf16 %v736_v34, %v728_v33  ;;  %v749_v33 = vld [vmem:[%s7418_s28 + $0x660] sm:$0xff] }
 0x1f5   : > { %5453 = vst [vmem:[%s7950_s20 + $0x60] sm:$0xff] %v5325_v46  ;;  %v3107_v60 = vpop.f32.mrf.mxu3  ;;  %v2931_v10 = vpop.f32.mrf.mxu1 }
 0x1f6   : > { %v3018_v17 = vpop.f32.mrf.mxu2  ;;  %v2842_v35 = vpop.f32.mrf.mxu0 }
 0x1f7   : > { %v3019_v32 = vadd.f32 %v3018_v17, %v2930_v48  ;;  %v2843_v58 = vadd.f32 %v2842_v35, %v7674_v28  ;;  %v733_v48 = vld [vmem:[%s7418_s28 + $0x5e0] sm:$0xff]  ;;  %v727_v17 = vld [vmem:[%s7418_s28 + $0x5b0] sm:$0xff]  ;;  %v5870_v28 = vor.u32 %v6787_v40, %v5867_v11  ;;  %v742_v40 = vld [vmem:[%s7418_s28 + $0x628] sm:$0xff] }
 0x1f8   : > { %v8077_v19 = vpack.c.bf16 %v735_v7, %v727_v17  ;;  %v741_v7 = vld [vmem:[%s7418_s28 + $0x620] sm:$0xff] }
 0x1f9   : > { %v3108_v42 = vadd.f32 %v3107_v60, %v3019_v32  ;;  %v2932_v45 = vadd.f32 %v2931_v10, %v2843_v58  ;;  %v8073_v32 = vpack.c.bf16 %v733_v48, %v725_v20  ;;  %3272 = vmatpush.bf16.msra.mxu1 %v5870_v28  ;;  %v743_v28 = vld [vmem:[%s7418_s28 + $0x630] sm:$0xff] }
 0x1fb   : > { %v5329_v46 = vadd.f32 %v3108_v42, %v7945_v59 }
 0x1fd   : > { %5457 = vst [vmem:[%s7950_s20 + $0x80] sm:$0xff] %v5329_v46  ;;  %v3109_v35 = vpop.f32.mrf.mxu3  ;;  %v2934_v42 = vpop.f32.mrf.mxu1 }
 0x1fe   : > { %v3020_v9 = vpop.f32.mrf.mxu2  ;;  %v2845_v44 = vpop.f32.mrf.mxu0 }
 0x1ff   : > { %v3021_v60 = vadd.f32 %v3020_v9, %v2932_v45  ;;  %v2846_v58 = vadd.f32 %v2845_v44, %v7680_v36  ;;  %v750_v9 = vld [vmem:[%s7418_s28 + $0x668] sm:$0xff]  ;;  %v744_v44 = vld [vmem:[%s7418_s28 + $0x638] sm:$0xff] }
 0x200   : > { %2973 = vmatmul.bf16.gmra.mxu1 %v8075_v3 }
 0x201   : > { %v3110_v10 = vadd.f32 %v3109_v35, %v3021_v60  ;;  %2884 = vmatmul.bf16.gmra.mxu0 %v8073_v32  ;;  %v2935_v34 = vadd.f32 %v2934_v42, %v2846_v58  ;;  %v751_v60 = vld [vmem:[%s7418_s28 + $0x670] sm:$0xff]  ;;  %v752_v42 = vld [vmem:[%s7418_s28 + $0x678] sm:$0xff]  ;;  %v8099_v58 = vpack.c.bf16 %v749_v33, %v741_v7  ;;  %v6815_v7 = vld [vmem:[#allocation5 + $0x204] sm:$0xf] }
 0x202   : > { %3151 = vmatmul.bf16.gmra.mxu3 %v8079_v21  ;;  %v5979_v33 = vld [vmem:[#allocation5 + $0x210] sm:$0xf0] }
 0x203   : > { %v5333_v11 = vadd.f32 %v3110_v10, %v7945_v59  ;;  %3062 = vmatmul.bf16.gmra.mxu2 %v8077_v19  ;;  %9496 = vst [vmem:[#allocation123_spill] sm:$0xff] %v8099_v58 }
 0x205   : > { %5461 = vst [vmem:[%s7950_s20 + $0xa0] sm:$0xff] %v5333_v11  ;;  %v3112_v20 = vpop.f32.mrf.mxu3  ;;  %v2936_v48 = vpop.f32.mrf.mxu1 }
 0x206   : > { %v3023_v36 = vpop.f32.mrf.mxu2  ;;  %v2847_v46 = vpop.f32.mrf.mxu0 }
 0x207   : > { %v3024_v45 = vadd.f32 %v3023_v36, %v2935_v34  ;;  %v2848_v1 = vadd.f32 %v2847_v46, %v7698_v18  ;;  %v8101_v18 = vpack.c.bf16 %v750_v9, %v742_v40  ;;  %v8105_v46 = vpack.c.bf16 %v752_v42, %v744_v44 }
 0x208   : > { %v5982_v9 = vor.u32 %v6815_v7, %v5979_v33  ;;  %v758_v7 = vld [vmem:[%s7418_s28 + $0x6a8] sm:$0xff] }
 0x209   : > { %v3113_v56 = vadd.f32 %v3112_v20, %v3024_v45  ;;  %v2937_v35 = vadd.f32 %v2936_v48, %v2848_v1  ;;  %9497 = vst [vmem:[#allocation124_spill] sm:$0xff] %v8101_v18  ;;  %v8103_v45 = vpack.c.bf16 %v751_v60, %v743_v28  ;;  %v6751_v28 = vld [vmem:[#allocation5 + $0x4] sm:$0xf]  ;;  %v5723_v60 = vld [vmem:[#allocation5 + $0x10] sm:$0xf0]  ;;  %v766_v33 = vld [vmem:[%s7418_s28 + $0x6e8] sm:$0xff] }
 0x20a   : > { %9499 = vst [vmem:[#allocation126_spill] sm:$0xff] %v8105_v46  ;;  %3362 = vmatpush.bf16.msra.mxu2 %v5982_v9  ;;  %v6783_v9 = vld [vmem:[#allocation5 + $0x104] sm:$0xf] }
 0x20b   : > { %v5337_v17 = vadd.f32 %v3113_v56, %v7945_v59  ;;  %9498 = vst [vmem:[#allocation125_spill] sm:$0xff] %v8103_v45 }
 0x20d   : > { %5465 = vst [vmem:[%s7950_s20 + $0xc0] sm:$0xff] %v5337_v17  ;;  %v3114_v34 = vpop.f32.mrf.mxu3  ;;  %v2939_v20 = vpop.f32.mrf.mxu1 }
 0x20e   : > { %v3025_v10 = vpop.f32.mrf.mxu2  ;;  %v2850_v36 = vpop.f32.mrf.mxu0 }
 0x20f   : > { %v3026_v11 = vadd.f32 %v3025_v10, %v2937_v35  ;;  %v2851_v17 = vadd.f32 %v2850_v36, %v7704_v61  ;;  %v6847_v61 = vld [vmem:[#allocation5 + $0x304] sm:$0xf]  ;;  %v5726_v10 = vor.u32 %v6751_v28, %v5723_v60  ;;  %v767_v28 = vld [vmem:[%s7418_s28 + $0x6f0] sm:$0xff]  ;;  %v760_v60 = vld [vmem:[%s7418_s28 + $0x6b8] sm:$0xff] }
 0x210   : > { %2978 = vmatmul.bf16.gmra.mxu1 %v8101_v18  ;;  %v5851_v18 = vld [vmem:[#allocation5 + $0x110] sm:$0xf0] }
 0x211   : > { %v3115_v56 = vadd.f32 %v3114_v34, %v3026_v11  ;;  %2889 = vmatmul.bf16.gmra.mxu0 %v8099_v58  ;;  %v2940_v1 = vadd.f32 %v2939_v20, %v2851_v17  ;;  %v6107_v11 = vld [vmem:[#allocation5 + $0x310] sm:$0xf0]  ;;  %v757_v17 = vld [vmem:[%s7418_s28 + $0x6a0] sm:$0xff] }
 0x212   : > { %3156 = vmatmul.bf16.gmra.mxu3 %v8105_v46  ;;  %v6110_v36 = vor.u32 %v6847_v61, %v6107_v11  ;;  %3184 = vmatpush.bf16.msra.mxu0 %v5726_v10  ;;  %v8127_v11 = vpack.c.bf16 %v766_v33, %v758_v7 }
 0x213   : > { %v5341_v48 = vadd.f32 %v3115_v56, %v7945_v59  ;;  %3067 = vmatmul.bf16.gmra.mxu2 %v8103_v45  ;;  %v768_v45 = vld [vmem:[%s7418_s28 + $0x6f8] sm:$0xff] }
 0x214   : > { %3451 = vmatpush.bf16.msra.mxu3 %v6110_v36  ;;  %v8131_v58 = vpack.c.bf16 %v768_v45, %v760_v60  ;;  %v781_v60 = vld [vmem:[%s7418_s28 + $0x760] sm:$0xff] }
 0x215   : > { %5469 = vst [vmem:[%s7950_s20 + $0xe0] sm:$0xff] %v5341_v48  ;;  %v3117_v44 = vpop.f32.mrf.mxu3  ;;  %v2941_v34 = vpop.f32.mrf.mxu1 }
 0x216   : > { %v3028_v40 = vpop.f32.mrf.mxu2  ;;  %v2852_v42 = vpop.f32.mrf.mxu0 }
 0x217   : > { %v3029_v35 = vadd.f32 %v3028_v40, %v2940_v1  ;;  %v2853_v56 = vadd.f32 %v2852_v42, %v7722_v5  ;;  %v765_v1 = vld [vmem:[%s7418_s28 + $0x6e0] sm:$0xff]  ;;  %v759_v40 = vld [vmem:[%s7418_s28 + $0x6b0] sm:$0xff]  ;;  %v5854_v5 = vor.u32 %v6783_v9, %v5851_v18  ;;  %v774_v9 = vld [vmem:[%s7418_s28 + $0x728] sm:$0xff] }
 0x218   : > { %v8129_v36 = vpack.c.bf16 %v767_v28, %v759_v40  ;;  %v773_v28 = vld [vmem:[%s7418_s28 + $0x720] sm:$0xff] }
 0x219   : > { %v3118_v20 = vadd.f32 %v3117_v44, %v3029_v35  ;;  %v2942_v46 = vadd.f32 %v2941_v34, %v2853_v56  ;;  %v8125_v35 = vpack.c.bf16 %v765_v1, %v757_v17  ;;  %3273 = vmatpush.bf16.msra.mxu1 %v5854_v5  ;;  %v775_v5 = vld [vmem:[%s7418_s28 + $0x730] sm:$0xff] }
 0x21b   : > { %v5345_v48 = vadd.f32 %v3118_v20, %v7945_v59 }
 0x21d   : > { %5473 = vst [vmem:[%s7950_s20 + $0x100] sm:$0xff] %v5345_v48  ;;  %v3119_v42 = vpop.f32.mrf.mxu3  ;;  %v2944_v20 = vpop.f32.mrf.mxu1 }
 0x21e   : > { %v3030_v61 = vpop.f32.mrf.mxu2  ;;  %v2855_v10 = vpop.f32.mrf.mxu0 }
 0x21f   : > { %v3031_v44 = vadd.f32 %v3030_v61, %v2942_v46  ;;  %v2856_v56 = vadd.f32 %v2855_v10, %v7728_v39  ;;  %v782_v61 = vld [vmem:[%s7418_s28 + $0x768] sm:$0xff]  ;;  %v776_v10 = vld [vmem:[%s7418_s28 + $0x738] sm:$0xff] }
 0x220   : > { %2983 = vmatmul.bf16.gmra.mxu1 %v8127_v11 }
 0x221   : > { %v3120_v34 = vadd.f32 %v3119_v42, %v3031_v44  ;;  %2894 = vmatmul.bf16.gmra.mxu0 %v8125_v35  ;;  %v2945_v45 = vadd.f32 %v2944_v20, %v2856_v56  ;;  %v783_v44 = vld [vmem:[%s7418_s28 + $0x770] sm:$0xff]  ;;  %v784_v20 = vld [vmem:[%s7418_s28 + $0x778] sm:$0xff]  ;;  %v8151_v56 = vpack.c.bf16 %v781_v60, %v773_v28  ;;  %v6971_v28 = vld [vmem:[#allocation5 + $0x6e4] sm:$0xf] }
 0x222   : > { %3161 = vmatmul.bf16.gmra.mxu3 %v8131_v58  ;;  %v6603_v60 = vld [vmem:[#allocation5 + $0x6f0] sm:$0xf0] }
 0x223   : > { %v5349_v18 = vadd.f32 %v3120_v34, %v7945_v59  ;;  %3072 = vmatmul.bf16.gmra.mxu2 %v8129_v36  ;;  %9500 = vst [vmem:[#allocation127_spill] sm:$0xff] %v8151_v56 }
 0x225   : > { %5477 = vst [vmem:[%s7950_s20 + $0x120] sm:$0xff] %v5349_v18  ;;  %v3122_v17 = vpop.f32.mrf.mxu3  ;;  %v2946_v1 = vpop.f32.mrf.mxu1 }
 0x226   : > { %v3033_v39 = vpop.f32.mrf.mxu2  ;;  %v2857_v48 = vpop.f32.mrf.mxu0 }
 0x227   : > { %v3034_v46 = vadd.f32 %v3033_v39, %v2945_v45  ;;  %v2858_v33 = vadd.f32 %v2857_v48, %v7746_v37  ;;  %v8153_v37 = vpack.c.bf16 %v782_v61, %v774_v9  ;;  %v8157_v48 = vpack.c.bf16 %v784_v20, %v776_v10 }
 0x228   : > { %v6606_v61 = vor.u32 %v6971_v28, %v6603_v60  ;;  %v790_v28 = vld [vmem:[%s7418_s28 + $0x7a8] sm:$0xff] }
 0x229   : > { %v3123_v7 = vadd.f32 %v3122_v17, %v3034_v46  ;;  %v2947_v42 = vadd.f32 %v2946_v1, %v2858_v33  ;;  %9501 = vst [vmem:[#allocation128_spill] sm:$0xff] %v8153_v37  ;;  %v8155_v46 = vpack.c.bf16 %v783_v44, %v775_v5  ;;  %v6907_v5 = vld [vmem:[#allocation5 + $0x4e4] sm:$0xf]  ;;  %v6347_v44 = vld [vmem:[#allocation5 + $0x4f0] sm:$0xf0]  ;;  %v798_v60 = vld [vmem:[%s7418_s28 + $0x7e8] sm:$0xff] }
 0x22a   : > { %9503 = vst [vmem:[#allocation130_spill] sm:$0xff] %v8157_v48  ;;  %3711 = vmatpush.bf16.msrb.mxu2 %v6606_v61  ;;  %v6939_v61 = vld [vmem:[#allocation5 + $0x5e4] sm:$0xf] }
 0x22b   : > { %v5353_v40 = vadd.f32 %v3123_v7, %v7945_v59  ;;  %9502 = vst [vmem:[#allocation129_spill] sm:$0xff] %v8155_v46 }
 0x22d   : > { %5481 = vst [vmem:[%s7950_s20 + $0x140] sm:$0xff] %v5353_v40  ;;  %v3124_v45 = vpop.f32.mrf.mxu3  ;;  %v2949_v17 = vpop.f32.mrf.mxu1 }
 0x22e   : > { %v3035_v34 = vpop.f32.mrf.mxu2  ;;  %v2860_v39 = vpop.f32.mrf.mxu0 }
 0x22f   : > { %v3036_v18 = vadd.f32 %v3035_v34, %v2947_v42  ;;  %v2861_v40 = vadd.f32 %v2860_v39, %v7752_v29  ;;  %v7003_v29 = vld [vmem:[#allocation5 + $0x7e4] sm:$0xf]  ;;  %v6350_v34 = vor.u32 %v6907_v5, %v6347_v44  ;;  %v799_v5 = vld [vmem:[%s7418_s28 + $0x7f0] sm:$0xff]  ;;  %v792_v44 = vld [vmem:[%s7418_s28 + $0x7b8] sm:$0xff] }
 0x230   : > { %2988 = vmatmul.bf16.gmra.mxu1 %v8153_v37  ;;  %v6475_v37 = vld [vmem:[#allocation5 + $0x5f0] sm:$0xf0] }
 0x231   : > { %v3125_v7 = vadd.f32 %v3124_v45, %v3036_v18  ;;  %2899 = vmatmul.bf16.gmra.mxu0 %v8151_v56  ;;  %v2950_v33 = vadd.f32 %v2949_v17, %v2861_v40  ;;  %v6731_v18 = vld [vmem:[#allocation5 + $0x7f0] sm:$0xf0]  ;;  %v789_v40 = vld [vmem:[%s7418_s28 + $0x7a0] sm:$0xff] }
 0x232   : > { %3166 = vmatmul.bf16.gmra.mxu3 %v8157_v48  ;;  %v6734_v39 = vor.u32 %v7003_v29, %v6731_v18  ;;  %3533 = vmatpush.bf16.msrb.mxu0 %v6350_v34  ;;  %v8179_v18 = vpack.c.bf16 %v798_v60, %v790_v28 }
 0x233   : > { %v5357_v1 = vadd.f32 %v3125_v7, %v7945_v59  ;;  %3077 = vmatmul.bf16.gmra.mxu2 %v8155_v46  ;;  %v800_v46 = vld [vmem:[%s7418_s28 + $0x7f8] sm:$0xff] }
 0x234   : > { %3800 = vmatpush.bf16.msrb.mxu3 %v6734_v39  ;;  %v8183_v56 = vpack.c.bf16 %v800_v46, %v792_v44 }
 0x235   : > { %5485 = vst [vmem:[%s7950_s20 + $0x160] sm:$0xff] %v5357_v1  ;;  %v3127_v10 = vpop.f32.mrf.mxu3  ;;  %v2951_v45 = vpop.f32.mrf.mxu1 }
 0x236   : > { %v3038_v9 = vpop.f32.mrf.mxu2  ;;  %v2862_v20 = vpop.f32.mrf.mxu0  ;;  %9504 = vst [vmem:[#allocation131_spill] sm:$0xff] %v8183_v56 }
 0x237   : > { %v3039_v42 = vadd.f32 %v3038_v9, %v2950_v33  ;;  %v2863_v7 = vadd.f32 %v2862_v20, %v7770_v6  ;;  %v797_v33 = vld [vmem:[%s7418_s28 + $0x7e0] sm:$0xff]  ;;  %v791_v9 = vld [vmem:[%s7418_s28 + $0x7b0] sm:$0xff]  ;;  %v6478_v6 = vor.u32 %v6939_v61, %v6475_v37 }
 0x238   : > { %v8181_v39 = vpack.c.bf16 %v799_v5, %v791_v9 }
 0x239   : > { %v3128_v17 = vadd.f32 %v3127_v10, %v3039_v42  ;;  %v2952_v48 = vadd.f32 %v2951_v45, %v2863_v7  ;;  %v8177_v42 = vpack.c.bf16 %v797_v33, %v789_v40  ;;  %3622 = vmatpush.bf16.msrb.mxu1 %v6478_v6 }
 0x23b   : > { %v5361_v1 = vadd.f32 %v3128_v17, %v7945_v59 }
 0x23d   : > { %5489 = vst [vmem:[%s7950_s20 + $0x180] sm:$0xff] %v5361_v1  ;;  %v3129_v20 = vpop.f32.mrf.mxu3  ;;  %v2954_v17 = vpop.f32.mrf.mxu1 }
 0x23e   : > { %v3040_v29 = vpop.f32.mrf.mxu2  ;;  %v2865_v34 = vpop.f32.mrf.mxu0 }
 0x23f   : > { %v3041_v10 = vadd.f32 %v3040_v29, %v2952_v48  ;;  %v2866_v7 = vadd.f32 %v2865_v34, %v7776_v4 }
 0x240   : > { %2993 = vmatmul.bf16.gmra.mxu1 %v8179_v18 }
 0x241   : > { %v3130_v45 = vadd.f32 %v3129_v20, %v3041_v10  ;;  %2904 = vmatmul.bf16.gmra.mxu0 %v8177_v42  ;;  %v2955_v48 = vadd.f32 %v2954_v17, %v2866_v7  ;;  %v6587_v7 = vld [vmem:[#allocation5 + $0x6d0] sm:$0xf0] }
 0x242   : > { %3171 = vmatmul.bf16.gmra.mxu3 %v8183_v56 }
 0x243   : > { %v5365_v37 = vadd.f32 %v3130_v45, %v7945_v59  ;;  %3082 = vmatmul.bf16.gmra.mxu2 %v8181_v39  ;;  %v6967_v45 = vld [vmem:[#allocation5 + $0x6c4] sm:$0xf] }
 0x245   : > { %5493 = vst [vmem:[%s7950_s20 + $0x1a0] sm:$0xff] %v5365_v37  ;;  %v3132_v1 = vpop.f32.mrf.mxu3  ;;  %v2956_v28 = vpop.f32.mrf.mxu1 }
 0x246   : > { %v3043_v40 = vpop.f32.mrf.mxu2  ;;  %v2867_v33 = vpop.f32.mrf.mxu0 }
 0x247   : > { %v3044_v46 = vadd.f32 %v3043_v40, %v2955_v48  ;;  %v2868_v4 = vadd.f32 %v2867_v33, %v7794_v41  ;;  %v6590_v48 = vor.u32 %v6967_v45, %v6587_v7  ;;  %v6903_v40 = vld [vmem:[#allocation5 + $0x4c4] sm:$0xf] }
 0x249   : > { %v3133_v60 = vadd.f32 %v3132_v1, %v3044_v46  ;;  %v2957_v5 = vadd.f32 %v2956_v28, %v2868_v4  ;;  %v6331_v46 = vld [vmem:[#allocation5 + $0x4d0] sm:$0xf0]  ;;  %3712 = vmatpush.bf16.msrb.mxu2 %v6590_v48 }
 0x24a   : > { %v6715_v4 = vld [vmem:[#allocation5 + $0x7d0] sm:$0xf0] }
 0x24b   : > { %v5369_v9 = vadd.f32 %v3133_v60, %v7945_v59  ;;  %v6334_v60 = vor.u32 %v6903_v40, %v6331_v46 }
 0x24d   : > { %5497 = vst [vmem:[%s7950_s20 + $0x1c0] sm:$0xff] %v5369_v9  ;;  %v3134_v29 = vpop.f32.mrf.mxu3  ;;  %v2959_v10 = vpop.f32.mrf.mxu1  ;;  %3534 = vmatpush.bf16.msrb.mxu0 %v6334_v60 }
 0x24e   : > { %v3045_v44 = vpop.f32.mrf.mxu2  ;;  %v2870_v6 = vpop.f32.mrf.mxu0 }
 0x24f   : > { %v3046_v61 = vadd.f32 %v3045_v44, %v2957_v5  ;;  %v2871_v34 = vadd.f32 %v2870_v6, %v7800_v16  ;;  %v6999_v16 = vld [vmem:[#allocation5 + $0x7c4] sm:$0xf] }
 0x250   : > { %3274 = vmatmul.bf16.vlgmr.msra.gmra.mxu1 %v7438_v51  ;;  %v6718_v5 = vor.u32 %v6999_v16, %v6715_v4 }
 0x251   : > { %v3135_v20 = vadd.f32 %v3134_v29, %v3046_v61  ;;  %3185 = vmatmul.bf16.vlgmr.msra.gmra.mxu0 %v7436_v47  ;;  %v2960_v41 = vadd.f32 %v2959_v10, %v2871_v34  ;;  %v6935_v10 = vld [vmem:[#allocation5 + $0x5c4] sm:$0xf] }
 0x252   : > { %3452 = vmatmul.bf16.vlgmr.msra.gmra.mxu3 %v7442_v53 }
 0x253   : > { %v5373_v17 = vadd.f32 %v3135_v20, %v7945_v59  ;;  %3363 = vmatmul.bf16.vlgmr.msra.gmra.mxu2 %v7440_v52  ;;  %3801 = vmatpush.bf16.msrb.mxu3 %v6718_v5  ;;  %v6459_v20 = vld [vmem:[#allocation5 + $0x5d0] sm:$0xf0] }
 0x255   : > { %5501 = vst [vmem:[%s7950_s20 + $0x1e0] sm:$0xff] %v5373_v17  ;;  %v3137_v33 = vpop.f32.mrf.mxu3  ;;  %v2961_v9 = vpop.f32.mrf.mxu1  ;;  %v6462_v17 = vor.u32 %v6935_v10, %v6459_v20 }
 0x256   : > { %v3048_v37 = vpop.f32.mrf.mxu2  ;;  %v2872_v28 = vpop.f32.mrf.mxu0 }
 0x257   : > { %v3049_v1 = vadd.f32 %v3048_v37, %v2960_v41  ;;  %v2873_v61 = vadd.f32 %v2872_v28, %v7818_v57  ;;  %3623 = vmatpush.bf16.msrb.mxu1 %v6462_v17 }
 0x259   : > { %v3138_v44 = vadd.f32 %v3137_v33, %v3049_v1  ;;  %v2962_v6 = vadd.f32 %v2961_v9, %v2873_v61 }
 0x25b   : > { %v5377_v29 = vadd.f32 %v3138_v44, %v7945_v59 }
 0x25d   : > { %5505 = vst [vmem:[%s7950_s20 + $0x200] sm:$0xff] %v5377_v29  ;;  %v3139_v45 = vpop.f32.mrf.mxu3  ;;  %v2964_v37 = vpop.f32.mrf.mxu1 }
 0x25e   : > { %v3050_v34 = vpop.f32.mrf.mxu2  ;;  %v2875_v7 = vpop.f32.mrf.mxu0 }
 0x25f   : > { %v3051_v41 = vadd.f32 %v3050_v34, %v2962_v6  ;;  %v2876_v40 = vadd.f32 %v2875_v7, %v7824_v43 }
 0x260   : > { %3279 = vmatmul.bf16.gmra.mxu1 %v7458_v13 }
 0x261   : > { %v3140_v48 = vadd.f32 %v3139_v45, %v3051_v41  ;;  %3190 = vmatmul.bf16.gmra.mxu0 %v7456_v12  ;;  %v2965_v46 = vadd.f32 %v2964_v37, %v2876_v40  ;;  %v6963_v41 = vld [vmem:[#allocation5 + $0x6a4] sm:$0xf]  ;;  %v6571_v45 = vld [vmem:[#allocation5 + $0x6b0] sm:$0xf0] }
 0x262   : > { %3457 = vmatmul.bf16.gmra.mxu3 %v7462_v15  ;;  %v6574_v37 = vor.u32 %v6963_v41, %v6571_v45  ;;  %v6315_v40 = vld [vmem:[#allocation5 + $0x4b0] sm:$0xf0] }
 0x263   : > { %v5381_v57 = vadd.f32 %v3140_v48, %v7945_v59  ;;  %3368 = vmatmul.bf16.gmra.mxu2 %v7460_v14  ;;  %v6899_v48 = vld [vmem:[#allocation5 + $0x4a4] sm:$0xf] }
 0x264   : > { %3713 = vmatpush.bf16.msrb.mxu2 %v6574_v37 }
 0x265   : > { %5509 = vst [vmem:[%s7950_s20 + $0x220] sm:$0xff] %v5381_v57  ;;  %v3142_v33 = vpop.f32.mrf.mxu3  ;;  %v2966_v60 = vpop.f32.mrf.mxu1 }
 0x266   : > { %v3053_v16 = vpop.f32.mrf.mxu2  ;;  %v2877_v28 = vpop.f32.mrf.mxu0 }
 0x267   : > { %v3054_v1 = vadd.f32 %v3053_v16, %v2965_v46  ;;  %v2878_v43 = vadd.f32 %v2877_v28, %v7842_v62 }
 0x269   : > { %v3143_v4 = vadd.f32 %v3142_v33, %v3054_v1  ;;  %v2967_v5 = vadd.f32 %v2966_v60, %v2878_v43  ;;  %v6318_v1 = vor.u32 %v6899_v48, %v6315_v40  ;;  %v6699_v33 = vld [vmem:[#allocation5 + $0x7b0] sm:$0xf0] }
 0x26b   : > { %v5385_v9 = vadd.f32 %v3143_v4, %v7945_v59  ;;  %3535 = vmatpush.bf16.msrb.mxu0 %v6318_v1 }
 0x26d   : > { %5513 = vst [vmem:[%s7950_s20 + $0x240] sm:$0xff] %v5385_v9  ;;  %v3144_v29 = vpop.f32.mrf.mxu3  ;;  %v2969_v10 = vpop.f32.mrf.mxu1 }
 0x26e   : > { %v3055_v44 = vpop.f32.mrf.mxu2  ;;  %v2880_v6 = vpop.f32.mrf.mxu0 }
 0x26f   : > { %v3056_v61 = vadd.f32 %v3055_v44, %v2967_v5  ;;  %v2881_v34 = vadd.f32 %v2880_v6, %v7848_v31  ;;  %v6995_v31 = vld [vmem:[#allocation5 + $0x7a4] sm:$0xf] }
 0x270   : > { %3284 = vmatmul.bf16.gmra.mxu1 %v7478_v25  ;;  %v6702_v60 = vor.u32 %v6995_v31, %v6699_v33  ;;  %v6931_v44 = vld [vmem:[#allocation5 + $0x5a4] sm:$0xf]  ;;  %v6806_v25 = vld [vmem:[#allocation5 + $0x1b4] sm:$0xf0] }
 0x271   : > { %v3145_v20 = vadd.f32 %v3144_v29, %v3056_v61  ;;  %3195 = vmatmul.bf16.gmra.mxu0 %v7476_v24  ;;  %v2970_v62 = vadd.f32 %v2969_v10, %v2881_v34  ;;  %v6443_v61 = vld [vmem:[#allocation5 + $0x5b0] sm:$0xf0] }
 0x272   : > { %3462 = vmatmul.bf16.gmra.mxu3 %v7482_v27  ;;  %v6446_v6 = vor.u32 %v6931_v44, %v6443_v61  ;;  %v9506_v61 = vld [vmem:[#allocation29_spill] sm:$0xff] }
 0x273   : > { %v5389_v17 = vadd.f32 %v3145_v20, %v7945_v59  ;;  %3373 = vmatmul.bf16.gmra.mxu2 %v7480_v26  ;;  %3802 = vmatpush.bf16.msrb.mxu3 %v6702_v60 }
 0x274   : > { %3624 = vmatpush.bf16.msrb.mxu1 %v6446_v6 }
 0x275   : > { %5517 = vst [vmem:[%s7950_s20 + $0x260] sm:$0xff] %v5389_v17  ;;  %v3147_v46 = vpop.f32.mrf.mxu3  ;;  %v2971_v28 = vpop.f32.mrf.mxu1 }
 0x276   : > { %v3058_v7 = vpop.f32.mrf.mxu2  ;;  %v2882_v16 = vpop.f32.mrf.mxu0 }
 0x277   : > { %v3059_v57 = vadd.f32 %v3058_v7, %v2970_v62  ;;  %v2883_v43 = vadd.f32 %v2882_v16, %v7866_v23 }
 0x279   : > { %v3148_v4 = vadd.f32 %v3147_v46, %v3059_v57  ;;  %v2972_v5 = vadd.f32 %v2971_v28, %v2883_v43  ;;  %v7098_v46 = vld [vmem:[%s7950_s20 + $0x340] sm:$0xff] }
 0x27b   : > { %v5393_v9 = vadd.f32 %v3148_v4, %v7945_v59 }
 0x27d   : > { %5521 = vst [vmem:[%s7950_s20 + $0x280] sm:$0xff] %v5393_v9  ;;  %v3149_v20 = vpop.f32.mrf.mxu3  ;;  %v2974_v17 = vpop.f32.mrf.mxu1 }
 0x27e   : > { %v3060_v29 = vpop.f32.mrf.mxu2  ;;  %v2885_v34 = vpop.f32.mrf.mxu0 }
 0x27f   : > { %v3061_v10 = vadd.f32 %v3060_v29, %v2972_v5  ;;  %v2886_v23 = vadd.f32 %v2885_v34, %v7872_v22  ;;  %v9505_v5 = vld [vmem:[#allocation28_spill] sm:$0xff]  ;;  %v9507_v29 = vld [vmem:[#allocation30_spill] sm:$0xff] }
 0x280   : > { %3289 = vmatmul.bf16.gmra.mxu1 %v7498_v50  ;;  %v6810_v50 = vld [vmem:[#allocation5 + $0x1d4] sm:$0xf0] }
 0x281   : > { %v3150_v62 = vadd.f32 %v3149_v20, %v3061_v10  ;;  %3200 = vmatmul.bf16.gmra.mxu0 %v7496_v49  ;;  %v2975_v45 = vadd.f32 %v2974_v17, %v2886_v23  ;;  %v6959_v10 = vld [vmem:[#allocation5 + $0x684] sm:$0xf]  ;;  %v6555_v20 = vld [vmem:[#allocation5 + $0x690] sm:$0xf0] }
 0x282   : > { %3467 = vmatmul.bf16.gmra.mxu3 %v7502_v55  ;;  %v6558_v17 = vor.u32 %v6959_v10, %v6555_v20  ;;  %v6299_v23 = vld [vmem:[#allocation5 + $0x490] sm:$0xf0]  ;;  %v9510_v20 = vld [vmem:[#allocation101_spill] sm:$0xff] }
 0x283   : > { %v5397_v41 = vadd.f32 %v3150_v62, %v7945_v59  ;;  %3378 = vmatmul.bf16.gmra.mxu2 %v7500_v54  ;;  %v6895_v62 = vld [vmem:[#allocation5 + $0x484] sm:$0xf] }
 0x284   : > { %3714 = vmatpush.bf16.msrb.mxu2 %v6558_v17  ;;  %v9511_v17 = vld [vmem:[#allocation32_spill] sm:$0xff] }
 0x285   : > { %5525 = vst [vmem:[%s7950_s20 + $0x2a0] sm:$0xff] %v5397_v41  ;;  %v3152_v48 = vpop.f32.mrf.mxu3  ;;  %v2976_v31 = vpop.f32.mrf.mxu1  ;;  %v6991_v41 = vld [vmem:[#allocation5 + $0x784] sm:$0xf] }
 0x286   : > { %v3063_v7 = vpop.f32.mrf.mxu2  ;;  %v2887_v40 = vpop.f32.mrf.mxu0 }
 0x287   : > { %v3064_v37 = vadd.f32 %v3063_v7, %v2975_v45  ;;  %v2888_v22 = vadd.f32 %v2887_v40, %v7890_v8  ;;  %v9508_v8 = vld [vmem:[#allocation31_spill] sm:$0xff] }
 0x289   : > { %v3153_v57 = vadd.f32 %v3152_v48, %v3064_v37  ;;  %v2977_v59 = vadd.f32 %v2976_v31, %v2888_v22  ;;  %v6302_v37 = vor.u32 %v6895_v62, %v6299_v23  ;;  %v6683_v48 = vld [vmem:[#allocation5 + $0x790] sm:$0xf0]  ;;  %v9509_v22 = vld [vmem:[#allocation100_spill] sm:$0xff]  ;;  %v9512_v23 = vld [vmem:[#allocation33_spill] sm:$0xff] }
 0x28a   : > { %v6686_v31 = vor.u32 %v6991_v41, %v6683_v48  ;;  %v9513_v41 = vld [vmem:[#allocation34_spill] sm:$0xff] }
 0x28b   : > { %v5401_v16 = vadd.f32 %v7098_v46, %v3153_v57  ;;  %3536 = vmatpush.bf16.msrb.mxu0 %v6302_v37 }
 0x28c   : > { %3803 = vmatpush.bf16.msrb.mxu3 %v6686_v31  ;;  %v521_v31 = vld [vmem:[%s7950_s20 + $0x340] sm:$0xff] }
 0x28d   : > { %5529 = vst [vmem:[%s7950_s20 + $0x2c0] sm:$0xff] %v5401_v16  ;;  %v3154_v28 = vpop.f32.mrf.mxu3  ;;  %v2979_v4 = vpop.f32.mrf.mxu1 }
 0x28e   : > { %v3065_v1 = vpop.f32.mrf.mxu2  ;;  %v2890_v60 = vpop.f32.mrf.mxu0 }
 0x28f   : > { %v3066_v33 = vadd.f32 %v3065_v1, %v2977_v59  ;;  %v2891_v9 = vadd.f32 %v2890_v60, %v7896_v30 }
 0x290   : > { %3294 = vmatmul.bf16.gmra.mxu1 %v9506_v61  ;;  %v6814_v61 = vld [vmem:[#allocation5 + $0x1f4] sm:$0xf0] }
 0x291   : > { %v3155_v43 = vadd.f32 %v3154_v28, %v3066_v33  ;;  %3205 = vmatmul.bf16.gmra.mxu0 %v9505_v5  ;;  %v2980_v6 = vadd.f32 %v2979_v4, %v2891_v9  ;;  %v6927_v33 = vld [vmem:[#allocation5 + $0x584] sm:$0xf]  ;;  %v6427_v28 = vld [vmem:[#allocation5 + $0x590] sm:$0xf0] }
 0x292   : > { %3472 = vmatmul.bf16.gmra.mxu3 %v9508_v8  ;;  %v6430_v4 = vor.u32 %v6927_v33, %v6427_v28 }
 0x293   : > { %v5405_v44 = vadd.f32 %v7098_v46, %v3155_v43  ;;  %3383 = vmatmul.bf16.gmra.mxu2 %v9507_v29 }
 0x294   : > { %3625 = vmatpush.bf16.msrb.mxu1 %v6430_v4 }
 0x295   : > { %5533 = vst [vmem:[%s7950_s20 + $0x2e0] sm:$0xff] %v5405_v44  ;;  %v3157_v45 = vpop.f32.mrf.mxu3  ;;  %v2981_v40 = vpop.f32.mrf.mxu1 }
 0x296   : > { %v3068_v34 = vpop.f32.mrf.mxu2  ;;  %v2892_v7 = vpop.f32.mrf.mxu0 }
 0x297   : > { %v3069_v30 = vadd.f32 %v3068_v34, %v2980_v6  ;;  %v2893_v16 = vadd.f32 %v2892_v7, %v9509_v22 }
 0x299   : > { %v3158_v57 = vadd.f32 %v3157_v45, %v3069_v30  ;;  %v2982_v1 = vadd.f32 %v2981_v40, %v2893_v16  ;;  %v9514_v30 = vld [vmem:[#allocation35_spill] sm:$0xff]  ;;  %v9515_v16 = vld [vmem:[#allocation106_spill] sm:$0xff] }
 0x29b   : > { %v5409_v59 = vadd.f32 %v7098_v46, %v3158_v57 }
 0x29d   : > { %5537 = vst [vmem:[%s7950_s20 + $0x300] sm:$0xff] %v5409_v59  ;;  %v3159_v9 = vpop.f32.mrf.mxu3  ;;  %v2984_v6 = vpop.f32.mrf.mxu1 }
 0x29e   : > { %v3070_v60 = vpop.f32.mrf.mxu2  ;;  %v2895_v44 = vpop.f32.mrf.mxu0 }
 0x29f   : > { %v3071_v43 = vadd.f32 %v3070_v60, %v2982_v1  ;;  %v2896_v34 = vadd.f32 %v2895_v44, %v9510_v20  ;;  %v9517_v20 = vld [vmem:[#allocation36_spill] sm:$0xff] }
 0x2a0   : > { %3299 = vmatmul.bf16.gmra.mxu1 %v9512_v23  ;;  %v6363_v23 = vld [vmem:[#allocation5 + $0x510] sm:$0xf0] }
 0x2a1   : > { %v3160_v10 = vadd.f32 %v3159_v9, %v3071_v43  ;;  %3210 = vmatmul.bf16.gmra.mxu0 %v9511_v17  ;;  %v2985_v45 = vadd.f32 %v2984_v6, %v2896_v34  ;;  %v525_v43 = vld [vmem:[%s7950_s20 + $0x360] sm:$0xff]  ;;  %v9516_v6 = vld [vmem:[#allocation107_spill] sm:$0xff] }
 0x2a2   : > { %3477 = vmatmul.bf16.gmra.mxu3 %v9514_v30 }
 0x2a3   : > { %v5413_v62 = vadd.f32 %v7098_v46, %v3160_v10  ;;  %3388 = vmatmul.bf16.gmra.mxu2 %v9513_v41 }
 0x2a5   : > { %5541 = vst [vmem:[%s7950_s20 + $0x320] sm:$0xff] %v5413_v62  ;;  %v3162_v48 = vpop.f32.mrf.mxu3  ;;  %v2986_v57 = vpop.f32.mrf.mxu1  ;;  %v9518_v62 = vld [vmem:[#allocation37_spill] sm:$0xff] }
 0x2a6   : > { %v3073_v7 = vpop.f32.mrf.mxu2  ;;  %v2897_v40 = vpop.f32.mrf.mxu0 }
 0x2a7   : > { %v3074_v37 = vadd.f32 %v3073_v7, %v2985_v45  ;;  %v2898_v59 = vadd.f32 %v2897_v40, %v9515_v16  ;;  %v9519_v45 = vld [vmem:[#allocation38_spill] sm:$0xff]  ;;  %v9520_v7 = vld [vmem:[#allocation39_spill] sm:$0xff] }
 0x2a8   : > { %v6539_v40 = vld [vmem:[#allocation5 + $0x670] sm:$0xf0] }
 0x2a9   : > { %v3163_v22 = vadd.f32 %v3162_v48, %v3074_v37  ;;  %v2987_v46 = vadd.f32 %v2986_v57, %v2898_v59  ;;  %v6955_v48 = vld [vmem:[#allocation5 + $0x664] sm:$0xf]  ;;  %v6283_v16 = vld [vmem:[#allocation5 + $0x470] sm:$0xf0] }
 0x2aa   : > { %v6542_v57 = vor.u32 %v6955_v48, %v6539_v40  ;;  %v6987_v59 = vld [vmem:[#allocation5 + $0x764] sm:$0xf]  ;;  %v6411_v48 = vld [vmem:[#allocation5 + $0x570] sm:$0xf0] }
 0x2ab   : > { %v5417_v1 = vadd.f32 %v3163_v22, %v521_v31  ;;  %v6891_v22 = vld [vmem:[#allocation5 + $0x464] sm:$0xf] }
 0x2ac   : > { %3715 = vmatpush.bf16.msrb.mxu2 %v6542_v57  ;;  %v533_v57 = vld [vmem:[%s7950_s20 + $0x3a0] sm:$0xff] }
 0x2ad   : > { %5545 = vst [vmem:[%s7950_s20 + $0x340] sm:$0xff] %v5417_v1  ;;  %v3164_v60 = vpop.f32.mrf.mxu3  ;;  %v2989_v9 = vpop.f32.mrf.mxu1 }
 0x2ae   : > { %v3075_v33 = vpop.f32.mrf.mxu2  ;;  %v2900_v4 = vpop.f32.mrf.mxu0 }
 0x2af   : > { %v3076_v28 = vadd.f32 %v3075_v33, %v2987_v46  ;;  %v2901_v10 = vadd.f32 %v2900_v4, %v9516_v6  ;;  %v529_v4 = vld [vmem:[%s7950_s20 + $0x380] sm:$0xff] }
 0x2b0   : > { %3304 = vmatmul.bf16.gmra.mxu1 %v9518_v62  ;;  %v6379_v62 = vld [vmem:[#allocation5 + $0x530] sm:$0xf0] }
 0x2b1   : > { %v3165_v44 = vadd.f32 %v3164_v60, %v3076_v28  ;;  %3215 = vmatmul.bf16.gmra.mxu0 %v9517_v20  ;;  %v2990_v37 = vadd.f32 %v2989_v9, %v2901_v10  ;;  %v6286_v28 = vor.u32 %v6891_v22, %v6283_v16  ;;  %v6667_v60 = vld [vmem:[#allocation5 + $0x770] sm:$0xf0]  ;;  %v9521_v9 = vld [vmem:[#allocation112_spill] sm:$0xff] }
 0x2b2   : > { %3482 = vmatmul.bf16.gmra.mxu3 %v9520_v7 }
 0x2b3   : > { %v5421_v34 = vadd.f32 %v3165_v44, %v525_v43  ;;  %3393 = vmatmul.bf16.gmra.mxu2 %v9519_v45  ;;  %v6670_v44 = vor.u32 %v6987_v59, %v6667_v60  ;;  %3537 = vmatpush.bf16.msrb.mxu0 %v6286_v28  ;;  %v9523_v28 = vld [vmem:[#allocation40_spill] sm:$0xff] }
 0x2b5   : > { %5549 = vst [vmem:[%s7950_s20 + $0x360] sm:$0xff] %v5421_v34  ;;  %v3167_v46 = vpop.f32.mrf.mxu3  ;;  %v2991_v43 = vpop.f32.mrf.mxu1  ;;  %v6923_v34 = vld [vmem:[#allocation5 + $0x564] sm:$0xf]  ;;  %3804 = vmatpush.bf16.msrb.mxu3 %v6670_v44  ;;  %v9524_v44 = vld [vmem:[#allocation41_spill] sm:$0xff] }
 0x2b6   : > { %v3078_v31 = vpop.f32.mrf.mxu2  ;;  %v2902_v33 = vpop.f32.mrf.mxu0  ;;  %v6414_v40 = vor.u32 %v6923_v34, %v6411_v48  ;;  %v537_v48 = vld [vmem:[%s7950_s20 + $0x3c0] sm:$0xff] }
 0x2b7   : > { %v3079_v1 = vadd.f32 %v3078_v31, %v2990_v37  ;;  %v2903_v10 = vadd.f32 %v2902_v33, %v9521_v9 }
 0x2b8   : > { %3626 = vmatpush.bf16.msrb.mxu1 %v6414_v40 }
 0x2b9   : > { %v3168_v6 = vadd.f32 %v3167_v46, %v3079_v1  ;;  %v2992_v37 = vadd.f32 %v2991_v43, %v2903_v10  ;;  %v9522_v46 = vld [vmem:[#allocation113_spill] sm:$0xff] }
 0x2bb   : > { %v5425_v7 = vadd.f32 %v3168_v6, %v529_v4  ;;  %v9525_v4 = vld [vmem:[#allocation42_spill] sm:$0xff] }
 0x2bd   : > { %5553 = vst [vmem:[%s7950_s20 + $0x380] sm:$0xff] %v5425_v7  ;;  %v3169_v16 = vpop.f32.mrf.mxu3  ;;  %v2994_v59 = vpop.f32.mrf.mxu1  ;;  %v9526_v7 = vld [vmem:[#allocation43_spill] sm:$0xff] }
 0x2be   : > { %v3080_v31 = vpop.f32.mrf.mxu2  ;;  %v2905_v45 = vpop.f32.mrf.mxu0 }
 0x2bf   : > { %v3081_v22 = vadd.f32 %v3080_v31, %v2992_v37  ;;  %v2906_v33 = vadd.f32 %v2905_v45, %v9522_v46  ;;  %v9527_v37 = vld [vmem:[#allocation118_spill] sm:$0xff] }
 0x2c0   : > { %3309 = vmatmul.bf16.gmra.mxu1 %v9524_v44  ;;  %v9529_v44 = vld [vmem:[#allocation45_spill] sm:$0xff] }
 0x2c1   : > { %v3170_v1 = vadd.f32 %v3169_v16, %v3081_v22  ;;  %3220 = vmatmul.bf16.gmra.mxu0 %v9523_v28  ;;  %v2995_v43 = vadd.f32 %v2994_v59, %v2906_v33 }
 0x2c2   : > { %3487 = vmatmul.bf16.gmra.mxu3 %v9526_v7 }
 0x2c3   : > { %v5429_v60 = vadd.f32 %v3170_v1, %v533_v57  ;;  %3398 = vmatmul.bf16.gmra.mxu2 %v9525_v4 }
 0x2c5   : > { %5557 = vst [vmem:[%s7950_s20 + $0x3a0] sm:$0xff] %v5429_v60  ;;  %v3172_v10 = vpop.f32.mrf.mxu3  ;;  %v2996_v40 = vpop.f32.mrf.mxu1  ;;  %v541_v60 = vld [vmem:[%s7950_s20 + $0x3e0] sm:$0xff] }
 0x2c6   : > { %v3083_v6 = vpop.f32.mrf.mxu2  ;;  %v2907_v34 = vpop.f32.mrf.mxu0 }
 0x2c7   : > { %v3084_v9 = vadd.f32 %v3083_v6, %v2995_v43  ;;  %v2908_v31 = vadd.f32 %v2907_v34, %v9527_v37  ;;  %v9528_v43 = vld [vmem:[#allocation44_spill] sm:$0xff]  ;;  %v6267_v37 = vld [vmem:[#allocation5 + $0x450] sm:$0xf0] }
 0x2c8   : > { %v6951_v34 = vld [vmem:[#allocation5 + $0x644] sm:$0xf] }
 0x2c9   : > { %v3173_v45 = vadd.f32 %v3172_v10, %v3084_v9  ;;  %v2997_v16 = vadd.f32 %v2996_v40, %v2908_v31  ;;  %v9530_v9 = vld [vmem:[#allocation46_spill] sm:$0xff]  ;;  %v9531_v10 = vld [vmem:[#allocation47_spill] sm:$0xff]  ;;  %v6887_v40 = vld [vmem:[#allocation5 + $0x444] sm:$0xf] }
 0x2ca   : > { %v6983_v31 = vld [vmem:[#allocation5 + $0x744] sm:$0xf] }
 0x2cb   : > { %v5433_v22 = vadd.f32 %v3173_v45, %v537_v48  ;;  %v6523_v48 = vld [vmem:[#allocation5 + $0x650] sm:$0xf0] }
 0x2cc   : > { %v6526_v45 = vor.u32 %v6951_v34, %v6523_v48 }
 0x2cd   : > { %5561 = vst [vmem:[%s7950_s20 + $0x3c0] sm:$0xff] %v5433_v22  ;;  %v3174_v46 = vpop.f32.mrf.mxu3  ;;  %v3275_v59 = vpop.f32.mrf.mxu1 }
 0x2ce   : > { %v3085_v57 = vpop.f32.mrf.mxu2  ;;  %v3186_v7 = vpop.f32.mrf.mxu0  ;;  %3716 = vmatpush.bf16.msrb.mxu2 %v6526_v45  ;;  %v9532_v45 = vld [vmem:[#allocation48_spill] sm:$0xff] }
 0x2cf   : > { %v3086_v1 = vadd.f32 %v3085_v57, %v2997_v16  ;;  %v3276_v4 = vadd.f32 %v3275_v59, %v3186_v7  ;;  %v6270_v16 = vor.u32 %v6887_v40, %v6267_v37  ;;  %v6651_v57 = vld [vmem:[#allocation5 + $0x750] sm:$0xf0] }
 0x2d0   : > { %3314 = vmatmul.bf16.gmra.mxu1 %v9529_v44  ;;  %v6395_v44 = vld [vmem:[#allocation5 + $0x550] sm:$0xf0] }
 0x2d1   : > { %v3175_v33 = vadd.f32 %v3174_v46, %v3086_v1  ;;  %3225 = vmatmul.bf16.gmra.mxu0 %v9528_v43 }
 0x2d2   : > { %3492 = vmatmul.bf16.gmra.mxu3 %v9531_v10  ;;  %3538 = vmatpush.bf16.msrb.mxu0 %v6270_v16  ;;  %v9534_v16 = vld [vmem:[#allocation50_spill] sm:$0xff] }
 0x2d3   : > { %v5437_v6 = vadd.f32 %v3175_v33, %v541_v60  ;;  %3403 = vmatmul.bf16.gmra.mxu2 %v9530_v9  ;;  %v6654_v60 = vor.u32 %v6983_v31, %v6651_v57  ;;  %v6919_v9 = vld [vmem:[#allocation5 + $0x544] sm:$0xf]  ;;  %v9533_v31 = vld [vmem:[#allocation49_spill] sm:$0xff]  ;;  %v9535_v57 = vld [vmem:[#allocation51_spill] sm:$0xff] }
 0x2d5   : > { %5565 = vst [vmem:[%s7950_s20 + $0x3e0] sm:$0xff] %v5437_v6  ;;  %v3453_v1 = vpop.f32.mrf.mxu3  ;;  %v3277_v59 = vpop.f32.mrf.mxu1  ;;  %3805 = vmatpush.bf16.msrb.mxu3 %v6654_v60  ;;  %v6398_v6 = vor.u32 %v6919_v9, %v6395_v44 }
 0x2d6   : > { %v3364_v22 = vpop.f32.mrf.mxu2  ;;  %v3188_v46 = vpop.f32.mrf.mxu0 }
 0x2d7   : > { %v3365_v7 = vadd.f32 %v3364_v22, %v3276_v4  ;;  %v3278_v10 = vadd.f32 %v3277_v59, %v3188_v46  ;;  %3627 = vmatpush.bf16.msrb.mxu1 %v6398_v6 }
 0x2d9   : > { %v8278_v33 = vadd.f32 %v3453_v1, %v3365_v7 }
 0x2dd   : > { %v3455_v43 = vpop.f32.mrf.mxu3  ;;  %v3280_v37 = vpop.f32.mrf.mxu1 }
 0x2de   : > { %v3366_v34 = vpop.f32.mrf.mxu2  ;;  %v3191_v40 = vpop.f32.mrf.mxu0 }
 0x2df   : > { %v3367_v48 = vadd.f32 %v3366_v34, %v3278_v10  ;;  %v3281_v22 = vadd.f32 %v3280_v37, %v3191_v40 }
 0x2e0   : > { %3319 = vmatmul.bf16.gmra.mxu1 %v9533_v31  ;;  %v9536_v31 = vld [vmem:[#allocation52_spill] sm:$0xff] }
 0x2e1   : > { %v8280_v4 = vadd.f32 %v3455_v43, %v3367_v48  ;;  %3230 = vmatmul.bf16.gmra.mxu0 %v9532_v45 }
 0x2e2   : > { %3497 = vmatmul.bf16.gmra.mxu3 %v9535_v57  ;;  %v9538_v57 = vld [vmem:[#allocation54_spill] sm:$0xff] }
 0x2e3   : > { %3408 = vmatmul.bf16.gmra.mxu2 %v9534_v16  ;;  %v9537_v16 = vld [vmem:[#allocation53_spill] sm:$0xff] }
 0x2e5   : > { %v3458_v44 = vpop.f32.mrf.mxu3  ;;  %v3282_v46 = vpop.f32.mrf.mxu1 }
 0x2e6   : > { %v3369_v7 = vpop.f32.mrf.mxu2  ;;  %v3193_v9 = vpop.f32.mrf.mxu0 }
 0x2e7   : > { %v3370_v1 = vadd.f32 %v3369_v7, %v3281_v22  ;;  %v3283_v60 = vadd.f32 %v3282_v46, %v3193_v9  ;;  %v9539_v22 = vld [vmem:[#allocation55_spill] sm:$0xff]  ;;  %v6947_v7 = vld [vmem:[#allocation5 + $0x624] sm:$0xf]  ;;  %v6251_v46 = vld [vmem:[#allocation5 + $0x430] sm:$0xf0] }
 0x2e9   : > { %v8286_v10 = vadd.f32 %v3458_v44, %v3370_v1  ;;  %v6507_v1 = vld [vmem:[#allocation5 + $0x630] sm:$0xf0]  ;;  %v6883_v44 = vld [vmem:[#allocation5 + $0x424] sm:$0xf] }
 0x2ea   : > { %v6510_v9 = vor.u32 %v6947_v7, %v6507_v1  ;;  %v6254_v28 = vor.u32 %v6883_v44, %v6251_v46 }
 0x2ec   : > { %3717 = vmatpush.bf16.msrb.mxu2 %v6510_v9  ;;  %3539 = vmatpush.bf16.msrb.mxu0 %v6254_v28  ;;  %v9541_v9 = vld [vmem:[#allocation57_spill] sm:$0xff]  ;;  %v9542_v28 = vld [vmem:[#allocation58_spill] sm:$0xff] }
 0x2ed   : > { %v3460_v6 = vpop.f32.mrf.mxu3  ;;  %v3285_v48 = vpop.f32.mrf.mxu1 }
 0x2ee   : > { %v3371_v59 = vpop.f32.mrf.mxu2  ;;  %v3196_v34 = vpop.f32.mrf.mxu0 }
 0x2ef   : > { %v3372_v43 = vadd.f32 %v3371_v59, %v3283_v60  ;;  %v3286_v37 = vadd.f32 %v3285_v48, %v3196_v34  ;;  %v6979_v60 = vld [vmem:[#allocation5 + $0x724] sm:$0xf]  ;;  %v6635_v59 = vld [vmem:[#allocation5 + $0x730] sm:$0xf0] }
 0x2f0   : > { %3324 = vmatmul.bf16.gmra.mxu1 %v9537_v16  ;;  %v6915_v16 = vld [vmem:[#allocation5 + $0x524] sm:$0xf] }
 0x2f1   : > { %v8288_v40 = vadd.f32 %v3460_v6, %v3372_v43  ;;  %3235 = vmatmul.bf16.gmra.mxu0 %v9536_v31  ;;  %v6638_v43 = vor.u32 %v6979_v60, %v6635_v59  ;;  %v6382_v20 = vor.u32 %v6915_v16, %v6379_v62  ;;  %v9543_v60 = vld [vmem:[#allocation59_spill] sm:$0xff] }
 0x2f2   : > { %3502 = vmatmul.bf16.gmra.mxu3 %v9539_v22 }
 0x2f3   : > { %3413 = vmatmul.bf16.gmra.mxu2 %v9538_v57  ;;  %3806 = vmatpush.bf16.msrb.mxu3 %v6638_v43 }
 0x2f4   : > { %3628 = vmatpush.bf16.msrb.mxu1 %v6382_v20 }
 0x2f5   : > { %v3463_v34 = vpop.f32.mrf.mxu3  ;;  %v3287_v31 = vpop.f32.mrf.mxu1 }
 0x2f6   : > { %v3374_v45 = vpop.f32.mrf.mxu2  ;;  %v3198_v48 = vpop.f32.mrf.mxu0 }
 0x2f7   : > { %v3375_v6 = vadd.f32 %v3374_v45, %v3286_v37  ;;  %v3288_v22 = vadd.f32 %v3287_v31, %v3198_v48  ;;  %v9540_v37 = vld [vmem:[#allocation56_spill] sm:$0xff] }
 0x2f9   : > { %v8294_v57 = vadd.f32 %v3463_v34, %v3375_v6 }
 0x2fd   : > { %v3465_v30 = vpop.f32.mrf.mxu3  ;;  %v3290_v44 = vpop.f32.mrf.mxu1 }
 0x2fe   : > { %v3376_v7 = vpop.f32.mrf.mxu2  ;;  %v3201_v41 = vpop.f32.mrf.mxu0 }
 0x2ff   : > { %v3377_v1 = vadd.f32 %v3376_v7, %v3288_v22  ;;  %v3291_v45 = vadd.f32 %v3290_v44, %v3201_v41  ;;  %v9544_v44 = vld [vmem:[#allocation60_spill] sm:$0xff] }
 0x300   : > { %3329 = vmatmul.bf16.gmra.mxu1 %v9541_v9 }
 0x301   : > { %v8296_v46 = vadd.f32 %v3465_v30, %v3377_v1  ;;  %3240 = vmatmul.bf16.gmra.mxu0 %v9540_v37 }
 0x302   : > { %3507 = vmatmul.bf16.gmra.mxu3 %v9543_v60  ;;  %v9546_v60 = vld [vmem:[#allocation62_spill] sm:$0xff] }
 0x303   : > { %3418 = vmatmul.bf16.gmra.mxu2 %v9542_v28  ;;  %v9545_v28 = vld [vmem:[#allocation61_spill] sm:$0xff] }
 0x305   : > { %v3468_v62 = vpop.f32.mrf.mxu3  ;;  %v3292_v16 = vpop.f32.mrf.mxu1 }
 0x306   : > { %v3379_v31 = vpop.f32.mrf.mxu2  ;;  %v3203_v20 = vpop.f32.mrf.mxu0 }
 0x307   : > { %v3380_v59 = vadd.f32 %v3379_v31, %v3291_v45  ;;  %v3293_v43 = vadd.f32 %v3292_v16, %v3203_v20  ;;  %v9547_v45 = vld [vmem:[#allocation63_spill] sm:$0xff]  ;;  %v6943_v31 = vld [vmem:[#allocation5 + $0x604] sm:$0xf]  ;;  %v6235_v16 = vld [vmem:[#allocation5 + $0x410] sm:$0xf0] }
 0x309   : > { %v8302_v22 = vadd.f32 %v3468_v62, %v3380_v59  ;;  %v6491_v59 = vld [vmem:[#allocation5 + $0x610] sm:$0xf0]  ;;  %v6879_v62 = vld [vmem:[#allocation5 + $0x404] sm:$0xf] }
 0x30a   : > { %v6494_v20 = vor.u32 %v6943_v31, %v6491_v59  ;;  %v6238_v37 = vor.u32 %v6879_v62, %v6235_v16 }
 0x30c   : > { %3718 = vmatpush.bf16.msrb.mxu2 %v6494_v20  ;;  %3540 = vmatpush.bf16.msrb.mxu0 %v6238_v37  ;;  %v9549_v20 = vld [vmem:[#allocation65_spill] sm:$0xff]  ;;  %v9550_v37 = vld [vmem:[#allocation66_spill] sm:$0xff] }
 0x30d   : > { %v3470_v34 = vpop.f32.mrf.mxu3  ;;  %v3295_v48 = vpop.f32.mrf.mxu1 }
 0x30e   : > { %v3381_v6 = vpop.f32.mrf.mxu2  ;;  %v3206_v41 = vpop.f32.mrf.mxu0 }
 0x30f   : > { %v3382_v30 = vadd.f32 %v3381_v6, %v3293_v43  ;;  %v3296_v1 = vadd.f32 %v3295_v48, %v3206_v41  ;;  %v6975_v43 = vld [vmem:[#allocation5 + $0x704] sm:$0xf]  ;;  %v6619_v6 = vld [vmem:[#allocation5 + $0x710] sm:$0xf0] }
 0x310   : > { %3334 = vmatmul.bf16.gmra.mxu1 %v9545_v28  ;;  %v6911_v28 = vld [vmem:[#allocation5 + $0x504] sm:$0xf] }
 0x311   : > { %v8304_v7 = vadd.f32 %v3470_v34, %v3382_v30  ;;  %3245 = vmatmul.bf16.gmra.mxu0 %v9544_v44  ;;  %v6622_v30 = vor.u32 %v6975_v43, %v6619_v6  ;;  %v6366_v17 = vor.u32 %v6911_v28, %v6363_v23  ;;  %v9551_v43 = vld [vmem:[#allocation67_spill] sm:$0xff] }
 0x312   : > { %3512 = vmatmul.bf16.gmra.mxu3 %v9547_v45 }
 0x313   : > { %3423 = vmatmul.bf16.gmra.mxu2 %v9546_v60  ;;  %3807 = vmatpush.bf16.msrb.mxu3 %v6622_v30 }
 0x314   : > { %3629 = vmatpush.bf16.msrb.mxu1 %v6366_v17 }
 0x315   : > { %v3473_v41 = vpop.f32.mrf.mxu3  ;;  %v3297_v44 = vpop.f32.mrf.mxu1 }
 0x316   : > { %v3384_v9 = vpop.f32.mrf.mxu2  ;;  %v3208_v48 = vpop.f32.mrf.mxu0 }
 0x317   : > { %v3385_v34 = vadd.f32 %v3384_v9, %v3296_v1  ;;  %v3298_v45 = vadd.f32 %v3297_v44, %v3208_v48  ;;  %v9548_v1 = vld [vmem:[#allocation64_spill] sm:$0xff] }
 0x319   : > { %v8310_v60 = vadd.f32 %v3473_v41, %v3385_v34 }
 0x31d   : > { %v3475_v8 = vpop.f32.mrf.mxu3  ;;  %v3300_v62 = vpop.f32.mrf.mxu1 }
 0x31e   : > { %v3386_v31 = vpop.f32.mrf.mxu2  ;;  %v3211_v29 = vpop.f32.mrf.mxu0 }
 0x31f   : > { %v3387_v59 = vadd.f32 %v3386_v31, %v3298_v45  ;;  %v3301_v9 = vadd.f32 %v3300_v62, %v3211_v29  ;;  %v9552_v62 = vld [vmem:[#allocation68_spill] sm:$0xff] }
 0x320   : > { %3339 = vmatmul.bf16.gmra.mxu1 %v9549_v20 }
 0x321   : > { %v8312_v16 = vadd.f32 %v3475_v8, %v3387_v59  ;;  %3250 = vmatmul.bf16.gmra.mxu0 %v9548_v1 }
 0x322   : > { %3517 = vmatmul.bf16.gmra.mxu3 %v9551_v43  ;;  %v9554_v43 = vld [vmem:[#allocation70_spill] sm:$0xff] }
 0x323   : > { %3428 = vmatmul.bf16.gmra.mxu2 %v9550_v37  ;;  %v9553_v37 = vld [vmem:[#allocation69_spill] sm:$0xff] }
 0x325   : > { %v3478_v23 = vpop.f32.mrf.mxu3  ;;  %v3302_v28 = vpop.f32.mrf.mxu1 }
 0x326   : > { %v3389_v44 = vpop.f32.mrf.mxu2  ;;  %v3213_v17 = vpop.f32.mrf.mxu0 }
 0x327   : > { %v3390_v6 = vadd.f32 %v3389_v44, %v3301_v9  ;;  %v3303_v30 = vadd.f32 %v3302_v28, %v3213_v17  ;;  %v9555_v9 = vld [vmem:[#allocation71_spill] sm:$0xff]  ;;  %v6097_v44 = vld [vmem:[#allocation5 + $0x2e8] sm:$0xf]  ;;  %v6782_v28 = vld [vmem:[#allocation5 + $0xf4] sm:$0xf0] }
 0x329   : > { %v8318_v45 = vadd.f32 %v3478_v23, %v3390_v6  ;;  %v6846_v6 = vld [vmem:[#allocation5 + $0x2f4] sm:$0xf0]  ;;  %v5841_v23 = vld [vmem:[#allocation5 + $0xe8] sm:$0xf] }
 0x32a   : > { %v6098_v17 = vor.u32 %v6846_v6, %v6097_v44  ;;  %v5842_v1 = vor.u32 %v6782_v28, %v5841_v23 }
 0x32c   : > { %4067 = vmatpush.bf16.msra.mxu2 %v6098_v17  ;;  %3889 = vmatpush.bf16.msra.mxu0 %v5842_v1  ;;  %v9557_v17 = vld [vmem:[#allocation73_spill] sm:$0xff]  ;;  %v9558_v1 = vld [vmem:[#allocation74_spill] sm:$0xff] }
 0x32d   : > { %v3480_v41 = vpop.f32.mrf.mxu3  ;;  %v3305_v48 = vpop.f32.mrf.mxu1 }
 0x32e   : > { %v3391_v34 = vpop.f32.mrf.mxu2  ;;  %v3216_v29 = vpop.f32.mrf.mxu0 }
 0x32f   : > { %v3392_v8 = vadd.f32 %v3391_v34, %v3303_v30  ;;  %v3306_v59 = vadd.f32 %v3305_v48, %v3216_v29  ;;  %v6225_v30 = vld [vmem:[#allocation5 + $0x3e8] sm:$0xf]  ;;  %v6878_v34 = vld [vmem:[#allocation5 + $0x3f4] sm:$0xf0] }
 0x330   : > { %3344 = vmatmul.bf16.gmra.mxu1 %v9553_v37  ;;  %v5969_v37 = vld [vmem:[#allocation5 + $0x1e8] sm:$0xf] }
 0x331   : > { %v8320_v31 = vadd.f32 %v3480_v41, %v3392_v8  ;;  %3255 = vmatmul.bf16.gmra.mxu0 %v9552_v62  ;;  %v6226_v8 = vor.u32 %v6878_v34, %v6225_v30  ;;  %v5970_v5 = vor.u32 %v6814_v61, %v5969_v37  ;;  %v9559_v30 = vld [vmem:[#allocation75_spill] sm:$0xff] }
 0x332   : > { %3522 = vmatmul.bf16.gmra.mxu3 %v9555_v9 }
 0x333   : > { %3433 = vmatmul.bf16.gmra.mxu2 %v9554_v43  ;;  %4156 = vmatpush.bf16.msra.mxu3 %v6226_v8 }
 0x334   : > { %3978 = vmatpush.bf16.msra.mxu1 %v5970_v5 }
 0x335   : > { %v3483_v29 = vpop.f32.mrf.mxu3  ;;  %v3307_v62 = vpop.f32.mrf.mxu1 }
 0x336   : > { %v3394_v20 = vpop.f32.mrf.mxu2  ;;  %v3218_v48 = vpop.f32.mrf.mxu0 }
 0x337   : > { %v3395_v41 = vadd.f32 %v3394_v20, %v3306_v59  ;;  %v3308_v9 = vadd.f32 %v3307_v62, %v3218_v48  ;;  %v9556_v59 = vld [vmem:[#allocation72_spill] sm:$0xff] }
 0x339   : > { %v8326_v43 = vadd.f32 %v3483_v29, %v3395_v41 }
 0x33d   : > { %v3485_v55 = vpop.f32.mrf.mxu3  ;;  %v3310_v23 = vpop.f32.mrf.mxu1 }
 0x33e   : > { %v3396_v44 = vpop.f32.mrf.mxu2  ;;  %v3221_v54 = vpop.f32.mrf.mxu0 }
 0x33f   : > { %v3397_v6 = vadd.f32 %v3396_v44, %v3308_v9  ;;  %v3311_v20 = vadd.f32 %v3310_v23, %v3221_v54  ;;  %v9560_v23 = vld [vmem:[#allocation76_spill] sm:$0xff] }
 0x340   : > { %3349 = vmatmul.bf16.gmra.mxu1 %v9557_v17 }
 0x341   : > { %v8328_v28 = vadd.f32 %v3485_v55, %v3397_v6  ;;  %3260 = vmatmul.bf16.gmra.mxu0 %v9556_v59 }
 0x342   : > { %3527 = vmatmul.bf16.gmra.mxu3 %v9559_v30  ;;  %v9562_v30 = vld [vmem:[#allocation78_spill] sm:$0xff] }
 0x343   : > { %3438 = vmatmul.bf16.gmra.mxu2 %v9558_v1  ;;  %v9561_v1 = vld [vmem:[#allocation77_spill] sm:$0xff] }
 0x345   : > { %v3488_v61 = vpop.f32.mrf.mxu3  ;;  %v3312_v37 = vpop.f32.mrf.mxu1 }
 0x346   : > { %v3399_v62 = vpop.f32.mrf.mxu2  ;;  %v3223_v5 = vpop.f32.mrf.mxu0 }
 0x347   : > { %v3400_v34 = vadd.f32 %v3399_v62, %v3311_v20  ;;  %v3313_v8 = vadd.f32 %v3312_v37, %v3223_v5  ;;  %v9563_v20 = vld [vmem:[#allocation79_spill] sm:$0xff]  ;;  %v6081_v62 = vld [vmem:[#allocation5 + $0x2c8] sm:$0xf]  ;;  %v6778_v37 = vld [vmem:[#allocation5 + $0xd4] sm:$0xf0] }
 0x349   : > { %v8334_v9 = vadd.f32 %v3488_v61, %v3400_v34  ;;  %v6842_v34 = vld [vmem:[#allocation5 + $0x2d4] sm:$0xf0]  ;;  %v5825_v61 = vld [vmem:[#allocation5 + $0xc8] sm:$0xf] }
 0x34a   : > { %v6082_v5 = vor.u32 %v6842_v34, %v6081_v62  ;;  %v5826_v59 = vor.u32 %v6778_v37, %v5825_v61 }
 0x34c   : > { %4068 = vmatpush.bf16.msra.mxu2 %v6082_v5  ;;  %3890 = vmatpush.bf16.msra.mxu0 %v5826_v59  ;;  %v9565_v5 = vld [vmem:[#allocation81_spill] sm:$0xff]  ;;  %v9566_v59 = vld [vmem:[#allocation82_spill] sm:$0xff] }
 0x34d   : > { %v3490_v29 = vpop.f32.mrf.mxu3  ;;  %v3315_v48 = vpop.f32.mrf.mxu1 }
 0x34e   : > { %v3401_v41 = vpop.f32.mrf.mxu2  ;;  %v3226_v54 = vpop.f32.mrf.mxu0 }
 0x34f   : > { %v3402_v55 = vadd.f32 %v3401_v41, %v3313_v8  ;;  %v3316_v6 = vadd.f32 %v3315_v48, %v3226_v54  ;;  %v6209_v8 = vld [vmem:[#allocation5 + $0x3c8] sm:$0xf]  ;;  %v6874_v41 = vld [vmem:[#allocation5 + $0x3d4] sm:$0xf0] }
 0x350   : > { %3630 = vmatmul.bf16.vlgmr.msrb.gmra.mxu1 %v9561_v1  ;;  %v5953_v1 = vld [vmem:[#allocation5 + $0x1c8] sm:$0xf] }
 0x351   : > { %v8336_v44 = vadd.f32 %v3490_v29, %v3402_v55  ;;  %3541 = vmatmul.bf16.vlgmr.msrb.gmra.mxu0 %v9560_v23  ;;  %v6210_v55 = vor.u32 %v6874_v41, %v6209_v8  ;;  %v5954_v49 = vor.u32 %v6810_v50, %v5953_v1  ;;  %v9567_v8 = vld [vmem:[#allocation83_spill] sm:$0xff] }
 0x352   : > { %3808 = vmatmul.bf16.vlgmr.msrb.gmra.mxu3 %v9563_v20 }
 0x353   : > { %3719 = vmatmul.bf16.vlgmr.msrb.gmra.mxu2 %v9562_v30  ;;  %4157 = vmatpush.bf16.msra.mxu3 %v6210_v55 }
 0x354   : > { %3979 = vmatpush.bf16.msra.mxu1 %v5954_v49 }
 0x355   : > { %v3493_v54 = vpop.f32.mrf.mxu3  ;;  %v3317_v23 = vpop.f32.mrf.mxu1 }
 0x356   : > { %v3404_v17 = vpop.f32.mrf.mxu2  ;;  %v3228_v48 = vpop.f32.mrf.mxu0 }
 0x357   : > { %v3405_v29 = vadd.f32 %v3404_v17, %v3316_v6  ;;  %v3318_v20 = vadd.f32 %v3317_v23, %v3228_v48  ;;  %v9564_v6 = vld [vmem:[#allocation80_spill] sm:$0xff] }
 0x359   : > { %v8342_v30 = vadd.f32 %v3493_v54, %v3405_v29 }
 0x35d   : > { %v3495_v27 = vpop.f32.mrf.mxu3  ;;  %v3320_v61 = vpop.f32.mrf.mxu1 }
 0x35e   : > { %v3406_v62 = vpop.f32.mrf.mxu2  ;;  %v3231_v26 = vpop.f32.mrf.mxu0 }
 0x35f   : > { %v3407_v34 = vadd.f32 %v3406_v62, %v3318_v20  ;;  %v3321_v17 = vadd.f32 %v3320_v61, %v3231_v26  ;;  %v9569_v61 = vld [vmem:[#allocation84_spill] sm:$0xff] }
 0x360   : > { %3635 = vmatmul.bf16.gmra.mxu1 %v9565_v5 }
 0x361   : > { %v8344_v37 = vadd.f32 %v3495_v27, %v3407_v34  ;;  %3546 = vmatmul.bf16.gmra.mxu0 %v9564_v6 }
 0x362   : > { %3813 = vmatmul.bf16.gmra.mxu3 %v9567_v8  ;;  %v9571_v8 = vld [vmem:[#allocation86_spill] sm:$0xff] }
 0x363   : > { %3724 = vmatmul.bf16.gmra.mxu2 %v9566_v59  ;;  %v9570_v59 = vld [vmem:[#allocation85_spill] sm:$0xff] }
 0x365   : > { %v3498_v50 = vpop.f32.mrf.mxu3  ;;  %v3322_v1 = vpop.f32.mrf.mxu1 }
 0x366   : > { %v3409_v23 = vpop.f32.mrf.mxu2  ;;  %v3233_v49 = vpop.f32.mrf.mxu0 }
 0x367   : > { %v3410_v41 = vadd.f32 %v3409_v23, %v3321_v17  ;;  %v3323_v55 = vadd.f32 %v3322_v1, %v3233_v49  ;;  %v9572_v17 = vld [vmem:[#allocation87_spill] sm:$0xff]  ;;  %v6065_v23 = vld [vmem:[#allocation5 + $0x2a8] sm:$0xf]  ;;  %v6774_v1 = vld [vmem:[#allocation5 + $0xb4] sm:$0xf0] }
 0x369   : > { %v8350_v20 = vadd.f32 %v3498_v50, %v3410_v41  ;;  %v6838_v41 = vld [vmem:[#allocation5 + $0x2b4] sm:$0xf0]  ;;  %v5809_v50 = vld [vmem:[#allocation5 + $0xa8] sm:$0xf] }
 0x36a   : > { %v6066_v49 = vor.u32 %v6838_v41, %v6065_v23  ;;  %v5810_v6 = vor.u32 %v6774_v1, %v5809_v50 }
 0x36c   : > { %4069 = vmatpush.bf16.msra.mxu2 %v6066_v49  ;;  %3891 = vmatpush.bf16.msra.mxu0 %v5810_v6  ;;  %v9576_v49 = vld [vmem:[#allocation89_spill] sm:$0xff]  ;;  %v9577_v6 = vld [vmem:[#allocation90_spill] sm:$0xff] }
 0x36d   : > { %v3500_v54 = vpop.f32.mrf.mxu3  ;;  %v3325_v48 = vpop.f32.mrf.mxu1 }
 0x36e   : > { %v3411_v29 = vpop.f32.mrf.mxu2  ;;  %v3236_v26 = vpop.f32.mrf.mxu0 }
 0x36f   : > { %v3412_v27 = vadd.f32 %v3411_v29, %v3323_v55  ;;  %v3326_v34 = vadd.f32 %v3325_v48, %v3236_v26  ;;  %v6193_v55 = vld [vmem:[#allocation5 + $0x3a8] sm:$0xf]  ;;  %v6870_v29 = vld [vmem:[#allocation5 + $0x3b4] sm:$0xf0] }
 0x370   : > { %3640 = vmatmul.bf16.gmra.mxu1 %v9570_v59  ;;  %v5937_v59 = vld [vmem:[#allocation5 + $0x1a8] sm:$0xf] }
 0x371   : > { %v8352_v62 = vadd.f32 %v3500_v54, %v3412_v27  ;;  %3551 = vmatmul.bf16.gmra.mxu0 %v9569_v61  ;;  %v6194_v27 = vor.u32 %v6870_v29, %v6193_v55  ;;  %v5938_v24 = vor.u32 %v6806_v25, %v5937_v59  ;;  %v9578_v55 = vld [vmem:[#allocation91_spill] sm:$0xff] }
 0x372   : > { %3818 = vmatmul.bf16.gmra.mxu3 %v9572_v17 }
 0x373   : > { %9568 = vst [vmem:[#allocation100_spill] sm:$0xff] %v8352_v62  ;;  %3729 = vmatmul.bf16.gmra.mxu2 %v9571_v8  ;;  %4158 = vmatpush.bf16.msra.mxu3 %v6194_v27 }
 0x374   : > { %3980 = vmatpush.bf16.msra.mxu1 %v5938_v24 }
 0x375   : > { %v3503_v26 = vpop.f32.mrf.mxu3  ;;  %v3327_v61 = vpop.f32.mrf.mxu1 }
 0x376   : > { %v3414_v5 = vpop.f32.mrf.mxu2  ;;  %v3238_v48 = vpop.f32.mrf.mxu0 }
 0x377   : > { %v3415_v54 = vadd.f32 %v3414_v5, %v3326_v34  ;;  %v3328_v17 = vadd.f32 %v3327_v61, %v3238_v48  ;;  %v9575_v34 = vld [vmem:[#allocation88_spill] sm:$0xff] }
 0x379   : > { %v8358_v8 = vadd.f32 %v3503_v26, %v3415_v54 }
 0x37b   : > { %9573 = vst [vmem:[#allocation101_spill] sm:$0xff] %v8358_v8 }
 0x37d   : > { %v3505_v62 = vpop.f32.mrf.mxu3  ;;  %v3330_v50 = vpop.f32.mrf.mxu1 }
 0x37e   : > { %v3416_v23 = vpop.f32.mrf.mxu2  ;;  %v3241_v15 = vpop.f32.mrf.mxu0 }
 0x37f   : > { %v3417_v41 = vadd.f32 %v3416_v23, %v3328_v17  ;;  %v3331_v5 = vadd.f32 %v3330_v50, %v3241_v15  ;;  %v9581_v50 = vld [vmem:[#allocation92_spill] sm:$0xff] }
 0x380   : > { %3645 = vmatmul.bf16.gmra.mxu1 %v9576_v49 }
 0x381   : > { %v8360_v1 = vadd.f32 %v3505_v62, %v3417_v41  ;;  %3556 = vmatmul.bf16.gmra.mxu0 %v9575_v34 }
 0x382   : > { %3823 = vmatmul.bf16.gmra.mxu3 %v9578_v55  ;;  %v9583_v55 = vld [vmem:[#allocation94_spill] sm:$0xff] }
 0x383   : > { %9574 = vst [vmem:[#allocation106_spill] sm:$0xff] %v8360_v1  ;;  %3734 = vmatmul.bf16.gmra.mxu2 %v9577_v6  ;;  %v9582_v6 = vld [vmem:[#allocation93_spill] sm:$0xff] }
 0x385   : > { %v3508_v25 = vpop.f32.mrf.mxu3  ;;  %v3332_v59 = vpop.f32.mrf.mxu1 }
 0x386   : > { %v3419_v61 = vpop.f32.mrf.mxu2  ;;  %v3243_v24 = vpop.f32.mrf.mxu0 }
 0x387   : > { %v3420_v29 = vadd.f32 %v3419_v61, %v3331_v5  ;;  %v3333_v27 = vadd.f32 %v3332_v59, %v3243_v24  ;;  %v9584_v5 = vld [vmem:[#allocation95_spill] sm:$0xff]  ;;  %v6049_v61 = vld [vmem:[#allocation5 + $0x288] sm:$0xf]  ;;  %v6770_v59 = vld [vmem:[#allocation5 + $0x94] sm:$0xf0] }
 0x389   : > { %v8366_v17 = vadd.f32 %v3508_v25, %v3420_v29  ;;  %v6834_v29 = vld [vmem:[#allocation5 + $0x294] sm:$0xf0]  ;;  %v5793_v25 = vld [vmem:[#allocation5 + $0x88] sm:$0xf] }
 0x38a   : > { %v6050_v24 = vor.u32 %v6834_v29, %v6049_v61  ;;  %v5794_v34 = vor.u32 %v6770_v59, %v5793_v25 }
 0x38b   : > { %9579 = vst [vmem:[#allocation107_spill] sm:$0xff] %v8366_v17 }
 0x38c   : > { %4070 = vmatpush.bf16.msra.mxu2 %v6050_v24  ;;  %3892 = vmatpush.bf16.msra.mxu0 %v5794_v34  ;;  %v9587_v24 = vld [vmem:[#allocation97_spill] sm:$0xff]  ;;  %v9588_v34 = vld [vmem:[#allocation98_spill] sm:$0xff] }
 0x38d   : > { %v3510_v26 = vpop.f32.mrf.mxu3  ;;  %v3335_v48 = vpop.f32.mrf.mxu1 }
 0x38e   : > { %v3421_v54 = vpop.f32.mrf.mxu2  ;;  %v3246_v15 = vpop.f32.mrf.mxu0 }
 0x38f   : > { %v3422_v62 = vadd.f32 %v3421_v54, %v3333_v27  ;;  %v3336_v41 = vadd.f32 %v3335_v48, %v3246_v15  ;;  %v6177_v27 = vld [vmem:[#allocation5 + $0x388] sm:$0xf]  ;;  %v6866_v54 = vld [vmem:[#allocation5 + $0x394] sm:$0xf0] }
 0x390   : > { %3650 = vmatmul.bf16.gmra.mxu1 %v9582_v6  ;;  %v5921_v6 = vld [vmem:[#allocation5 + $0x188] sm:$0xf] }
 0x391   : > { %v8368_v23 = vadd.f32 %v3510_v26, %v3422_v62  ;;  %3561 = vmatmul.bf16.gmra.mxu0 %v9581_v50  ;;  %v6178_v62 = vor.u32 %v6866_v54, %v6177_v27  ;;  %v9589_v27 = vld [vmem:[#allocation99_spill] sm:$0xff] }
 0x392   : > { %3828 = vmatmul.bf16.gmra.mxu3 %v9584_v5 }
 0x393   : > { %9580 = vst [vmem:[#allocation112_spill] sm:$0xff] %v8368_v23  ;;  %3739 = vmatmul.bf16.gmra.mxu2 %v9583_v55  ;;  %4159 = vmatpush.bf16.msra.mxu3 %v6178_v62  ;;  %v6802_v23 = vld [vmem:[#allocation5 + $0x194] sm:$0xf0] }
 0x394   : > { %v5922_v17 = vor.u32 %v6802_v23, %v5921_v6 }
 0x395   : > { %v3513_v15 = vpop.f32.mrf.mxu3  ;;  %v3337_v50 = vpop.f32.mrf.mxu1 }
 0x396   : > { %v3424_v49 = vpop.f32.mrf.mxu2  ;;  %v3248_v48 = vpop.f32.mrf.mxu0  ;;  %3981 = vmatpush.bf16.msra.mxu1 %v5922_v17 }
 0x397   : > { %v3425_v26 = vadd.f32 %v3424_v49, %v3336_v41  ;;  %v3338_v5 = vadd.f32 %v3337_v50, %v3248_v48  ;;  %v9586_v41 = vld [vmem:[#allocation96_spill] sm:$0xff] }
 0x399   : > { %v8374_v55 = vadd.f32 %v3513_v15, %v3425_v26 }
 0x39d   : > { %v3515_v1 = vpop.f32.mrf.mxu3  ;;  %v3340_v25 = vpop.f32.mrf.mxu1 }
 0x39e   : > { %v3426_v61 = vpop.f32.mrf.mxu2  ;;  %v3251_v8 = vpop.f32.mrf.mxu0 }
 0x39f   : > { %v3427_v29 = vadd.f32 %v3426_v61, %v3338_v5  ;;  %v3341_v49 = vadd.f32 %v3340_v25, %v3251_v8  ;;  %v9592_v25 = vld [vmem:[#allocation102_spill] sm:$0xff] }
 0x3a0   : > { %3655 = vmatmul.bf16.gmra.mxu1 %v9587_v24 }
 0x3a1   : > { %v8376_v59 = vadd.f32 %v3515_v1, %v3427_v29  ;;  %3566 = vmatmul.bf16.gmra.mxu0 %v9586_v41 }
 0x3a2   : > { %3833 = vmatmul.bf16.gmra.mxu3 %v9589_v27  ;;  %v9594_v27 = vld [vmem:[#allocation104_spill] sm:$0xff] }
 0x3a3   : > { %9585 = vst [vmem:[#allocation113_spill] sm:$0xff] %v8376_v59  ;;  %3744 = vmatmul.bf16.gmra.mxu2 %v9588_v34  ;;  %v9593_v34 = vld [vmem:[#allocation103_spill] sm:$0xff] }
 0x3a5   : > { %v3518_v6 = vpop.f32.mrf.mxu3  ;;  %v3342_v23 = vpop.f32.mrf.mxu1 }
 0x3a6   : > { %v3429_v50 = vpop.f32.mrf.mxu2  ;;  %v3253_v17 = vpop.f32.mrf.mxu0 }
 0x3a7   : > { %v3430_v54 = vadd.f32 %v3429_v50, %v3341_v49  ;;  %v3343_v62 = vadd.f32 %v3342_v23, %v3253_v17  ;;  %v9595_v49 = vld [vmem:[#allocation105_spill] sm:$0xff]  ;;  %v6033_v50 = vld [vmem:[#allocation5 + $0x268] sm:$0xf]  ;;  %v6766_v23 = vld [vmem:[#allocation5 + $0x74] sm:$0xf0] }
 0x3a9   : > { %v8382_v5 = vadd.f32 %v3518_v6, %v3430_v54  ;;  %v6830_v54 = vld [vmem:[#allocation5 + $0x274] sm:$0xf0]  ;;  %v5777_v6 = vld [vmem:[#allocation5 + $0x68] sm:$0xf] }
 0x3aa   : > { %v6034_v17 = vor.u32 %v6830_v54, %v6033_v50  ;;  %v5905_v54 = vld [vmem:[#allocation5 + $0x168] sm:$0xf] }
 0x3ab   : > { %9590 = vst [vmem:[#allocation118_spill] sm:$0xff] %v8382_v5 }
 0x3ac   : > { %4071 = vmatpush.bf16.msra.mxu2 %v6034_v17 }
 0x3ad   : > { %v3520_v15 = vpop.f32.mrf.mxu3  ;;  %v3345_v48 = vpop.f32.mrf.mxu1 }
 0x3ae   : > { %v3431_v26 = vpop.f32.mrf.mxu2  ;;  %v3256_v8 = vpop.f32.mrf.mxu0 }
 0x3af   : > { %v3432_v1 = vadd.f32 %v3431_v26, %v3343_v62  ;;  %v3346_v29 = vadd.f32 %v3345_v48, %v3256_v8  ;;  %v6161_v62 = vld [vmem:[#allocation5 + $0x368] sm:$0xf]  ;;  %v6862_v26 = vld [vmem:[#allocation5 + $0x374] sm:$0xf0] }
 0x3b0   : > { %3660 = vmatmul.bf16.gmra.mxu1 %v9593_v34  ;;  %v7099_v34 = vld [vmem:[#allocation7] sm:$0xf] }
 0x3b1   : > { %v8384_v61 = vadd.f32 %v3520_v15, %v3432_v1  ;;  %3571 = vmatmul.bf16.gmra.mxu0 %v9592_v25  ;;  %v5778_v1 = vor.u32 %v6766_v23, %v5777_v6  ;;  %v6162_v15 = vor.u32 %v6862_v26, %v6161_v62  ;;  %v8390_v41 = vperm.slane %v7099_v34, 1  ;;  %v9598_v26 = vld [vmem:[#allocation108_spill] sm:$0xff] }
 0x3b2   : > { %3838 = vmatmul.bf16.gmra.mxu3 %v9595_v49 }
 0x3b3   : > { %9591 = vst [vmem:[#allocation132_spill] sm:$0xff] %v8384_v61  ;;  %3749 = vmatmul.bf16.gmra.mxu2 %v9594_v27  ;;  %3893 = vmatpush.bf16.msra.mxu0 %v5778_v1  ;;  %v6798_v61 = vld [vmem:[#allocation5 + $0x174] sm:$0xf0]  ;;  %v9599_v1 = vld [vmem:[#allocation109_spill] sm:$0xff] }
 0x3b4   : > { %4160 = vmatpush.bf16.msra.mxu3 %v6162_v15  ;;  %414 = vst [vmem:[%s7950_s20 + $0x3e8] sm:$0xff] %v8390_v41  ;;  %v5906_v6 = vor.u32 %v6798_v61, %v5905_v54  ;;  %v9600_v15 = vld [vmem:[#allocation110_spill] sm:$0xff] }
 0x3b5   : > { %v3523_v48 = vpop.f32.mrf.mxu3  ;;  %v3347_v27 = vpop.f32.mrf.mxu1 }
 0x3b6   : > { %v3434_v24 = vpop.f32.mrf.mxu2  ;;  %v3258_v25 = vpop.f32.mrf.mxu0  ;;  %3982 = vmatpush.bf16.msra.mxu1 %v5906_v6 }
 0x3b7   : > { %v3435_v8 = vadd.f32 %v3434_v24, %v3346_v29  ;;  %v3348_v50 = vadd.f32 %v3347_v27, %v3258_v25  ;;  %v9601_v27 = vld [vmem:[#allocation111_spill] sm:$0xff] }
 0x3b9   : > { %v8392_v49 = vadd.f32 %v3523_v48, %v3435_v8 }
 0x3bb   : > { %9596 = vst [vmem:[#allocation133_spill] sm:$0xff] %v8392_v49 }
 0x3bd   : > { %v3525_v24 = vpop.f32.mrf.mxu3  ;;  %v3350_v62 = vpop.f32.mrf.mxu1 }
 0x3be   : > { %v3436_v5 = vpop.f32.mrf.mxu2  ;;  %v3261_v29 = vpop.f32.mrf.mxu0 }
 0x3bf   : > { %v3437_v23 = vadd.f32 %v3436_v5, %v3348_v50  ;;  %v3351_v34 = vadd.f32 %v3350_v62, %v3261_v29 }
 0x3c0   : > { %3665 = vmatmul.bf16.gmra.mxu1 %v9599_v1 }
 0x3c1   : > { %v8396_v17 = vadd.f32 %v3525_v24, %v3437_v23  ;;  %3576 = vmatmul.bf16.gmra.mxu0 %v9598_v26 }
 0x3c2   : > { %3843 = vmatmul.bf16.gmra.mxu3 %v9601_v27  ;;  %v9605_v27 = vld [vmem:[#allocation115_spill] sm:$0xff] }
 0x3c3   : > { %9597 = vst [vmem:[#allocation134_spill] sm:$0xff] %v8396_v17  ;;  %3754 = vmatmul.bf16.gmra.mxu2 %v9600_v15  ;;  %v9604_v15 = vld [vmem:[#allocation114_spill] sm:$0xff] }
 0x3c5   : > { %v3528_v48 = vpop.f32.mrf.mxu3  ;;  %v3352_v5 = vpop.f32.mrf.mxu1 }
 0x3c6   : > { %v3439_v25 = vpop.f32.mrf.mxu2  ;;  %v3263_v61 = vpop.f32.mrf.mxu0 }
 0x3c7   : > { %v3440_v8 = vadd.f32 %v3439_v25, %v3351_v34  ;;  %v3353_v54 = vadd.f32 %v3352_v5, %v3263_v61  ;;  %v9606_v34 = vld [vmem:[#allocation116_spill] sm:$0xff]  ;;  %v9607_v25 = vld [vmem:[#allocation117_spill] sm:$0xff]  ;;  %v6826_v61 = vld [vmem:[#allocation5 + $0x254] sm:$0xf0] }
 0x3c8   : > { %v5761_v5 = vld [vmem:[#allocation5 + $0x48] sm:$0xf] }
 0x3c9   : > { %v8402_v50 = vadd.f32 %v3528_v48, %v3440_v8  ;;  %v6017_v48 = vld [vmem:[#allocation5 + $0x248] sm:$0xf] }
 0x3cb   : > { %9602 = vst [vmem:[#allocation135_spill] sm:$0xff] %v8402_v50  ;;  %v6762_v50 = vld [vmem:[#allocation5 + $0x54] sm:$0xf0] }
 0x3cd   : > { %v3530_v24 = vpop.f32.mrf.mxu3  ;;  %v3631_v62 = vpop.f32.mrf.mxu1 }
 0x3ce   : > { %v3441_v6 = vpop.f32.mrf.mxu2  ;;  %v3542_v29 = vpop.f32.mrf.mxu0 }
 0x3cf   : > { %v3442_v23 = vadd.f32 %v3441_v6, %v3353_v54  ;;  %v3543_v1 = vadd.f32 %v3542_v29, %v8278_v33  ;;  %v6018_v6 = vor.u32 %v6826_v61, %v6017_v48  ;;  %v5889_v48 = vld [vmem:[#allocation5 + $0x148] sm:$0xf]  ;;  %v6794_v61 = vld [vmem:[#allocation5 + $0x154] sm:$0xf0] }
 0x3d0   : > { %3670 = vmatmul.bf16.gmra.mxu1 %v9605_v27 }
 0x3d1   : > { %v8404_v26 = vadd.f32 %v3530_v24, %v3442_v23  ;;  %3581 = vmatmul.bf16.gmra.mxu0 %v9604_v15  ;;  %v3632_v8 = vadd.f32 %v3631_v62, %v3543_v1  ;;  %v6145_v23 = vld [vmem:[#allocation5 + $0x348] sm:$0xf]  ;;  %v6858_v24 = vld [vmem:[#allocation5 + $0x354] sm:$0xf0]  ;;  %v5762_v15 = vor.u32 %v6762_v50, %v5761_v5  ;;  %4072 = vmatpush.bf16.msra.mxu2 %v6018_v6 }
 0x3d2   : > { %3848 = vmatmul.bf16.gmra.mxu3 %v9607_v25  ;;  %v6146_v17 = vor.u32 %v6858_v24, %v6145_v23 }
 0x3d3   : > { %9603 = vst [vmem:[#allocation136_spill] sm:$0xff] %v8404_v26  ;;  %3759 = vmatmul.bf16.gmra.mxu2 %v9606_v34  ;;  %3894 = vmatpush.bf16.msra.mxu0 %v5762_v15 }
 0x3d4   : > { %4161 = vmatpush.bf16.msra.mxu3 %v6146_v17 }
 0x3d5   : > { %v3809_v33 = vpop.f32.mrf.mxu3  ;;  %v3633_v27 = vpop.f32.mrf.mxu1 }
 0x3d6   : > { %v3720_v54 = vpop.f32.mrf.mxu2  ;;  %v3544_v29 = vpop.f32.mrf.mxu0 }
 0x3d7   : > { %v3721_v26 = vadd.f32 %v3720_v54, %v3632_v8  ;;  %v3545_v25 = vadd.f32 %v3544_v29, %v8280_v4  ;;  %v5890_v8 = vor.u32 %v6794_v61, %v5889_v48 }
 0x3d9   : > { %v3810_v34 = vadd.f32 %v3809_v33, %v3721_v26  ;;  %v3634_v62 = vadd.f32 %v3633_v27, %v3545_v25  ;;  %3983 = vmatpush.bf16.msra.mxu1 %v5890_v8 }
 0x3db   : > { %v5314_v1 = vadd.f32 %v3810_v34, %v8390_v41 }
 0x3dd   : > { %5442 = vst [vmem:[%s7950_s20 + $0x8] sm:$0xff] %v5314_v1  ;;  %v3811_v59 = vpop.f32.mrf.mxu3  ;;  %v3636_v5 = vpop.f32.mrf.mxu1 }
 0x3de   : > { %v3722_v49 = vpop.f32.mrf.mxu2  ;;  %v3547_v50 = vpop.f32.mrf.mxu0 }
 0x3df   : > { %v3723_v54 = vadd.f32 %v3722_v49, %v3634_v62  ;;  %v3548_v26 = vadd.f32 %v3547_v50, %v8286_v10 }
 0x3e0   : > { %3675 = vmatmul.bf16.gmra.mxu1 %v8023_v63 }
 0x3e1   : > { %v3812_v6 = vadd.f32 %v3811_v59, %v3723_v54  ;;  %3586 = vmatmul.bf16.gmra.mxu0 %v8021_v38  ;;  %v3637_v49 = vadd.f32 %v3636_v5, %v3548_v26  ;;  %v9608_v54 = vld [vmem:[#allocation119_spill] sm:$0xff]  ;;  %v9609_v5 = vld [vmem:[#allocation120_spill] sm:$0xff] }
 0x3e2   : > { %3853 = vmatmul.bf16.gmra.mxu3 %v8027_v0 }
 0x3e3   : > { %v5318_v4 = vadd.f32 %v3812_v6, %v8390_v41  ;;  %3764 = vmatmul.bf16.gmra.mxu2 %v8025_v2  ;;  %v9611_v6 = vld [vmem:[#allocation122_spill] sm:$0xff] }
 0x3e5   : > { %5446 = vst [vmem:[%s7950_s20 + $0x28] sm:$0xff] %v5318_v4  ;;  %v3814_v27 = vpop.f32.mrf.mxu3  ;;  %v3638_v59 = vpop.f32.mrf.mxu1  ;;  %v6001_v4 = vld [vmem:[#allocation5 + $0x228] sm:$0xf] }
 0x3e6   : > { %v3725_v17 = vpop.f32.mrf.mxu2  ;;  %v3549_v34 = vpop.f32.mrf.mxu0 }
 0x3e7   : > { %v3726_v15 = vadd.f32 %v3725_v17, %v3637_v49  ;;  %v3550_v10 = vadd.f32 %v3549_v34, %v8288_v40  ;;  %v9610_v40 = vld [vmem:[#allocation121_spill] sm:$0xff]  ;;  %v6822_v49 = vld [vmem:[#allocation5 + $0x234] sm:$0xf0] }
 0x3e8   : > { %v6758_v34 = vld [vmem:[#allocation5 + $0x34] sm:$0xf0] }
 0x3e9   : > { %v3815_v25 = vadd.f32 %v3814_v27, %v3726_v15  ;;  %v3639_v24 = vadd.f32 %v3638_v59, %v3550_v10  ;;  %v6002_v15 = vor.u32 %v6822_v49, %v6001_v4  ;;  %v5745_v27 = vld [vmem:[#allocation5 + $0x28] sm:$0xf] }
 0x3eb   : > { %v5322_v23 = vadd.f32 %v3815_v25, %v8390_v41  ;;  %4073 = vmatpush.bf16.msra.mxu2 %v6002_v15 }
 0x3ed   : > { %5450 = vst [vmem:[%s7950_s20 + $0x48] sm:$0xff] %v5322_v23  ;;  %v3816_v1 = vpop.f32.mrf.mxu3  ;;  %v3641_v48 = vpop.f32.mrf.mxu1  ;;  %v5746_v23 = vor.u32 %v6758_v34, %v5745_v27 }
 0x3ee   : > { %v3727_v33 = vpop.f32.mrf.mxu2  ;;  %v3552_v62 = vpop.f32.mrf.mxu0 }
 0x3ef   : > { %v3728_v29 = vadd.f32 %v3727_v33, %v3639_v24  ;;  %v3553_v8 = vadd.f32 %v3552_v62, %v8294_v57  ;;  %v6129_v57 = vld [vmem:[#allocation5 + $0x328] sm:$0xf]  ;;  %v6854_v24 = vld [vmem:[#allocation5 + $0x334] sm:$0xf0]  ;;  %3895 = vmatpush.bf16.msra.mxu0 %v5746_v23 }
 0x3f0   : > { %3680 = vmatmul.bf16.gmra.mxu1 %v9609_v5 }
 0x3f1   : > { %v3817_v61 = vadd.f32 %v3816_v1, %v3728_v29  ;;  %3591 = vmatmul.bf16.gmra.mxu0 %v9608_v54  ;;  %v3642_v26 = vadd.f32 %v3641_v48, %v3553_v8  ;;  %v6130_v29 = vor.u32 %v6854_v24, %v6129_v57  ;;  %v5873_v8 = vld [vmem:[#allocation5 + $0x128] sm:$0xf] }
 0x3f2   : > { %3858 = vmatmul.bf16.gmra.mxu3 %v9611_v6 }
 0x3f3   : > { %v5326_v50 = vadd.f32 %v3817_v61, %v8390_v41  ;;  %3769 = vmatmul.bf16.gmra.mxu2 %v9610_v40  ;;  %4162 = vmatpush.bf16.msra.mxu3 %v6130_v29 }
 0x3f5   : > { %5454 = vst [vmem:[%s7950_s20 + $0x68] sm:$0xff] %v5326_v50  ;;  %v3819_v25 = vpop.f32.mrf.mxu3  ;;  %v3643_v33 = vpop.f32.mrf.mxu1  ;;  %v6790_v50 = vld [vmem:[#allocation5 + $0x134] sm:$0xf0] }
 0x3f6   : > { %v3730_v17 = vpop.f32.mrf.mxu2  ;;  %v3554_v10 = vpop.f32.mrf.mxu0  ;;  %v5874_v4 = vor.u32 %v6790_v50, %v5873_v8 }
 0x3f7   : > { %v3731_v59 = vadd.f32 %v3730_v17, %v3642_v26  ;;  %v3555_v62 = vadd.f32 %v3554_v10, %v8296_v46 }
 0x3f8   : > { %3984 = vmatpush.bf16.msra.mxu1 %v5874_v4 }
 0x3f9   : > { %v3820_v1 = vadd.f32 %v3819_v25, %v3731_v59  ;;  %v3644_v61 = vadd.f32 %v3643_v33, %v3555_v62 }
 0x3fb   : > { %v5330_v48 = vadd.f32 %v3820_v1, %v8390_v41 }
 0x3fd   : > { %5458 = vst [vmem:[%s7950_s20 + $0x88] sm:$0xff] %v5330_v48  ;;  %v3821_v17 = vpop.f32.mrf.mxu3  ;;  %v3646_v34 = vpop.f32.mrf.mxu1 }
 0x3fe   : > { %v3732_v26 = vpop.f32.mrf.mxu2  ;;  %v3557_v27 = vpop.f32.mrf.mxu0 }
 0x3ff   : > { %v3733_v49 = vadd.f32 %v3732_v26, %v3644_v61  ;;  %v3558_v57 = vadd.f32 %v3557_v27, %v8302_v22 }
 0x400   : > { %3685 = vmatmul.bf16.gmra.mxu1 %v8075_v3 }
 0x401   : > { %v3822_v15 = vadd.f32 %v3821_v17, %v3733_v49  ;;  %3596 = vmatmul.bf16.gmra.mxu0 %v8073_v32  ;;  %v3647_v59 = vadd.f32 %v3646_v34, %v3558_v57  ;;  %v9612_v17 = vld [vmem:[#allocation123_spill] sm:$0xff]  ;;  %v9613_v34 = vld [vmem:[#allocation124_spill] sm:$0xff] }
 0x402   : > { %3863 = vmatmul.bf16.gmra.mxu3 %v8079_v21 }
 0x403   : > { %v5334_v46 = vadd.f32 %v3822_v15, %v8390_v41  ;;  %3774 = vmatmul.bf16.gmra.mxu2 %v8077_v19  ;;  %v9615_v15 = vld [vmem:[#allocation126_spill] sm:$0xff] }
 0x405   : > { %5462 = vst [vmem:[%s7950_s20 + $0xa8] sm:$0xff] %v5334_v46  ;;  %v3824_v23 = vpop.f32.mrf.mxu3  ;;  %v3648_v33 = vpop.f32.mrf.mxu1  ;;  %v5985_v46 = vld [vmem:[#allocation5 + $0x208] sm:$0xf] }
 0x406   : > { %v3735_v25 = vpop.f32.mrf.mxu2  ;;  %v3559_v24 = vpop.f32.mrf.mxu0 }
 0x407   : > { %v3736_v10 = vadd.f32 %v3735_v25, %v3647_v59  ;;  %v3560_v22 = vadd.f32 %v3559_v24, %v8304_v7  ;;  %v9614_v7 = vld [vmem:[#allocation125_spill] sm:$0xff]  ;;  %v6818_v59 = vld [vmem:[#allocation5 + $0x214] sm:$0xf0] }
 0x408   : > { %v6754_v24 = vld [vmem:[#allocation5 + $0x14] sm:$0xf0] }
 0x409   : > { %v3825_v29 = vadd.f32 %v3824_v23, %v3736_v10  ;;  %v3649_v62 = vadd.f32 %v3648_v33, %v3560_v22  ;;  %v5986_v10 = vor.u32 %v6818_v59, %v5985_v46  ;;  %v5729_v23 = vld [vmem:[#allocation5 + $0x8] sm:$0xf] }
 0x40b   : > { %v5338_v1 = vadd.f32 %v3825_v29, %v8390_v41  ;;  %4074 = vmatpush.bf16.msra.mxu2 %v5986_v10 }
 0x40d   : > { %5466 = vst [vmem:[%s7950_s20 + $0xc8] sm:$0xff] %v5338_v1  ;;  %v3826_v8 = vpop.f32.mrf.mxu3  ;;  %v3651_v26 = vpop.f32.mrf.mxu1  ;;  %v5730_v1 = vor.u32 %v6754_v24, %v5729_v23 }
 0x40e   : > { %v3737_v48 = vpop.f32.mrf.mxu2  ;;  %v3562_v50 = vpop.f32.mrf.mxu0 }
 0x40f   : > { %v3738_v61 = vadd.f32 %v3737_v48, %v3649_v62  ;;  %v3563_v49 = vadd.f32 %v3562_v50, %v8310_v60  ;;  %v6113_v60 = vld [vmem:[#allocation5 + $0x308] sm:$0xf]  ;;  %v6850_v62 = vld [vmem:[#allocation5 + $0x314] sm:$0xf0]  ;;  %3896 = vmatpush.bf16.msra.mxu0 %v5730_v1 }
 0x410   : > { %3690 = vmatmul.bf16.gmra.mxu1 %v9613_v34 }
 0x411   : > { %v3827_v4 = vadd.f32 %v3826_v8, %v3738_v61  ;;  %3601 = vmatmul.bf16.gmra.mxu0 %v9612_v17  ;;  %v3652_v57 = vadd.f32 %v3651_v26, %v3563_v49  ;;  %v6114_v61 = vor.u32 %v6850_v62, %v6113_v60  ;;  %v5857_v49 = vld [vmem:[#allocation5 + $0x108] sm:$0xf] }
 0x412   : > { %3868 = vmatmul.bf16.gmra.mxu3 %v9615_v15 }
 0x413   : > { %v5342_v27 = vadd.f32 %v3827_v4, %v8390_v41  ;;  %3779 = vmatmul.bf16.gmra.mxu2 %v9614_v7  ;;  %4163 = vmatpush.bf16.msra.mxu3 %v6114_v61 }
 0x415   : > { %5470 = vst [vmem:[%s7950_s20 + $0xe8] sm:$0xff] %v5342_v27  ;;  %v3829_v29 = vpop.f32.mrf.mxu3  ;;  %v3653_v48 = vpop.f32.mrf.mxu1  ;;  %v6786_v27 = vld [vmem:[#allocation5 + $0x114] sm:$0xf0] }
 0x416   : > { %v3740_v25 = vpop.f32.mrf.mxu2  ;;  %v3564_v22 = vpop.f32.mrf.mxu0  ;;  %v5858_v46 = vor.u32 %v6786_v27, %v5857_v49 }
 0x417   : > { %v3741_v33 = vadd.f32 %v3740_v25, %v3652_v57  ;;  %v3565_v50 = vadd.f32 %v3564_v22, %v8312_v16 }
 0x418   : > { %3985 = vmatpush.bf16.msra.mxu1 %v5858_v46 }
 0x419   : > { %v3830_v8 = vadd.f32 %v3829_v29, %v3741_v33  ;;  %v3654_v4 = vadd.f32 %v3653_v48, %v3565_v50 }
 0x41b   : > { %v5346_v26 = vadd.f32 %v3830_v8, %v8390_v41 }
 0x41d   : > { %5474 = vst [vmem:[%s7950_s20 + $0x108] sm:$0xff] %v5346_v26  ;;  %v3831_v25 = vpop.f32.mrf.mxu3  ;;  %v3656_v24 = vpop.f32.mrf.mxu1 }
 0x41e   : > { %v3742_v57 = vpop.f32.mrf.mxu2  ;;  %v3567_v23 = vpop.f32.mrf.mxu0 }
 0x41f   : > { %v3743_v59 = vadd.f32 %v3742_v57, %v3654_v4  ;;  %v3568_v60 = vadd.f32 %v3567_v23, %v8318_v45 }
 0x420   : > { %3695 = vmatmul.bf16.gmra.mxu1 %v8127_v11 }
 0x421   : > { %v3832_v10 = vadd.f32 %v3831_v25, %v3743_v59  ;;  %3606 = vmatmul.bf16.gmra.mxu0 %v8125_v35  ;;  %v3657_v33 = vadd.f32 %v3656_v24, %v3568_v60  ;;  %v9616_v25 = vld [vmem:[#allocation127_spill] sm:$0xff]  ;;  %v9617_v24 = vld [vmem:[#allocation128_spill] sm:$0xff] }
 0x422   : > { %3873 = vmatmul.bf16.gmra.mxu3 %v8131_v58 }
 0x423   : > { %v5350_v16 = vadd.f32 %v3832_v10, %v8390_v41  ;;  %3784 = vmatmul.bf16.gmra.mxu2 %v8129_v36  ;;  %v9619_v10 = vld [vmem:[#allocation130_spill] sm:$0xff] }
 0x425   : > { %5478 = vst [vmem:[%s7950_s20 + $0x128] sm:$0xff] %v5350_v16  ;;  %v3834_v1 = vpop.f32.mrf.mxu3  ;;  %v3658_v48 = vpop.f32.mrf.mxu1  ;;  %v6609_v16 = vld [vmem:[#allocation5 + $0x6e8] sm:$0xf] }
 0x426   : > { %v3745_v29 = vpop.f32.mrf.mxu2  ;;  %v3569_v62 = vpop.f32.mrf.mxu0 }
 0x427   : > { %v3746_v22 = vadd.f32 %v3745_v29, %v3657_v33  ;;  %v3570_v45 = vadd.f32 %v3569_v62, %v8320_v31  ;;  %v9618_v31 = vld [vmem:[#allocation129_spill] sm:$0xff]  ;;  %v6974_v33 = vld [vmem:[#allocation5 + $0x6f4] sm:$0xf0] }
 0x428   : > { %v6910_v62 = vld [vmem:[#allocation5 + $0x4f4] sm:$0xf0] }
 0x429   : > { %v3835_v61 = vadd.f32 %v3834_v1, %v3746_v22  ;;  %v3659_v50 = vadd.f32 %v3658_v48, %v3570_v45  ;;  %v6610_v22 = vor.u32 %v6974_v33, %v6609_v16  ;;  %v6353_v1 = vld [vmem:[#allocation5 + $0x4e8] sm:$0xf] }
 0x42b   : > { %v5354_v8 = vadd.f32 %v3835_v61, %v8390_v41  ;;  %4423 = vmatpush.bf16.msrb.mxu2 %v6610_v22 }
 0x42d   : > { %5482 = vst [vmem:[%s7950_s20 + $0x148] sm:$0xff] %v5354_v8  ;;  %v3836_v49 = vpop.f32.mrf.mxu3  ;;  %v3661_v57 = vpop.f32.mrf.mxu1  ;;  %v6354_v8 = vor.u32 %v6910_v62, %v6353_v1 }
 0x42e   : > { %v3747_v26 = vpop.f32.mrf.mxu2  ;;  %v3572_v27 = vpop.f32.mrf.mxu0 }
 0x42f   : > { %v3748_v4 = vadd.f32 %v3747_v26, %v3659_v50  ;;  %v3573_v59 = vadd.f32 %v3572_v27, %v8326_v43  ;;  %v6737_v43 = vld [vmem:[#allocation5 + $0x7e8] sm:$0xf]  ;;  %v7006_v50 = vld [vmem:[#allocation5 + $0x7f4] sm:$0xf0]  ;;  %4245 = vmatpush.bf16.msrb.mxu0 %v6354_v8 }
 0x430   : > { %3700 = vmatmul.bf16.gmra.mxu1 %v9617_v24 }
 0x431   : > { %v3837_v46 = vadd.f32 %v3836_v49, %v3748_v4  ;;  %3611 = vmatmul.bf16.gmra.mxu0 %v9616_v25  ;;  %v3662_v60 = vadd.f32 %v3661_v57, %v3573_v59  ;;  %v6738_v4 = vor.u32 %v7006_v50, %v6737_v43  ;;  %v6481_v59 = vld [vmem:[#allocation5 + $0x5e8] sm:$0xf] }
 0x432   : > { %3878 = vmatmul.bf16.gmra.mxu3 %v9619_v10 }
 0x433   : > { %v5358_v23 = vadd.f32 %v3837_v46, %v8390_v41  ;;  %3789 = vmatmul.bf16.gmra.mxu2 %v9618_v31  ;;  %4512 = vmatpush.bf16.msrb.mxu3 %v6738_v4 }
 0x435   : > { %5486 = vst [vmem:[%s7950_s20 + $0x168] sm:$0xff] %v5358_v23  ;;  %v3839_v61 = vpop.f32.mrf.mxu3  ;;  %v3663_v26 = vpop.f32.mrf.mxu1  ;;  %v6942_v23 = vld [vmem:[#allocation5 + $0x5f4] sm:$0xf0] }
 0x436   : > { %v3750_v29 = vpop.f32.mrf.mxu2  ;;  %v3574_v45 = vpop.f32.mrf.mxu0  ;;  %v6482_v16 = vor.u32 %v6942_v23, %v6481_v59 }
 0x437   : > { %v3751_v48 = vadd.f32 %v3750_v29, %v3662_v60  ;;  %v3575_v27 = vadd.f32 %v3574_v45, %v8328_v28 }
 0x438   : > { %4334 = vmatpush.bf16.msrb.mxu1 %v6482_v16 }
 0x439   : > { %v3840_v49 = vadd.f32 %v3839_v61, %v3751_v48  ;;  %v3664_v46 = vadd.f32 %v3663_v26, %v3575_v27 }
 0x43b   : > { %v5362_v57 = vadd.f32 %v3840_v49, %v8390_v41 }
 0x43d   : > { %5490 = vst [vmem:[%s7950_s20 + $0x188] sm:$0xff] %v5362_v57  ;;  %v3841_v29 = vpop.f32.mrf.mxu3  ;;  %v3666_v62 = vpop.f32.mrf.mxu1 }
 0x43e   : > { %v3752_v60 = vpop.f32.mrf.mxu2  ;;  %v3577_v1 = vpop.f32.mrf.mxu0 }
 0x43f   : > { %v3753_v33 = vadd.f32 %v3752_v60, %v3664_v46  ;;  %v3578_v43 = vadd.f32 %v3577_v1, %v8334_v9  ;;  %v6593_v1 = vld [vmem:[#allocation5 + $0x6c8] sm:$0xf] }
 0x440   : > { %3705 = vmatmul.bf16.gmra.mxu1 %v8179_v18 }
 0x441   : > { %v3842_v22 = vadd.f32 %v3841_v29, %v3753_v33  ;;  %3616 = vmatmul.bf16.gmra.mxu0 %v8177_v42  ;;  %v3667_v48 = vadd.f32 %v3666_v62, %v3578_v43  ;;  %v6970_v62 = vld [vmem:[#allocation5 + $0x6d4] sm:$0xf0] }
 0x442   : > { %3883 = vmatmul.bf16.gmra.mxu3 %v8183_v56  ;;  %v6594_v43 = vor.u32 %v6970_v62, %v6593_v1 }
 0x443   : > { %v5366_v28 = vadd.f32 %v3842_v22, %v8390_v41  ;;  %3794 = vmatmul.bf16.gmra.mxu2 %v8181_v39 }
 0x444   : > { %4424 = vmatpush.bf16.msrb.mxu2 %v6594_v43  ;;  %v9620_v43 = vld [vmem:[#allocation19_spill] sm:$0xff] }
 0x445   : > { %5494 = vst [vmem:[%s7950_s20 + $0x1a8] sm:$0xff] %v5366_v28  ;;  %v3844_v8 = vpop.f32.mrf.mxu3  ;;  %v3668_v26 = vpop.f32.mrf.mxu1  ;;  %v6337_v28 = vld [vmem:[#allocation5 + $0x4c8] sm:$0xf] }
 0x446   : > { %v3755_v61 = vpop.f32.mrf.mxu2  ;;  %v3579_v50 = vpop.f32.mrf.mxu0 }
 0x447   : > { %v3756_v45 = vadd.f32 %v3755_v61, %v3667_v48  ;;  %v3580_v9 = vadd.f32 %v3579_v50, %v8336_v44  ;;  %v6906_v48 = vld [vmem:[#allocation5 + $0x4d4] sm:$0xf0] }
 0x448   : > { %v6338_v50 = vor.u32 %v6906_v48, %v6337_v28 }
 0x449   : > { %v3845_v4 = vadd.f32 %v3844_v8, %v3756_v45  ;;  %v3669_v27 = vadd.f32 %v3668_v26, %v3580_v9  ;;  %v7002_v26 = vld [vmem:[#allocation5 + $0x7d4] sm:$0xf0] }
 0x44a   : > { %4246 = vmatpush.bf16.msrb.mxu0 %v6338_v50 }
 0x44b   : > { %v5370_v49 = vadd.f32 %v3845_v4, %v8390_v41 }
 0x44d   : > { %5498 = vst [vmem:[%s7950_s20 + $0x1c8] sm:$0xff] %v5370_v49  ;;  %v3846_v59 = vpop.f32.mrf.mxu3  ;;  %v3671_v60 = vpop.f32.mrf.mxu1 }
 0x44e   : > { %v3757_v57 = vpop.f32.mrf.mxu2  ;;  %v3582_v23 = vpop.f32.mrf.mxu0 }
 0x44f   : > { %v3758_v46 = vadd.f32 %v3757_v57, %v3669_v27  ;;  %v3583_v33 = vadd.f32 %v3582_v23, %v8342_v30  ;;  %v6721_v30 = vld [vmem:[#allocation5 + $0x7c8] sm:$0xf]  ;;  %v6938_v23 = vld [vmem:[#allocation5 + $0x5d4] sm:$0xf0] }
 0x450   : > { %3986 = vmatmul.bf16.vlgmr.msra.gmra.mxu1 %v7438_v51  ;;  %v6722_v9 = vor.u32 %v7002_v26, %v6721_v30  ;;  %v5955_v51 = vld [vmem:[#allocation5 + $0x1d8] sm:$0xf0] }
 0x451   : > { %v3847_v16 = vadd.f32 %v3846_v59, %v3758_v46  ;;  %3897 = vmatmul.bf16.vlgmr.msra.gmra.mxu0 %v7436_v47  ;;  %v3672_v44 = vadd.f32 %v3671_v60, %v3583_v33  ;;  %v6465_v59 = vld [vmem:[#allocation5 + $0x5c8] sm:$0xf] }
 0x452   : > { %4164 = vmatmul.bf16.vlgmr.msra.gmra.mxu3 %v7442_v53 }
 0x453   : > { %v5374_v29 = vadd.f32 %v3847_v16, %v8390_v41  ;;  %4075 = vmatmul.bf16.vlgmr.msra.gmra.mxu2 %v7440_v52  ;;  %4513 = vmatpush.bf16.msrb.mxu3 %v6722_v9  ;;  %v6466_v16 = vor.u32 %v6938_v23, %v6465_v59 }
 0x455   : > { %5502 = vst [vmem:[%s7950_s20 + $0x1e8] sm:$0xff] %v5374_v29  ;;  %v3849_v45 = vpop.f32.mrf.mxu3  ;;  %v3673_v4 = vpop.f32.mrf.mxu1  ;;  %4335 = vmatpush.bf16.msrb.mxu1 %v6466_v16 }
 0x456   : > { %v3760_v22 = vpop.f32.mrf.mxu2  ;;  %v3584_v8 = vpop.f32.mrf.mxu0 }
 0x457   : > { %v3761_v61 = vadd.f32 %v3760_v22, %v3672_v44  ;;  %v3585_v27 = vadd.f32 %v3584_v8, %v8344_v37 }
 0x459   : > { %v3850_v49 = vadd.f32 %v3849_v45, %v3761_v61  ;;  %v3674_v46 = vadd.f32 %v3673_v4, %v3585_v27 }
 0x45b   : > { %v5378_v57 = vadd.f32 %v3850_v49, %v8390_v41 }
 0x45d   : > { %5506 = vst [vmem:[%s7950_s20 + $0x208] sm:$0xff] %v5378_v57  ;;  %v3851_v29 = vpop.f32.mrf.mxu3  ;;  %v3676_v1 = vpop.f32.mrf.mxu1 }
 0x45e   : > { %v3762_v60 = vpop.f32.mrf.mxu2  ;;  %v3587_v44 = vpop.f32.mrf.mxu0 }
 0x45f   : > { %v3763_v33 = vadd.f32 %v3762_v60, %v3674_v46  ;;  %v3588_v22 = vadd.f32 %v3587_v44, %v8350_v20  ;;  %v9621_v20 = vld [vmem:[#allocation100_spill] sm:$0xff]  ;;  %v9622_v60 = vld [vmem:[#allocation101_spill] sm:$0xff] }
 0x460   : > { %3991 = vmatmul.bf16.gmra.mxu1 %v7458_v13  ;;  %v9624_v44 = vld [vmem:[#allocation21_spill] sm:$0xff]  ;;  %v5971_v13 = vld [vmem:[#allocation5 + $0x1f8] sm:$0xf0] }
 0x461   : > { %v3852_v62 = vadd.f32 %v3851_v29, %v3763_v33  ;;  %3902 = vmatmul.bf16.gmra.mxu0 %v7456_v12  ;;  %v3677_v28 = vadd.f32 %v3676_v1, %v3588_v22  ;;  %v9623_v33 = vld [vmem:[#allocation20_spill] sm:$0xff]  ;;  %v9625_v1 = vld [vmem:[#allocation22_spill] sm:$0xff] }
 0x462   : > { %4169 = vmatmul.bf16.gmra.mxu3 %v9620_v43 }
 0x463   : > { %v5382_v37 = vadd.f32 %v3852_v62, %v8390_v41  ;;  %4080 = vmatmul.bf16.gmra.mxu2 %v7460_v14  ;;  %v9626_v62 = vld [vmem:[#allocation23_spill] sm:$0xff] }
 0x465   : > { %5510 = vst [vmem:[%s7950_s20 + $0x228] sm:$0xff] %v5382_v37  ;;  %v3854_v61 = vpop.f32.mrf.mxu3  ;;  %v3678_v8 = vpop.f32.mrf.mxu1  ;;  %v6577_v37 = vld [vmem:[#allocation5 + $0x6a8] sm:$0xf] }
 0x466   : > { %v3765_v48 = vpop.f32.mrf.mxu2  ;;  %v3589_v45 = vpop.f32.mrf.mxu0 }
 0x467   : > { %v3766_v30 = vadd.f32 %v3765_v48, %v3677_v28  ;;  %v3590_v26 = vadd.f32 %v3589_v45, %v9621_v20  ;;  %v6966_v28 = vld [vmem:[#allocation5 + $0x6b4] sm:$0xf0] }
 0x468   : > { %v6902_v45 = vld [vmem:[#allocation5 + $0x4b4] sm:$0xf0] }
 0x469   : > { %v3855_v50 = vadd.f32 %v3854_v61, %v3766_v30  ;;  %v3679_v9 = vadd.f32 %v3678_v8, %v3590_v26  ;;  %v6578_v30 = vor.u32 %v6966_v28, %v6577_v37  ;;  %v6321_v61 = vld [vmem:[#allocation5 + $0x4a8] sm:$0xf] }
 0x46a   : > { %v6705_v8 = vld [vmem:[#allocation5 + $0x7a8] sm:$0xf] }
 0x46b   : > { %v5386_v4 = vadd.f32 %v3855_v50, %v8390_v41  ;;  %4425 = vmatpush.bf16.msrb.mxu2 %v6578_v30 }
 0x46d   : > { %5514 = vst [vmem:[%s7950_s20 + $0x248] sm:$0xff] %v5386_v4  ;;  %v3856_v57 = vpop.f32.mrf.mxu3  ;;  %v3681_v59 = vpop.f32.mrf.mxu1  ;;  %v6322_v4 = vor.u32 %v6902_v45, %v6321_v61 }
 0x46e   : > { %v3767_v49 = vpop.f32.mrf.mxu2  ;;  %v3592_v46 = vpop.f32.mrf.mxu0 }
 0x46f   : > { %v3768_v27 = vadd.f32 %v3767_v49, %v3679_v9  ;;  %v3593_v16 = vadd.f32 %v3592_v46, %v9622_v60  ;;  %v6998_v9 = vld [vmem:[#allocation5 + $0x7b4] sm:$0xf0]  ;;  %4247 = vmatpush.bf16.msrb.mxu0 %v6322_v4  ;;  %v9630_v4 = vld [vmem:[#allocation25_spill] sm:$0xff] }
 0x470   : > { %3996 = vmatmul.bf16.gmra.mxu1 %v9624_v44  ;;  %v9627_v46 = vld [vmem:[#allocation106_spill] sm:$0xff] }
 0x471   : > { %v3857_v23 = vadd.f32 %v3856_v57, %v3768_v27  ;;  %3907 = vmatmul.bf16.gmra.mxu0 %v9623_v33  ;;  %v3682_v22 = vadd.f32 %v3681_v59, %v3593_v16  ;;  %v6706_v27 = vor.u32 %v6998_v9, %v6705_v8  ;;  %v6449_v16 = vld [vmem:[#allocation5 + $0x5a8] sm:$0xf]  ;;  %v9628_v8 = vld [vmem:[#allocation107_spill] sm:$0xff]  ;;  %v9631_v9 = vld [vmem:[#allocation26_spill] sm:$0xff] }
 0x472   : > { %4174 = vmatmul.bf16.gmra.mxu3 %v9626_v62  ;;  %v6914_v44 = vld [vmem:[#allocation5 + $0x514] sm:$0xf0] }
 0x473   : > { %v5390_v29 = vadd.f32 %v3857_v23, %v8390_v41  ;;  %4085 = vmatmul.bf16.gmra.mxu2 %v9625_v1  ;;  %4514 = vmatpush.bf16.msrb.mxu3 %v6706_v27 }
 0x475   : > { %5518 = vst [vmem:[%s7950_s20 + $0x268] sm:$0xff] %v5390_v29  ;;  %v3859_v20 = vpop.f32.mrf.mxu3  ;;  %v3683_v49 = vpop.f32.mrf.mxu1  ;;  %v6934_v29 = vld [vmem:[#allocation5 + $0x5b4] sm:$0xf0] }
 0x476   : > { %v3770_v48 = vpop.f32.mrf.mxu2  ;;  %v3594_v26 = vpop.f32.mrf.mxu0  ;;  %v6450_v37 = vor.u32 %v6934_v29, %v6449_v16  ;;  %v9633_v29 = vld [vmem:[#allocation112_spill] sm:$0xff] }
 0x477   : > { %v3771_v50 = vadd.f32 %v3770_v48, %v3682_v22  ;;  %v3595_v23 = vadd.f32 %v3594_v26, %v9627_v46 }
 0x478   : > { %4336 = vmatpush.bf16.msrb.mxu1 %v6450_v37 }
 0x479   : > { %v3860_v57 = vadd.f32 %v3859_v20, %v3771_v50  ;;  %v3684_v60 = vadd.f32 %v3683_v49, %v3595_v23  ;;  %v9629_v20 = vld [vmem:[#allocation24_spill] sm:$0xff]  ;;  %v9632_v49 = vld [vmem:[#allocation27_spill] sm:$0xff] }
 0x47b   : > { %v5394_v59 = vadd.f32 %v3860_v57, %v8390_v41 }
 0x47d   : > { %5522 = vst [vmem:[%s7950_s20 + $0x288] sm:$0xff] %v5394_v59  ;;  %v3861_v48 = vpop.f32.mrf.mxu3  ;;  %v3686_v45 = vpop.f32.mrf.mxu1 }
 0x47e   : > { %v3772_v22 = vpop.f32.mrf.mxu2  ;;  %v3597_v61 = vpop.f32.mrf.mxu0 }
 0x47f   : > { %v3773_v28 = vadd.f32 %v3772_v22, %v3684_v60  ;;  %v3598_v50 = vadd.f32 %v3597_v61, %v9628_v8 }
 0x480   : > { %4001 = vmatmul.bf16.gmra.mxu1 %v9630_v4 }
 0x481   : > { %v3862_v30 = vadd.f32 %v3861_v48, %v3773_v28  ;;  %3912 = vmatmul.bf16.gmra.mxu0 %v9629_v20  ;;  %v3687_v27 = vadd.f32 %v3686_v45, %v3598_v50  ;;  %v9634_v50 = vld [vmem:[#allocation28_spill] sm:$0xff] }
 0x482   : > { %4179 = vmatmul.bf16.gmra.mxu3 %v9632_v49 }
 0x483   : > { %v5398_v26 = vadd.f32 %v3862_v30, %v8390_v41  ;;  %4090 = vmatmul.bf16.gmra.mxu2 %v9631_v9 }
 0x485   : > { %5526 = vst [vmem:[%s7950_s20 + $0x2a8] sm:$0xff] %v5398_v26  ;;  %v3864_v23 = vpop.f32.mrf.mxu3  ;;  %v3688_v60 = vpop.f32.mrf.mxu1 }
 0x486   : > { %v3775_v57 = vpop.f32.mrf.mxu2  ;;  %v3599_v59 = vpop.f32.mrf.mxu0 }
 0x487   : > { %v3776_v46 = vadd.f32 %v3775_v57, %v3687_v27  ;;  %v3600_v22 = vadd.f32 %v3599_v59, %v9633_v29  ;;  %v9635_v57 = vld [vmem:[#allocation29_spill] sm:$0xff] }
 0x489   : > { %v3865_v16 = vadd.f32 %v3864_v23, %v3776_v46  ;;  %v3689_v28 = vadd.f32 %v3688_v60, %v3600_v22  ;;  %v9636_v46 = vld [vmem:[#allocation30_spill] sm:$0xff]  ;;  %v9637_v23 = vld [vmem:[#allocation31_spill] sm:$0xff]  ;;  %v6561_v60 = vld [vmem:[#allocation5 + $0x688] sm:$0xf] }
 0x48b   : > { %v5402_v37 = vadd.f32 %v3865_v16, %v8390_v41  ;;  %v6962_v16 = vld [vmem:[#allocation5 + $0x694] sm:$0xf0] }
 0x48c   : > { %v6562_v22 = vor.u32 %v6962_v16, %v6561_v60  ;;  %v6433_v60 = vld [vmem:[#allocation5 + $0x588] sm:$0xf]  ;;  %v6930_v16 = vld [vmem:[#allocation5 + $0x594] sm:$0xf0] }
 0x48d   : > { %5530 = vst [vmem:[%s7950_s20 + $0x2c8] sm:$0xff] %v5402_v37  ;;  %v3866_v30 = vpop.f32.mrf.mxu3  ;;  %v3691_v49 = vpop.f32.mrf.mxu1  ;;  %v6305_v37 = vld [vmem:[#allocation5 + $0x488] sm:$0xf] }
 0x48e   : > { %v3777_v48 = vpop.f32.mrf.mxu2  ;;  %v3602_v8 = vpop.f32.mrf.mxu0  ;;  %4426 = vmatpush.bf16.msrb.mxu2 %v6562_v22 }
 0x48f   : > { %v3778_v61 = vadd.f32 %v3777_v48, %v3689_v28  ;;  %v3603_v45 = vadd.f32 %v3602_v8, %v8374_v55  ;;  %v6898_v28 = vld [vmem:[#allocation5 + $0x494] sm:$0xf0]  ;;  %v6689_v55 = vld [vmem:[#allocation5 + $0x788] sm:$0xf] }
 0x490   : > { %4006 = vmatmul.bf16.gmra.mxu1 %v9635_v57  ;;  %v6306_v8 = vor.u32 %v6898_v28, %v6305_v37 }
 0x491   : > { %v3867_v26 = vadd.f32 %v3866_v30, %v3778_v61  ;;  %3917 = vmatmul.bf16.gmra.mxu0 %v9634_v50  ;;  %v3692_v59 = vadd.f32 %v3691_v49, %v3603_v45 }
 0x492   : > { %4184 = vmatmul.bf16.gmra.mxu3 %v9637_v23  ;;  %v9638_v23 = vld [vmem:[#allocation113_spill] sm:$0xff]  ;;  %4248 = vmatpush.bf16.msrb.mxu0 %v6306_v8 }
 0x493   : > { %v5406_v27 = vadd.f32 %v3867_v26, %v8390_v41  ;;  %4095 = vmatmul.bf16.gmra.mxu2 %v9636_v46  ;;  %v6994_v26 = vld [vmem:[#allocation5 + $0x794] sm:$0xf0] }
 0x494   : > { %v6690_v46 = vor.u32 %v6994_v26, %v6689_v55  ;;  %v9639_v55 = vld [vmem:[#allocation118_spill] sm:$0xff] }
 0x495   : > { %5534 = vst [vmem:[%s7950_s20 + $0x2e8] sm:$0xff] %v5406_v27  ;;  %v3869_v61 = vpop.f32.mrf.mxu3  ;;  %v3693_v57 = vpop.f32.mrf.mxu1 }
 0x496   : > { %v3780_v29 = vpop.f32.mrf.mxu2  ;;  %v3604_v30 = vpop.f32.mrf.mxu0  ;;  %4515 = vmatpush.bf16.msrb.mxu3 %v6690_v46  ;;  %v9641_v46 = vld [vmem:[#allocation33_spill] sm:$0xff] }
 0x497   : > { %v3781_v48 = vadd.f32 %v3780_v29, %v3692_v59  ;;  %v3605_v27 = vadd.f32 %v3604_v30, %v9638_v23  ;;  %v6434_v29 = vor.u32 %v6930_v16, %v6433_v60  ;;  %v9640_v23 = vld [vmem:[#allocation32_spill] sm:$0xff] }
 0x498   : > { %v9644_v60 = vld [vmem:[#allocation132_spill] sm:$0xff] }
 0x499   : > { %v3870_v50 = vadd.f32 %v3869_v61, %v3781_v48  ;;  %v3694_v45 = vadd.f32 %v3693_v57, %v3605_v27  ;;  %4337 = vmatpush.bf16.msrb.mxu1 %v6434_v29  ;;  %v9642_v57 = vld [vmem:[#allocation34_spill] sm:$0xff]  ;;  %v9643_v61 = vld [vmem:[#allocation35_spill] sm:$0xff] }
 0x49b   : > { %v5410_v49 = vadd.f32 %v3870_v50, %v8390_v41 }
 0x49d   : > { %5538 = vst [vmem:[%s7950_s20 + $0x308] sm:$0xff] %v5410_v49  ;;  %v3871_v37 = vpop.f32.mrf.mxu3  ;;  %v3696_v4 = vpop.f32.mrf.mxu1 }
 0x49e   : > { %v3782_v59 = vpop.f32.mrf.mxu2  ;;  %v3607_v28 = vpop.f32.mrf.mxu0 }
 0x49f   : > { %v3783_v9 = vadd.f32 %v3782_v59, %v3694_v45  ;;  %v3608_v48 = vadd.f32 %v3607_v28, %v9639_v55 }
 0x4a0   : > { %4011 = vmatmul.bf16.gmra.mxu1 %v9641_v46 }
 0x4a1   : > { %v3872_v22 = vadd.f32 %v3871_v37, %v3783_v9  ;;  %3922 = vmatmul.bf16.gmra.mxu0 %v9640_v23  ;;  %v3697_v30 = vadd.f32 %v3696_v4, %v3608_v48  ;;  %v9645_v4 = vld [vmem:[#allocation133_spill] sm:$0xff]  ;;  %v6918_v23 = vld [vmem:[#allocation5 + $0x534] sm:$0xf0] }
 0x4a2   : > { %4189 = vmatmul.bf16.gmra.mxu3 %v9643_v61 }
 0x4a3   : > { %v5414_v50 = vadd.f32 %v3872_v22, %v8390_v41  ;;  %4100 = vmatmul.bf16.gmra.mxu2 %v9642_v57 }
 0x4a5   : > { %5542 = vst [vmem:[%s7950_s20 + $0x328] sm:$0xff] %v5414_v50  ;;  %v3874_v27 = vpop.f32.mrf.mxu3  ;;  %v3698_v9 = vpop.f32.mrf.mxu1 }
 0x4a6   : > { %v3785_v8 = vpop.f32.mrf.mxu2  ;;  %v3609_v49 = vpop.f32.mrf.mxu0 }
 0x4a7   : > { %v3786_v26 = vadd.f32 %v3785_v8, %v3697_v30  ;;  %v3610_v16 = vadd.f32 %v3609_v49, %v9644_v60  ;;  %v9646_v30 = vld [vmem:[#allocation36_spill] sm:$0xff]  ;;  %v9649_v49 = vld [vmem:[#allocation39_spill] sm:$0xff]  ;;  %v6958_v60 = vld [vmem:[#allocation5 + $0x674] sm:$0xf0] }
 0x4a9   : > { %v3875_v45 = vadd.f32 %v3874_v27, %v3786_v26  ;;  %v3699_v29 = vadd.f32 %v3698_v9, %v3610_v16  ;;  %v9647_v26 = vld [vmem:[#allocation37_spill] sm:$0xff]  ;;  %v9648_v27 = vld [vmem:[#allocation38_spill] sm:$0xff] }
 0x4ab   : > { %v5418_v59 = vadd.f32 %v3875_v45, %v8390_v41  ;;  %v6545_v45 = vld [vmem:[#allocation5 + $0x668] sm:$0xf] }
 0x4ad   : > { %5546 = vst [vmem:[%s7950_s20 + $0x348] sm:$0xff] %v5418_v59  ;;  %v3876_v22 = vpop.f32.mrf.mxu3  ;;  %v3701_v61 = vpop.f32.mrf.mxu1  ;;  %v6546_v59 = vor.u32 %v6958_v60, %v6545_v45 }
 0x4ae   : > { %v3787_v37 = vpop.f32.mrf.mxu2  ;;  %v3612_v55 = vpop.f32.mrf.mxu0 }
 0x4af   : > { %v3788_v28 = vadd.f32 %v3787_v37, %v3699_v29  ;;  %v3613_v48 = vadd.f32 %v3612_v55, %v9645_v4  ;;  %v6289_v29 = vld [vmem:[#allocation5 + $0x468] sm:$0xf]  ;;  %v6894_v37 = vld [vmem:[#allocation5 + $0x474] sm:$0xf0]  ;;  %4427 = vmatpush.bf16.msrb.mxu2 %v6546_v59 }
 0x4b0   : > { %4016 = vmatmul.bf16.gmra.mxu1 %v9647_v26 }
 0x4b1   : > { %v3877_v50 = vadd.f32 %v3876_v22, %v3788_v28  ;;  %3927 = vmatmul.bf16.gmra.mxu0 %v9646_v30  ;;  %v3702_v9 = vadd.f32 %v3701_v61, %v3613_v48  ;;  %v6673_v28 = vld [vmem:[#allocation5 + $0x768] sm:$0xf]  ;;  %v6990_v30 = vld [vmem:[#allocation5 + $0x774] sm:$0xf0] }
 0x4b2   : > { %4194 = vmatmul.bf16.gmra.mxu3 %v9649_v49  ;;  %v9650_v49 = vld [vmem:[#allocation134_spill] sm:$0xff]  ;;  %v6417_v61 = vld [vmem:[#allocation5 + $0x568] sm:$0xf] }
 0x4b3   : > { %v5422_v8 = vadd.f32 %v3877_v50, %v8390_v41  ;;  %4105 = vmatmul.bf16.gmra.mxu2 %v9648_v27  ;;  %v6290_v50 = vor.u32 %v6894_v37, %v6289_v29  ;;  %v6674_v27 = vor.u32 %v6990_v30, %v6673_v28  ;;  %v6926_v48 = vld [vmem:[#allocation5 + $0x574] sm:$0xf0] }
 0x4b4   : > { %v6418_v45 = vor.u32 %v6926_v48, %v6417_v61 }
 0x4b5   : > { %5550 = vst [vmem:[%s7950_s20 + $0x368] sm:$0xff] %v5422_v8  ;;  %v3879_v55 = vpop.f32.mrf.mxu3  ;;  %v3703_v26 = vpop.f32.mrf.mxu1  ;;  %4249 = vmatpush.bf16.msrb.mxu0 %v6290_v50  ;;  %4516 = vmatpush.bf16.msrb.mxu3 %v6674_v27  ;;  %v9653_v50 = vld [vmem:[#allocation41_spill] sm:$0xff] }
 0x4b6   : > { %v3790_v16 = vpop.f32.mrf.mxu2  ;;  %v3614_v4 = vpop.f32.mrf.mxu0  ;;  %4338 = vmatpush.bf16.msrb.mxu1 %v6418_v45 }
 0x4b7   : > { %v3791_v22 = vadd.f32 %v3790_v16, %v3702_v9  ;;  %v3615_v8 = vadd.f32 %v3614_v4, %v9650_v49  ;;  %v7100_v4 = vld [vmem:[%s7950_s20 + $0x3e8] sm:$0xff] }
 0x4b9   : > { %v3880_v57 = vadd.f32 %v3879_v55, %v3791_v22  ;;  %v3704_v9 = vadd.f32 %v3703_v26, %v3615_v8  ;;  %v9651_v22 = vld [vmem:[#allocation135_spill] sm:$0xff]  ;;  %v9652_v55 = vld [vmem:[#allocation40_spill] sm:$0xff] }
 0x4bb   : > { %v5426_v60 = vadd.f32 %v3880_v57, %v8390_v41  ;;  %v9654_v41 = vld [vmem:[#allocation42_spill] sm:$0xff]  ;;  %v9655_v57 = vld [vmem:[#allocation43_spill] sm:$0xff] }
 0x4bd   : > { %5554 = vst [vmem:[%s7950_s20 + $0x388] sm:$0xff] %v5426_v60  ;;  %v3881_v37 = vpop.f32.mrf.mxu3  ;;  %v3706_v30 = vpop.f32.mrf.mxu1 }
 0x4be   : > { %v3792_v16 = vpop.f32.mrf.mxu2  ;;  %v3617_v59 = vpop.f32.mrf.mxu0 }
 0x4bf   : > { %v3793_v29 = vadd.f32 %v3792_v16, %v3704_v9  ;;  %v3618_v49 = vadd.f32 %v3617_v59, %v9651_v22  ;;  %v9656_v16 = vld [vmem:[#allocation136_spill] sm:$0xff] }
 0x4c0   : > { %4021 = vmatmul.bf16.gmra.mxu1 %v9653_v50 }
 0x4c1   : > { %v3882_v28 = vadd.f32 %v3881_v37, %v3793_v29  ;;  %3932 = vmatmul.bf16.gmra.mxu0 %v9652_v55  ;;  %v3707_v26 = vadd.f32 %v3706_v30, %v3618_v49  ;;  %v9657_v49 = vld [vmem:[#allocation44_spill] sm:$0xff] }
 0x4c2   : > { %4199 = vmatmul.bf16.gmra.mxu3 %v9655_v57  ;;  %v542_v57 = vld [vmem:[%s7950_s20 + $0x3e8] sm:$0xff] }
 0x4c3   : > { %v5430_v27 = vadd.f32 %v7100_v4, %v3882_v28  ;;  %4110 = vmatmul.bf16.gmra.mxu2 %v9654_v41 }
 0x4c5   : > { %5558 = vst [vmem:[%s7950_s20 + $0x3a8] sm:$0xff] %v5430_v27  ;;  %v3884_v48 = vpop.f32.mrf.mxu3  ;;  %v3708_v60 = vpop.f32.mrf.mxu1 }
 0x4c6   : > { %v3795_v8 = vpop.f32.mrf.mxu2  ;;  %v3619_v45 = vpop.f32.mrf.mxu0 }
 0x4c7   : > { %v3796_v61 = vadd.f32 %v3795_v8, %v3707_v26  ;;  %v3620_v29 = vadd.f32 %v3619_v45, %v9656_v16  ;;  %v9658_v8 = vld [vmem:[#allocation45_spill] sm:$0xff]  ;;  %v6954_v45 = vld [vmem:[#allocation5 + $0x654] sm:$0xf0] }
 0x4c8   : > { %v6890_v16 = vld [vmem:[#allocation5 + $0x454] sm:$0xf0] }
 0x4c9   : > { %v3885_v9 = vadd.f32 %v3884_v48, %v3796_v61  ;;  %v3709_v59 = vadd.f32 %v3708_v60, %v3620_v29  ;;  %v9659_v61 = vld [vmem:[#allocation46_spill] sm:$0xff]  ;;  %v9660_v48 = vld [vmem:[#allocation47_spill] sm:$0xff]  ;;  %v6273_v60 = vld [vmem:[#allocation5 + $0x448] sm:$0xf] }
 0x4ca   : > { %v6657_v29 = vld [vmem:[#allocation5 + $0x748] sm:$0xf] }
 0x4cb   : > { %v5434_v37 = vadd.f32 %v7100_v4, %v3885_v9  ;;  %v6529_v4 = vld [vmem:[#allocation5 + $0x648] sm:$0xf] }
 0x4cc   : > { %v6530_v9 = vor.u32 %v6954_v45, %v6529_v4 }
 0x4cd   : > { %5562 = vst [vmem:[%s7950_s20 + $0x3c8] sm:$0xff] %v5434_v37  ;;  %v3886_v41 = vpop.f32.mrf.mxu3  ;;  %v3987_v27 = vpop.f32.mrf.mxu1 }
 0x4ce   : > { %v3797_v28 = vpop.f32.mrf.mxu2  ;;  %v3898_v50 = vpop.f32.mrf.mxu0  ;;  %4428 = vmatpush.bf16.msrb.mxu2 %v6530_v9  ;;  %v9661_v9 = vld [vmem:[#allocation48_spill] sm:$0xff] }
 0x4cf   : > { %v3798_v22 = vadd.f32 %v3797_v28, %v3709_v59  ;;  %v3988_v30 = vadd.f32 %v3987_v27, %v3898_v50  ;;  %v6274_v59 = vor.u32 %v6890_v16, %v6273_v60 }
 0x4d0   : > { %4026 = vmatmul.bf16.gmra.mxu1 %v9658_v8  ;;  %v6922_v8 = vld [vmem:[#allocation5 + $0x554] sm:$0xf0] }
 0x4d1   : > { %v3887_v55 = vadd.f32 %v3886_v41, %v3798_v22  ;;  %3937 = vmatmul.bf16.gmra.mxu0 %v9657_v49  ;;  %v6986_v41 = vld [vmem:[#allocation5 + $0x754] sm:$0xf0] }
 0x4d2   : > { %4204 = vmatmul.bf16.gmra.mxu3 %v9660_v48  ;;  %4250 = vmatpush.bf16.msrb.mxu0 %v6274_v59  ;;  %v9663_v59 = vld [vmem:[#allocation50_spill] sm:$0xff] }
 0x4d3   : > { %v5438_v26 = vadd.f32 %v3887_v55, %v542_v57  ;;  %4115 = vmatmul.bf16.gmra.mxu2 %v9659_v61  ;;  %v6658_v55 = vor.u32 %v6986_v41, %v6657_v29  ;;  %v6401_v61 = vld [vmem:[#allocation5 + $0x548] sm:$0xf]  ;;  %v9662_v29 = vld [vmem:[#allocation49_spill] sm:$0xff]  ;;  %v9664_v41 = vld [vmem:[#allocation51_spill] sm:$0xff] }
 0x4d5   : > { %5566 = vst [vmem:[%s7950_s20 + $0x3e8] sm:$0xff] %v5438_v26  ;;  %v4165_v28 = vpop.f32.mrf.mxu3  ;;  %v3989_v57 = vpop.f32.mrf.mxu1  ;;  %4517 = vmatpush.bf16.msrb.mxu3 %v6658_v55  ;;  %v6402_v26 = vor.u32 %v6922_v8, %v6401_v61 }
 0x4d6   : > { %v4076_v37 = vpop.f32.mrf.mxu2  ;;  %v3900_v22 = vpop.f32.mrf.mxu0 }
 0x4d7   : > { %v4077_v50 = vadd.f32 %v4076_v37, %v3988_v30  ;;  %v3990_v48 = vadd.f32 %v3989_v57, %v3900_v22  ;;  %4339 = vmatpush.bf16.msrb.mxu1 %v6402_v26 }
 0x4d9   : > { %v8569_v27 = vadd.f32 %v4165_v28, %v4077_v50 }
 0x4dd   : > { %v4167_v49 = vpop.f32.mrf.mxu3  ;;  %v3992_v16 = vpop.f32.mrf.mxu1 }
 0x4de   : > { %v4078_v4 = vpop.f32.mrf.mxu2  ;;  %v3903_v60 = vpop.f32.mrf.mxu0 }
 0x4df   : > { %v4079_v45 = vadd.f32 %v4078_v4, %v3990_v48  ;;  %v3993_v37 = vadd.f32 %v3992_v16, %v3903_v60 }
 0x4e0   : > { %4031 = vmatmul.bf16.gmra.mxu1 %v9662_v29  ;;  %v9665_v29 = vld [vmem:[#allocation52_spill] sm:$0xff] }
 0x4e1   : > { %v8571_v30 = vadd.f32 %v4167_v49, %v4079_v45  ;;  %3942 = vmatmul.bf16.gmra.mxu0 %v9661_v9 }
 0x4e2   : > { %4209 = vmatmul.bf16.gmra.mxu3 %v9664_v41  ;;  %v9667_v41 = vld [vmem:[#allocation54_spill] sm:$0xff] }
 0x4e3   : > { %4120 = vmatmul.bf16.gmra.mxu2 %v9663_v59  ;;  %v9666_v59 = vld [vmem:[#allocation53_spill] sm:$0xff] }
 0x4e5   : > { %v4170_v8 = vpop.f32.mrf.mxu3  ;;  %v3994_v22 = vpop.f32.mrf.mxu1 }
 0x4e6   : > { %v4081_v50 = vpop.f32.mrf.mxu2  ;;  %v3905_v61 = vpop.f32.mrf.mxu0 }
 0x4e7   : > { %v4082_v28 = vadd.f32 %v4081_v50, %v3993_v37  ;;  %v3995_v55 = vadd.f32 %v3994_v22, %v3905_v61  ;;  %v9668_v37 = vld [vmem:[#allocation55_spill] sm:$0xff]  ;;  %v6513_v50 = vld [vmem:[#allocation5 + $0x628] sm:$0xf]  ;;  %v6886_v22 = vld [vmem:[#allocation5 + $0x434] sm:$0xf0] }
 0x4e9   : > { %v8577_v48 = vadd.f32 %v4170_v8, %v4082_v28  ;;  %v6950_v28 = vld [vmem:[#allocation5 + $0x634] sm:$0xf0]  ;;  %v6257_v8 = vld [vmem:[#allocation5 + $0x428] sm:$0xf] }
 0x4ea   : > { %v6514_v61 = vor.u32 %v6950_v28, %v6513_v50  ;;  %v6258_v46 = vor.u32 %v6886_v22, %v6257_v8 }
 0x4ec   : > { %4429 = vmatpush.bf16.msrb.mxu2 %v6514_v61  ;;  %4251 = vmatpush.bf16.msrb.mxu0 %v6258_v46  ;;  %v9670_v61 = vld [vmem:[#allocation57_spill] sm:$0xff]  ;;  %v9671_v46 = vld [vmem:[#allocation58_spill] sm:$0xff] }
 0x4ed   : > { %v4172_v26 = vpop.f32.mrf.mxu3  ;;  %v3997_v45 = vpop.f32.mrf.mxu1 }
 0x4ee   : > { %v4083_v57 = vpop.f32.mrf.mxu2  ;;  %v3908_v4 = vpop.f32.mrf.mxu0 }
 0x4ef   : > { %v4084_v49 = vadd.f32 %v4083_v57, %v3995_v55  ;;  %v3998_v16 = vadd.f32 %v3997_v45, %v3908_v4  ;;  %v6641_v55 = vld [vmem:[#allocation5 + $0x728] sm:$0xf]  ;;  %v6982_v57 = vld [vmem:[#allocation5 + $0x734] sm:$0xf0] }
 0x4f0   : > { %4036 = vmatmul.bf16.gmra.mxu1 %v9666_v59  ;;  %v6385_v59 = vld [vmem:[#allocation5 + $0x528] sm:$0xf] }
 0x4f1   : > { %v8579_v60 = vadd.f32 %v4172_v26, %v4084_v49  ;;  %3947 = vmatmul.bf16.gmra.mxu0 %v9665_v29  ;;  %v6642_v49 = vor.u32 %v6982_v57, %v6641_v55  ;;  %v6386_v20 = vor.u32 %v6918_v23, %v6385_v59  ;;  %v9672_v55 = vld [vmem:[#allocation59_spill] sm:$0xff] }
 0x4f2   : > { %4214 = vmatmul.bf16.gmra.mxu3 %v9668_v37 }
 0x4f3   : > { %4125 = vmatmul.bf16.gmra.mxu2 %v9667_v41  ;;  %4518 = vmatpush.bf16.msrb.mxu3 %v6642_v49 }
 0x4f4   : > { %4340 = vmatpush.bf16.msrb.mxu1 %v6386_v20 }
 0x4f5   : > { %v4175_v4 = vpop.f32.mrf.mxu3  ;;  %v3999_v29 = vpop.f32.mrf.mxu1 }
 0x4f6   : > { %v4086_v9 = vpop.f32.mrf.mxu2  ;;  %v3910_v45 = vpop.f32.mrf.mxu0 }
 0x4f7   : > { %v4087_v26 = vadd.f32 %v4086_v9, %v3998_v16  ;;  %v4000_v37 = vadd.f32 %v3999_v29, %v3910_v45  ;;  %v9669_v16 = vld [vmem:[#allocation56_spill] sm:$0xff] }
 0x4f9   : > { %v8585_v41 = vadd.f32 %v4175_v4, %v4087_v26 }
 0x4fd   : > { %v4177_v62 = vpop.f32.mrf.mxu3  ;;  %v4002_v8 = vpop.f32.mrf.mxu1 }
 0x4fe   : > { %v4088_v50 = vpop.f32.mrf.mxu2  ;;  %v3913_v1 = vpop.f32.mrf.mxu0 }
 0x4ff   : > { %v4089_v28 = vadd.f32 %v4088_v50, %v4000_v37  ;;  %v4003_v9 = vadd.f32 %v4002_v8, %v3913_v1  ;;  %v9673_v8 = vld [vmem:[#allocation60_spill] sm:$0xff] }
 0x500   : > { %4041 = vmatmul.bf16.gmra.mxu1 %v9670_v61 }
 0x501   : > { %v8587_v22 = vadd.f32 %v4177_v62, %v4089_v28  ;;  %3952 = vmatmul.bf16.gmra.mxu0 %v9669_v16 }
 0x502   : > { %4219 = vmatmul.bf16.gmra.mxu3 %v9672_v55  ;;  %v9675_v55 = vld [vmem:[#allocation62_spill] sm:$0xff] }
 0x503   : > { %4130 = vmatmul.bf16.gmra.mxu2 %v9671_v46  ;;  %v9674_v46 = vld [vmem:[#allocation61_spill] sm:$0xff] }
 0x505   : > { %v4180_v23 = vpop.f32.mrf.mxu3  ;;  %v4004_v59 = vpop.f32.mrf.mxu1 }
 0x506   : > { %v4091_v29 = vpop.f32.mrf.mxu2  ;;  %v3915_v20 = vpop.f32.mrf.mxu0 }
 0x507   : > { %v4092_v57 = vadd.f32 %v4091_v29, %v4003_v9  ;;  %v4005_v49 = vadd.f32 %v4004_v59, %v3915_v20  ;;  %v9676_v9 = vld [vmem:[#allocation63_spill] sm:$0xff]  ;;  %v6497_v29 = vld [vmem:[#allocation5 + $0x608] sm:$0xf]  ;;  %v6882_v59 = vld [vmem:[#allocation5 + $0x414] sm:$0xf0] }
 0x509   : > { %v8593_v37 = vadd.f32 %v4180_v23, %v4092_v57  ;;  %v6946_v57 = vld [vmem:[#allocation5 + $0x614] sm:$0xf0]  ;;  %v6241_v23 = vld [vmem:[#allocation5 + $0x408] sm:$0xf] }
 0x50a   : > { %v6498_v20 = vor.u32 %v6946_v57, %v6497_v29  ;;  %v6242_v16 = vor.u32 %v6882_v59, %v6241_v23 }
 0x50c   : > { %4430 = vmatpush.bf16.msrb.mxu2 %v6498_v20  ;;  %4252 = vmatpush.bf16.msrb.mxu0 %v6242_v16  ;;  %v9678_v20 = vld [vmem:[#allocation65_spill] sm:$0xff]  ;;  %v9679_v16 = vld [vmem:[#allocation66_spill] sm:$0xff] }
 0x50d   : > { %v4182_v4 = vpop.f32.mrf.mxu3  ;;  %v4007_v45 = vpop.f32.mrf.mxu1 }
 0x50e   : > { %v4093_v26 = vpop.f32.mrf.mxu2  ;;  %v3918_v1 = vpop.f32.mrf.mxu0 }
 0x50f   : > { %v4094_v62 = vadd.f32 %v4093_v26, %v4005_v49  ;;  %v4008_v28 = vadd.f32 %v4007_v45, %v3918_v1  ;;  %v6625_v49 = vld [vmem:[#allocation5 + $0x708] sm:$0xf]  ;;  %v6978_v26 = vld [vmem:[#allocation5 + $0x714] sm:$0xf0] }
 0x510   : > { %4046 = vmatmul.bf16.gmra.mxu1 %v9674_v46  ;;  %v6369_v46 = vld [vmem:[#allocation5 + $0x508] sm:$0xf] }
 0x511   : > { %v8595_v50 = vadd.f32 %v4182_v4, %v4094_v62  ;;  %3957 = vmatmul.bf16.gmra.mxu0 %v9673_v8  ;;  %v6626_v62 = vor.u32 %v6978_v26, %v6625_v49  ;;  %v6370_v33 = vor.u32 %v6914_v44, %v6369_v46  ;;  %v9680_v49 = vld [vmem:[#allocation67_spill] sm:$0xff] }
 0x512   : > { %4224 = vmatmul.bf16.gmra.mxu3 %v9676_v9 }
 0x513   : > { %4135 = vmatmul.bf16.gmra.mxu2 %v9675_v55  ;;  %4519 = vmatpush.bf16.msrb.mxu3 %v6626_v62 }
 0x514   : > { %4341 = vmatpush.bf16.msrb.mxu1 %v6370_v33 }
 0x515   : > { %v4185_v1 = vpop.f32.mrf.mxu3  ;;  %v4009_v8 = vpop.f32.mrf.mxu1 }
 0x516   : > { %v4096_v61 = vpop.f32.mrf.mxu2  ;;  %v3920_v45 = vpop.f32.mrf.mxu0 }
 0x517   : > { %v4097_v4 = vadd.f32 %v4096_v61, %v4008_v28  ;;  %v4010_v9 = vadd.f32 %v4009_v8, %v3920_v45  ;;  %v9677_v28 = vld [vmem:[#allocation64_spill] sm:$0xff] }
 0x519   : > { %v8601_v55 = vadd.f32 %v4185_v1, %v4097_v4 }
 0x51d   : > { %v4187_v43 = vpop.f32.mrf.mxu3  ;;  %v4012_v23 = vpop.f32.mrf.mxu1 }
 0x51e   : > { %v4098_v29 = vpop.f32.mrf.mxu2  ;;  %v3923_v14 = vpop.f32.mrf.mxu0 }
 0x51f   : > { %v4099_v57 = vadd.f32 %v4098_v29, %v4010_v9  ;;  %v4013_v61 = vadd.f32 %v4012_v23, %v3923_v14  ;;  %v9681_v23 = vld [vmem:[#allocation68_spill] sm:$0xff] }
 0x520   : > { %4051 = vmatmul.bf16.gmra.mxu1 %v9678_v20 }
 0x521   : > { %v8603_v59 = vadd.f32 %v4187_v43, %v4099_v57  ;;  %3962 = vmatmul.bf16.gmra.mxu0 %v9677_v28 }
 0x522   : > { %4229 = vmatmul.bf16.gmra.mxu3 %v9680_v49  ;;  %v9683_v49 = vld [vmem:[#allocation70_spill] sm:$0xff] }
 0x523   : > { %4140 = vmatmul.bf16.gmra.mxu2 %v9679_v16  ;;  %v9682_v16 = vld [vmem:[#allocation69_spill] sm:$0xff] }
 0x525   : > { %v4190_v44 = vpop.f32.mrf.mxu3  ;;  %v4014_v46 = vpop.f32.mrf.mxu1 }
 0x526   : > { %v4101_v8 = vpop.f32.mrf.mxu2  ;;  %v3925_v33 = vpop.f32.mrf.mxu0 }
 0x527   : > { %v4102_v26 = vadd.f32 %v4101_v8, %v4013_v61  ;;  %v4015_v62 = vadd.f32 %v4014_v46, %v3925_v33  ;;  %v9684_v61 = vld [vmem:[#allocation71_spill] sm:$0xff]  ;;  %v6844_v8 = vld [vmem:[#allocation5 + $0x2ec] sm:$0xf] }
 0x528   : > { %v5843_v46 = vld [vmem:[#allocation5 + $0xf8] sm:$0xf0] }
 0x529   : > { %v8609_v9 = vadd.f32 %v4190_v44, %v4102_v26  ;;  %v6099_v26 = vld [vmem:[#allocation5 + $0x2f8] sm:$0xf0]  ;;  %v6780_v44 = vld [vmem:[#allocation5 + $0xec] sm:$0xf] }
 0x52a   : > { %v6102_v33 = vor.u32 %v6844_v8, %v6099_v26  ;;  %v5846_v28 = vor.u32 %v6780_v44, %v5843_v46 }
 0x52c   : > { %4779 = vmatpush.bf16.msra.mxu2 %v6102_v33  ;;  %4601 = vmatpush.bf16.msra.mxu0 %v5846_v28  ;;  %v9686_v33 = vld [vmem:[#allocation73_spill] sm:$0xff]  ;;  %v9687_v28 = vld [vmem:[#allocation74_spill] sm:$0xff] }
 0x52d   : > { %v4192_v1 = vpop.f32.mrf.mxu3  ;;  %v4017_v45 = vpop.f32.mrf.mxu1 }
 0x52e   : > { %v4103_v4 = vpop.f32.mrf.mxu2  ;;  %v3928_v14 = vpop.f32.mrf.mxu0 }
 0x52f   : > { %v4104_v43 = vadd.f32 %v4103_v4, %v4015_v62  ;;  %v4018_v57 = vadd.f32 %v4017_v45, %v3928_v14  ;;  %v6876_v62 = vld [vmem:[#allocation5 + $0x3ec] sm:$0xf]  ;;  %v6227_v4 = vld [vmem:[#allocation5 + $0x3f8] sm:$0xf0] }
 0x530   : > { %4056 = vmatmul.bf16.gmra.mxu1 %v9682_v16  ;;  %v6812_v16 = vld [vmem:[#allocation5 + $0x1ec] sm:$0xf] }
 0x531   : > { %v8611_v29 = vadd.f32 %v4192_v1, %v4104_v43  ;;  %3967 = vmatmul.bf16.gmra.mxu0 %v9681_v23  ;;  %v6230_v43 = vor.u32 %v6876_v62, %v6227_v4  ;;  %v5974_v12 = vor.u32 %v6812_v16, %v5971_v13  ;;  %v9688_v62 = vld [vmem:[#allocation75_spill] sm:$0xff] }
 0x532   : > { %4234 = vmatmul.bf16.gmra.mxu3 %v9684_v61 }
 0x533   : > { %4145 = vmatmul.bf16.gmra.mxu2 %v9683_v49  ;;  %4868 = vmatpush.bf16.msra.mxu3 %v6230_v43 }
 0x534   : > { %4690 = vmatpush.bf16.msra.mxu1 %v5974_v12 }
 0x535   : > { %v4195_v14 = vpop.f32.mrf.mxu3  ;;  %v4019_v23 = vpop.f32.mrf.mxu1 }
 0x536   : > { %v4106_v20 = vpop.f32.mrf.mxu2  ;;  %v3930_v45 = vpop.f32.mrf.mxu0 }
 0x537   : > { %v4107_v1 = vadd.f32 %v4106_v20, %v4018_v57  ;;  %v4020_v61 = vadd.f32 %v4019_v23, %v3930_v45  ;;  %v9685_v57 = vld [vmem:[#allocation72_spill] sm:$0xff] }
 0x539   : > { %v8617_v49 = vadd.f32 %v4195_v14, %v4107_v1 }
 0x53d   : > { %v4197_v53 = vpop.f32.mrf.mxu3  ;;  %v4022_v44 = vpop.f32.mrf.mxu1 }
 0x53e   : > { %v4108_v8 = vpop.f32.mrf.mxu2  ;;  %v3933_v52 = vpop.f32.mrf.mxu0 }
 0x53f   : > { %v4109_v26 = vadd.f32 %v4108_v8, %v4020_v61  ;;  %v4023_v20 = vadd.f32 %v4022_v44, %v3933_v52  ;;  %v9690_v44 = vld [vmem:[#allocation76_spill] sm:$0xff] }
 0x540   : > { %4061 = vmatmul.bf16.gmra.mxu1 %v9686_v33 }
 0x541   : > { %v8619_v46 = vadd.f32 %v4197_v53, %v4109_v26  ;;  %3972 = vmatmul.bf16.gmra.mxu0 %v9685_v57 }
 0x542   : > { %4239 = vmatmul.bf16.gmra.mxu3 %v9688_v62  ;;  %v9692_v62 = vld [vmem:[#allocation78_spill] sm:$0xff] }
 0x543   : > { %4150 = vmatmul.bf16.gmra.mxu2 %v9687_v28  ;;  %v9691_v28 = vld [vmem:[#allocation77_spill] sm:$0xff] }
 0x545   : > { %v4200_v13 = vpop.f32.mrf.mxu3  ;;  %v4024_v16 = vpop.f32.mrf.mxu1 }
 0x546   : > { %v4111_v23 = vpop.f32.mrf.mxu2  ;;  %v3935_v12 = vpop.f32.mrf.mxu0 }
 0x547   : > { %v4112_v4 = vadd.f32 %v4111_v23, %v4023_v20  ;;  %v4025_v43 = vadd.f32 %v4024_v16, %v3935_v12  ;;  %v9693_v20 = vld [vmem:[#allocation79_spill] sm:$0xff]  ;;  %v6840_v23 = vld [vmem:[#allocation5 + $0x2cc] sm:$0xf] }
 0x548   : > { %v5827_v16 = vld [vmem:[#allocation5 + $0xd8] sm:$0xf0] }
 0x549   : > { %v8625_v61 = vadd.f32 %v4200_v13, %v4112_v4  ;;  %v6083_v4 = vld [vmem:[#allocation5 + $0x2d8] sm:$0xf0]  ;;  %v6776_v13 = vld [vmem:[#allocation5 + $0xcc] sm:$0xf] }
 0x54a   : > { %v6086_v12 = vor.u32 %v6840_v23, %v6083_v4  ;;  %v5830_v57 = vor.u32 %v6776_v13, %v5827_v16 }
 0x54c   : > { %4780 = vmatpush.bf16.msra.mxu2 %v6086_v12  ;;  %4602 = vmatpush.bf16.msra.mxu0 %v5830_v57  ;;  %v9697_v12 = vld [vmem:[#allocation81_spill] sm:$0xff]  ;;  %v9698_v57 = vld [vmem:[#allocation82_spill] sm:$0xff] }
 0x54d   : > { %v4202_v14 = vpop.f32.mrf.mxu3  ;;  %v4027_v45 = vpop.f32.mrf.mxu1 }
 0x54e   : > { %v4113_v1 = vpop.f32.mrf.mxu2  ;;  %v3938_v52 = vpop.f32.mrf.mxu0 }
 0x54f   : > { %v4114_v53 = vadd.f32 %v4113_v1, %v4025_v43  ;;  %v4028_v26 = vadd.f32 %v4027_v45, %v3938_v52  ;;  %v6872_v43 = vld [vmem:[#allocation5 + $0x3cc] sm:$0xf]  ;;  %v6211_v1 = vld [vmem:[#allocation5 + $0x3d8] sm:$0xf0] }
 0x550   : > { %4342 = vmatmul.bf16.vlgmr.msrb.gmra.mxu1 %v9691_v28  ;;  %v6808_v28 = vld [vmem:[#allocation5 + $0x1cc] sm:$0xf] }
 0x551   : > { %v8627_v8 = vadd.f32 %v4202_v14, %v4114_v53  ;;  %4253 = vmatmul.bf16.vlgmr.msrb.gmra.mxu0 %v9690_v44  ;;  %v6214_v53 = vor.u32 %v6872_v43, %v6211_v1  ;;  %v5958_v47 = vor.u32 %v6808_v28, %v5955_v51  ;;  %v9699_v43 = vld [vmem:[#allocation83_spill] sm:$0xff] }
 0x552   : > { %4520 = vmatmul.bf16.vlgmr.msrb.gmra.mxu3 %v9693_v20 }
 0x553   : > { %9689 = vst [vmem:[#allocation119_spill] sm:$0xff] %v8627_v8  ;;  %4431 = vmatmul.bf16.vlgmr.msrb.gmra.mxu2 %v9692_v62  ;;  %4869 = vmatpush.bf16.msra.mxu3 %v6214_v53 }
 0x554   : > { %4691 = vmatpush.bf16.msra.mxu1 %v5958_v47 }
 0x555   : > { %v4205_v52 = vpop.f32.mrf.mxu3  ;;  %v4029_v44 = vpop.f32.mrf.mxu1 }
 0x556   : > { %v4116_v33 = vpop.f32.mrf.mxu2  ;;  %v3940_v45 = vpop.f32.mrf.mxu0 }
 0x557   : > { %v4117_v14 = vadd.f32 %v4116_v33, %v4028_v26  ;;  %v4030_v20 = vadd.f32 %v4029_v44, %v3940_v45  ;;  %v9696_v26 = vld [vmem:[#allocation80_spill] sm:$0xff] }
 0x559   : > { %v8633_v62 = vadd.f32 %v4205_v52, %v4117_v14 }
 0x55b   : > { %9694 = vst [vmem:[#allocation120_spill] sm:$0xff] %v8633_v62 }
 0x55d   : > { %v4207_v8 = vpop.f32.mrf.mxu3  ;;  %v4032_v13 = vpop.f32.mrf.mxu1 }
 0x55e   : > { %v4118_v23 = vpop.f32.mrf.mxu2  ;;  %v3943_v56 = vpop.f32.mrf.mxu0 }
 0x55f   : > { %v4119_v4 = vadd.f32 %v4118_v23, %v4030_v20  ;;  %v4033_v33 = vadd.f32 %v4032_v13, %v3943_v56  ;;  %v9702_v13 = vld [vmem:[#allocation84_spill] sm:$0xff] }
 0x560   : > { %4347 = vmatmul.bf16.gmra.mxu1 %v9697_v12 }
 0x561   : > { %v8635_v16 = vadd.f32 %v4207_v8, %v4119_v4  ;;  %4258 = vmatmul.bf16.gmra.mxu0 %v9696_v26 }
 0x562   : > { %4525 = vmatmul.bf16.gmra.mxu3 %v9699_v43  ;;  %v9704_v43 = vld [vmem:[#allocation86_spill] sm:$0xff] }
 0x563   : > { %9695 = vst [vmem:[#allocation121_spill] sm:$0xff] %v8635_v16  ;;  %4436 = vmatmul.bf16.gmra.mxu2 %v9698_v57  ;;  %v9703_v57 = vld [vmem:[#allocation85_spill] sm:$0xff] }
 0x565   : > { %v4210_v51 = vpop.f32.mrf.mxu3  ;;  %v4034_v28 = vpop.f32.mrf.mxu1 }
 0x566   : > { %v4121_v44 = vpop.f32.mrf.mxu2  ;;  %v3945_v47 = vpop.f32.mrf.mxu0 }
 0x567   : > { %v4122_v1 = vadd.f32 %v4121_v44, %v4033_v33  ;;  %v4035_v53 = vadd.f32 %v4034_v28, %v3945_v47  ;;  %v9705_v33 = vld [vmem:[#allocation87_spill] sm:$0xff]  ;;  %v6836_v44 = vld [vmem:[#allocation5 + $0x2ac] sm:$0xf] }
 0x568   : > { %v5811_v28 = vld [vmem:[#allocation5 + $0xb8] sm:$0xf0] }
 0x569   : > { %v8641_v20 = vadd.f32 %v4210_v51, %v4122_v1  ;;  %v6067_v1 = vld [vmem:[#allocation5 + $0x2b8] sm:$0xf0]  ;;  %v6772_v51 = vld [vmem:[#allocation5 + $0xac] sm:$0xf] }
 0x56a   : > { %v6070_v47 = vor.u32 %v6836_v44, %v6067_v1  ;;  %v5814_v26 = vor.u32 %v6772_v51, %v5811_v28 }
 0x56b   : > { %9700 = vst [vmem:[#allocation122_spill] sm:$0xff] %v8641_v20 }
 0x56c   : > { %4781 = vmatpush.bf16.msra.mxu2 %v6070_v47  ;;  %4603 = vmatpush.bf16.msra.mxu0 %v5814_v26  ;;  %v9709_v47 = vld [vmem:[#allocation89_spill] sm:$0xff]  ;;  %v9710_v26 = vld [vmem:[#allocation90_spill] sm:$0xff] }
 0x56d   : > { %v4212_v52 = vpop.f32.mrf.mxu3  ;;  %v4037_v45 = vpop.f32.mrf.mxu1 }
 0x56e   : > { %v4123_v14 = vpop.f32.mrf.mxu2  ;;  %v3948_v56 = vpop.f32.mrf.mxu0 }
 0x56f   : > { %v4124_v8 = vadd.f32 %v4123_v14, %v4035_v53  ;;  %v4038_v4 = vadd.f32 %v4037_v45, %v3948_v56  ;;  %v6868_v53 = vld [vmem:[#allocation5 + $0x3ac] sm:$0xf]  ;;  %v6195_v14 = vld [vmem:[#allocation5 + $0x3b8] sm:$0xf0] }
 0x570   : > { %4352 = vmatmul.bf16.gmra.mxu1 %v9703_v57  ;;  %v6804_v57 = vld [vmem:[#allocation5 + $0x1ac] sm:$0xf] }
 0x571   : > { %v8643_v23 = vadd.f32 %v4212_v52, %v4124_v8  ;;  %4263 = vmatmul.bf16.gmra.mxu0 %v9702_v13  ;;  %v6198_v8 = vor.u32 %v6868_v53, %v6195_v14  ;;  %v9711_v53 = vld [vmem:[#allocation91_spill] sm:$0xff] }
 0x572   : > { %4530 = vmatmul.bf16.gmra.mxu3 %v9705_v33 }
 0x573   : > { %9701 = vst [vmem:[#allocation123_spill] sm:$0xff] %v8643_v23  ;;  %4441 = vmatmul.bf16.gmra.mxu2 %v9704_v43  ;;  %4870 = vmatpush.bf16.msra.mxu3 %v6198_v8  ;;  %v5939_v23 = vld [vmem:[#allocation5 + $0x1b8] sm:$0xf0] }
 0x574   : > { %v5942_v20 = vor.u32 %v6804_v57, %v5939_v23 }
 0x575   : > { %v4215_v56 = vpop.f32.mrf.mxu3  ;;  %v4039_v13 = vpop.f32.mrf.mxu1 }
 0x576   : > { %v4126_v12 = vpop.f32.mrf.mxu2  ;;  %v3950_v45 = vpop.f32.mrf.mxu0  ;;  %4692 = vmatpush.bf16.msra.mxu1 %v5942_v20 }
 0x577   : > { %v4127_v52 = vadd.f32 %v4126_v12, %v4038_v4  ;;  %v4040_v33 = vadd.f32 %v4039_v13, %v3950_v45  ;;  %v9708_v4 = vld [vmem:[#allocation88_spill] sm:$0xff] }
 0x579   : > { %v8649_v43 = vadd.f32 %v4215_v56, %v4127_v52 }
 0x57b   : > { %9706 = vst [vmem:[#allocation124_spill] sm:$0xff] %v8649_v43 }
 0x57d   : > { %v4217_v16 = vpop.f32.mrf.mxu3  ;;  %v4042_v51 = vpop.f32.mrf.mxu1 }
 0x57e   : > { %v4128_v44 = vpop.f32.mrf.mxu2  ;;  %v3953_v62 = vpop.f32.mrf.mxu0 }
 0x57f   : > { %v4129_v1 = vadd.f32 %v4128_v44, %v4040_v33  ;;  %v4043_v12 = vadd.f32 %v4042_v51, %v3953_v62  ;;  %v9714_v51 = vld [vmem:[#allocation92_spill] sm:$0xff] }
 0x580   : > { %4357 = vmatmul.bf16.gmra.mxu1 %v9709_v47 }
 0x581   : > { %v8651_v28 = vadd.f32 %v4217_v16, %v4129_v1  ;;  %4268 = vmatmul.bf16.gmra.mxu0 %v9708_v4 }
 0x582   : > { %4535 = vmatmul.bf16.gmra.mxu3 %v9711_v53  ;;  %v9716_v53 = vld [vmem:[#allocation94_spill] sm:$0xff] }
 0x583   : > { %9707 = vst [vmem:[#allocation125_spill] sm:$0xff] %v8651_v28  ;;  %4446 = vmatmul.bf16.gmra.mxu2 %v9710_v26  ;;  %v9715_v26 = vld [vmem:[#allocation93_spill] sm:$0xff] }
 0x585   : > { %v4220_v57 = vpop.f32.mrf.mxu3  ;;  %v4044_v23 = vpop.f32.mrf.mxu1 }
 0x586   : > { %v4131_v13 = vpop.f32.mrf.mxu2  ;;  %v3955_v20 = vpop.f32.mrf.mxu0 }
 0x587   : > { %v4132_v14 = vadd.f32 %v4131_v13, %v4043_v12  ;;  %v4045_v8 = vadd.f32 %v4044_v23, %v3955_v20  ;;  %v9717_v12 = vld [vmem:[#allocation95_spill] sm:$0xff]  ;;  %v6832_v13 = vld [vmem:[#allocation5 + $0x28c] sm:$0xf] }
 0x588   : > { %v5795_v23 = vld [vmem:[#allocation5 + $0x98] sm:$0xf0] }
 0x589   : > { %v8657_v33 = vadd.f32 %v4220_v57, %v4132_v14  ;;  %v6051_v14 = vld [vmem:[#allocation5 + $0x298] sm:$0xf0]  ;;  %v6768_v57 = vld [vmem:[#allocation5 + $0x8c] sm:$0xf] }
 0x58a   : > { %v6054_v20 = vor.u32 %v6832_v13, %v6051_v14  ;;  %v5798_v4 = vor.u32 %v6768_v57, %v5795_v23 }
 0x58b   : > { %9712 = vst [vmem:[#allocation126_spill] sm:$0xff] %v8657_v33 }
 0x58c   : > { %4782 = vmatpush.bf16.msra.mxu2 %v6054_v20  ;;  %4604 = vmatpush.bf16.msra.mxu0 %v5798_v4  ;;  %v9720_v20 = vld [vmem:[#allocation97_spill] sm:$0xff]  ;;  %v9721_v4 = vld [vmem:[#allocation98_spill] sm:$0xff] }
 0x58d   : > { %v4222_v56 = vpop.f32.mrf.mxu3  ;;  %v4047_v45 = vpop.f32.mrf.mxu1 }
 0x58e   : > { %v4133_v52 = vpop.f32.mrf.mxu2  ;;  %v3958_v62 = vpop.f32.mrf.mxu0 }
 0x58f   : > { %v4134_v16 = vadd.f32 %v4133_v52, %v4045_v8  ;;  %v4048_v1 = vadd.f32 %v4047_v45, %v3958_v62  ;;  %v6864_v8 = vld [vmem:[#allocation5 + $0x38c] sm:$0xf]  ;;  %v6179_v52 = vld [vmem:[#allocation5 + $0x398] sm:$0xf0] }
 0x590   : > { %4362 = vmatmul.bf16.gmra.mxu1 %v9715_v26  ;;  %v6800_v26 = vld [vmem:[#allocation5 + $0x18c] sm:$0xf] }
 0x591   : > { %v8659_v44 = vadd.f32 %v4222_v56, %v4134_v16  ;;  %4273 = vmatmul.bf16.gmra.mxu0 %v9714_v51  ;;  %v6182_v16 = vor.u32 %v6864_v8, %v6179_v52  ;;  %v9722_v8 = vld [vmem:[#allocation99_spill] sm:$0xff] }
 0x592   : > { %4540 = vmatmul.bf16.gmra.mxu3 %v9717_v12 }
 0x593   : > { %9713 = vst [vmem:[#allocation127_spill] sm:$0xff] %v8659_v44  ;;  %4451 = vmatmul.bf16.gmra.mxu2 %v9716_v53  ;;  %4871 = vmatpush.bf16.msra.mxu3 %v6182_v16  ;;  %v5923_v44 = vld [vmem:[#allocation5 + $0x198] sm:$0xf0] }
 0x594   : > { %v5926_v33 = vor.u32 %v6800_v26, %v5923_v44 }
 0x595   : > { %v4225_v62 = vpop.f32.mrf.mxu3  ;;  %v4049_v51 = vpop.f32.mrf.mxu1 }
 0x596   : > { %v4136_v47 = vpop.f32.mrf.mxu2  ;;  %v3960_v45 = vpop.f32.mrf.mxu0  ;;  %4693 = vmatpush.bf16.msra.mxu1 %v5926_v33 }
 0x597   : > { %v4137_v56 = vadd.f32 %v4136_v47, %v4048_v1  ;;  %v4050_v12 = vadd.f32 %v4049_v51, %v3960_v45  ;;  %v9719_v1 = vld [vmem:[#allocation96_spill] sm:$0xff] }
 0x599   : > { %v8665_v53 = vadd.f32 %v4225_v62, %v4137_v56 }
 0x59d   : > { %v4227_v28 = vpop.f32.mrf.mxu3  ;;  %v4052_v57 = vpop.f32.mrf.mxu1 }
 0x59e   : > { %v4138_v13 = vpop.f32.mrf.mxu2  ;;  %v3963_v43 = vpop.f32.mrf.mxu0 }
 0x59f   : > { %v4139_v14 = vadd.f32 %v4138_v13, %v4050_v12  ;;  %v4053_v47 = vadd.f32 %v4052_v57, %v3963_v43  ;;  %v9725_v57 = vld [vmem:[#allocation102_spill] sm:$0xff] }
 0x5a0   : > { %4367 = vmatmul.bf16.gmra.mxu1 %v9720_v20 }
 0x5a1   : > { %v8667_v23 = vadd.f32 %v4227_v28, %v4139_v14  ;;  %4278 = vmatmul.bf16.gmra.mxu0 %v9719_v1 }
 0x5a2   : > { %4545 = vmatmul.bf16.gmra.mxu3 %v9722_v8  ;;  %v9727_v8 = vld [vmem:[#allocation104_spill] sm:$0xff] }
 0x5a3   : > { %9718 = vst [vmem:[#allocation128_spill] sm:$0xff] %v8667_v23  ;;  %4456 = vmatmul.bf16.gmra.mxu2 %v9721_v4  ;;  %v9726_v4 = vld [vmem:[#allocation103_spill] sm:$0xff] }
 0x5a5   : > { %v4230_v26 = vpop.f32.mrf.mxu3  ;;  %v4054_v44 = vpop.f32.mrf.mxu1 }
 0x5a6   : > { %v4141_v51 = vpop.f32.mrf.mxu2  ;;  %v3965_v33 = vpop.f32.mrf.mxu0 }
 0x5a7   : > { %v4142_v52 = vadd.f32 %v4141_v51, %v4053_v47  ;;  %v4055_v16 = vadd.f32 %v4054_v44, %v3965_v33  ;;  %v9728_v47 = vld [vmem:[#allocation105_spill] sm:$0xff]  ;;  %v5779_v44 = vld [vmem:[#allocation5 + $0x78] sm:$0xf0] }
 0x5a8   : > { %v6828_v51 = vld [vmem:[#allocation5 + $0x26c] sm:$0xf] }
 0x5a9   : > { %v8673_v12 = vadd.f32 %v4230_v26, %v4142_v52  ;;  %v6035_v52 = vld [vmem:[#allocation5 + $0x278] sm:$0xf0]  ;;  %v6764_v26 = vld [vmem:[#allocation5 + $0x6c] sm:$0xf] }
 0x5aa   : > { %v6038_v33 = vor.u32 %v6828_v51, %v6035_v52  ;;  %v6796_v52 = vld [vmem:[#allocation5 + $0x16c] sm:$0xf] }
 0x5ab   : > { %9723 = vst [vmem:[#allocation129_spill] sm:$0xff] %v8673_v12 }
 0x5ac   : > { %4783 = vmatpush.bf16.msra.mxu2 %v6038_v33 }
 0x5ad   : > { %v4232_v62 = vpop.f32.mrf.mxu3  ;;  %v4057_v45 = vpop.f32.mrf.mxu1 }
 0x5ae   : > { %v4143_v56 = vpop.f32.mrf.mxu2  ;;  %v3968_v43 = vpop.f32.mrf.mxu0 }
 0x5af   : > { %v4144_v28 = vadd.f32 %v4143_v56, %v4055_v16  ;;  %v4058_v14 = vadd.f32 %v4057_v45, %v3968_v43  ;;  %v6860_v16 = vld [vmem:[#allocation5 + $0x36c] sm:$0xf]  ;;  %v6163_v56 = vld [vmem:[#allocation5 + $0x378] sm:$0xf0] }
 0x5b0   : > { %4372 = vmatmul.bf16.gmra.mxu1 %v9726_v4  ;;  %v7101_v4 = vld [vmem:[#allocation7] sm:$0xf] }
 0x5b1   : > { %v8675_v13 = vadd.f32 %v4232_v62, %v4144_v28  ;;  %4283 = vmatmul.bf16.gmra.mxu0 %v9725_v57  ;;  %v5782_v28 = vor.u32 %v6764_v26, %v5779_v44  ;;  %v6166_v62 = vor.u32 %v6860_v16, %v6163_v56  ;;  %v8681_v1 = vperm.slane %v7101_v4, 2  ;;  %v9731_v56 = vld [vmem:[#allocation108_spill] sm:$0xff] }
 0x5b2   : > { %4550 = vmatmul.bf16.gmra.mxu3 %v9728_v47 }
 0x5b3   : > { %9724 = vst [vmem:[#allocation130_spill] sm:$0xff] %v8675_v13  ;;  %4461 = vmatmul.bf16.gmra.mxu2 %v9727_v8  ;;  %4605 = vmatpush.bf16.msra.mxu0 %v5782_v28  ;;  %v5907_v13 = vld [vmem:[#allocation5 + $0x178] sm:$0xf0]  ;;  %v9732_v28 = vld [vmem:[#allocation109_spill] sm:$0xff] }
 0x5b4   : > { %4872 = vmatpush.bf16.msra.mxu3 %v6166_v62  ;;  %415 = vst [vmem:[%s7950_s20 + $0x3f0] sm:$0xff] %v8681_v1  ;;  %v5910_v26 = vor.u32 %v6796_v52, %v5907_v13  ;;  %v9733_v62 = vld [vmem:[#allocation110_spill] sm:$0xff] }
 0x5b5   : > { %v4235_v45 = vpop.f32.mrf.mxu3  ;;  %v4059_v8 = vpop.f32.mrf.mxu1 }
 0x5b6   : > { %v4146_v20 = vpop.f32.mrf.mxu2  ;;  %v3970_v57 = vpop.f32.mrf.mxu0  ;;  %4694 = vmatpush.bf16.msra.mxu1 %v5910_v26 }
 0x5b7   : > { %v4147_v43 = vadd.f32 %v4146_v20, %v4058_v14  ;;  %v4060_v51 = vadd.f32 %v4059_v8, %v3970_v57  ;;  %v9734_v8 = vld [vmem:[#allocation111_spill] sm:$0xff] }
 0x5b9   : > { %v8683_v47 = vadd.f32 %v4235_v45, %v4147_v43 }
 0x5bb   : > { %9729 = vst [vmem:[#allocation100_spill] sm:$0xff] %v8683_v47 }
 0x5bd   : > { %v4237_v20 = vpop.f32.mrf.mxu3  ;;  %v4062_v16 = vpop.f32.mrf.mxu1 }
 0x5be   : > { %v4148_v12 = vpop.f32.mrf.mxu2  ;;  %v3973_v14 = vpop.f32.mrf.mxu0 }
 0x5bf   : > { %v4149_v44 = vadd.f32 %v4148_v12, %v4060_v51  ;;  %v4063_v4 = vadd.f32 %v4062_v16, %v3973_v14 }
 0x5c0   : > { %4377 = vmatmul.bf16.gmra.mxu1 %v9732_v28 }
 0x5c1   : > { %v8687_v33 = vadd.f32 %v4237_v20, %v4149_v44  ;;  %4288 = vmatmul.bf16.gmra.mxu0 %v9731_v56 }
 0x5c2   : > { %4555 = vmatmul.bf16.gmra.mxu3 %v9734_v8  ;;  %v9738_v8 = vld [vmem:[#allocation115_spill] sm:$0xff] }
 0x5c3   : > { %9730 = vst [vmem:[#allocation101_spill] sm:$0xff] %v8687_v33  ;;  %4466 = vmatmul.bf16.gmra.mxu2 %v9733_v62  ;;  %v9737_v62 = vld [vmem:[#allocation114_spill] sm:$0xff] }
 0x5c5   : > { %v4240_v45 = vpop.f32.mrf.mxu3  ;;  %v4064_v12 = vpop.f32.mrf.mxu1 }
 0x5c6   : > { %v4151_v57 = vpop.f32.mrf.mxu2  ;;  %v3975_v13 = vpop.f32.mrf.mxu0 }
 0x5c7   : > { %v4152_v43 = vadd.f32 %v4151_v57, %v4063_v4  ;;  %v4065_v52 = vadd.f32 %v4064_v12, %v3975_v13  ;;  %v9739_v4 = vld [vmem:[#allocation116_spill] sm:$0xff]  ;;  %v9740_v57 = vld [vmem:[#allocation117_spill] sm:$0xff]  ;;  %v6019_v13 = vld [vmem:[#allocation5 + $0x258] sm:$0xf0] }
 0x5c8   : > { %v6760_v12 = vld [vmem:[#allocation5 + $0x4c] sm:$0xf] }
 0x5c9   : > { %v8693_v51 = vadd.f32 %v4240_v45, %v4152_v43  ;;  %v6824_v45 = vld [vmem:[#allocation5 + $0x24c] sm:$0xf] }
 0x5cb   : > { %9735 = vst [vmem:[#allocation106_spill] sm:$0xff] %v8693_v51  ;;  %v5763_v51 = vld [vmem:[#allocation5 + $0x58] sm:$0xf0] }
 0x5cd   : > { %v4242_v20 = vpop.f32.mrf.mxu3  ;;  %v4343_v16 = vpop.f32.mrf.mxu1 }
 0x5ce   : > { %v4153_v26 = vpop.f32.mrf.mxu2  ;;  %v4254_v14 = vpop.f32.mrf.mxu0 }
 0x5cf   : > { %v4154_v44 = vadd.f32 %v4153_v26, %v4065_v52  ;;  %v4255_v28 = vadd.f32 %v4254_v14, %v8569_v27  ;;  %v6022_v26 = vor.u32 %v6824_v45, %v6019_v13  ;;  %v6792_v45 = vld [vmem:[#allocation5 + $0x14c] sm:$0xf]  ;;  %v5891_v13 = vld [vmem:[#allocation5 + $0x158] sm:$0xf0] }
 0x5d0   : > { %4382 = vmatmul.bf16.gmra.mxu1 %v9738_v8 }
 0x5d1   : > { %v8695_v56 = vadd.f32 %v4242_v20, %v4154_v44  ;;  %4293 = vmatmul.bf16.gmra.mxu0 %v9737_v62  ;;  %v4344_v43 = vadd.f32 %v4343_v16, %v4255_v28  ;;  %v6856_v44 = vld [vmem:[#allocation5 + $0x34c] sm:$0xf]  ;;  %v6147_v20 = vld [vmem:[#allocation5 + $0x358] sm:$0xf0]  ;;  %v5766_v62 = vor.u32 %v6760_v12, %v5763_v51  ;;  %4784 = vmatpush.bf16.msra.mxu2 %v6022_v26 }
 0x5d2   : > { %4560 = vmatmul.bf16.gmra.mxu3 %v9740_v57  ;;  %v6150_v33 = vor.u32 %v6856_v44, %v6147_v20 }
 0x5d3   : > { %9736 = vst [vmem:[#allocation107_spill] sm:$0xff] %v8695_v56  ;;  %4471 = vmatmul.bf16.gmra.mxu2 %v9739_v4  ;;  %4606 = vmatpush.bf16.msra.mxu0 %v5766_v62 }
 0x5d4   : > { %4873 = vmatpush.bf16.msra.mxu3 %v6150_v33 }
 0x5d5   : > { %v4521_v27 = vpop.f32.mrf.mxu3  ;;  %v4345_v8 = vpop.f32.mrf.mxu1 }
 0x5d6   : > { %v4432_v52 = vpop.f32.mrf.mxu2  ;;  %v4256_v14 = vpop.f32.mrf.mxu0 }
 0x5d7   : > { %v4433_v56 = vadd.f32 %v4432_v52, %v4344_v43  ;;  %v4257_v57 = vadd.f32 %v4256_v14, %v8571_v30  ;;  %v5894_v43 = vor.u32 %v6792_v45, %v5891_v13 }
 0x5d9   : > { %v4522_v4 = vadd.f32 %v4521_v27, %v4433_v56  ;;  %v4346_v16 = vadd.f32 %v4345_v8, %v4257_v57  ;;  %4695 = vmatpush.bf16.msra.mxu1 %v5894_v43 }
 0x5db   : > { %v5315_v28 = vadd.f32 %v4522_v4, %v8681_v1 }
 0x5dd   : > { %5443 = vst [vmem:[%s7950_s20 + $0x10] sm:$0xff] %v5315_v28  ;;  %v4523_v23 = vpop.f32.mrf.mxu3  ;;  %v4348_v12 = vpop.f32.mrf.mxu1 }
 0x5de   : > { %v4434_v47 = vpop.f32.mrf.mxu2  ;;  %v4259_v51 = vpop.f32.mrf.mxu0 }
 0x5df   : > { %v4435_v52 = vadd.f32 %v4434_v47, %v4346_v16  ;;  %v4260_v56 = vadd.f32 %v4259_v51, %v8577_v48  ;;  %v6820_v51 = vld [vmem:[#allocation5 + $0x22c] sm:$0xf] }
 0x5e0   : > { %4387 = vmatmul.bf16.gmra.mxu1 %v8023_v63 }
 0x5e1   : > { %v4524_v26 = vadd.f32 %v4523_v23, %v4435_v52  ;;  %4298 = vmatmul.bf16.gmra.mxu0 %v8021_v38  ;;  %v4349_v47 = vadd.f32 %v4348_v12, %v4260_v56  ;;  %v6003_v12 = vld [vmem:[#allocation5 + $0x238] sm:$0xf0] }
 0x5e2   : > { %4565 = vmatmul.bf16.gmra.mxu3 %v8027_v0  ;;  %v6006_v56 = vor.u32 %v6820_v51, %v6003_v12 }
 0x5e3   : > { %v5319_v30 = vadd.f32 %v4524_v26, %v8681_v1  ;;  %4476 = vmatmul.bf16.gmra.mxu2 %v8025_v2 }
 0x5e4   : > { %4785 = vmatpush.bf16.msra.mxu2 %v6006_v56 }
 0x5e5   : > { %5447 = vst [vmem:[%s7950_s20 + $0x30] sm:$0xff] %v5319_v30  ;;  %v4526_v8 = vpop.f32.mrf.mxu3  ;;  %v4350_v23 = vpop.f32.mrf.mxu1  ;;  %v6756_v30 = vld [vmem:[#allocation5 + $0x2c] sm:$0xf] }
 0x5e6   : > { %v4437_v33 = vpop.f32.mrf.mxu2  ;;  %v4261_v4 = vpop.f32.mrf.mxu0 }
 0x5e7   : > { %v4438_v62 = vadd.f32 %v4437_v33, %v4349_v47  ;;  %v4262_v48 = vadd.f32 %v4261_v4, %v8579_v60  ;;  %v5747_v47 = vld [vmem:[#allocation5 + $0x38] sm:$0xf0] }
 0x5e8   : > { %v5750_v4 = vor.u32 %v6756_v30, %v5747_v47 }
 0x5e9   : > { %v4527_v57 = vadd.f32 %v4526_v8, %v4438_v62  ;;  %v4351_v20 = vadd.f32 %v4350_v23, %v4262_v48  ;;  %v6131_v23 = vld [vmem:[#allocation5 + $0x338] sm:$0xf0] }
 0x5ea   : > { %4607 = vmatpush.bf16.msra.mxu0 %v5750_v4 }
 0x5eb   : > { %v5323_v44 = vadd.f32 %v4527_v57, %v8681_v1 }
 0x5ed   : > { %5451 = vst [vmem:[%s7950_s20 + $0x50] sm:$0xff] %v5323_v44  ;;  %v4528_v28 = vpop.f32.mrf.mxu3  ;;  %v4353_v45 = vpop.f32.mrf.mxu1 }
 0x5ee   : > { %v4439_v27 = vpop.f32.mrf.mxu2  ;;  %v4264_v16 = vpop.f32.mrf.mxu0 }
 0x5ef   : > { %v4440_v14 = vadd.f32 %v4439_v27, %v4351_v20  ;;  %v4265_v43 = vadd.f32 %v4264_v16, %v8585_v41  ;;  %v6852_v41 = vld [vmem:[#allocation5 + $0x32c] sm:$0xf]  ;;  %v5875_v16 = vld [vmem:[#allocation5 + $0x138] sm:$0xf0] }
 0x5f0   : > { %4392 = vmatmul.bf16.gmra.mxu1 %v9609_v5  ;;  %v6134_v48 = vor.u32 %v6852_v41, %v6131_v23 }
 0x5f1   : > { %v4529_v13 = vadd.f32 %v4528_v28, %v4440_v14  ;;  %4303 = vmatmul.bf16.gmra.mxu0 %v9608_v54  ;;  %v4354_v60 = vadd.f32 %v4353_v45, %v4265_v43  ;;  %v6788_v28 = vld [vmem:[#allocation5 + $0x12c] sm:$0xf] }
 0x5f2   : > { %4570 = vmatmul.bf16.gmra.mxu3 %v9611_v6 }
 0x5f3   : > { %v5327_v52 = vadd.f32 %v4529_v13, %v8681_v1  ;;  %4481 = vmatmul.bf16.gmra.mxu2 %v9610_v40  ;;  %4874 = vmatpush.bf16.msra.mxu3 %v6134_v48  ;;  %v5878_v13 = vor.u32 %v6788_v28, %v5875_v16 }
 0x5f5   : > { %5455 = vst [vmem:[%s7950_s20 + $0x70] sm:$0xff] %v5327_v52  ;;  %v4531_v62 = vpop.f32.mrf.mxu3  ;;  %v4355_v57 = vpop.f32.mrf.mxu1  ;;  %4696 = vmatpush.bf16.msra.mxu1 %v5878_v13  ;;  %v5987_v13 = vld [vmem:[#allocation5 + $0x218] sm:$0xf0] }
 0x5f6   : > { %v4442_v26 = vpop.f32.mrf.mxu2  ;;  %v4266_v8 = vpop.f32.mrf.mxu0 }
 0x5f7   : > { %v4443_v33 = vadd.f32 %v4442_v26, %v4354_v60  ;;  %v4267_v20 = vadd.f32 %v4266_v8, %v8587_v22 }
 0x5f9   : > { %v4532_v44 = vadd.f32 %v4531_v62, %v4443_v33  ;;  %v4356_v14 = vadd.f32 %v4355_v57, %v4267_v20 }
 0x5fb   : > { %v5331_v27 = vadd.f32 %v4532_v44, %v8681_v1 }
 0x5fd   : > { %5459 = vst [vmem:[%s7950_s20 + $0x90] sm:$0xff] %v5331_v27  ;;  %v4533_v52 = vpop.f32.mrf.mxu3  ;;  %v4358_v51 = vpop.f32.mrf.mxu1 }
 0x5fe   : > { %v4444_v45 = vpop.f32.mrf.mxu2  ;;  %v4269_v60 = vpop.f32.mrf.mxu0 }
 0x5ff   : > { %v4445_v43 = vadd.f32 %v4444_v45, %v4356_v14  ;;  %v4270_v26 = vadd.f32 %v4269_v60, %v8593_v37  ;;  %v6816_v45 = vld [vmem:[#allocation5 + $0x20c] sm:$0xf] }
 0x600   : > { %4397 = vmatmul.bf16.gmra.mxu1 %v8075_v3  ;;  %v6752_v60 = vld [vmem:[#allocation5 + $0xc] sm:$0xf] }
 0x601   : > { %v4534_v12 = vadd.f32 %v4533_v52, %v4445_v43  ;;  %4308 = vmatmul.bf16.gmra.mxu0 %v8073_v32  ;;  %v4359_v56 = vadd.f32 %v4358_v51, %v4270_v26  ;;  %v5990_v52 = vor.u32 %v6816_v45, %v5987_v13  ;;  %v5731_v51 = vld [vmem:[#allocation5 + $0x18] sm:$0xf0] }
 0x602   : > { %4575 = vmatmul.bf16.gmra.mxu3 %v8079_v21 }
 0x603   : > { %v5335_v22 = vadd.f32 %v4534_v12, %v8681_v1  ;;  %4486 = vmatmul.bf16.gmra.mxu2 %v8077_v19 }
 0x604   : > { %4786 = vmatpush.bf16.msra.mxu2 %v5990_v52 }
 0x605   : > { %5463 = vst [vmem:[%s7950_s20 + $0xb0] sm:$0xff] %v5335_v22  ;;  %v4536_v41 = vpop.f32.mrf.mxu3  ;;  %v4360_v62 = vpop.f32.mrf.mxu1 }
 0x606   : > { %v4447_v30 = vpop.f32.mrf.mxu2  ;;  %v4271_v33 = vpop.f32.mrf.mxu0 }
 0x607   : > { %v4448_v47 = vadd.f32 %v4447_v30, %v4359_v56  ;;  %v4272_v37 = vadd.f32 %v4271_v33, %v8595_v50  ;;  %v5734_v56 = vor.u32 %v6752_v60, %v5731_v51  ;;  %v6115_v30 = vld [vmem:[#allocation5 + $0x318] sm:$0xf0] }
 0x609   : > { %v4537_v8 = vadd.f32 %v4536_v41, %v4448_v47  ;;  %v4361_v23 = vadd.f32 %v4360_v62, %v4272_v37  ;;  %4608 = vmatpush.bf16.msra.mxu0 %v5734_v56 }
 0x60b   : > { %v5339_v4 = vadd.f32 %v4537_v8, %v8681_v1 }
 0x60d   : > { %5467 = vst [vmem:[%s7950_s20 + $0xd0] sm:$0xff] %v5339_v4  ;;  %v4538_v44 = vpop.f32.mrf.mxu3  ;;  %v4363_v27 = vpop.f32.mrf.mxu1  ;;  %v6784_v4 = vld [vmem:[#allocation5 + $0x10c] sm:$0xf] }
 0x60e   : > { %v4449_v57 = vpop.f32.mrf.mxu2  ;;  %v4274_v20 = vpop.f32.mrf.mxu0 }
 0x60f   : > { %v4450_v48 = vadd.f32 %v4449_v57, %v4361_v23  ;;  %v4275_v28 = vadd.f32 %v4274_v20, %v8601_v55  ;;  %v6848_v55 = vld [vmem:[#allocation5 + $0x30c] sm:$0xf]  ;;  %v5859_v23 = vld [vmem:[#allocation5 + $0x118] sm:$0xf0] }
 0x610   : > { %4402 = vmatmul.bf16.gmra.mxu1 %v9613_v34  ;;  %v6118_v41 = vor.u32 %v6848_v55, %v6115_v30 }
 0x611   : > { %v4539_v14 = vadd.f32 %v4538_v44, %v4450_v48  ;;  %4313 = vmatmul.bf16.gmra.mxu0 %v9612_v17  ;;  %v4364_v50 = vadd.f32 %v4363_v27, %v4275_v28  ;;  %v5862_v48 = vor.u32 %v6784_v4, %v5859_v23 }
 0x612   : > { %4580 = vmatmul.bf16.gmra.mxu3 %v9615_v15 }
 0x613   : > { %v5343_v16 = vadd.f32 %v4539_v14, %v8681_v1  ;;  %4491 = vmatmul.bf16.gmra.mxu2 %v9614_v7  ;;  %4875 = vmatpush.bf16.msra.mxu3 %v6118_v41 }
 0x614   : > { %4697 = vmatpush.bf16.msra.mxu1 %v5862_v48  ;;  %v6355_v48 = vld [vmem:[#allocation5 + $0x4f8] sm:$0xf0] }
 0x615   : > { %5471 = vst [vmem:[%s7950_s20 + $0xf0] sm:$0xff] %v5343_v16  ;;  %v4541_v26 = vpop.f32.mrf.mxu3  ;;  %v4365_v47 = vpop.f32.mrf.mxu1 }
 0x616   : > { %v4452_v43 = vpop.f32.mrf.mxu2  ;;  %v4276_v22 = vpop.f32.mrf.mxu0 }
 0x617   : > { %v4453_v12 = vadd.f32 %v4452_v43, %v4364_v50  ;;  %v4277_v62 = vadd.f32 %v4276_v22, %v8603_v59 }
 0x619   : > { %v4542_v33 = vadd.f32 %v4541_v26, %v4453_v12  ;;  %v4366_v37 = vadd.f32 %v4365_v47, %v4277_v62 }
 0x61b   : > { %v5347_v8 = vadd.f32 %v4542_v33, %v8681_v1 }
 0x61d   : > { %5475 = vst [vmem:[%s7950_s20 + $0x110] sm:$0xff] %v5347_v8  ;;  %v4543_v20 = vpop.f32.mrf.mxu3  ;;  %v4368_v14 = vpop.f32.mrf.mxu1  ;;  %v6972_v8 = vld [vmem:[#allocation5 + $0x6ec] sm:$0xf] }
 0x61e   : > { %v4454_v57 = vpop.f32.mrf.mxu2  ;;  %v4279_v27 = vpop.f32.mrf.mxu0 }
 0x61f   : > { %v4455_v44 = vadd.f32 %v4454_v57, %v4366_v37  ;;  %v4280_v16 = vadd.f32 %v4279_v27, %v8609_v9  ;;  %v6611_v37 = vld [vmem:[#allocation5 + $0x6f8] sm:$0xf0]  ;;  %v6908_v57 = vld [vmem:[#allocation5 + $0x4ec] sm:$0xf] }
 0x620   : > { %4407 = vmatmul.bf16.gmra.mxu1 %v8127_v11  ;;  %v6614_v23 = vor.u32 %v6972_v8, %v6611_v37 }
 0x621   : > { %v4544_v28 = vadd.f32 %v4543_v20, %v4455_v44  ;;  %4318 = vmatmul.bf16.gmra.mxu0 %v8125_v35  ;;  %v4369_v50 = vadd.f32 %v4368_v14, %v4280_v16  ;;  %v6358_v14 = vor.u32 %v6908_v57, %v6355_v48 }
 0x622   : > { %4585 = vmatmul.bf16.gmra.mxu3 %v8131_v58  ;;  %5135 = vmatpush.bf16.msrb.mxu2 %v6614_v23 }
 0x623   : > { %v5351_v59 = vadd.f32 %v4544_v28, %v8681_v1  ;;  %4496 = vmatmul.bf16.gmra.mxu2 %v8129_v36  ;;  %v6739_v28 = vld [vmem:[#allocation5 + $0x7f8] sm:$0xf0]  ;;  %4957 = vmatpush.bf16.msrb.mxu0 %v6358_v14 }
 0x625   : > { %5479 = vst [vmem:[%s7950_s20 + $0x130] sm:$0xff] %v5351_v59  ;;  %v4546_v43 = vpop.f32.mrf.mxu3  ;;  %v4370_v60 = vpop.f32.mrf.mxu1 }
 0x626   : > { %v4457_v45 = vpop.f32.mrf.mxu2  ;;  %v4281_v52 = vpop.f32.mrf.mxu0 }
 0x627   : > { %v4458_v13 = vadd.f32 %v4457_v45, %v4369_v50  ;;  %v4282_v9 = vadd.f32 %v4281_v52, %v8611_v29  ;;  %v6940_v52 = vld [vmem:[#allocation5 + $0x5ec] sm:$0xf] }
 0x629   : > { %v4547_v51 = vadd.f32 %v4546_v43, %v4458_v13  ;;  %v4371_v12 = vadd.f32 %v4370_v60, %v4282_v9  ;;  %v6483_v60 = vld [vmem:[#allocation5 + $0x5f8] sm:$0xf0] }
 0x62a   : > { %v6486_v9 = vor.u32 %v6940_v52, %v6483_v60  ;;  %v9747_v52 = vld [vmem:[#allocation15_spill] sm:$0xff] }
 0x62b   : > { %v5355_v55 = vadd.f32 %v4547_v51, %v8681_v1 }
 0x62c   : > { %5046 = vmatpush.bf16.msrb.mxu1 %v6486_v9  ;;  %v6595_v9 = vld [vmem:[#allocation5 + $0x6d8] sm:$0xf0] }
 0x62d   : > { %5483 = vst [vmem:[%s7950_s20 + $0x150] sm:$0xff] %v5355_v55  ;;  %v4548_v56 = vpop.f32.mrf.mxu3  ;;  %v4373_v47 = vpop.f32.mrf.mxu1 }
 0x62e   : > { %v4459_v26 = vpop.f32.mrf.mxu2  ;;  %v4284_v30 = vpop.f32.mrf.mxu0 }
 0x62f   : > { %v4460_v22 = vadd.f32 %v4459_v26, %v4371_v12  ;;  %v4285_v33 = vadd.f32 %v4284_v30, %v8617_v49  ;;  %v7004_v49 = vld [vmem:[#allocation5 + $0x7ec] sm:$0xf] }
 0x630   : > { %4412 = vmatmul.bf16.gmra.mxu1 %v9617_v24  ;;  %v6742_v59 = vor.u32 %v7004_v49, %v6739_v28 }
 0x631   : > { %v4549_v41 = vadd.f32 %v4548_v56, %v4460_v22  ;;  %4323 = vmatmul.bf16.gmra.mxu0 %v9616_v25  ;;  %v4374_v29 = vadd.f32 %v4373_v47, %v4285_v33  ;;  %v9741_v47 = vld [vmem:[#allocation131_spill] sm:$0xff] }
 0x632   : > { %4590 = vmatmul.bf16.gmra.mxu3 %v9619_v10 }
 0x633   : > { %v5359_v62 = vadd.f32 %v4549_v41, %v8681_v1  ;;  %4501 = vmatmul.bf16.gmra.mxu2 %v9618_v31  ;;  %5224 = vmatpush.bf16.msrb.mxu3 %v6742_v59 }
 0x635   : > { %5487 = vst [vmem:[%s7950_s20 + $0x170] sm:$0xff] %v5359_v62  ;;  %v4551_v20 = vpop.f32.mrf.mxu3  ;;  %v4375_v16 = vpop.f32.mrf.mxu1 }
 0x636   : > { %v4462_v4 = vpop.f32.mrf.mxu2  ;;  %v4286_v27 = vpop.f32.mrf.mxu0 }
 0x637   : > { %v4463_v44 = vadd.f32 %v4462_v4, %v4374_v29  ;;  %v4287_v45 = vadd.f32 %v4286_v27, %v8619_v46 }
 0x639   : > { %v4552_v50 = vadd.f32 %v4551_v20, %v4463_v44  ;;  %v4376_v43 = vadd.f32 %v4375_v16, %v4287_v45  ;;  %v9743_v16 = vld [vmem:[#allocation120_spill] sm:$0xff] }
 0x63b   : > { %v5363_v13 = vadd.f32 %v4552_v50, %v8681_v1  ;;  %v9744_v50 = vld [vmem:[#allocation12_spill] sm:$0xff] }
 0x63d   : > { %5491 = vst [vmem:[%s7950_s20 + $0x190] sm:$0xff] %v5363_v13  ;;  %v4553_v12 = vpop.f32.mrf.mxu3  ;;  %v4378_v22 = vpop.f32.mrf.mxu1  ;;  %v9745_v13 = vld [vmem:[#allocation13_spill] sm:$0xff] }
 0x63e   : > { %v4464_v51 = vpop.f32.mrf.mxu2  ;;  %v4289_v26 = vpop.f32.mrf.mxu0 }
 0x63f   : > { %v4465_v55 = vadd.f32 %v4464_v51, %v4376_v43  ;;  %v4290_v30 = vadd.f32 %v4289_v26, %v8625_v61  ;;  %v9742_v61 = vld [vmem:[#allocation119_spill] sm:$0xff]  ;;  %v9746_v43 = vld [vmem:[#allocation14_spill] sm:$0xff]  ;;  %v6968_v51 = vld [vmem:[#allocation5 + $0x6cc] sm:$0xf] }
 0x640   : > { %4417 = vmatmul.bf16.gmra.mxu1 %v8179_v18  ;;  %v6904_v26 = vld [vmem:[#allocation5 + $0x4cc] sm:$0xf] }
 0x641   : > { %v4554_v56 = vadd.f32 %v4553_v12, %v4465_v55  ;;  %4328 = vmatmul.bf16.gmra.mxu0 %v8177_v42  ;;  %v4379_v41 = vadd.f32 %v4378_v22, %v4290_v30  ;;  %v6598_v12 = vor.u32 %v6968_v51, %v6595_v9  ;;  %v6339_v22 = vld [vmem:[#allocation5 + $0x4d8] sm:$0xf0] }
 0x642   : > { %4595 = vmatmul.bf16.gmra.mxu3 %v9741_v47  ;;  %v9753_v51 = vld [vmem:[#allocation19_spill] sm:$0xff] }
 0x643   : > { %v5367_v46 = vadd.f32 %v4554_v56, %v8681_v1  ;;  %4506 = vmatmul.bf16.gmra.mxu2 %v8181_v39  ;;  %v7000_v56 = vld [vmem:[#allocation5 + $0x7cc] sm:$0xf] }
 0x644   : > { %5136 = vmatpush.bf16.msrb.mxu2 %v6598_v12 }
 0x645   : > { %5495 = vst [vmem:[%s7950_s20 + $0x1b0] sm:$0xff] %v5367_v46  ;;  %v4556_v29 = vpop.f32.mrf.mxu3  ;;  %v4380_v37 = vpop.f32.mrf.mxu1 }
 0x646   : > { %v4467_v33 = vpop.f32.mrf.mxu2  ;;  %v4291_v8 = vpop.f32.mrf.mxu0 }
 0x647   : > { %v4468_v62 = vadd.f32 %v4467_v33, %v4379_v41  ;;  %v4292_v23 = vadd.f32 %v4291_v8, %v9742_v61  ;;  %v6342_v33 = vor.u32 %v6904_v26, %v6339_v22 }
 0x649   : > { %v4557_v4 = vadd.f32 %v4556_v29, %v4468_v62  ;;  %v4381_v48 = vadd.f32 %v4380_v37, %v4292_v23  ;;  %v6723_v62 = vld [vmem:[#allocation5 + $0x7d8] sm:$0xf0]  ;;  %4958 = vmatpush.bf16.msrb.mxu0 %v6342_v33 }
 0x64a   : > { %v6726_v8 = vor.u32 %v7000_v56, %v6723_v62 }
 0x64b   : > { %v5371_v57 = vadd.f32 %v4557_v4, %v8681_v1  ;;  %v9748_v4 = vld [vmem:[#allocation121_spill] sm:$0xff] }
 0x64c   : > { %5225 = vmatpush.bf16.msrb.mxu3 %v6726_v8 }
 0x64d   : > { %5499 = vst [vmem:[%s7950_s20 + $0x1d0] sm:$0xff] %v5371_v57  ;;  %v4558_v20 = vpop.f32.mrf.mxu3  ;;  %v4383_v14 = vpop.f32.mrf.mxu1 }
 0x64e   : > { %v4469_v49 = vpop.f32.mrf.mxu2  ;;  %v4294_v27 = vpop.f32.mrf.mxu0 }
 0x64f   : > { %v4470_v44 = vadd.f32 %v4469_v49, %v4381_v48  ;;  %v4295_v59 = vadd.f32 %v4294_v27, %v9743_v16  ;;  %v6936_v48 = vld [vmem:[#allocation5 + $0x5cc] sm:$0xf]  ;;  %v6467_v49 = vld [vmem:[#allocation5 + $0x5d8] sm:$0xf0] }
 0x650   : > { %4698 = vmatmul.bf16.vlgmr.msra.gmra.mxu1 %v9745_v13  ;;  %v9750_v13 = vld [vmem:[#allocation16_spill] sm:$0xff] }
 0x651   : > { %v4559_v28 = vadd.f32 %v4558_v20, %v4470_v44  ;;  %4609 = vmatmul.bf16.vlgmr.msra.gmra.mxu0 %v9744_v50  ;;  %v4384_v60 = vadd.f32 %v4383_v14, %v4295_v59  ;;  %v6470_v20 = vor.u32 %v6936_v48, %v6467_v49  ;;  %v9749_v50 = vld [vmem:[#allocation122_spill] sm:$0xff]  ;;  %v9756_v49 = vld [vmem:[#allocation20_spill] sm:$0xff] }
 0x652   : > { %4876 = vmatmul.bf16.vlgmr.msra.gmra.mxu3 %v9747_v52  ;;  %v9751_v52 = vld [vmem:[#allocation17_spill] sm:$0xff] }
 0x653   : > { %v5375_v45 = vadd.f32 %v4559_v28, %v8681_v1  ;;  %4787 = vmatmul.bf16.vlgmr.msra.gmra.mxu2 %v9746_v43  ;;  %5047 = vmatpush.bf16.msrb.mxu1 %v6470_v20  ;;  %v9757_v20 = vld [vmem:[#allocation21_spill] sm:$0xff] }
 0x655   : > { %5503 = vst [vmem:[%s7950_s20 + $0x1f0] sm:$0xff] %v5375_v45  ;;  %v4561_v46 = vpop.f32.mrf.mxu3  ;;  %v4385_v29 = vpop.f32.mrf.mxu1 }
 0x656   : > { %v4472_v55 = vpop.f32.mrf.mxu2  ;;  %v4296_v41 = vpop.f32.mrf.mxu0 }
 0x657   : > { %v4473_v30 = vadd.f32 %v4472_v55, %v4384_v60  ;;  %v4297_v61 = vadd.f32 %v4296_v41, %v9748_v4  ;;  %v9752_v60 = vld [vmem:[#allocation18_spill] sm:$0xff] }
 0x659   : > { %v4562_v37 = vadd.f32 %v4561_v46, %v4473_v30  ;;  %v4386_v57 = vadd.f32 %v4385_v29, %v4297_v61  ;;  %v9754_v46 = vld [vmem:[#allocation123_spill] sm:$0xff] }
 0x65b   : > { %v5379_v23 = vadd.f32 %v4562_v37, %v8681_v1 }
 0x65d   : > { %5507 = vst [vmem:[%s7950_s20 + $0x210] sm:$0xff] %v5379_v23  ;;  %v4563_v14 = vpop.f32.mrf.mxu3  ;;  %v4388_v16 = vpop.f32.mrf.mxu1 }
 0x65e   : > { %v4474_v44 = vpop.f32.mrf.mxu2  ;;  %v4299_v28 = vpop.f32.mrf.mxu0 }
 0x65f   : > { %v4475_v27 = vadd.f32 %v4474_v44, %v4386_v57  ;;  %v4300_v45 = vadd.f32 %v4299_v28, %v9749_v50  ;;  %v9755_v57 = vld [vmem:[#allocation124_spill] sm:$0xff] }
 0x660   : > { %4703 = vmatmul.bf16.gmra.mxu1 %v9751_v52  ;;  %v6996_v52 = vld [vmem:[#allocation5 + $0x7ac] sm:$0xf] }
 0x661   : > { %v4564_v59 = vadd.f32 %v4563_v14, %v4475_v27  ;;  %4614 = vmatmul.bf16.gmra.mxu0 %v9750_v13  ;;  %v4389_v9 = vadd.f32 %v4388_v16, %v4300_v45  ;;  %v9758_v27 = vld [vmem:[#allocation22_spill] sm:$0xff]  ;;  %v9759_v14 = vld [vmem:[#allocation23_spill] sm:$0xff]  ;;  %v6964_v16 = vld [vmem:[#allocation5 + $0x6ac] sm:$0xf] }
 0x662   : > { %4881 = vmatmul.bf16.gmra.mxu3 %v9753_v51  ;;  %v6900_v13 = vld [vmem:[#allocation5 + $0x4ac] sm:$0xf] }
 0x663   : > { %v5383_v43 = vadd.f32 %v4564_v59, %v8681_v1  ;;  %4792 = vmatmul.bf16.gmra.mxu2 %v9752_v60  ;;  %v6579_v59 = vld [vmem:[#allocation5 + $0x6b8] sm:$0xf0] }
 0x664   : > { %v6582_v45 = vor.u32 %v6964_v16, %v6579_v59  ;;  %v9765_v16 = vld [vmem:[#allocation27_spill] sm:$0xff] }
 0x665   : > { %5511 = vst [vmem:[%s7950_s20 + $0x230] sm:$0xff] %v5383_v43  ;;  %v4566_v26 = vpop.f32.mrf.mxu3  ;;  %v4390_v56 = vpop.f32.mrf.mxu1  ;;  %v6323_v43 = vld [vmem:[#allocation5 + $0x4b8] sm:$0xf0] }
 0x666   : > { %v4477_v55 = vpop.f32.mrf.mxu2  ;;  %v4301_v22 = vpop.f32.mrf.mxu0  ;;  %5137 = vmatpush.bf16.msrb.mxu2 %v6582_v45 }
 0x667   : > { %v4478_v12 = vadd.f32 %v4477_v55, %v4389_v9  ;;  %v4302_v41 = vadd.f32 %v4301_v22, %v9754_v46  ;;  %v6326_v55 = vor.u32 %v6900_v13, %v6323_v43 }
 0x669   : > { %v4567_v30 = vadd.f32 %v4566_v26, %v4478_v12  ;;  %v4391_v62 = vadd.f32 %v4390_v56, %v4302_v41  ;;  %v6707_v12 = vld [vmem:[#allocation5 + $0x7b8] sm:$0xf0]  ;;  %4959 = vmatpush.bf16.msrb.mxu0 %v6326_v55 }
 0x66a   : > { %v6710_v22 = vor.u32 %v6996_v52, %v6707_v12 }
 0x66b   : > { %v5387_v33 = vadd.f32 %v4567_v30, %v8681_v1  ;;  %v9760_v30 = vld [vmem:[#allocation125_spill] sm:$0xff] }
 0x66c   : > { %5226 = vmatpush.bf16.msrb.mxu3 %v6710_v22 }
 0x66d   : > { %5515 = vst [vmem:[%s7950_s20 + $0x250] sm:$0xff] %v5387_v33  ;;  %v4568_v37 = vpop.f32.mrf.mxu3  ;;  %v4393_v61 = vpop.f32.mrf.mxu1 }
 0x66e   : > { %v4479_v29 = vpop.f32.mrf.mxu2  ;;  %v4304_v4 = vpop.f32.mrf.mxu0 }
 0x66f   : > { %v4480_v8 = vadd.f32 %v4479_v29, %v4391_v62  ;;  %v4305_v48 = vadd.f32 %v4304_v4, %v9755_v57  ;;  %v6932_v62 = vld [vmem:[#allocation5 + $0x5ac] sm:$0xf]  ;;  %v6451_v29 = vld [vmem:[#allocation5 + $0x5b8] sm:$0xf0] }
 0x670   : > { %4708 = vmatmul.bf16.gmra.mxu1 %v9757_v20  ;;  %v9762_v20 = vld [vmem:[#allocation24_spill] sm:$0xff] }
 0x671   : > { %v4569_v23 = vadd.f32 %v4568_v37, %v4480_v8  ;;  %4619 = vmatmul.bf16.gmra.mxu0 %v9756_v49  ;;  %v4394_v28 = vadd.f32 %v4393_v61, %v4305_v48  ;;  %v6454_v37 = vor.u32 %v6932_v62, %v6451_v29  ;;  %v9761_v49 = vld [vmem:[#allocation126_spill] sm:$0xff]  ;;  %v9767_v62 = vld [vmem:[#allocation28_spill] sm:$0xff] }
 0x672   : > { %4886 = vmatmul.bf16.gmra.mxu3 %v9759_v14  ;;  %v9763_v14 = vld [vmem:[#allocation25_spill] sm:$0xff] }
 0x673   : > { %v5391_v44 = vadd.f32 %v4569_v23, %v8681_v1  ;;  %4797 = vmatmul.bf16.gmra.mxu2 %v9758_v27  ;;  %5048 = vmatpush.bf16.msrb.mxu1 %v6454_v37  ;;  %v9769_v37 = vld [vmem:[#allocation30_spill] sm:$0xff] }
 0x675   : > { %5519 = vst [vmem:[%s7950_s20 + $0x270] sm:$0xff] %v5391_v44  ;;  %v4571_v51 = vpop.f32.mrf.mxu3  ;;  %v4395_v26 = vpop.f32.mrf.mxu1 }
 0x676   : > { %v4482_v50 = vpop.f32.mrf.mxu2  ;;  %v4306_v9 = vpop.f32.mrf.mxu0 }
 0x677   : > { %v4483_v60 = vadd.f32 %v4482_v50, %v4394_v28  ;;  %v4307_v46 = vadd.f32 %v4306_v9, %v9760_v30  ;;  %v9764_v28 = vld [vmem:[#allocation26_spill] sm:$0xff] }
 0x679   : > { %v4572_v56 = vadd.f32 %v4571_v51, %v4483_v60  ;;  %v4396_v33 = vadd.f32 %v4395_v26, %v4307_v46  ;;  %v9766_v51 = vld [vmem:[#allocation127_spill] sm:$0xff] }
 0x67b   : > { %v5395_v41 = vadd.f32 %v4572_v56, %v8681_v1 }
 0x67d   : > { %5523 = vst [vmem:[%s7950_s20 + $0x290] sm:$0xff] %v5395_v41  ;;  %v4573_v61 = vpop.f32.mrf.mxu3  ;;  %v4398_v57 = vpop.f32.mrf.mxu1 }
 0x67e   : > { %v4484_v8 = vpop.f32.mrf.mxu2  ;;  %v4309_v23 = vpop.f32.mrf.mxu0 }
 0x67f   : > { %v4485_v4 = vadd.f32 %v4484_v8, %v4396_v33  ;;  %v4310_v44 = vadd.f32 %v4309_v23, %v9761_v49  ;;  %v9768_v8 = vld [vmem:[#allocation29_spill] sm:$0xff] }
 0x680   : > { %4713 = vmatmul.bf16.gmra.mxu1 %v9763_v14  ;;  %v6960_v23 = vld [vmem:[#allocation5 + $0x68c] sm:$0xf] }
 0x681   : > { %v4574_v48 = vadd.f32 %v4573_v61, %v4485_v4  ;;  %4624 = vmatmul.bf16.gmra.mxu0 %v9762_v20  ;;  %v4399_v59 = vadd.f32 %v4398_v57, %v4310_v44  ;;  %v9770_v4 = vld [vmem:[#allocation31_spill] sm:$0xff]  ;;  %v6896_v44 = vld [vmem:[#allocation5 + $0x48c] sm:$0xf] }
 0x682   : > { %4891 = vmatmul.bf16.gmra.mxu3 %v9765_v16  ;;  %v6563_v57 = vld [vmem:[#allocation5 + $0x698] sm:$0xf0] }
 0x683   : > { %v5399_v27 = vadd.f32 %v4574_v48, %v8681_v1  ;;  %4802 = vmatmul.bf16.gmra.mxu2 %v9764_v28  ;;  %v6566_v49 = vor.u32 %v6960_v23, %v6563_v57  ;;  %v6307_v20 = vld [vmem:[#allocation5 + $0x498] sm:$0xf0] }
 0x684   : > { %v6310_v16 = vor.u32 %v6896_v44, %v6307_v20 }
 0x685   : > { %5527 = vst [vmem:[%s7950_s20 + $0x2b0] sm:$0xff] %v5399_v27  ;;  %v4576_v13 = vpop.f32.mrf.mxu3  ;;  %v4400_v52 = vpop.f32.mrf.mxu1  ;;  %5138 = vmatpush.bf16.msrb.mxu2 %v6566_v49 }
 0x686   : > { %v4487_v50 = vpop.f32.mrf.mxu2  ;;  %v4311_v43 = vpop.f32.mrf.mxu0  ;;  %4960 = vmatpush.bf16.msrb.mxu0 %v6310_v16 }
 0x687   : > { %v4488_v45 = vadd.f32 %v4487_v50, %v4399_v59  ;;  %v4312_v9 = vadd.f32 %v4311_v43, %v9766_v51  ;;  %v6691_v59 = vld [vmem:[#allocation5 + $0x798] sm:$0xf0]  ;;  %v9771_v43 = vld [vmem:[#allocation128_spill] sm:$0xff] }
 0x689   : > { %v4577_v60 = vadd.f32 %v4576_v13, %v4488_v45  ;;  %v4401_v12 = vadd.f32 %v4400_v52, %v4312_v9  ;;  %v6928_v9 = vld [vmem:[#allocation5 + $0x58c] sm:$0xf] }
 0x68b   : > { %v5403_v55 = vadd.f32 %v4577_v60, %v8681_v1 }
 0x68d   : > { %5531 = vst [vmem:[%s7950_s20 + $0x2d0] sm:$0xff] %v5403_v55  ;;  %v4578_v56 = vpop.f32.mrf.mxu3  ;;  %v4403_v46 = vpop.f32.mrf.mxu1  ;;  %v6435_v55 = vld [vmem:[#allocation5 + $0x598] sm:$0xf0] }
 0x68e   : > { %v4489_v26 = vpop.f32.mrf.mxu2  ;;  %v4314_v30 = vpop.f32.mrf.mxu0 }
 0x68f   : > { %v4490_v22 = vadd.f32 %v4489_v26, %v4401_v12  ;;  %v4315_v33 = vadd.f32 %v4314_v30, %v8665_v53  ;;  %v6992_v53 = vld [vmem:[#allocation5 + $0x78c] sm:$0xf]  ;;  %v6438_v26 = vor.u32 %v6928_v9, %v6435_v55  ;;  %v9779_v9 = vld [vmem:[#allocation36_spill] sm:$0xff] }
 0x690   : > { %4718 = vmatmul.bf16.gmra.mxu1 %v9768_v8  ;;  %v6694_v45 = vor.u32 %v6992_v53, %v6691_v59 }
 0x691   : > { %v4579_v41 = vadd.f32 %v4578_v56, %v4490_v22  ;;  %4629 = vmatmul.bf16.gmra.mxu0 %v9767_v62  ;;  %v4404_v61 = vadd.f32 %v4403_v46, %v4315_v33  ;;  %5049 = vmatpush.bf16.msrb.mxu1 %v6438_v26  ;;  %v9772_v33 = vld [vmem:[#allocation129_spill] sm:$0xff]  ;;  %v9781_v26 = vld [vmem:[#allocation38_spill] sm:$0xff] }
 0x692   : > { %4896 = vmatmul.bf16.gmra.mxu3 %v9770_v4  ;;  %v9775_v4 = vld [vmem:[#allocation34_spill] sm:$0xff] }
 0x693   : > { %v5407_v29 = vadd.f32 %v4579_v41, %v8681_v1  ;;  %4807 = vmatmul.bf16.gmra.mxu2 %v9769_v37  ;;  %5227 = vmatpush.bf16.msrb.mxu3 %v6694_v45  ;;  %v9774_v37 = vld [vmem:[#allocation33_spill] sm:$0xff] }
 0x695   : > { %5535 = vst [vmem:[%s7950_s20 + $0x2f0] sm:$0xff] %v5407_v29  ;;  %v4581_v14 = vpop.f32.mrf.mxu3  ;;  %v4405_v50 = vpop.f32.mrf.mxu1  ;;  %v9773_v29 = vld [vmem:[#allocation32_spill] sm:$0xff] }
 0x696   : > { %v4492_v48 = vpop.f32.mrf.mxu2  ;;  %v4316_v28 = vpop.f32.mrf.mxu0 }
 0x697   : > { %v4493_v27 = vadd.f32 %v4492_v48, %v4404_v61  ;;  %v4317_v52 = vadd.f32 %v4316_v28, %v9771_v43  ;;  %v9776_v61 = vld [vmem:[#allocation35_spill] sm:$0xff] }
 0x699   : > { %v4582_v13 = vadd.f32 %v4581_v14, %v4493_v27  ;;  %v4406_v51 = vadd.f32 %v4405_v50, %v4317_v52  ;;  %v9777_v27 = vld [vmem:[#allocation130_spill] sm:$0xff] }
 0x69b   : > { %v5411_v60 = vadd.f32 %v4582_v13, %v8681_v1 }
 0x69d   : > { %5539 = vst [vmem:[%s7950_s20 + $0x310] sm:$0xff] %v5411_v60  ;;  %v4583_v56 = vpop.f32.mrf.mxu3  ;;  %v4408_v46 = vpop.f32.mrf.mxu1  ;;  %v9778_v60 = vld [vmem:[#allocation100_spill] sm:$0xff] }
 0x69e   : > { %v4494_v12 = vpop.f32.mrf.mxu2  ;;  %v4319_v30 = vpop.f32.mrf.mxu0 }
 0x69f   : > { %v4495_v22 = vadd.f32 %v4494_v12, %v4406_v51  ;;  %v4320_v62 = vadd.f32 %v4319_v30, %v9772_v33  ;;  %v9780_v12 = vld [vmem:[#allocation37_spill] sm:$0xff] }
 0x6a0   : > { %4723 = vmatmul.bf16.gmra.mxu1 %v9774_v37  ;;  %v6956_v30 = vld [vmem:[#allocation5 + $0x66c] sm:$0xf] }
 0x6a1   : > { %v4584_v41 = vadd.f32 %v4583_v56, %v4495_v22  ;;  %4634 = vmatmul.bf16.gmra.mxu0 %v9773_v29  ;;  %v4409_v23 = vadd.f32 %v4408_v46, %v4320_v62  ;;  %v9782_v22 = vld [vmem:[#allocation39_spill] sm:$0xff]  ;;  %v6892_v62 = vld [vmem:[#allocation5 + $0x46c] sm:$0xf] }
 0x6a2   : > { %4901 = vmatmul.bf16.gmra.mxu3 %v9776_v61  ;;  %v6547_v46 = vld [vmem:[#allocation5 + $0x678] sm:$0xf0] }
 0x6a3   : > { %v5415_v8 = vadd.f32 %v4584_v41, %v8681_v1  ;;  %4812 = vmatmul.bf16.gmra.mxu2 %v9775_v4  ;;  %v6550_v33 = vor.u32 %v6956_v30, %v6547_v46  ;;  %v6291_v29 = vld [vmem:[#allocation5 + $0x478] sm:$0xf0] }
 0x6a5   : > { %5543 = vst [vmem:[%s7950_s20 + $0x330] sm:$0xff] %v5415_v8  ;;  %v4586_v49 = vpop.f32.mrf.mxu3  ;;  %v4410_v20 = vpop.f32.mrf.mxu1  ;;  %v6988_v8 = vld [vmem:[#allocation5 + $0x76c] sm:$0xf]  ;;  %5139 = vmatpush.bf16.msrb.mxu2 %v6550_v33 }
 0x6a6   : > { %v4497_v57 = vpop.f32.mrf.mxu2  ;;  %v4321_v44 = vpop.f32.mrf.mxu0 }
 0x6a7   : > { %v4498_v48 = vadd.f32 %v4497_v57, %v4409_v23  ;;  %v4322_v14 = vadd.f32 %v4321_v44, %v9777_v27  ;;  %v6294_v23 = vor.u32 %v6892_v62, %v6291_v29  ;;  %v6675_v57 = vld [vmem:[#allocation5 + $0x778] sm:$0xf0]  ;;  %v6924_v27 = vld [vmem:[#allocation5 + $0x56c] sm:$0xf] }
 0x6a9   : > { %v4587_v53 = vadd.f32 %v4586_v49, %v4498_v48  ;;  %v4411_v16 = vadd.f32 %v4410_v20, %v4322_v14  ;;  %v6678_v49 = vor.u32 %v6988_v8, %v6675_v57  ;;  %v9783_v20 = vld [vmem:[#allocation101_spill] sm:$0xff]  ;;  %4961 = vmatpush.bf16.msrb.mxu0 %v6294_v23  ;;  %v6419_v14 = vld [vmem:[#allocation5 + $0x578] sm:$0xf0] }
 0x6ab   : > { %v5419_v28 = vadd.f32 %v4587_v53, %v8681_v1  ;;  %5228 = vmatpush.bf16.msrb.mxu3 %v6678_v49 }
 0x6ad   : > { %5547 = vst [vmem:[%s7950_s20 + $0x350] sm:$0xff] %v5419_v28  ;;  %v4588_v45 = vpop.f32.mrf.mxu3  ;;  %v4413_v43 = vpop.f32.mrf.mxu1  ;;  %v6422_v28 = vor.u32 %v6924_v27, %v6419_v14 }
 0x6ae   : > { %v4499_v59 = vpop.f32.mrf.mxu2  ;;  %v4324_v13 = vpop.f32.mrf.mxu0 }
 0x6af   : > { %v4500_v50 = vadd.f32 %v4499_v59, %v4411_v16  ;;  %v4325_v51 = vadd.f32 %v4324_v13, %v9778_v60  ;;  %5050 = vmatpush.bf16.msrb.mxu1 %v6422_v28  ;;  %v9790_v28 = vld [vmem:[#allocation44_spill] sm:$0xff] }
 0x6b0   : > { %4728 = vmatmul.bf16.gmra.mxu1 %v9780_v12  ;;  %v7102_v12 = vld [vmem:[%s7950_s20 + $0x3f0] sm:$0xff] }
 0x6b1   : > { %v4589_v52 = vadd.f32 %v4588_v45, %v4500_v50  ;;  %4639 = vmatmul.bf16.gmra.mxu0 %v9779_v9  ;;  %v4414_v56 = vadd.f32 %v4413_v43, %v4325_v51  ;;  %v9784_v51 = vld [vmem:[#allocation106_spill] sm:$0xff] }
 0x6b2   : > { %4906 = vmatmul.bf16.gmra.mxu3 %v9782_v22  ;;  %v9786_v22 = vld [vmem:[#allocation41_spill] sm:$0xff] }
 0x6b3   : > { %v5423_v55 = vadd.f32 %v4589_v52, %v8681_v1  ;;  %4817 = vmatmul.bf16.gmra.mxu2 %v9781_v26 }
 0x6b5   : > { %5551 = vst [vmem:[%s7950_s20 + $0x370] sm:$0xff] %v5423_v55  ;;  %v4591_v4 = vpop.f32.mrf.mxu3  ;;  %v4415_v48 = vpop.f32.mrf.mxu1  ;;  %v9785_v55 = vld [vmem:[#allocation40_spill] sm:$0xff] }
 0x6b6   : > { %v4502_v41 = vpop.f32.mrf.mxu2  ;;  %v4326_v61 = vpop.f32.mrf.mxu0 }
 0x6b7   : > { %v4503_v37 = vadd.f32 %v4502_v41, %v4414_v56  ;;  %v4327_v53 = vadd.f32 %v4326_v61, %v9783_v20  ;;  %v9788_v56 = vld [vmem:[#allocation43_spill] sm:$0xff]  ;;  %v543_v20 = vld [vmem:[%s7950_s20 + $0x3f0] sm:$0xff] }
 0x6b9   : > { %v4592_v44 = vadd.f32 %v4591_v4, %v4503_v37  ;;  %v4416_v59 = vadd.f32 %v4415_v48, %v4327_v53  ;;  %v9789_v37 = vld [vmem:[#allocation107_spill] sm:$0xff] }
 0x6bb   : > { %v5427_v16 = vadd.f32 %v4592_v44, %v8681_v1  ;;  %v9787_v1 = vld [vmem:[#allocation42_spill] sm:$0xff] }
 0x6bd   : > { %5555 = vst [vmem:[%s7950_s20 + $0x390] sm:$0xff] %v5427_v16  ;;  %v4593_v13 = vpop.f32.mrf.mxu3  ;;  %v4418_v52 = vpop.f32.mrf.mxu1 }
 0x6be   : > { %v4504_v50 = vpop.f32.mrf.mxu2  ;;  %v4329_v43 = vpop.f32.mrf.mxu0 }
 0x6bf   : > { %v4505_v45 = vadd.f32 %v4504_v50, %v4416_v59  ;;  %v4330_v9 = vadd.f32 %v4329_v43, %v9784_v51  ;;  %v9791_v59 = vld [vmem:[#allocation45_spill] sm:$0xff]  ;;  %v9792_v50 = vld [vmem:[#allocation46_spill] sm:$0xff]  ;;  %v6531_v43 = vld [vmem:[#allocation5 + $0x658] sm:$0xf0] }
 0x6c0   : > { %4733 = vmatmul.bf16.gmra.mxu1 %v9786_v22  ;;  %v6275_v51 = vld [vmem:[#allocation5 + $0x458] sm:$0xf0] }
 0x6c1   : > { %v4594_v60 = vadd.f32 %v4593_v13, %v4505_v45  ;;  %4644 = vmatmul.bf16.gmra.mxu0 %v9785_v55  ;;  %v4419_v30 = vadd.f32 %v4418_v52, %v4330_v9  ;;  %v9793_v45 = vld [vmem:[#allocation47_spill] sm:$0xff]  ;;  %v6952_v13 = vld [vmem:[#allocation5 + $0x64c] sm:$0xf] }
 0x6c2   : > { %4911 = vmatmul.bf16.gmra.mxu3 %v9788_v56  ;;  %v6888_v52 = vld [vmem:[#allocation5 + $0x44c] sm:$0xf] }
 0x6c3   : > { %v5431_v26 = vadd.f32 %v7102_v12, %v4594_v60  ;;  %4822 = vmatmul.bf16.gmra.mxu2 %v9787_v1  ;;  %v6534_v60 = vor.u32 %v6952_v13, %v6531_v43  ;;  %v6984_v9 = vld [vmem:[#allocation5 + $0x74c] sm:$0xf] }
 0x6c5   : > { %5559 = vst [vmem:[%s7950_s20 + $0x3b0] sm:$0xff] %v5431_v26  ;;  %v4596_v33 = vpop.f32.mrf.mxu3  ;;  %v4420_v29 = vpop.f32.mrf.mxu1  ;;  %v6659_v26 = vld [vmem:[#allocation5 + $0x758] sm:$0xf0]  ;;  %5140 = vmatpush.bf16.msrb.mxu2 %v6534_v60 }
 0x6c6   : > { %v4507_v46 = vpop.f32.mrf.mxu2  ;;  %v4331_v62 = vpop.f32.mrf.mxu0 }
 0x6c7   : > { %v4508_v41 = vadd.f32 %v4507_v46, %v4419_v30  ;;  %v4332_v4 = vadd.f32 %v4331_v62, %v9789_v37  ;;  %v6662_v30 = vor.u32 %v6984_v9, %v6659_v26  ;;  %v6920_v62 = vld [vmem:[#allocation5 + $0x54c] sm:$0xf]  ;;  %v9798_v26 = vld [vmem:[#allocation52_spill] sm:$0xff] }
 0x6c9   : > { %v4597_v8 = vadd.f32 %v4596_v33, %v4508_v41  ;;  %v4421_v23 = vadd.f32 %v4420_v29, %v4332_v4  ;;  %5229 = vmatpush.bf16.msrb.mxu3 %v6662_v30  ;;  %v6403_v29 = vld [vmem:[#allocation5 + $0x558] sm:$0xf0]  ;;  %v6948_v30 = vld [vmem:[#allocation5 + $0x62c] sm:$0xf] }
 0x6cb   : > { %v5435_v61 = vadd.f32 %v7102_v12, %v4597_v8  ;;  %v6278_v12 = vor.u32 %v6888_v52, %v6275_v51  ;;  %v6406_v8 = vor.u32 %v6920_v62, %v6403_v29  ;;  %v6259_v29 = vld [vmem:[#allocation5 + $0x438] sm:$0xf0] }
 0x6cd   : > { %5563 = vst [vmem:[%s7950_s20 + $0x3d0] sm:$0xff] %v5435_v61  ;;  %v4598_v49 = vpop.f32.mrf.mxu3  ;;  %v4699_v53 = vpop.f32.mrf.mxu1  ;;  %4962 = vmatpush.bf16.msrb.mxu0 %v6278_v12  ;;  %5051 = vmatpush.bf16.msrb.mxu1 %v6406_v8  ;;  %v6980_v8 = vld [vmem:[#allocation5 + $0x72c] sm:$0xf] }
 0x6ce   : > { %v4509_v57 = vpop.f32.mrf.mxu2  ;;  %v4610_v44 = vpop.f32.mrf.mxu0 }
 0x6cf   : > { %v4510_v48 = vadd.f32 %v4509_v57, %v4421_v23  ;;  %v4700_v14 = vadd.f32 %v4699_v53, %v4610_v44  ;;  %v9794_v44 = vld [vmem:[#allocation48_spill] sm:$0xff]  ;;  %v9796_v53 = vld [vmem:[#allocation50_spill] sm:$0xff] }
 0x6d0   : > { %4738 = vmatmul.bf16.gmra.mxu1 %v9791_v59 }
 0x6d1   : > { %v4599_v27 = vadd.f32 %v4598_v49, %v4510_v48  ;;  %4649 = vmatmul.bf16.gmra.mxu0 %v9790_v28 }
 0x6d2   : > { %4916 = vmatmul.bf16.gmra.mxu3 %v9793_v45 }
 0x6d3   : > { %v5439_v16 = vadd.f32 %v4599_v27, %v543_v20  ;;  %4827 = vmatmul.bf16.gmra.mxu2 %v9792_v50  ;;  %v9795_v20 = vld [vmem:[#allocation49_spill] sm:$0xff]  ;;  %v9797_v27 = vld [vmem:[#allocation51_spill] sm:$0xff] }
 0x6d5   : > { %5567 = vst [vmem:[%s7950_s20 + $0x3f0] sm:$0xff] %v5439_v16  ;;  %v4877_v1 = vpop.f32.mrf.mxu3  ;;  %v4701_v46 = vpop.f32.mrf.mxu1 }
 0x6d6   : > { %v4788_v55 = vpop.f32.mrf.mxu2  ;;  %v4612_v56 = vpop.f32.mrf.mxu0 }
 0x6d7   : > { %v4789_v22 = vadd.f32 %v4788_v55, %v4700_v14  ;;  %v4702_v33 = vadd.f32 %v4701_v46, %v4612_v56  ;;  %v9801_v56 = vld [vmem:[#allocation55_spill] sm:$0xff] }
 0x6d8   : > { %v6515_v46 = vld [vmem:[#allocation5 + $0x638] sm:$0xf0] }
 0x6d9   : > { %v8860_v41 = vadd.f32 %v4877_v1, %v4789_v22  ;;  %v9799_v22 = vld [vmem:[#allocation53_spill] sm:$0xff]  ;;  %v9800_v1 = vld [vmem:[#allocation54_spill] sm:$0xff]  ;;  %v6518_v62 = vor.u32 %v6948_v30, %v6515_v46 }
 0x6db   : > { %5141 = vmatpush.bf16.msrb.mxu2 %v6518_v62 }
 0x6dd   : > { %v4879_v61 = vpop.f32.mrf.mxu3  ;;  %v4704_v57 = vpop.f32.mrf.mxu1 }
 0x6de   : > { %v4790_v37 = vpop.f32.mrf.mxu2  ;;  %v4615_v23 = vpop.f32.mrf.mxu0 }
 0x6df   : > { %v4791_v4 = vadd.f32 %v4790_v37, %v4702_v33  ;;  %v4705_v49 = vadd.f32 %v4704_v57, %v4615_v23  ;;  %v6884_v33 = vld [vmem:[#allocation5 + $0x42c] sm:$0xf]  ;;  %v6643_v37 = vld [vmem:[#allocation5 + $0x738] sm:$0xf0] }
 0x6e0   : > { %4743 = vmatmul.bf16.gmra.mxu1 %v9795_v20  ;;  %v6646_v23 = vor.u32 %v6980_v8, %v6643_v37 }
 0x6e1   : > { %v8862_v48 = vadd.f32 %v4879_v61, %v4791_v4  ;;  %4654 = vmatmul.bf16.gmra.mxu0 %v9794_v44  ;;  %v6262_v61 = vor.u32 %v6884_v33, %v6259_v29 }
 0x6e2   : > { %4921 = vmatmul.bf16.gmra.mxu3 %v9797_v27 }
 0x6e3   : > { %4832 = vmatmul.bf16.gmra.mxu2 %v9796_v53  ;;  %4963 = vmatpush.bf16.msrb.mxu0 %v6262_v61 }
 0x6e4   : > { %5230 = vmatpush.bf16.msrb.mxu3 %v6646_v23 }
 0x6e5   : > { %v4882_v16 = vpop.f32.mrf.mxu3  ;;  %v4706_v50 = vpop.f32.mrf.mxu1 }
 0x6e6   : > { %v4793_v14 = vpop.f32.mrf.mxu2  ;;  %v4617_v59 = vpop.f32.mrf.mxu0 }
 0x6e7   : > { %v4794_v28 = vadd.f32 %v4793_v14, %v4705_v49  ;;  %v4707_v13 = vadd.f32 %v4706_v50, %v4617_v59  ;;  %v6916_v14 = vld [vmem:[#allocation5 + $0x52c] sm:$0xf] }
 0x6e9   : > { %v8868_v45 = vadd.f32 %v4882_v16, %v4794_v28  ;;  %v6387_v28 = vld [vmem:[#allocation5 + $0x538] sm:$0xf0] }
 0x6ea   : > { %v6390_v16 = vor.u32 %v6916_v14, %v6387_v28  ;;  %v9809_v14 = vld [vmem:[#allocation63_spill] sm:$0xff]  ;;  %v6944_v28 = vld [vmem:[#allocation5 + $0x60c] sm:$0xf] }
 0x6ec   : > { %5052 = vmatpush.bf16.msrb.mxu1 %v6390_v16  ;;  %v6499_v16 = vld [vmem:[#allocation5 + $0x618] sm:$0xf0] }
 0x6ed   : > { %v4884_v60 = vpop.f32.mrf.mxu3  ;;  %v4709_v9 = vpop.f32.mrf.mxu1 }
 0x6ee   : > { %v4795_v43 = vpop.f32.mrf.mxu2  ;;  %v4620_v51 = vpop.f32.mrf.mxu0 }
 0x6ef   : > { %v4796_v52 = vadd.f32 %v4795_v43, %v4707_v13  ;;  %v4710_v12 = vadd.f32 %v4709_v9, %v4620_v51  ;;  %v9802_v9 = vld [vmem:[#allocation56_spill] sm:$0xff] }
 0x6f0   : > { %4748 = vmatmul.bf16.gmra.mxu1 %v9799_v22  ;;  %v9805_v22 = vld [vmem:[#allocation59_spill] sm:$0xff] }
 0x6f1   : > { %v8870_v55 = vadd.f32 %v4884_v60, %v4796_v52  ;;  %4659 = vmatmul.bf16.gmra.mxu0 %v9798_v26  ;;  %v9804_v26 = vld [vmem:[#allocation58_spill] sm:$0xff] }
 0x6f2   : > { %4926 = vmatmul.bf16.gmra.mxu3 %v9801_v56 }
 0x6f3   : > { %4837 = vmatmul.bf16.gmra.mxu2 %v9800_v1 }
 0x6f5   : > { %v4887_v49 = vpop.f32.mrf.mxu3  ;;  %v4711_v20 = vpop.f32.mrf.mxu1 }
 0x6f6   : > { %v4798_v4 = vpop.f32.mrf.mxu2  ;;  %v4622_v44 = vpop.f32.mrf.mxu0 }
 0x6f7   : > { %v4799_v57 = vadd.f32 %v4798_v4, %v4710_v12  ;;  %v4712_v27 = vadd.f32 %v4711_v20, %v4622_v44  ;;  %v9803_v12 = vld [vmem:[#allocation57_spill] sm:$0xff]  ;;  %v9806_v44 = vld [vmem:[#allocation60_spill] sm:$0xff] }
 0x6f8   : > { %v9807_v20 = vld [vmem:[#allocation61_spill] sm:$0xff] }
 0x6f9   : > { %v8876_v53 = vadd.f32 %v4887_v49, %v4799_v57 }
 0x6fd   : > { %v4889_v13 = vpop.f32.mrf.mxu3  ;;  %v4714_v52 = vpop.f32.mrf.mxu1 }
 0x6fe   : > { %v4800_v59 = vpop.f32.mrf.mxu2  ;;  %v4625_v43 = vpop.f32.mrf.mxu0 }
 0x6ff   : > { %v4801_v50 = vadd.f32 %v4800_v59, %v4712_v27  ;;  %v4715_v51 = vadd.f32 %v4714_v52, %v4625_v43  ;;  %v9808_v27 = vld [vmem:[#allocation62_spill] sm:$0xff]  ;;  %v6880_v59 = vld [vmem:[#allocation5 + $0x40c] sm:$0xf]  ;;  %v6627_v52 = vld [vmem:[#allocation5 + $0x718] sm:$0xf0] }
 0x700   : > { %4753 = vmatmul.bf16.gmra.mxu1 %v9803_v12  ;;  %v6976_v43 = vld [vmem:[#allocation5 + $0x70c] sm:$0xf] }
 0x701   : > { %v8878_v60 = vadd.f32 %v4889_v13, %v4801_v50  ;;  %4664 = vmatmul.bf16.gmra.mxu0 %v9802_v9  ;;  %v6502_v50 = vor.u32 %v6944_v28, %v6499_v16  ;;  %v6243_v13 = vld [vmem:[#allocation5 + $0x418] sm:$0xf0]  ;;  %v6630_v12 = vor.u32 %v6976_v43, %v6627_v52  ;;  %v9812_v28 = vld [vmem:[#allocation66_spill] sm:$0xff] }
 0x702   : > { %4931 = vmatmul.bf16.gmra.mxu3 %v9805_v22  ;;  %v6246_v9 = vor.u32 %v6880_v59, %v6243_v13  ;;  %v9813_v16 = vld [vmem:[#allocation67_spill] sm:$0xff] }
 0x703   : > { %4842 = vmatmul.bf16.gmra.mxu2 %v9804_v26  ;;  %5231 = vmatpush.bf16.msrb.mxu3 %v6630_v12 }
 0x704   : > { %5142 = vmatpush.bf16.msrb.mxu2 %v6502_v50  ;;  %4964 = vmatpush.bf16.msrb.mxu0 %v6246_v9 }
 0x705   : > { %v4892_v30 = vpop.f32.mrf.mxu3  ;;  %v4716_v33 = vpop.f32.mrf.mxu1 }
 0x706   : > { %v4803_v1 = vpop.f32.mrf.mxu2  ;;  %v4627_v46 = vpop.f32.mrf.mxu0 }
 0x707   : > { %v4804_v56 = vadd.f32 %v4803_v1, %v4715_v51  ;;  %v4717_v29 = vadd.f32 %v4716_v33, %v4627_v46  ;;  %v6912_v33 = vld [vmem:[#allocation5 + $0x50c] sm:$0xf] }
 0x709   : > { %v8884_v62 = vadd.f32 %v4892_v30, %v4804_v56 }
 0x70d   : > { %v4894_v4 = vpop.f32.mrf.mxu3  ;;  %v4719_v23 = vpop.f32.mrf.mxu1 }
 0x70e   : > { %v4805_v8 = vpop.f32.mrf.mxu2  ;;  %v4630_v61 = vpop.f32.mrf.mxu0 }
 0x70f   : > { %v4806_v37 = vadd.f32 %v4805_v8, %v4717_v29  ;;  %v4720_v49 = vadd.f32 %v4719_v23, %v4630_v61  ;;  %v6371_v29 = vld [vmem:[#allocation5 + $0x518] sm:$0xf0] }
 0x710   : > { %4758 = vmatmul.bf16.gmra.mxu1 %v9807_v20  ;;  %v6374_v8 = vor.u32 %v6912_v33, %v6371_v29  ;;  %v9814_v29 = vld [vmem:[#allocation68_spill] sm:$0xff] }
 0x711   : > { %v8886_v57 = vadd.f32 %v4894_v4, %v4806_v37  ;;  %4669 = vmatmul.bf16.gmra.mxu0 %v9806_v44 }
 0x712   : > { %4936 = vmatmul.bf16.gmra.mxu3 %v9809_v14  ;;  %5053 = vmatpush.bf16.msrb.mxu1 %v6374_v8  ;;  %v9811_v14 = vld [vmem:[#allocation65_spill] sm:$0xff] }
 0x713   : > { %4847 = vmatmul.bf16.gmra.mxu2 %v9808_v27  ;;  %v9810_v27 = vld [vmem:[#allocation64_spill] sm:$0xff]  ;;  %v9815_v8 = vld [vmem:[#allocation69_spill] sm:$0xff] }
 0x715   : > { %v4897_v22 = vpop.f32.mrf.mxu3  ;;  %v4721_v56 = vpop.f32.mrf.mxu1 }
 0x716   : > { %v4808_v51 = vpop.f32.mrf.mxu2  ;;  %v4632_v1 = vpop.f32.mrf.mxu0 }
 0x717   : > { %v4809_v26 = vadd.f32 %v4808_v51, %v4720_v49  ;;  %v4722_v46 = vadd.f32 %v4721_v56, %v4632_v1 }
 0x719   : > { %v8892_v30 = vadd.f32 %v4897_v22, %v4809_v26 }
 0x71d   : > { %v4899_v61 = vpop.f32.mrf.mxu3  ;;  %v4724_v44 = vpop.f32.mrf.mxu1 }
 0x71e   : > { %v4810_v37 = vpop.f32.mrf.mxu2  ;;  %v4635_v23 = vpop.f32.mrf.mxu0 }
 0x71f   : > { %v4811_v4 = vadd.f32 %v4810_v37, %v4722_v46  ;;  %v4725_v49 = vadd.f32 %v4724_v44, %v4635_v23  ;;  %v9816_v37 = vld [vmem:[#allocation70_spill] sm:$0xff] }
 0x720   : > { %4763 = vmatmul.bf16.gmra.mxu1 %v9811_v14 }
 0x721   : > { %v8894_v20 = vadd.f32 %v4899_v61, %v4811_v4  ;;  %4674 = vmatmul.bf16.gmra.mxu0 %v9810_v27  ;;  %v9817_v4 = vld [vmem:[#allocation71_spill] sm:$0xff] }
 0x722   : > { %4941 = vmatmul.bf16.gmra.mxu3 %v9813_v16 }
 0x723   : > { %4852 = vmatmul.bf16.gmra.mxu2 %v9812_v28 }
 0x725   : > { %v4902_v13 = vpop.f32.mrf.mxu3  ;;  %v4726_v52 = vpop.f32.mrf.mxu1 }
 0x726   : > { %v4813_v59 = vpop.f32.mrf.mxu2  ;;  %v4637_v43 = vpop.f32.mrf.mxu0 }
 0x727   : > { %v4814_v50 = vadd.f32 %v4813_v59, %v4725_v49  ;;  %v4727_v9 = vadd.f32 %v4726_v52, %v4637_v43 }
 0x729   : > { %v8900_v51 = vadd.f32 %v4902_v13, %v4814_v50 }
 0x72d   : > { %v4904_v22 = vpop.f32.mrf.mxu3  ;;  %v4729_v56 = vpop.f32.mrf.mxu1 }
 0x72e   : > { %v4815_v12 = vpop.f32.mrf.mxu2  ;;  %v4640_v1 = vpop.f32.mrf.mxu0 }
 0x72f   : > { %v4816_v26 = vadd.f32 %v4815_v12, %v4727_v9  ;;  %v4730_v33 = vadd.f32 %v4729_v56, %v4640_v1  ;;  %v9818_v12 = vld [vmem:[#allocation72_spill] sm:$0xff]  ;;  %v9821_v1 = vld [vmem:[#allocation75_spill] sm:$0xff] }
 0x730   : > { %4768 = vmatmul.bf16.gmra.mxu1 %v9815_v8 }
 0x731   : > { %v8902_v46 = vadd.f32 %v4904_v22, %v4816_v26  ;;  %4679 = vmatmul.bf16.gmra.mxu0 %v9814_v29  ;;  %v9819_v26 = vld [vmem:[#allocation73_spill] sm:$0xff]  ;;  %v9820_v22 = vld [vmem:[#allocation74_spill] sm:$0xff] }
 0x732   : > { %4946 = vmatmul.bf16.gmra.mxu3 %v9817_v4 }
 0x733   : > { %4857 = vmatmul.bf16.gmra.mxu2 %v9816_v37 }
 0x735   : > { %v4907_v44 = vpop.f32.mrf.mxu3  ;;  %v4731_v27 = vpop.f32.mrf.mxu1 }
 0x736   : > { %v4818_v61 = vpop.f32.mrf.mxu2  ;;  %v4642_v49 = vpop.f32.mrf.mxu0 }
 0x737   : > { %v4819_v23 = vadd.f32 %v4818_v61, %v4730_v33  ;;  %v4732_v28 = vadd.f32 %v4731_v27, %v4642_v49 }
 0x739   : > { %v8908_v14 = vadd.f32 %v4907_v44, %v4819_v23 }
 0x73d   : > { %v4909_v50 = vpop.f32.mrf.mxu3  ;;  %v4734_v43 = vpop.f32.mrf.mxu1 }
 0x73e   : > { %v4820_v16 = vpop.f32.mrf.mxu2  ;;  %v4645_v13 = vpop.f32.mrf.mxu0 }
 0x73f   : > { %v4821_v59 = vadd.f32 %v4820_v16, %v4732_v28  ;;  %v4735_v9 = vadd.f32 %v4734_v43, %v4645_v13  ;;  %v9823_v13 = vld [vmem:[#allocation77_spill] sm:$0xff]  ;;  %v9824_v43 = vld [vmem:[#allocation78_spill] sm:$0xff] }
 0x740   : > { %4773 = vmatmul.bf16.gmra.mxu1 %v9819_v26 }
 0x741   : > { %v8910_v52 = vadd.f32 %v4909_v50, %v4821_v59  ;;  %4684 = vmatmul.bf16.gmra.mxu0 %v9818_v12  ;;  %v9822_v50 = vld [vmem:[#allocation76_spill] sm:$0xff] }
 0x742   : > { %4951 = vmatmul.bf16.gmra.mxu3 %v9821_v1 }
 0x743   : > { %4862 = vmatmul.bf16.gmra.mxu2 %v9820_v22 }
 0x745   : > { %v4912_v29 = vpop.f32.mrf.mxu3  ;;  %v4736_v37 = vpop.f32.mrf.mxu1 }
 0x746   : > { %v4823_v56 = vpop.f32.mrf.mxu2  ;;  %v4647_v8 = vpop.f32.mrf.mxu0 }
 0x747   : > { %v4824_v33 = vadd.f32 %v4823_v56, %v4735_v9  ;;  %v4737_v61 = vadd.f32 %v4736_v37, %v4647_v8  ;;  %v9825_v9 = vld [vmem:[#allocation79_spill] sm:$0xff] }
 0x749   : > { %v8916_v4 = vadd.f32 %v4912_v29, %v4824_v33 }
 0x74d   : > { %v4914_v49 = vpop.f32.mrf.mxu3  ;;  %v4739_v28 = vpop.f32.mrf.mxu1 }
 0x74e   : > { %v4825_v23 = vpop.f32.mrf.mxu2  ;;  %v4650_v27 = vpop.f32.mrf.mxu0 }
 0x74f   : > { %v4826_v44 = vadd.f32 %v4825_v23, %v4737_v61  ;;  %v4740_v59 = vadd.f32 %v4739_v28, %v4650_v27  ;;  %v9826_v28 = vld [vmem:[#allocation80_spill] sm:$0xff] }
 0x750   : > { %5054 = vmatmul.bf16.vlgmr.msrb.gmra.mxu1 %v9823_v13  ;;  %v9828_v13 = vld [vmem:[#allocation82_spill] sm:$0xff] }
 0x751   : > { %v8918_v16 = vadd.f32 %v4914_v49, %v4826_v44  ;;  %4965 = vmatmul.bf16.vlgmr.msrb.gmra.mxu0 %v9822_v50  ;;  %v9827_v50 = vld [vmem:[#allocation81_spill] sm:$0xff] }
 0x752   : > { %5232 = vmatmul.bf16.vlgmr.msrb.gmra.mxu3 %v9825_v9 }
 0x753   : > { %5143 = vmatmul.bf16.vlgmr.msrb.gmra.mxu2 %v9824_v43 }
 0x755   : > { %v4917_v22 = vpop.f32.mrf.mxu3  ;;  %v4741_v56 = vpop.f32.mrf.mxu1 }
 0x756   : > { %v4828_v12 = vpop.f32.mrf.mxu2  ;;  %v4652_v1 = vpop.f32.mrf.mxu0 }
 0x757   : > { %v4829_v26 = vadd.f32 %v4828_v12, %v4740_v59  ;;  %v4742_v29 = vadd.f32 %v4741_v56, %v4652_v1  ;;  %v9829_v59 = vld [vmem:[#allocation83_spill] sm:$0xff] }
 0x759   : > { %v8924_v33 = vadd.f32 %v4917_v22, %v4829_v26 }
 0x75d   : > { %v4919_v61 = vpop.f32.mrf.mxu3  ;;  %v4744_v44 = vpop.f32.mrf.mxu1 }
 0x75e   : > { %v4830_v8 = vpop.f32.mrf.mxu2  ;;  %v4655_v23 = vpop.f32.mrf.mxu0 }
 0x75f   : > { %v4831_v37 = vadd.f32 %v4830_v8, %v4742_v29  ;;  %v4745_v27 = vadd.f32 %v4744_v44, %v4655_v23 }
 0x760   : > { %5059 = vmatmul.bf16.gmra.mxu1 %v9827_v50  ;;  %v9832_v50 = vld [vmem:[#allocation84_spill] sm:$0xff] }
 0x761   : > { %v8926_v49 = vadd.f32 %v4919_v61, %v4831_v37  ;;  %4970 = vmatmul.bf16.gmra.mxu0 %v9826_v28 }
 0x762   : > { %5237 = vmatmul.bf16.gmra.mxu3 %v9829_v59  ;;  %v9834_v59 = vld [vmem:[#allocation86_spill] sm:$0xff] }
 0x763   : > { %5148 = vmatmul.bf16.gmra.mxu2 %v9828_v13  ;;  %v9833_v13 = vld [vmem:[#allocation85_spill] sm:$0xff] }
 0x765   : > { %v4922_v12 = vpop.f32.mrf.mxu3  ;;  %v4746_v22 = vpop.f32.mrf.mxu1 }
 0x766   : > { %v4833_v43 = vpop.f32.mrf.mxu2  ;;  %v4657_v26 = vpop.f32.mrf.mxu0 }
 0x767   : > { %v4834_v9 = vadd.f32 %v4833_v43, %v4745_v27  ;;  %v4747_v56 = vadd.f32 %v4746_v22, %v4657_v26  ;;  %v9835_v27 = vld [vmem:[#allocation87_spill] sm:$0xff] }
 0x769   : > { %v8932_v1 = vadd.f32 %v4922_v12, %v4834_v9 }
 0x76b   : > { %9830 = vst [vmem:[#allocation112_spill] sm:$0xff] %v8932_v1 }
 0x76d   : > { %v4924_v37 = vpop.f32.mrf.mxu3  ;;  %v4749_v23 = vpop.f32.mrf.mxu1 }
 0x76e   : > { %v4835_v29 = vpop.f32.mrf.mxu2  ;;  %v4660_v61 = vpop.f32.mrf.mxu0 }
 0x76f   : > { %v4836_v8 = vadd.f32 %v4835_v29, %v4747_v56  ;;  %v4750_v28 = vadd.f32 %v4749_v23, %v4660_v61 }
 0x770   : > { %5064 = vmatmul.bf16.gmra.mxu1 %v9833_v13 }
 0x771   : > { %v8934_v44 = vadd.f32 %v4924_v37, %v4836_v8  ;;  %4975 = vmatmul.bf16.gmra.mxu0 %v9832_v50 }
 0x772   : > { %5242 = vmatmul.bf16.gmra.mxu3 %v9835_v27  ;;  %v9840_v27 = vld [vmem:[#allocation90_spill] sm:$0xff] }
 0x773   : > { %9831 = vst [vmem:[#allocation113_spill] sm:$0xff] %v8934_v44  ;;  %5153 = vmatmul.bf16.gmra.mxu2 %v9834_v59  ;;  %v9838_v44 = vld [vmem:[#allocation88_spill] sm:$0xff]  ;;  %v9839_v59 = vld [vmem:[#allocation89_spill] sm:$0xff] }
 0x775   : > { %v4927_v12 = vpop.f32.mrf.mxu3  ;;  %v4751_v22 = vpop.f32.mrf.mxu1 }
 0x776   : > { %v4838_v43 = vpop.f32.mrf.mxu2  ;;  %v4662_v26 = vpop.f32.mrf.mxu0 }
 0x777   : > { %v4839_v9 = vadd.f32 %v4838_v43, %v4750_v28  ;;  %v4752_v29 = vadd.f32 %v4751_v22, %v4662_v26  ;;  %v9841_v28 = vld [vmem:[#allocation91_spill] sm:$0xff] }
 0x779   : > { %v8940_v56 = vadd.f32 %v4927_v12, %v4839_v9 }
 0x77b   : > { %9836 = vst [vmem:[#allocation118_spill] sm:$0xff] %v8940_v56 }
 0x77d   : > { %v4929_v37 = vpop.f32.mrf.mxu3  ;;  %v4754_v23 = vpop.f32.mrf.mxu1 }
 0x77e   : > { %v4840_v1 = vpop.f32.mrf.mxu2  ;;  %v4665_v61 = vpop.f32.mrf.mxu0 }
 0x77f   : > { %v4841_v8 = vadd.f32 %v4840_v1, %v4752_v29  ;;  %v4755_v13 = vadd.f32 %v4754_v23, %v4665_v61 }
 0x780   : > { %5069 = vmatmul.bf16.gmra.mxu1 %v9839_v59 }
 0x781   : > { %v8942_v50 = vadd.f32 %v4929_v37, %v4841_v8  ;;  %4980 = vmatmul.bf16.gmra.mxu0 %v9838_v44 }
 0x782   : > { %5247 = vmatmul.bf16.gmra.mxu3 %v9841_v28  ;;  %v9846_v28 = vld [vmem:[#allocation94_spill] sm:$0xff] }
 0x783   : > { %9837 = vst [vmem:[#allocation132_spill] sm:$0xff] %v8942_v50  ;;  %5158 = vmatmul.bf16.gmra.mxu2 %v9840_v27  ;;  %v9844_v50 = vld [vmem:[#allocation92_spill] sm:$0xff]  ;;  %v9845_v27 = vld [vmem:[#allocation93_spill] sm:$0xff] }
 0x785   : > { %v4932_v12 = vpop.f32.mrf.mxu3  ;;  %v4756_v22 = vpop.f32.mrf.mxu1 }
 0x786   : > { %v4843_v43 = vpop.f32.mrf.mxu2  ;;  %v4667_v26 = vpop.f32.mrf.mxu0 }
 0x787   : > { %v4844_v9 = vadd.f32 %v4843_v43, %v4755_v13  ;;  %v4757_v29 = vadd.f32 %v4756_v22, %v4667_v26  ;;  %v9847_v13 = vld [vmem:[#allocation95_spill] sm:$0xff] }
 0x789   : > { %v8948_v1 = vadd.f32 %v4932_v12, %v4844_v9 }
 0x78b   : > { %9842 = vst [vmem:[#allocation133_spill] sm:$0xff] %v8948_v1 }
 0x78d   : > { %v4934_v37 = vpop.f32.mrf.mxu3  ;;  %v4759_v23 = vpop.f32.mrf.mxu1 }
 0x78e   : > { %v4845_v56 = vpop.f32.mrf.mxu2  ;;  %v4670_v61 = vpop.f32.mrf.mxu0 }
 0x78f   : > { %v4846_v8 = vadd.f32 %v4845_v56, %v4757_v29  ;;  %v4760_v59 = vadd.f32 %v4759_v23, %v4670_v61 }
 0x790   : > { %5074 = vmatmul.bf16.gmra.mxu1 %v9845_v27 }
 0x791   : > { %v8950_v44 = vadd.f32 %v4934_v37, %v4846_v8  ;;  %4985 = vmatmul.bf16.gmra.mxu0 %v9844_v50 }
 0x792   : > { %5252 = vmatmul.bf16.gmra.mxu3 %v9847_v13  ;;  %v9852_v13 = vld [vmem:[#allocation98_spill] sm:$0xff] }
 0x793   : > { %9843 = vst [vmem:[#allocation134_spill] sm:$0xff] %v8950_v44  ;;  %5163 = vmatmul.bf16.gmra.mxu2 %v9846_v28  ;;  %v9850_v44 = vld [vmem:[#allocation96_spill] sm:$0xff]  ;;  %v9851_v28 = vld [vmem:[#allocation97_spill] sm:$0xff] }
 0x795   : > { %v4937_v12 = vpop.f32.mrf.mxu3  ;;  %v4761_v22 = vpop.f32.mrf.mxu1 }
 0x796   : > { %v4848_v43 = vpop.f32.mrf.mxu2  ;;  %v4672_v26 = vpop.f32.mrf.mxu0 }
 0x797   : > { %v4849_v9 = vadd.f32 %v4848_v43, %v4760_v59  ;;  %v4762_v29 = vadd.f32 %v4761_v22, %v4672_v26  ;;  %v9853_v59 = vld [vmem:[#allocation99_spill] sm:$0xff] }
 0x799   : > { %v8956_v56 = vadd.f32 %v4937_v12, %v4849_v9 }
 0x79b   : > { %9848 = vst [vmem:[#allocation135_spill] sm:$0xff] %v8956_v56 }
 0x79d   : > { %v4939_v37 = vpop.f32.mrf.mxu3  ;;  %v4764_v23 = vpop.f32.mrf.mxu1 }
 0x79e   : > { %v4850_v1 = vpop.f32.mrf.mxu2  ;;  %v4675_v61 = vpop.f32.mrf.mxu0 }
 0x79f   : > { %v4851_v8 = vadd.f32 %v4850_v1, %v4762_v29  ;;  %v4765_v27 = vadd.f32 %v4764_v23, %v4675_v61 }
 0x7a0   : > { %5079 = vmatmul.bf16.gmra.mxu1 %v9851_v28 }
 0x7a1   : > { %v8958_v50 = vadd.f32 %v4939_v37, %v4851_v8  ;;  %4990 = vmatmul.bf16.gmra.mxu0 %v9850_v44 }
 0x7a2   : > { %5257 = vmatmul.bf16.gmra.mxu3 %v9853_v59  ;;  %v9858_v59 = vld [vmem:[#allocation104_spill] sm:$0xff] }
 0x7a3   : > { %9849 = vst [vmem:[#allocation136_spill] sm:$0xff] %v8958_v50  ;;  %5168 = vmatmul.bf16.gmra.mxu2 %v9852_v13  ;;  %v9856_v50 = vld [vmem:[#allocation102_spill] sm:$0xff]  ;;  %v9857_v13 = vld [vmem:[#allocation103_spill] sm:$0xff] }
 0x7a5   : > { %v4942_v12 = vpop.f32.mrf.mxu3  ;;  %v4766_v22 = vpop.f32.mrf.mxu1 }
 0x7a6   : > { %v4853_v43 = vpop.f32.mrf.mxu2  ;;  %v4677_v26 = vpop.f32.mrf.mxu0 }
 0x7a7   : > { %v4854_v9 = vadd.f32 %v4853_v43, %v4765_v27  ;;  %v4767_v29 = vadd.f32 %v4766_v22, %v4677_v26  ;;  %v9859_v27 = vld [vmem:[#allocation105_spill] sm:$0xff] }
 0x7a9   : > { %v8964_v1 = vadd.f32 %v4942_v12, %v4854_v9 }
 0x7ab   : > { %9854 = vst [vmem:[#allocation131_spill] sm:$0xff] %v8964_v1 }
 0x7ad   : > { %v4944_v37 = vpop.f32.mrf.mxu3  ;;  %v4769_v23 = vpop.f32.mrf.mxu1 }
 0x7ae   : > { %v4855_v56 = vpop.f32.mrf.mxu2  ;;  %v4680_v61 = vpop.f32.mrf.mxu0 }
 0x7af   : > { %v4856_v8 = vadd.f32 %v4855_v56, %v4767_v29  ;;  %v4770_v28 = vadd.f32 %v4769_v23, %v4680_v61 }
 0x7b0   : > { %5084 = vmatmul.bf16.gmra.mxu1 %v9857_v13 }
 0x7b1   : > { %v8966_v44 = vadd.f32 %v4944_v37, %v4856_v8  ;;  %4995 = vmatmul.bf16.gmra.mxu0 %v9856_v50 }
 0x7b2   : > { %5262 = vmatmul.bf16.gmra.mxu3 %v9859_v27  ;;  %v9863_v27 = vld [vmem:[#allocation110_spill] sm:$0xff] }
 0x7b3   : > { %9855 = vst [vmem:[#allocation119_spill] sm:$0xff] %v8966_v44  ;;  %5173 = vmatmul.bf16.gmra.mxu2 %v9858_v59  ;;  %v9861_v44 = vld [vmem:[#allocation108_spill] sm:$0xff]  ;;  %v9862_v59 = vld [vmem:[#allocation109_spill] sm:$0xff] }
 0x7b5   : > { %v4947_v12 = vpop.f32.mrf.mxu3  ;;  %v4771_v22 = vpop.f32.mrf.mxu1 }
 0x7b6   : > { %v4858_v43 = vpop.f32.mrf.mxu2  ;;  %v4682_v26 = vpop.f32.mrf.mxu0 }
 0x7b7   : > { %v4859_v9 = vadd.f32 %v4858_v43, %v4770_v28  ;;  %v4772_v29 = vadd.f32 %v4771_v22, %v4682_v26  ;;  %v9864_v28 = vld [vmem:[#allocation111_spill] sm:$0xff] }
 0x7b9   : > { %v8972_v56 = vadd.f32 %v4947_v12, %v4859_v9 }
 0x7bb   : > { %9860 = vst [vmem:[#allocation120_spill] sm:$0xff] %v8972_v56 }
 0x7bd   : > { %v4949_v37 = vpop.f32.mrf.mxu3  ;;  %v4774_v23 = vpop.f32.mrf.mxu1 }
 0x7be   : > { %v4860_v1 = vpop.f32.mrf.mxu2  ;;  %v4685_v61 = vpop.f32.mrf.mxu0 }
 0x7bf   : > { %v4861_v8 = vadd.f32 %v4860_v1, %v4772_v29  ;;  %v4775_v13 = vadd.f32 %v4774_v23, %v4685_v61 }
 0x7c0   : > { %5089 = vmatmul.bf16.gmra.mxu1 %v9862_v59 }
 0x7c1   : > { %v8974_v50 = vadd.f32 %v4949_v37, %v4861_v8  ;;  %5000 = vmatmul.bf16.gmra.mxu0 %v9861_v44 }
 0x7c2   : > { %5267 = vmatmul.bf16.gmra.mxu3 %v9864_v28  ;;  %v9867_v28 = vld [vmem:[#allocation115_spill] sm:$0xff] }
 0x7c3   : > { %5178 = vmatmul.bf16.gmra.mxu2 %v9863_v27  ;;  %v9866_v27 = vld [vmem:[#allocation114_spill] sm:$0xff] }
 0x7c5   : > { %v4952_v12 = vpop.f32.mrf.mxu3  ;;  %v4776_v22 = vpop.f32.mrf.mxu1 }
 0x7c6   : > { %v4863_v43 = vpop.f32.mrf.mxu2  ;;  %v4687_v26 = vpop.f32.mrf.mxu0 }
 0x7c7   : > { %v4864_v9 = vadd.f32 %v4863_v43, %v4775_v13  ;;  %v4777_v29 = vadd.f32 %v4776_v22, %v4687_v26  ;;  %v9868_v13 = vld [vmem:[#allocation116_spill] sm:$0xff]  ;;  %v9869_v43 = vld [vmem:[#allocation117_spill] sm:$0xff] }
 0x7c9   : > { %v8980_v1 = vadd.f32 %v4952_v12, %v4864_v9 }
 0x7cd   : > { %v4954_v37 = vpop.f32.mrf.mxu3  ;;  %v5055_v23 = vpop.f32.mrf.mxu1 }
 0x7ce   : > { %v4865_v56 = vpop.f32.mrf.mxu2  ;;  %v4966_v61 = vpop.f32.mrf.mxu0 }
 0x7cf   : > { %v4866_v8 = vadd.f32 %v4865_v56, %v4777_v29  ;;  %v4967_v59 = vadd.f32 %v4966_v61, %v8860_v41  ;;  %v7103_v56 = vld [vmem:[#allocation7] sm:$0xf] }
 0x7d0   : > { %5094 = vmatmul.bf16.gmra.mxu1 %v9867_v28  ;;  %v8989_v22 = vperm.slane %v7103_v56, 3 }
 0x7d1   : > { %v8982_v44 = vadd.f32 %v4954_v37, %v4866_v8  ;;  %5005 = vmatmul.bf16.gmra.mxu0 %v9866_v27  ;;  %v5056_v9 = vadd.f32 %v5055_v23, %v4967_v59 }
 0x7d2   : > { %5272 = vmatmul.bf16.gmra.mxu3 %v9869_v43 }
 0x7d3   : > { %9865 = vst [vmem:[#allocation12_spill] sm:$0xff] %v8982_v44  ;;  %5183 = vmatmul.bf16.gmra.mxu2 %v9868_v13 }
 0x7d5   : > { %v5233_v29 = vpop.f32.mrf.mxu3  ;;  %v5057_v37 = vpop.f32.mrf.mxu1 }
 0x7d6   : > { %v5144_v12 = vpop.f32.mrf.mxu2  ;;  %v4968_v8 = vpop.f32.mrf.mxu0 }
 0x7d7   : > { %v5145_v26 = vadd.f32 %v5144_v12, %v5056_v9  ;;  %v4969_v41 = vadd.f32 %v4968_v8, %v8862_v48 }
 0x7d9   : > { %v5234_v44 = vadd.f32 %v5233_v29, %v5145_v26  ;;  %v5058_v27 = vadd.f32 %v5057_v37, %v4969_v41 }
 0x7db   : > { %v5316_v61 = vadd.f32 %v5234_v44, %v8989_v22 }
 0x7dd   : > { %5444 = vst [vmem:[%s7950_s20 + $0x18] sm:$0xff] %v5316_v61  ;;  %v5235_v43 = vpop.f32.mrf.mxu3  ;;  %v5060_v59 = vpop.f32.mrf.mxu1 }
 0x7de   : > { %v5146_v28 = vpop.f32.mrf.mxu2  ;;  %v4971_v23 = vpop.f32.mrf.mxu0 }
 0x7df   : > { %v5147_v13 = vadd.f32 %v5146_v28, %v5058_v27  ;;  %v4972_v12 = vadd.f32 %v4971_v23, %v8868_v45 }
 0x7e0   : > { %5099 = vmatmul.bf16.gmra.mxu1 %v8023_v63 }
 0x7e1   : > { %v5236_v9 = vadd.f32 %v5235_v43, %v5147_v13  ;;  %5010 = vmatmul.bf16.gmra.mxu0 %v8021_v38  ;;  %v5061_v48 = vadd.f32 %v5060_v59, %v4972_v12 }
 0x7e2   : > { %5277 = vmatmul.bf16.gmra.mxu3 %v8027_v0 }
 0x7e3   : > { %v5320_v26 = vadd.f32 %v5236_v9, %v8989_v22  ;;  %5188 = vmatmul.bf16.gmra.mxu2 %v8025_v2 }
 0x7e5   : > { %5448 = vst [vmem:[%s7950_s20 + $0x38] sm:$0xff] %v5320_v26  ;;  %v5238_v29 = vpop.f32.mrf.mxu3  ;;  %v5062_v37 = vpop.f32.mrf.mxu1 }
 0x7e6   : > { %v5149_v44 = vpop.f32.mrf.mxu2  ;;  %v4973_v8 = vpop.f32.mrf.mxu0 }
 0x7e7   : > { %v5150_v56 = vadd.f32 %v5149_v44, %v5061_v48  ;;  %v4974_v45 = vadd.f32 %v4973_v8, %v8870_v55 }
 0x7e9   : > { %v5239_v41 = vadd.f32 %v5238_v29, %v5150_v56  ;;  %v5063_v61 = vadd.f32 %v5062_v37, %v4974_v45 }
 0x7eb   : > { %v5324_v38 = vadd.f32 %v5239_v41, %v8989_v22 }
 0x7ed   : > { %5452 = vst [vmem:[%s7950_s20 + $0x58] sm:$0xff] %v5324_v38  ;;  %v5240_v2 = vpop.f32.mrf.mxu3  ;;  %v5065_v0 = vpop.f32.mrf.mxu1 }
 0x7ee   : > { %v5151_v63 = vpop.f32.mrf.mxu2  ;;  %v4976_v28 = vpop.f32.mrf.mxu0 }
 0x7ef   : > { %v5152_v27 = vadd.f32 %v5151_v63, %v5063_v61  ;;  %v4977_v43 = vadd.f32 %v4976_v28, %v8876_v53 }
 0x7f0   : > { %5104 = vmatmul.bf16.gmra.mxu1 %v9609_v5 }
 0x7f1   : > { %v5241_v13 = vadd.f32 %v5240_v2, %v5152_v27  ;;  %5015 = vmatmul.bf16.gmra.mxu0 %v9608_v54  ;;  %v5066_v55 = vadd.f32 %v5065_v0, %v4977_v43 }
 0x7f2   : > { %5282 = vmatmul.bf16.gmra.mxu3 %v9611_v6 }
 0x7f3   : > { %v5328_v23 = vadd.f32 %v5241_v13, %v8989_v22  ;;  %5193 = vmatmul.bf16.gmra.mxu2 %v9610_v40 }
 0x7f5   : > { %5456 = vst [vmem:[%s7950_s20 + $0x78] sm:$0xff] %v5328_v23  ;;  %v5243_v12 = vpop.f32.mrf.mxu3  ;;  %v5067_v48 = vpop.f32.mrf.mxu1 }
 0x7f6   : > { %v5154_v59 = vpop.f32.mrf.mxu2  ;;  %v4978_v26 = vpop.f32.mrf.mxu0 }
 0x7f7   : > { %v5155_v9 = vadd.f32 %v5154_v59, %v5066_v55  ;;  %v4979_v53 = vadd.f32 %v4978_v26, %v8878_v60 }
 0x7f9   : > { %v5244_v44 = vadd.f32 %v5243_v12, %v5155_v9  ;;  %v5068_v56 = vadd.f32 %v5067_v48, %v4979_v53 }
 0x7fb   : > { %v5332_v54 = vadd.f32 %v5244_v44, %v8989_v22 }
 0x7fd   : > { %5460 = vst [vmem:[%s7950_s20 + $0x98] sm:$0xff] %v5332_v54  ;;  %v5245_v40 = vpop.f32.mrf.mxu3  ;;  %v5070_v6 = vpop.f32.mrf.mxu1 }
 0x7fe   : > { %v5156_v5 = vpop.f32.mrf.mxu2  ;;  %v4981_v8 = vpop.f32.mrf.mxu0 }
 0x7ff   : > { %v5157_v29 = vadd.f32 %v5156_v5, %v5068_v56  ;;  %v4982_v41 = vadd.f32 %v4981_v8, %v8884_v62 }
 0x800   : > { %5109 = vmatmul.bf16.gmra.mxu1 %v8075_v3 }
 0x801   : > { %v5246_v37 = vadd.f32 %v5245_v40, %v5157_v29  ;;  %5020 = vmatmul.bf16.gmra.mxu0 %v8073_v32  ;;  %v5071_v60 = vadd.f32 %v5070_v6, %v4982_v41 }
 0x802   : > { %5287 = vmatmul.bf16.gmra.mxu3 %v8079_v21 }
 0x803   : > { %v5336_v45 = vadd.f32 %v5246_v37, %v8989_v22  ;;  %5198 = vmatmul.bf16.gmra.mxu2 %v8077_v19 }
 0x805   : > { %5464 = vst [vmem:[%s7950_s20 + $0xb8] sm:$0xff] %v5336_v45  ;;  %v5248_v63 = vpop.f32.mrf.mxu3  ;;  %v5072_v2 = vpop.f32.mrf.mxu1 }
 0x806   : > { %v5159_v38 = vpop.f32.mrf.mxu2  ;;  %v4983_v27 = vpop.f32.mrf.mxu0 }
 0x807   : > { %v5160_v61 = vadd.f32 %v5159_v38, %v5071_v60  ;;  %v4984_v62 = vadd.f32 %v4983_v27, %v8886_v57 }
 0x809   : > { %v5249_v28 = vadd.f32 %v5248_v63, %v5160_v61  ;;  %v5073_v0 = vadd.f32 %v5072_v2, %v4984_v62 }
 0x80b   : > { %v5340_v32 = vadd.f32 %v5249_v28, %v8989_v22 }
 0x80d   : > { %5468 = vst [vmem:[%s7950_s20 + $0xd8] sm:$0xff] %v5340_v32  ;;  %v5250_v19 = vpop.f32.mrf.mxu3  ;;  %v5075_v21 = vpop.f32.mrf.mxu1 }
 0x80e   : > { %v5161_v3 = vpop.f32.mrf.mxu2  ;;  %v4986_v43 = vpop.f32.mrf.mxu0 }
 0x80f   : > { %v5162_v13 = vadd.f32 %v5161_v3, %v5073_v0  ;;  %v4987_v55 = vadd.f32 %v4986_v43, %v8892_v30 }
 0x810   : > { %5114 = vmatmul.bf16.gmra.mxu1 %v9613_v34 }
 0x811   : > { %v5251_v23 = vadd.f32 %v5250_v19, %v5162_v13  ;;  %5025 = vmatmul.bf16.gmra.mxu0 %v9612_v17  ;;  %v5076_v57 = vadd.f32 %v5075_v21, %v4987_v55 }
 0x812   : > { %5292 = vmatmul.bf16.gmra.mxu3 %v9615_v15 }
 0x813   : > { %v5344_v59 = vadd.f32 %v5251_v23, %v8989_v22  ;;  %5203 = vmatmul.bf16.gmra.mxu2 %v9614_v7 }
 0x815   : > { %5472 = vst [vmem:[%s7950_s20 + $0xf8] sm:$0xff] %v5344_v59  ;;  %v5253_v26 = vpop.f32.mrf.mxu3  ;;  %v5077_v44 = vpop.f32.mrf.mxu1 }
 0x816   : > { %v5164_v9 = vpop.f32.mrf.mxu2  ;;  %v4988_v48 = vpop.f32.mrf.mxu0 }
 0x817   : > { %v5165_v12 = vadd.f32 %v5164_v9, %v5076_v57  ;;  %v4989_v30 = vadd.f32 %v4988_v48, %v8894_v20 }
 0x819   : > { %v5254_v53 = vadd.f32 %v5253_v26, %v5165_v12  ;;  %v5078_v54 = vadd.f32 %v5077_v44, %v4989_v30 }
 0x81b   : > { %v5348_v17 = vadd.f32 %v5254_v53, %v8989_v22 }
 0x81d   : > { %5476 = vst [vmem:[%s7950_s20 + $0x118] sm:$0xff] %v5348_v17  ;;  %v5255_v7 = vpop.f32.mrf.mxu3  ;;  %v5080_v15 = vpop.f32.mrf.mxu1 }
 0x81e   : > { %v5166_v34 = vpop.f32.mrf.mxu2  ;;  %v4991_v5 = vpop.f32.mrf.mxu0 }
 0x81f   : > { %v5167_v56 = vadd.f32 %v5166_v34, %v5078_v54  ;;  %v4992_v40 = vadd.f32 %v4991_v5, %v8900_v51 }
 0x820   : > { %5119 = vmatmul.bf16.gmra.mxu1 %v8127_v11 }
 0x821   : > { %v5256_v29 = vadd.f32 %v5255_v7, %v5167_v56  ;;  %5030 = vmatmul.bf16.gmra.mxu0 %v8125_v35  ;;  %v5081_v20 = vadd.f32 %v5080_v15, %v4992_v40 }
 0x822   : > { %5297 = vmatmul.bf16.gmra.mxu3 %v8131_v58 }
 0x823   : > { %v5352_v8 = vadd.f32 %v5256_v29, %v8989_v22  ;;  %5208 = vmatmul.bf16.gmra.mxu2 %v8129_v36 }
 0x825   : > { %5480 = vst [vmem:[%s7950_s20 + $0x138] sm:$0xff] %v5352_v8  ;;  %v5258_v41 = vpop.f32.mrf.mxu3  ;;  %v5082_v60 = vpop.f32.mrf.mxu1 }
 0x826   : > { %v5169_v6 = vpop.f32.mrf.mxu2  ;;  %v4993_v45 = vpop.f32.mrf.mxu0 }
 0x827   : > { %v5170_v37 = vadd.f32 %v5169_v6, %v5081_v20  ;;  %v4994_v51 = vadd.f32 %v4993_v45, %v8902_v46 }
 0x829   : > { %v5259_v38 = vadd.f32 %v5258_v41, %v5170_v37  ;;  %v5083_v61 = vadd.f32 %v5082_v60, %v4994_v51 }
 0x82b   : > { %v5356_v35 = vadd.f32 %v5259_v38, %v8989_v22 }
 0x82d   : > { %5484 = vst [vmem:[%s7950_s20 + $0x158] sm:$0xff] %v5356_v35  ;;  %v5260_v36 = vpop.f32.mrf.mxu3  ;;  %v5085_v58 = vpop.f32.mrf.mxu1 }
 0x82e   : > { %v5171_v11 = vpop.f32.mrf.mxu2  ;;  %v4996_v27 = vpop.f32.mrf.mxu0 }
 0x82f   : > { %v5172_v63 = vadd.f32 %v5171_v11, %v5083_v61  ;;  %v4997_v28 = vadd.f32 %v4996_v27, %v8908_v14  ;;  %v9870_v11 = vld [vmem:[#allocation112_spill] sm:$0xff] }
 0x830   : > { %5124 = vmatmul.bf16.gmra.mxu1 %v9617_v24 }
 0x831   : > { %v5261_v2 = vadd.f32 %v5260_v36, %v5172_v63  ;;  %5035 = vmatmul.bf16.gmra.mxu0 %v9616_v25  ;;  %v5086_v46 = vadd.f32 %v5085_v58, %v4997_v28 }
 0x832   : > { %5302 = vmatmul.bf16.gmra.mxu3 %v9619_v10 }
 0x833   : > { %v5360_v62 = vadd.f32 %v5261_v2, %v8989_v22  ;;  %5213 = vmatmul.bf16.gmra.mxu2 %v9618_v31 }
 0x835   : > { %5488 = vst [vmem:[%s7950_s20 + $0x178] sm:$0xff] %v5360_v62  ;;  %v5263_v3 = vpop.f32.mrf.mxu3  ;;  %v5087_v19 = vpop.f32.mrf.mxu1 }
 0x836   : > { %v5174_v32 = vpop.f32.mrf.mxu2  ;;  %v4998_v13 = vpop.f32.mrf.mxu0 }
 0x837   : > { %v5175_v0 = vadd.f32 %v5174_v32, %v5086_v46  ;;  %v4999_v14 = vadd.f32 %v4998_v13, %v8910_v52  ;;  %v9871_v32 = vld [vmem:[#allocation113_spill] sm:$0xff] }
 0x839   : > { %v5264_v43 = vadd.f32 %v5263_v3, %v5175_v0  ;;  %v5088_v21 = vadd.f32 %v5087_v19, %v4999_v14 }
 0x83b   : > { %v5364_v25 = vadd.f32 %v5264_v43, %v8989_v22 }
 0x83d   : > { %5492 = vst [vmem:[%s7950_s20 + $0x198] sm:$0xff] %v5364_v25  ;;  %v5265_v31 = vpop.f32.mrf.mxu3  ;;  %v5090_v10 = vpop.f32.mrf.mxu1 }
 0x83e   : > { %v5176_v24 = vpop.f32.mrf.mxu2  ;;  %v5001_v55 = vpop.f32.mrf.mxu0 }
 0x83f   : > { %v5177_v23 = vadd.f32 %v5176_v24, %v5088_v21  ;;  %v5002_v57 = vadd.f32 %v5001_v55, %v8916_v4 }
 0x840   : > { %5129 = vmatmul.bf16.gmra.mxu1 %v8179_v18 }
 0x841   : > { %v5266_v59 = vadd.f32 %v5265_v31, %v5177_v23  ;;  %5040 = vmatmul.bf16.gmra.mxu0 %v8177_v42  ;;  %v5091_v52 = vadd.f32 %v5090_v10, %v5002_v57  ;;  %v9872_v23 = vld [vmem:[#allocation118_spill] sm:$0xff] }
 0x842   : > { %5307 = vmatmul.bf16.gmra.mxu3 %v9741_v47 }
 0x843   : > { %v5368_v9 = vadd.f32 %v5266_v59, %v8989_v22  ;;  %5218 = vmatmul.bf16.gmra.mxu2 %v8181_v39 }
 0x845   : > { %5496 = vst [vmem:[%s7950_s20 + $0x1b8] sm:$0xff] %v5368_v9  ;;  %v5268_v48 = vpop.f32.mrf.mxu3  ;;  %v5092_v53 = vpop.f32.mrf.mxu1 }
 0x846   : > { %v5179_v12 = vpop.f32.mrf.mxu2  ;;  %v5003_v44 = vpop.f32.mrf.mxu0 }
 0x847   : > { %v5180_v26 = vadd.f32 %v5179_v12, %v5091_v52  ;;  %v5004_v30 = vadd.f32 %v5003_v44, %v8918_v16 }
 0x849   : > { %v5269_v4 = vadd.f32 %v5268_v48, %v5180_v26  ;;  %v5093_v17 = vadd.f32 %v5092_v53, %v5004_v30  ;;  %v9873_v48 = vld [vmem:[#allocation132_spill] sm:$0xff] }
 0x84b   : > { %v5372_v42 = vadd.f32 %v5269_v4, %v8989_v22 }
 0x84d   : > { %5500 = vst [vmem:[%s7950_s20 + $0x1d8] sm:$0xff] %v5372_v42  ;;  %v5270_v39 = vpop.f32.mrf.mxu3  ;;  %v5095_v34 = vpop.f32.mrf.mxu1 }
 0x84e   : > { %v5181_v18 = vpop.f32.mrf.mxu2  ;;  %v5006_v47 = vpop.f32.mrf.mxu0 }
 0x84f   : > { %v5182_v54 = vadd.f32 %v5181_v18, %v5093_v17  ;;  %v5007_v7 = vadd.f32 %v5006_v47, %v8924_v33  ;;  %v9874_v47 = vld [vmem:[#allocation133_spill] sm:$0xff] }
 0x851   : > { %v5271_v56 = vadd.f32 %v5270_v39, %v5182_v54  ;;  %v5096_v15 = vadd.f32 %v5095_v34, %v5007_v7 }
 0x853   : > { %v5376_v5 = vadd.f32 %v5271_v56, %v8989_v22 }
 0x855   : > { %5504 = vst [vmem:[%s7950_s20 + $0x1f8] sm:$0xff] %v5376_v5  ;;  %v5273_v16 = vpop.f32.mrf.mxu3  ;;  %v5097_v20 = vpop.f32.mrf.mxu1 }
 0x856   : > { %v5184_v29 = vpop.f32.mrf.mxu2  ;;  %v5008_v8 = vpop.f32.mrf.mxu0 }
 0x857   : > { %v5185_v40 = vadd.f32 %v5184_v29, %v5096_v15  ;;  %v5009_v37 = vadd.f32 %v5008_v8, %v8926_v49 }
 0x859   : > { %v5274_v6 = vadd.f32 %v5273_v16, %v5185_v40  ;;  %v5098_v45 = vadd.f32 %v5097_v20, %v5009_v37  ;;  %v9875_v20 = vld [vmem:[#allocation134_spill] sm:$0xff] }
 0x85b   : > { %v5380_v41 = vadd.f32 %v5274_v6, %v8989_v22 }
 0x85d   : > { %5508 = vst [vmem:[%s7950_s20 + $0x218] sm:$0xff] %v5380_v41  ;;  %v5275_v33 = vpop.f32.mrf.mxu3  ;;  %v5100_v35 = vpop.f32.mrf.mxu1 }
 0x85e   : > { %v5186_v60 = vpop.f32.mrf.mxu2  ;;  %v5011_v51 = vpop.f32.mrf.mxu0 }
 0x85f   : > { %v5187_v38 = vadd.f32 %v5186_v60, %v5098_v45  ;;  %v5012_v63 = vadd.f32 %v5011_v51, %v9870_v11 }
 0x861   : > { %v5276_v61 = vadd.f32 %v5275_v33, %v5187_v38  ;;  %v5101_v27 = vadd.f32 %v5100_v35, %v5012_v63 }
 0x863   : > { %v5384_v36 = vadd.f32 %v5276_v61, %v8989_v22  ;;  %v9876_v61 = vld [vmem:[#allocation135_spill] sm:$0xff] }
 0x865   : > { %5512 = vst [vmem:[%s7950_s20 + $0x238] sm:$0xff] %v5384_v36  ;;  %v5278_v49 = vpop.f32.mrf.mxu3  ;;  %v5102_v62 = vpop.f32.mrf.mxu1 }
 0x866   : > { %v5189_v58 = vpop.f32.mrf.mxu2  ;;  %v5013_v28 = vpop.f32.mrf.mxu0 }
 0x867   : > { %v5190_v2 = vadd.f32 %v5189_v58, %v5101_v27  ;;  %v5014_v0 = vadd.f32 %v5013_v28, %v9871_v32 }
 0x869   : > { %v5279_v46 = vadd.f32 %v5278_v49, %v5190_v2  ;;  %v5103_v13 = vadd.f32 %v5102_v62, %v5014_v0 }
 0x86b   : > { %v5388_v3 = vadd.f32 %v5279_v46, %v8989_v22  ;;  %v9877_v46 = vld [vmem:[#allocation136_spill] sm:$0xff] }
 0x86d   : > { %5516 = vst [vmem:[%s7950_s20 + $0x258] sm:$0xff] %v5388_v3  ;;  %v5280_v14 = vpop.f32.mrf.mxu3  ;;  %v5105_v21 = vpop.f32.mrf.mxu1 }
 0x86e   : > { %v5191_v19 = vpop.f32.mrf.mxu2  ;;  %v5016_v25 = vpop.f32.mrf.mxu0 }
 0x86f   : > { %v5192_v43 = vadd.f32 %v5191_v19, %v5103_v13  ;;  %v5017_v31 = vadd.f32 %v5016_v25, %v9872_v23 }
 0x871   : > { %v5281_v24 = vadd.f32 %v5280_v14, %v5192_v43  ;;  %v5106_v10 = vadd.f32 %v5105_v21, %v5017_v31 }
 0x873   : > { %v5392_v55 = vadd.f32 %v5281_v24, %v8989_v22  ;;  %v9878_v24 = vld [vmem:[#allocation131_spill] sm:$0xff] }
 0x875   : > { %5520 = vst [vmem:[%s7950_s20 + $0x278] sm:$0xff] %v5392_v55  ;;  %v5283_v9 = vpop.f32.mrf.mxu3  ;;  %v5107_v12 = vpop.f32.mrf.mxu1 }
 0x876   : > { %v5194_v59 = vpop.f32.mrf.mxu2  ;;  %v5018_v52 = vpop.f32.mrf.mxu0 }
 0x877   : > { %v5195_v57 = vadd.f32 %v5194_v59, %v5106_v10  ;;  %v5019_v44 = vadd.f32 %v5018_v52, %v9873_v48 }
 0x879   : > { %v5284_v26 = vadd.f32 %v5283_v9, %v5195_v57  ;;  %v5108_v4 = vadd.f32 %v5107_v12, %v5019_v44 }
 0x87b   : > { %v5396_v53 = vadd.f32 %v5284_v26, %v8989_v22  ;;  %v9879_v26 = vld [vmem:[#allocation119_spill] sm:$0xff] }
 0x87d   : > { %5524 = vst [vmem:[%s7950_s20 + $0x298] sm:$0xff] %v5396_v53  ;;  %v5285_v17 = vpop.f32.mrf.mxu3  ;;  %v5110_v54 = vpop.f32.mrf.mxu1 }
 0x87e   : > { %v5196_v30 = vpop.f32.mrf.mxu2  ;;  %v5021_v18 = vpop.f32.mrf.mxu0 }
 0x87f   : > { %v5197_v42 = vadd.f32 %v5196_v30, %v5108_v4  ;;  %v5022_v34 = vadd.f32 %v5021_v18, %v9874_v47 }
 0x881   : > { %v5286_v39 = vadd.f32 %v5285_v17, %v5197_v42  ;;  %v5111_v7 = vadd.f32 %v5110_v54, %v5022_v34 }
 0x883   : > { %v5400_v56 = vadd.f32 %v5286_v39, %v8989_v22  ;;  %v9880_v39 = vld [vmem:[#allocation120_spill] sm:$0xff] }
 0x885   : > { %5528 = vst [vmem:[%s7950_s20 + $0x2b8] sm:$0xff] %v5400_v56  ;;  %v5288_v29 = vpop.f32.mrf.mxu3  ;;  %v5112_v16 = vpop.f32.mrf.mxu1 }
 0x886   : > { %v5199_v5 = vpop.f32.mrf.mxu2  ;;  %v5023_v40 = vpop.f32.mrf.mxu0 }
 0x887   : > { %v5200_v15 = vadd.f32 %v5199_v5, %v5111_v7  ;;  %v5024_v6 = vadd.f32 %v5023_v40, %v9875_v20 }
 0x889   : > { %v5289_v8 = vadd.f32 %v5288_v29, %v5200_v15  ;;  %v5113_v41 = vadd.f32 %v5112_v16, %v5024_v6 }
 0x88b   : > { %v5404_v37 = vadd.f32 %v5289_v8, %v8989_v22 }
 0x88d   : > { %5532 = vst [vmem:[%s7950_s20 + $0x2d8] sm:$0xff] %v5404_v37  ;;  %v5290_v38 = vpop.f32.mrf.mxu3  ;;  %v5115_v51 = vpop.f32.mrf.mxu1 }
 0x88e   : > { %v5201_v45 = vpop.f32.mrf.mxu2  ;;  %v5026_v33 = vpop.f32.mrf.mxu0 }
 0x88f   : > { %v5202_v60 = vadd.f32 %v5201_v45, %v5113_v41  ;;  %v5027_v11 = vadd.f32 %v5026_v33, %v9876_v61 }
 0x891   : > { %v5291_v35 = vadd.f32 %v5290_v38, %v5202_v60  ;;  %v5116_v36 = vadd.f32 %v5115_v51, %v5027_v11 }
 0x893   : > { %v5408_v63 = vadd.f32 %v5291_v35, %v8989_v22 }
 0x895   : > { %5536 = vst [vmem:[%s7950_s20 + $0x2f8] sm:$0xff] %v5408_v63  ;;  %v5293_v2 = vpop.f32.mrf.mxu3  ;;  %v5117_v28 = vpop.f32.mrf.mxu1 }
 0x896   : > { %v5204_v27 = vpop.f32.mrf.mxu2  ;;  %v5028_v49 = vpop.f32.mrf.mxu0 }
 0x897   : > { %v5205_v58 = vadd.f32 %v5204_v27, %v5116_v36  ;;  %v5029_v32 = vadd.f32 %v5028_v49, %v9877_v46 }
 0x899   : > { %v5294_v62 = vadd.f32 %v5293_v2, %v5205_v58  ;;  %v5118_v3 = vadd.f32 %v5117_v28, %v5029_v32  ;;  %v9881_v58 = vld [vmem:[#allocation12_spill] sm:$0xff] }
 0x89b   : > { %v5412_v0 = vadd.f32 %v5294_v62, %v8989_v22 }
 0x89d   : > { %5540 = vst [vmem:[%s7950_s20 + $0x318] sm:$0xff] %v5412_v0  ;;  %v5295_v43 = vpop.f32.mrf.mxu3  ;;  %v5120_v25 = vpop.f32.mrf.mxu1 }
 0x89e   : > { %v5206_v13 = vpop.f32.mrf.mxu2  ;;  %v5031_v14 = vpop.f32.mrf.mxu0 }
 0x89f   : > { %v5207_v19 = vadd.f32 %v5206_v13, %v5118_v3  ;;  %v5032_v23 = vadd.f32 %v5031_v14, %v9878_v24 }
 0x8a1   : > { %v5296_v21 = vadd.f32 %v5295_v43, %v5207_v19  ;;  %v5121_v55 = vadd.f32 %v5120_v25, %v5032_v23 }
 0x8a3   : > { %v5416_v31 = vadd.f32 %v5296_v21, %v8989_v22 }
 0x8a5   : > { %5544 = vst [vmem:[%s7950_s20 + $0x338] sm:$0xff] %v5416_v31  ;;  %v5298_v57 = vpop.f32.mrf.mxu3  ;;  %v5122_v52 = vpop.f32.mrf.mxu1 }
 0x8a6   : > { %v5209_v10 = vpop.f32.mrf.mxu2  ;;  %v5033_v9 = vpop.f32.mrf.mxu0 }
 0x8a7   : > { %v5210_v59 = vadd.f32 %v5209_v10, %v5121_v55  ;;  %v5034_v48 = vadd.f32 %v5033_v9, %v9879_v26 }
 0x8a9   : > { %v5299_v12 = vadd.f32 %v5298_v57, %v5210_v59  ;;  %v5123_v53 = vadd.f32 %v5122_v52, %v5034_v48 }
 0x8ab   : > { %v5420_v44 = vadd.f32 %v5299_v12, %v8989_v22 }
 0x8ad   : > { %5548 = vst [vmem:[%s7950_s20 + $0x358] sm:$0xff] %v5420_v44  ;;  %v5300_v42 = vpop.f32.mrf.mxu3  ;;  %v5125_v18 = vpop.f32.mrf.mxu1 }
 0x8ae   : > { %v5211_v4 = vpop.f32.mrf.mxu2  ;;  %v5036_v17 = vpop.f32.mrf.mxu0 }
 0x8af   : > { %v5212_v30 = vadd.f32 %v5211_v4, %v5123_v53  ;;  %v5037_v47 = vadd.f32 %v5036_v17, %v9880_v39 }
 0x8b1   : > { %v5301_v54 = vadd.f32 %v5300_v42, %v5212_v30  ;;  %v5126_v56 = vadd.f32 %v5125_v18, %v5037_v47 }
 0x8b3   : > { %v5424_v34 = vadd.f32 %v5301_v54, %v8989_v22 }
 0x8b5   : > { %5552 = vst [vmem:[%s7950_s20 + $0x378] sm:$0xff] %v5424_v34  ;;  %v5303_v15 = vpop.f32.mrf.mxu3  ;;  %v5127_v40 = vpop.f32.mrf.mxu1 }
 0x8b6   : > { %v5214_v7 = vpop.f32.mrf.mxu2  ;;  %v5038_v29 = vpop.f32.mrf.mxu0 }
 0x8b7   : > { %v5215_v5 = vadd.f32 %v5214_v7, %v5126_v56  ;;  %v5039_v8 = vadd.f32 %v5038_v29, %v8974_v50 }
 0x8b9   : > { %v5304_v16 = vadd.f32 %v5303_v15, %v5215_v5  ;;  %v5128_v6 = vadd.f32 %v5127_v40, %v5039_v8 }
 0x8bb   : > { %v5428_v20 = vadd.f32 %v5304_v16, %v8989_v22 }
 0x8bd   : > { %5556 = vst [vmem:[%s7950_s20 + $0x398] sm:$0xff] %v5428_v20  ;;  %v5305_v45 = vpop.f32.mrf.mxu3  ;;  %v5130_v51 = vpop.f32.mrf.mxu1 }
 0x8be   : > { %v5216_v37 = vpop.f32.mrf.mxu2  ;;  %v5041_v60 = vpop.f32.mrf.mxu0 }
 0x8bf   : > { %v5217_v41 = vadd.f32 %v5216_v37, %v5128_v6  ;;  %v5042_v33 = vadd.f32 %v5041_v60, %v8980_v1 }
 0x8c1   : > { %v5306_v38 = vadd.f32 %v5305_v45, %v5217_v41  ;;  %v5131_v61 = vadd.f32 %v5130_v51, %v5042_v33 }
 0x8c3   : > { %v5432_v35 = vadd.f32 %v5306_v38, %v8989_v22 }
 0x8c5   : > { %5560 = vst [vmem:[%s7950_s20 + $0x3b8] sm:$0xff] %v5432_v35  ;;  %v5308_v63 = vpop.f32.mrf.mxu3  ;;  %v5132_v28 = vpop.f32.mrf.mxu1 }
 0x8c6   : > { %v5219_v50 = vpop.f32.mrf.mxu2  ;;  %v5043_v36 = vpop.f32.mrf.mxu0 }
 0x8c7   : > { %v5220_v11 = vadd.f32 %v5219_v50, %v5131_v61  ;;  %v5044_v2 = vadd.f32 %v5043_v36, %v9881_v58 }
 0x8c9   : > { %v5309_v27 = vadd.f32 %v5308_v63, %v5220_v11  ;;  %v5133_v1 = vadd.f32 %v5132_v28, %v5044_v2 }
 0x8cb   : > { %v5436_v49 = vadd.f32 %v5309_v27, %v8989_v22 }
 0x8cd   : > { %5564 = vst [vmem:[%s7950_s20 + $0x3d8] sm:$0xff] %v5436_v49  ;;  %v5310_v32 = vpop.f32.mrf.mxu3 }
 0x8ce   : > { %v5221_v62 = vpop.f32.mrf.mxu2 }
 0x8cf   : > { %v5222_v46 = vadd.f32 %v5221_v62, %v5133_v1 }
 0x8d1   : > { %v5311_v0 = vadd.f32 %v5310_v32, %v5222_v46 }
 0x8d3   : > { %v5440_v3 = vadd.f32 %v5311_v0, %v8989_v22 }
 0x8d5   : > { %5568 = vst [vmem:[%s7950_s20 + $0x3f8] sm:$0xff] %v5440_v3 }
 0x8d6   : > { %7221 = shalt.err (!%p7218_p0)
}
 0x8d7   : > { %s7288_s11 = smov 512   ;;  %s7289_s26 = smov 32  }
 0x8d8   : > { %7019 = dma.vmem_to_hbm [thread:$0]  (%p7393_p7), %s5586_s30, 16384, %s5588_s4, %s5570_s15, %s7288_s11, %s7288_s11, %s7289_s26  }
 0x8d9 PF: > { %s5602_s28 = sand.u32 1, %s7260_s12   ;;  %p7033_p3 = pnand %p5709_p11, %p7359_p6 }
 0x8da   : > { %s5603_s1 = scalar_lea.sflag [#allocation4], %s5602_s28 }
 0x8db   : > { %p7034_p5 = pneg %p7033_p3 }
 0x8dd   : > { %7255 = dma.done.wait (%p7034_p5), %s5603_s1, 16384  }
 0x8de   : > { %7257 = vsyncadd (%p7034_p5), %s5603_s1, 4294950912  ;;  %s20_s17 = sadd.s32 1, %s7280_s17   ;;  %s9882_s12 = smov %s7264_s13 }
 0x8df   : > { %p17_p9 = scmp.ge.s32.totalorder %s20_s17, 4   ;;  %s9883_s13 = smov %s7268_s14 }
 0x8e0   : > { %s9884_s14 = smov %s7402_s29  ;;  %s9885_s15 = smov %s7276_s16 }
 0x8e1   : > { %s9886_s16 = smov %s9888_s10  ;;  %19 = sbr.rel (!%p17_p9) target bundleno = 9 (0x9), region = 91 }
 0x8e6   :  { %5609 = vsyncpa [#allocation3], 1 }
 0x8e7   :  { %5611 = vsyncpa [#allocation3 + $0x1], 1 }
 0x8e8   :  { %5612 = vsyncpa [#allocation6], 1 }
 0x8e9   :  { %5613 = vsyncpa [#allocation4], 1 }
 0x8ea   :  { %5615 = vsyncpa [#allocation4 + $0x1], 1 }

</bundles_post_ra>
